<compile_context>
chip_gen: v7x
topology: tpu7x:2x2x1
jax: 0.10.0
libtpu: 0.0.40
codegen_flags: <defaults>
</compile_context>

<pallas_src>
import functools

import jax
import jax.numpy as jnp
from jax import lax
from jax.experimental import pallas as pl
from jax.experimental.pallas import tpu as pltpu


# ----------------------------------------------------------------------------
# Fused SiamInconv forward (single Pallas kernel, batch on lanes)
# ----------------------------------------------------------------------------
def siam_inconv_pallas(x_nchw, params, out_channels=32):
    """Fused SiamInconv forward.  x: (N, Cin, H, W) NCHW -> (N, Cout, H, W)."""
    N, Cin, H, W = x_nchw.shape
    C = out_channels
    assert Cin <= C, "in_channels must be <= out_channels (channel zero-pad)"
    Hp, Wp = H + 2, W + 2
    L = Hp * Wp                              # flattened zero-padded plane length
    Lp = ((L + 127) // 128) * 128            # lane-padded plane length (384)
    NL = N * Lp                              # both images side by side on lanes
    OFF = 128                                # lane-aligned offset of planes in buf
    MARGIN = Wp + 1                          # largest |3x3 tap shift| on the plane
    BUFW = ((OFF + NL + MARGIN + 127) // 128) * 128
    S = 2 * len(params)                      # 10 Conv+BN+ReLU stages

    # ---- parameter glue: fold BN scale into weights, stack all stages -------
    # Stage s weight becomes wf[s][co, (dy*3+dx)*C + ci] = w[dy,dx,ci,co]*scale[co]
    # (input channels zero-padded to C).
    wf_list, b_list = [], []
    for blk in params:
        for j in (1, 2):
            w, s, b = blk[f"w{j}"], blk[f"s{j}"], blk[f"b{j}"]
            cin = w.shape[2]
            if cin < C:
                w = jnp.pad(w, ((0, 0), (0, 0), (0, C - cin), (0, 0)))
            wf = (w * s[None, None, None, :]).transpose(3, 0, 1, 2).reshape(C, 9 * C)
            wf_list.append(wf)
            b_list.append(b)
    wf_stack = jnp.stack(wf_list).astype(jnp.bfloat16)           # (S, C, 9C)
    b_stack = jnp.stack(b_list).astype(jnp.float32)[..., None]   # (S, C, 1)

    # ---- input glue: SAME halo pad, channel pad, lane pad, batch -> lanes ---
    xp = jnp.pad(x_nchw.astype(jnp.float32),
                 ((0, 0), (0, C - Cin), (1, 1), (1, 1)))          # (N, C, Hp, Wp)
    xf = jnp.pad(xp.reshape(N, C, L), ((0, 0), (0, 0), (0, Lp - L)))
    xf = xf.transpose(1, 0, 2).reshape(C, NL).astype(jnp.bfloat16)  # (C, NL) bf16

    # interior mask: 1.0 at real pixels, 0.0 on the halo and the lane-pad tail
    yy, xx = jnp.meshgrid(jnp.arange(Hp), jnp.arange(Wp), indexing="ij")
    interior = ((yy >= 1) & (yy <= H) & (xx >= 1) & (xx <= W)).astype(jnp.float32)
    mask_img = jnp.pad(interior.reshape(L), (0, Lp - L))           # (Lp,)
    mask = jnp.tile(mask_img, (N,))[None, :]                       # (1, NL)

    def kernel(x_ref, wf_ref, b_ref, mask_ref, o_ref, buf_ref, patch_ref):
        # x_ref    : (C, NL)     bf16  padded input planes (batch on lanes)
        # wf_ref   : (S, C, 9C)  bf16  scale-folded conv weights
        # b_ref    : (S, C, 1)   f32   folded BN (+conv) bias
        # mask_ref : (1, NL)     f32   interior mask
        # o_ref    : (C, NL)     f32   output planes (wrapper crops halo/tail)
        # buf_ref  : (C, BUFW)   bf16  scratch: planes stored at lane offset OFF
        # patch_ref: (9C, NL)    bf16  persistent im2col patch scratch
        buf_ref[...] = jnp.zeros_like(buf_ref)          # zero margins once
        m_b = jnp.broadcast_to(mask_ref[...], (C, NL))  # hoisted (no re-broadcast)

        def fill(act_bf16):
            buf_ref[:, OFF:OFF + NL] = act_bf16

        def conv_stage(s, apply_mask=True):
            # 3x3 SAME conv == 9 static lane shifts of the flattened plane.
            # Each tap is written into its sublane-aligned band of the patch.
            for t in range(9):
                dy, dx = t // 3, t % 3
                sh = (dy - 1) * Wp + (dx - 1)
                patch_ref[t * C:(t + 1) * C, :] = buf_ref[:, OFF + sh:OFF + sh + NL]
            # One MXU matmul per stage: (C, 9C) @ (9C, NL), f32 accumulate.
            acc = jnp.dot(wf_ref[s], patch_ref[...],
                          preferred_element_type=jnp.float32)     # (C, NL) f32
            h = jnp.maximum(acc + b_ref[s], 0.0)
            # Re-zero the halo/tail so the next conv reads zeros (skip on last).
            return h * m_b if apply_mask else h

        # DoubleConv 1 (no residual)
        fill(x_ref[...])
        cur = conv_stage(0)
        fill(cur.astype(jnp.bfloat16))
        cur = conv_stage(1)
        # DoubleConv 2..5 with residual adds (f32)
        for i in range(1, S // 2):
            fill(cur.astype(jnp.bfloat16))
            h = conv_stage(2 * i)
            fill(h.astype(jnp.bfloat16))
            h = conv_stage(2 * i + 1, apply_mask=(i < S // 2 - 1))
            cur = h + cur
        o_ref[...] = cur

    out_flat = pl.pallas_call(
        kernel,
        out_shape=jax.ShapeDtypeStruct((C, NL), jnp.float32),
        grid_spec=pltpu.PrefetchScalarGridSpec(
            num_scalar_prefetch=0,
            grid=(1,),
            in_specs=[
                pl.BlockSpec((C, NL), lambda n: (0, 0)),
                pl.BlockSpec((S, C, 9 * C), lambda n: (0, 0, 0)),
                pl.BlockSpec((S, C, 1), lambda n: (0, 0, 0)),
                pl.BlockSpec((1, NL), lambda n: (0, 0)),
            ],
            out_specs=pl.BlockSpec((C, NL), lambda n: (0, 0)),
            scratch_shapes=[
                pltpu.VMEM((C, BUFW), jnp.bfloat16),     # plane buffer
                pltpu.VMEM((9 * C, NL), jnp.bfloat16),   # persistent im2col patch
            ],
        ),
        compiler_params=pltpu.CompilerParams(
            dimension_semantics=("arbitrary",),
            vmem_limit_bytes=32 * 1024 * 1024,
        ),
    )(xf, wf_stack, b_stack, mask)

    # layout glue: split batch back out of the lanes, crop the SAME halo
    out = out_flat.reshape(C, N, Lp)[:, :, :L].reshape(C, N, Hp, Wp)
    return out[:, :, 1:H + 1, 1:W + 1].transpose(1, 0, 2, 3)      # (N, C, H, W)


# ----------------------------------------------------------------------------
# Parameter initialization (deterministic, synthetic) + BN folding
# ----------------------------------------------------------------------------
def _fold_bn(conv_bias, gamma, beta, mean, var, eps=1e-5):
    scale = gamma / jnp.sqrt(var + eps)
    bias = beta + scale * (conv_bias - mean)
    return scale, bias


def init_params(key, in_channels=1, out_channels=32):
    blocks = []
    cin = in_channels
    for _ in range(5):
        blk = {}
        for j in (1, 2):
            c_in = cin if j == 1 else out_channels
            key, k1, k2, k3, k4, k5, k6 = jax.random.split(key, 7)
            fan_in = c_in * 9
            w = jax.random.normal(k1, (3, 3, c_in, out_channels),
                                  jnp.float32) / jnp.sqrt(fan_in)
            cb = 0.1 * jax.random.normal(k2, (out_channels,), jnp.float32)
            gamma = 1.0 + 0.1 * jax.random.normal(k3, (out_channels,), jnp.float32)
            beta = 0.1 * jax.random.normal(k4, (out_channels,), jnp.float32)
            mean = 0.1 * jax.random.normal(k5, (out_channels,), jnp.float32)
            var = 1.0 + 0.1 * jax.random.uniform(k6, (out_channels,), jnp.float32)
            scale, bias = _fold_bn(cb, gamma, beta, mean, var)
            blk[f"w{j}"], blk[f"s{j}"], blk[f"b{j}"] = w, scale, bias
        blocks.append(blk)
        cin = out_channels
    return blocks


# ----------------------------------------------------------------------------
# Pure-JAX reference (f32, HIGHEST precision)
# ----------------------------------------------------------------------------
def _ref_conv_bn_relu(x, w, scale, bias):
    y = lax.conv_general_dilated(
        x, w, window_strides=(1, 1), padding="SAME",
        dimension_numbers=("NCHW", "HWIO", "NCHW"),
        precision=lax.Precision.HIGHEST)
    return jnp.maximum(y * scale[None, :, None, None]
                       + bias[None, :, None, None], 0.0)


def siam_inconv_ref(x_nchw, params):
    cur = x_nchw
    for i, blk in enumerate(params):
        h = _ref_conv_bn_relu(cur, blk["w1"], blk["s1"], blk["b1"])
        h = _ref_conv_bn_relu(h, blk["w2"], blk["s2"], blk["b2"])
        cur = h if i == 0 else h + cur
    return cur


# ----------------------------------------------------------------------------
if __name__ == "__main__":
    key = jax.random.PRNGKey(0)
    kx, kp = jax.random.split(key)

    N, Cin, H, W = 2, 1, 16, 16          # matches SiamInconv(in_channels=1)
    Cout = 32
    x = jax.random.normal(kx, (N, Cin, H, W), jnp.float32)   # NCHW
    params = init_params(kp, in_channels=Cin, out_channels=Cout)

    fwd = jax.jit(functools.partial(siam_inconv_pallas, out_channels=Cout))
    out = jax.block_until_ready(fwd(x, params))

    ref = jax.block_until_ready(siam_inconv_ref(x, params))

    assert out.shape == (N, Cout, H, W)
    err = float(jnp.max(jnp.abs(out - ref)))
    rel = float(jnp.linalg.norm(out - ref) / jnp.linalg.norm(ref))
    # bf16 MXU operands (DEFAULT precision) across 10 fused conv stages:
    # expect ~1e-3 .. 1e-2 max-abs deviation from the f32/HIGHEST reference.
    if not (err < 1e-1 and rel < 2e-2):
        raise AssertionError(
            f"mismatch vs reference: max abs err = {err}, rel l2 err = {rel}")
    print("KERNEL_OK")
</pallas_src>

<mosaic_0001>
module attributes {stable_mosaic.version = 11 : i64} {
  func.func @kernel(%arg0: i32, %arg1: memref<32x768xbf16, #tpu.memory_space<vmem>>, %arg2: memref<10x32x288xbf16, #tpu.memory_space<vmem>>, %arg3: memref<10x32x1xf32, #tpu.memory_space<vmem>>, %arg4: memref<1x768xf32, #tpu.memory_space<vmem>>, %arg5: memref<32x768xf32, #tpu.memory_space<vmem>>, %arg6: memref<32x1024xbf16, #tpu.memory_space<vmem>>, %arg7: memref<288x768xbf16, #tpu.memory_space<vmem>>) attributes {dimension_semantics = [#tpu.dimension_semantics<arbitrary>], iteration_bounds = array<i64: 1>, scalar_prefetch = 0 : i64, scratch_operands = 2 : i64, tpu.core_type = #tpu.core_type<tc>, window_params = [{pipeline_mode = #tpu.pipeline_mode<synchronous>, transform_indices = @transform_0, window_bounds = array<i64: 32, 768>}, {pipeline_mode = #tpu.pipeline_mode<synchronous>, transform_indices = @transform_1, window_bounds = array<i64: 10, 32, 288>}, {pipeline_mode = #tpu.pipeline_mode<synchronous>, transform_indices = @transform_2, window_bounds = array<i64: 10, 32, 1>}, {pipeline_mode = #tpu.pipeline_mode<synchronous>, transform_indices = @transform_3, window_bounds = array<i64: 1, 768>}, {pipeline_mode = #tpu.pipeline_mode<synchronous>, transform_indices = @transform_4, window_bounds = array<i64: 32, 768>}]} {
    %cst = arith.constant 0.000000e+00 : bf16
    %0 = vector.broadcast %cst : bf16 to vector<32x1024xbf16>
    %c0 = arith.constant 0 : index
    %c0_0 = arith.constant 0 : index
    %1 = vector.load %arg6[%c0, %c0_0] : memref<32x1024xbf16, #tpu.memory_space<vmem>>, vector<32x1024xbf16>
    tpu.vector_store %arg6[%c0, %c0_0], %0 {strides = array<i32>} : memref<32x1024xbf16, #tpu.memory_space<vmem>>, vector<32x1024xbf16>,
    %c0_1 = arith.constant 0 : index
    %c0_2 = arith.constant 0 : index
    %2 = vector.load %arg4[%c0_1, %c0_2] : memref<1x768xf32, #tpu.memory_space<vmem>>, vector<1x768xf32>
    %3 = vector.shape_cast %2 : vector<1x768xf32> to vector<1x768xf32>
    %4 = vector.broadcast %3 : vector<1x768xf32> to vector<32x768xf32>
    %c0_3 = arith.constant 0 : index
    %c0_4 = arith.constant 0 : index
    %5 = vector.load %arg1[%c0_3, %c0_4] : memref<32x768xbf16, #tpu.memory_space<vmem>>, vector<32x768xbf16>
    %c0_5 = arith.constant 0 : index
    %c128 = arith.constant 128 : index
    %6 = vector.load %arg6[%c0_5, %c128] : memref<32x1024xbf16, #tpu.memory_space<vmem>>, vector<32x768xbf16>
    tpu.vector_store %arg6[%c0_5, %c128], %5 {strides = array<i32>} : memref<32x1024xbf16, #tpu.memory_space<vmem>>, vector<32x768xbf16>,
    %c0_6 = arith.constant 0 : index
    %c109 = arith.constant 109 : index
    %7 = vector.load %arg6[%c0_6, %c109] : memref<32x1024xbf16, #tpu.memory_space<vmem>>, vector<32x768xbf16>
    %c0_7 = arith.constant 0 : index
    %c0_8 = arith.constant 0 : index
    %8 = vector.load %arg7[%c0_7, %c0_8] : memref<288x768xbf16, #tpu.memory_space<vmem>>, vector<32x768xbf16>
    tpu.vector_store %arg7[%c0_7, %c0_8], %7 {strides = array<i32>} : memref<288x768xbf16, #tpu.memory_space<vmem>>, vector<32x768xbf16>,
    %c0_9 = arith.constant 0 : index
    %c110 = arith.constant 110 : index
    %9 = vector.load %arg6[%c0_9, %c110] : memref<32x1024xbf16, #tpu.memory_space<vmem>>, vector<32x768xbf16>
    %c32 = arith.constant 32 : index
    %c0_10 = arith.constant 0 : index
    %10 = vector.load %arg7[%c32, %c0_10] : memref<288x768xbf16, #tpu.memory_space<vmem>>, vector<32x768xbf16>
    tpu.vector_store %arg7[%c32, %c0_10], %9 {strides = array<i32>} : memref<288x768xbf16, #tpu.memory_space<vmem>>, vector<32x768xbf16>,
    %c0_11 = arith.constant 0 : index
    %c111 = arith.constant 111 : index
    %11 = vector.load %arg6[%c0_11, %c111] : memref<32x1024xbf16, #tpu.memory_space<vmem>>, vector<32x768xbf16>
    %c64 = arith.constant 64 : index
    %c0_12 = arith.constant 0 : index
    %12 = vector.load %arg7[%c64, %c0_12] : memref<288x768xbf16, #tpu.memory_space<vmem>>, vector<32x768xbf16>
    tpu.vector_store %arg7[%c64, %c0_12], %11 {strides = array<i32>} : memref<288x768xbf16, #tpu.memory_space<vmem>>, vector<32x768xbf16>,
    %c0_13 = arith.constant 0 : index
    %c127 = arith.constant 127 : index
    %13 = vector.load %arg6[%c0_13, %c127] : memref<32x1024xbf16, #tpu.memory_space<vmem>>, vector<32x768xbf16>
    %c96 = arith.constant 96 : index
    %c0_14 = arith.constant 0 : index
    %14 = vector.load %arg7[%c96, %c0_14] : memref<288x768xbf16, #tpu.memory_space<vmem>>, vector<32x768xbf16>
    tpu.vector_store %arg7[%c96, %c0_14], %13 {strides = array<i32>} : memref<288x768xbf16, #tpu.memory_space<vmem>>, vector<32x768xbf16>,
    %c0_15 = arith.constant 0 : index
    %c128_16 = arith.constant 128 : index
    %15 = vector.load %arg6[%c0_15, %c128_16] : memref<32x1024xbf16, #tpu.memory_space<vmem>>, vector<32x768xbf16>
    %c128_17 = arith.constant 128 : index
    %c0_18 = arith.constant 0 : index
    %16 = vector.load %arg7[%c128_17, %c0_18] : memref<288x768xbf16, #tpu.memory_space<vmem>>, vector<32x768xbf16>
    tpu.vector_store %arg7[%c128_17, %c0_18], %15 {strides = array<i32>} : memref<288x768xbf16, #tpu.memory_space<vmem>>, vector<32x768xbf16>,
    %c0_19 = arith.constant 0 : index
    %c129 = arith.constant 129 : index
    %17 = vector.load %arg6[%c0_19, %c129] : memref<32x1024xbf16, #tpu.memory_space<vmem>>, vector<32x768xbf16>
    %c160 = arith.constant 160 : index
    %c0_20 = arith.constant 0 : index
    %18 = vector.load %arg7[%c160, %c0_20] : memref<288x768xbf16, #tpu.memory_space<vmem>>, vector<32x768xbf16>
    tpu.vector_store %arg7[%c160, %c0_20], %17 {strides = array<i32>} : memref<288x768xbf16, #tpu.memory_space<vmem>>, vector<32x768xbf16>,
    %c0_21 = arith.constant 0 : index
    %c145 = arith.constant 145 : index
    %19 = vector.load %arg6[%c0_21, %c145] : memref<32x1024xbf16, #tpu.memory_space<vmem>>, vector<32x768xbf16>
    %c192 = arith.constant 192 : index
    %c0_22 = arith.constant 0 : index
    %20 = vector.load %arg7[%c192, %c0_22] : memref<288x768xbf16, #tpu.memory_space<vmem>>, vector<32x768xbf16>
    tpu.vector_store %arg7[%c192, %c0_22], %19 {strides = array<i32>} : memref<288x768xbf16, #tpu.memory_space<vmem>>, vector<32x768xbf16>,
    %c0_23 = arith.constant 0 : index
    %c146 = arith.constant 146 : index
    %21 = vector.load %arg6[%c0_23, %c146] : memref<32x1024xbf16, #tpu.memory_space<vmem>>, vector<32x768xbf16>
    %c224 = arith.constant 224 : index
    %c0_24 = arith.constant 0 : index
    %22 = vector.load %arg7[%c224, %c0_24] : memref<288x768xbf16, #tpu.memory_space<vmem>>, vector<32x768xbf16>
    tpu.vector_store %arg7[%c224, %c0_24], %21 {strides = array<i32>} : memref<288x768xbf16, #tpu.memory_space<vmem>>, vector<32x768xbf16>,
    %c0_25 = arith.constant 0 : index
    %c147 = arith.constant 147 : index
    %23 = vector.load %arg6[%c0_25, %c147] : memref<32x1024xbf16, #tpu.memory_space<vmem>>, vector<32x768xbf16>
    %c256 = arith.constant 256 : index
    %c0_26 = arith.constant 0 : index
    %24 = vector.load %arg7[%c256, %c0_26] : memref<288x768xbf16, #tpu.memory_space<vmem>>, vector<32x768xbf16>
    tpu.vector_store %arg7[%c256, %c0_26], %23 {strides = array<i32>} : memref<288x768xbf16, #tpu.memory_space<vmem>>, vector<32x768xbf16>,
    %c0_27 = arith.constant 0 : index
    %c0_28 = arith.constant 0 : index
    %c0_29 = arith.constant 0 : index
    %25 = vector.load %arg2[%c0_27, %c0_28, %c0_29] : memref<10x32x288xbf16, #tpu.memory_space<vmem>>, vector<1x32x288xbf16>
    %26 = vector.shape_cast %25 : vector<1x32x288xbf16> to vector<32x288xbf16>
    %c0_30 = arith.constant 0 : index
    %c0_31 = arith.constant 0 : index
    %27 = vector.load %arg7[%c0_30, %c0_31] : memref<288x768xbf16, #tpu.memory_space<vmem>>, vector<288x768xbf16>
    %cst_32 = arith.constant dense<0.000000e+00> : vector<32x768xf32>
    %28 = tpu.matmul %26, %27, %cst_32 {dimension_numbers = #tpu.dot_dimension_numbers<[1], [0], [0], [1], [0, 0, 1, 1], [], []>} : vector<32x288xbf16>, vector<288x768xbf16>, vector<32x768xf32> -> vector<32x768xf32>
    %c0_33 = arith.constant 0 : index
    %c0_34 = arith.constant 0 : index
    %c0_35 = arith.constant 0 : index
    %29 = vector.load %arg3[%c0_33, %c0_34, %c0_35] : memref<10x32x1xf32, #tpu.memory_space<vmem>>, vector<1x32x1xf32>
    %30 = vector.shape_cast %29 : vector<1x32x1xf32> to vector<32x1xf32>
    %31 = vector.broadcast %30 : vector<32x1xf32> to vector<32x768xf32>
    %32 = arith.addf %28, %31 : vector<32x768xf32>
    %cst_36 = arith.constant 0.000000e+00 : f32
    %33 = vector.broadcast %cst_36 : f32 to vector<32x768xf32>
    %34 = arith.maximumf %32, %33 : vector<32x768xf32>
    %35 = arith.mulf %34, %4 : vector<32x768xf32>
    %36 = arith.truncf %35 : vector<32x768xf32> to vector<32x768xbf16>
    %c0_37 = arith.constant 0 : index
    %c128_38 = arith.constant 128 : index
    %37 = vector.load %arg6[%c0_37, %c128_38] : memref<32x1024xbf16, #tpu.memory_space<vmem>>, vector<32x768xbf16>
    tpu.vector_store %arg6[%c0_37, %c128_38], %36 {strides = array<i32>} : memref<32x1024xbf16, #tpu.memory_space<vmem>>, vector<32x768xbf16>,
    %c0_39 = arith.constant 0 : index
    %c109_40 = arith.constant 109 : index
    %38 = vector.load %arg6[%c0_39, %c109_40] : memref<32x1024xbf16, #tpu.memory_space<vmem>>, vector<32x768xbf16>
    %c0_41 = arith.constant 0 : index
    %c0_42 = arith.constant 0 : index
    %39 = vector.load %arg7[%c0_41, %c0_42] : memref<288x768xbf16, #tpu.memory_space<vmem>>, vector<32x768xbf16>
    tpu.vector_store %arg7[%c0_41, %c0_42], %38 {strides = array<i32>} : memref<288x768xbf16, #tpu.memory_space<vmem>>, vector<32x768xbf16>,
    %c0_43 = arith.constant 0 : index
    %c110_44 = arith.constant 110 : index
    %40 = vector.load %arg6[%c0_43, %c110_44] : memref<32x1024xbf16, #tpu.memory_space<vmem>>, vector<32x768xbf16>
    %c32_45 = arith.constant 32 : index
    %c0_46 = arith.constant 0 : index
    %41 = vector.load %arg7[%c32_45, %c0_46] : memref<288x768xbf16, #tpu.memory_space<vmem>>, vector<32x768xbf16>
    tpu.vector_store %arg7[%c32_45, %c0_46], %40 {strides = array<i32>} : memref<288x768xbf16, #tpu.memory_space<vmem>>, vector<32x768xbf16>,
    %c0_47 = arith.constant 0 : index
    %c111_48 = arith.constant 111 : index
    %42 = vector.load %arg6[%c0_47, %c111_48] : memref<32x1024xbf16, #tpu.memory_space<vmem>>, vector<32x768xbf16>
    %c64_49 = arith.constant 64 : index
    %c0_50 = arith.constant 0 : index
    %43 = vector.load %arg7[%c64_49, %c0_50] : memref<288x768xbf16, #tpu.memory_space<vmem>>, vector<32x768xbf16>
    tpu.vector_store %arg7[%c64_49, %c0_50], %42 {strides = array<i32>} : memref<288x768xbf16, #tpu.memory_space<vmem>>, vector<32x768xbf16>,
    %c0_51 = arith.constant 0 : index
    %c127_52 = arith.constant 127 : index
    %44 = vector.load %arg6[%c0_51, %c127_52] : memref<32x1024xbf16, #tpu.memory_space<vmem>>, vector<32x768xbf16>
    %c96_53 = arith.constant 96 : index
    %c0_54 = arith.constant 0 : index
    %45 = vector.load %arg7[%c96_53, %c0_54] : memref<288x768xbf16, #tpu.memory_space<vmem>>, vector<32x768xbf16>
    tpu.vector_store %arg7[%c96_53, %c0_54], %44 {strides = array<i32>} : memref<288x768xbf16, #tpu.memory_space<vmem>>, vector<32x768xbf16>,
    %c0_55 = arith.constant 0 : index
    %c128_56 = arith.constant 128 : index
    %46 = vector.load %arg6[%c0_55, %c128_56] : memref<32x1024xbf16, #tpu.memory_space<vmem>>, vector<32x768xbf16>
    %c128_57 = arith.constant 128 : index
    %c0_58 = arith.constant 0 : index
    %47 = vector.load %arg7[%c128_57, %c0_58] : memref<288x768xbf16, #tpu.memory_space<vmem>>, vector<32x768xbf16>
    tpu.vector_store %arg7[%c128_57, %c0_58], %46 {strides = array<i32>} : memref<288x768xbf16, #tpu.memory_space<vmem>>, vector<32x768xbf16>,
    %c0_59 = arith.constant 0 : index
    %c129_60 = arith.constant 129 : index
    %48 = vector.load %arg6[%c0_59, %c129_60] : memref<32x1024xbf16, #tpu.memory_space<vmem>>, vector<32x768xbf16>
    %c160_61 = arith.constant 160 : index
    %c0_62 = arith.constant 0 : index
    %49 = vector.load %arg7[%c160_61, %c0_62] : memref<288x768xbf16, #tpu.memory_space<vmem>>, vector<32x768xbf16>
    tpu.vector_store %arg7[%c160_61, %c0_62], %48 {strides = array<i32>} : memref<288x768xbf16, #tpu.memory_space<vmem>>, vector<32x768xbf16>,
    %c0_63 = arith.constant 0 : index
    %c145_64 = arith.constant 145 : index
    %50 = vector.load %arg6[%c0_63, %c145_64] : memref<32x1024xbf16, #tpu.memory_space<vmem>>, vector<32x768xbf16>
    %c192_65 = arith.constant 192 : index
    %c0_66 = arith.constant 0 : index
    %51 = vector.load %arg7[%c192_65, %c0_66] : memref<288x768xbf16, #tpu.memory_space<vmem>>, vector<32x768xbf16>
    tpu.vector_store %arg7[%c192_65, %c0_66], %50 {strides = array<i32>} : memref<288x768xbf16, #tpu.memory_space<vmem>>, vector<32x768xbf16>,
    %c0_67 = arith.constant 0 : index
    %c146_68 = arith.constant 146 : index
    %52 = vector.load %arg6[%c0_67, %c146_68] : memref<32x1024xbf16, #tpu.memory_space<vmem>>, vector<32x768xbf16>
    %c224_69 = arith.constant 224 : index
    %c0_70 = arith.constant 0 : index
    %53 = vector.load %arg7[%c224_69, %c0_70] : memref<288x768xbf16, #tpu.memory_space<vmem>>, vector<32x768xbf16>
    tpu.vector_store %arg7[%c224_69, %c0_70], %52 {strides = array<i32>} : memref<288x768xbf16, #tpu.memory_space<vmem>>, vector<32x768xbf16>,
    %c0_71 = arith.constant 0 : index
    %c147_72 = arith.constant 147 : index
    %54 = vector.load %arg6[%c0_71, %c147_72] : memref<32x1024xbf16, #tpu.memory_space<vmem>>, vector<32x768xbf16>
    %c256_73 = arith.constant 256 : index
    %c0_74 = arith.constant 0 : index
    %55 = vector.load %arg7[%c256_73, %c0_74] : memref<288x768xbf16, #tpu.memory_space<vmem>>, vector<32x768xbf16>
    tpu.vector_store %arg7[%c256_73, %c0_74], %54 {strides = array<i32>} : memref<288x768xbf16, #tpu.memory_space<vmem>>, vector<32x768xbf16>,
    %c1 = arith.constant 1 : index
    %c0_75 = arith.constant 0 : index
    %c0_76 = arith.constant 0 : index
    %56 = vector.load %arg2[%c1, %c0_75, %c0_76] : memref<10x32x288xbf16, #tpu.memory_space<vmem>>, vector<1x32x288xbf16>
    %57 = vector.shape_cast %56 : vector<1x32x288xbf16> to vector<32x288xbf16>
    %c0_77 = arith.constant 0 : index
    %c0_78 = arith.constant 0 : index
    %58 = vector.load %arg7[%c0_77, %c0_78] : memref<288x768xbf16, #tpu.memory_space<vmem>>, vector<288x768xbf16>
    %cst_79 = arith.constant dense<0.000000e+00> : vector<32x768xf32>
    %59 = tpu.matmul %57, %58, %cst_79 {dimension_numbers = #tpu.dot_dimension_numbers<[1], [0], [0], [1], [0, 0, 1, 1], [], []>} : vector<32x288xbf16>, vector<288x768xbf16>, vector<32x768xf32> -> vector<32x768xf32>
    %c1_80 = arith.constant 1 : index
    %c0_81 = arith.constant 0 : index
    %c0_82 = arith.constant 0 : index
    %60 = vector.load %arg3[%c1_80, %c0_81, %c0_82] : memref<10x32x1xf32, #tpu.memory_space<vmem>>, vector<1x32x1xf32>
    %61 = vector.shape_cast %60 : vector<1x32x1xf32> to vector<32x1xf32>
    %62 = vector.broadcast %61 : vector<32x1xf32> to vector<32x768xf32>
    %63 = arith.addf %59, %62 : vector<32x768xf32>
    %cst_83 = arith.constant 0.000000e+00 : f32
    %64 = vector.broadcast %cst_83 : f32 to vector<32x768xf32>
    %65 = arith.maximumf %63, %64 : vector<32x768xf32>
    %66 = arith.mulf %65, %4 : vector<32x768xf32>
    %67 = arith.truncf %66 : vector<32x768xf32> to vector<32x768xbf16>
    %c0_84 = arith.constant 0 : index
    %c128_85 = arith.constant 128 : index
    %68 = vector.load %arg6[%c0_84, %c128_85] : memref<32x1024xbf16, #tpu.memory_space<vmem>>, vector<32x768xbf16>
    tpu.vector_store %arg6[%c0_84, %c128_85], %67 {strides = array<i32>} : memref<32x1024xbf16, #tpu.memory_space<vmem>>, vector<32x768xbf16>,
    %c0_86 = arith.constant 0 : index
    %c109_87 = arith.constant 109 : index
    %69 = vector.load %arg6[%c0_86, %c109_87] : memref<32x1024xbf16, #tpu.memory_space<vmem>>, vector<32x768xbf16>
    %c0_88 = arith.constant 0 : index
    %c0_89 = arith.constant 0 : index
    %70 = vector.load %arg7[%c0_88, %c0_89] : memref<288x768xbf16, #tpu.memory_space<vmem>>, vector<32x768xbf16>
    tpu.vector_store %arg7[%c0_88, %c0_89], %69 {strides = array<i32>} : memref<288x768xbf16, #tpu.memory_space<vmem>>, vector<32x768xbf16>,
    %c0_90 = arith.constant 0 : index
    %c110_91 = arith.constant 110 : index
    %71 = vector.load %arg6[%c0_90, %c110_91] : memref<32x1024xbf16, #tpu.memory_space<vmem>>, vector<32x768xbf16>
    %c32_92 = arith.constant 32 : index
    %c0_93 = arith.constant 0 : index
    %72 = vector.load %arg7[%c32_92, %c0_93] : memref<288x768xbf16, #tpu.memory_space<vmem>>, vector<32x768xbf16>
    tpu.vector_store %arg7[%c32_92, %c0_93], %71 {strides = array<i32>} : memref<288x768xbf16, #tpu.memory_space<vmem>>, vector<32x768xbf16>,
    %c0_94 = arith.constant 0 : index
    %c111_95 = arith.constant 111 : index
    %73 = vector.load %arg6[%c0_94, %c111_95] : memref<32x1024xbf16, #tpu.memory_space<vmem>>, vector<32x768xbf16>
    %c64_96 = arith.constant 64 : index
    %c0_97 = arith.constant 0 : index
    %74 = vector.load %arg7[%c64_96, %c0_97] : memref<288x768xbf16, #tpu.memory_space<vmem>>, vector<32x768xbf16>
    tpu.vector_store %arg7[%c64_96, %c0_97], %73 {strides = array<i32>} : memref<288x768xbf16, #tpu.memory_space<vmem>>, vector<32x768xbf16>,
    %c0_98 = arith.constant 0 : index
    %c127_99 = arith.constant 127 : index
    %75 = vector.load %arg6[%c0_98, %c127_99] : memref<32x1024xbf16, #tpu.memory_space<vmem>>, vector<32x768xbf16>
    %c96_100 = arith.constant 96 : index
    %c0_101 = arith.constant 0 : index
    %76 = vector.load %arg7[%c96_100, %c0_101] : memref<288x768xbf16, #tpu.memory_space<vmem>>, vector<32x768xbf16>
    tpu.vector_store %arg7[%c96_100, %c0_101], %75 {strides = array<i32>} : memref<288x768xbf16, #tpu.memory_space<vmem>>, vector<32x768xbf16>,
    %c0_102 = arith.constant 0 : index
    %c128_103 = arith.constant 128 : index
    %77 = vector.load %arg6[%c0_102, %c128_103] : memref<32x1024xbf16, #tpu.memory_space<vmem>>, vector<32x768xbf16>
    %c128_104 = arith.constant 128 : index
    %c0_105 = arith.constant 0 : index
    %78 = vector.load %arg7[%c128_104, %c0_105] : memref<288x768xbf16, #tpu.memory_space<vmem>>, vector<32x768xbf16>
    tpu.vector_store %arg7[%c128_104, %c0_105], %77 {strides = array<i32>} : memref<288x768xbf16, #tpu.memory_space<vmem>>, vector<32x768xbf16>,
    %c0_106 = arith.constant 0 : index
    %c129_107 = arith.constant 129 : index
    %79 = vector.load %arg6[%c0_106, %c129_107] : memref<32x1024xbf16, #tpu.memory_space<vmem>>, vector<32x768xbf16>
    %c160_108 = arith.constant 160 : index
    %c0_109 = arith.constant 0 : index
    %80 = vector.load %arg7[%c160_108, %c0_109] : memref<288x768xbf16, #tpu.memory_space<vmem>>, vector<32x768xbf16>
    tpu.vector_store %arg7[%c160_108, %c0_109], %79 {strides = array<i32>} : memref<288x768xbf16, #tpu.memory_space<vmem>>, vector<32x768xbf16>,
    %c0_110 = arith.constant 0 : index
    %c145_111 = arith.constant 145 : index
    %81 = vector.load %arg6[%c0_110, %c145_111] : memref<32x1024xbf16, #tpu.memory_space<vmem>>, vector<32x768xbf16>
    %c192_112 = arith.constant 192 : index
    %c0_113 = arith.constant 0 : index
    %82 = vector.load %arg7[%c192_112, %c0_113] : memref<288x768xbf16, #tpu.memory_space<vmem>>, vector<32x768xbf16>
    tpu.vector_store %arg7[%c192_112, %c0_113], %81 {strides = array<i32>} : memref<288x768xbf16, #tpu.memory_space<vmem>>, vector<32x768xbf16>,
    %c0_114 = arith.constant 0 : index
    %c146_115 = arith.constant 146 : index
    %83 = vector.load %arg6[%c0_114, %c146_115] : memref<32x1024xbf16, #tpu.memory_space<vmem>>, vector<32x768xbf16>
    %c224_116 = arith.constant 224 : index
    %c0_117 = arith.constant 0 : index
    %84 = vector.load %arg7[%c224_116, %c0_117] : memref<288x768xbf16, #tpu.memory_space<vmem>>, vector<32x768xbf16>
    tpu.vector_store %arg7[%c224_116, %c0_117], %83 {strides = array<i32>} : memref<288x768xbf16, #tpu.memory_space<vmem>>, vector<32x768xbf16>,
    %c0_118 = arith.constant 0 : index
    %c147_119 = arith.constant 147 : index
    %85 = vector.load %arg6[%c0_118, %c147_119] : memref<32x1024xbf16, #tpu.memory_space<vmem>>, vector<32x768xbf16>
    %c256_120 = arith.constant 256 : index
    %c0_121 = arith.constant 0 : index
    %86 = vector.load %arg7[%c256_120, %c0_121] : memref<288x768xbf16, #tpu.memory_space<vmem>>, vector<32x768xbf16>
    tpu.vector_store %arg7[%c256_120, %c0_121], %85 {strides = array<i32>} : memref<288x768xbf16, #tpu.memory_space<vmem>>, vector<32x768xbf16>,
    %c2 = arith.constant 2 : index
    %c0_122 = arith.constant 0 : index
    %c0_123 = arith.constant 0 : index
    %87 = vector.load %arg2[%c2, %c0_122, %c0_123] : memref<10x32x288xbf16, #tpu.memory_space<vmem>>, vector<1x32x288xbf16>
    %88 = vector.shape_cast %87 : vector<1x32x288xbf16> to vector<32x288xbf16>
    %c0_124 = arith.constant 0 : index
    %c0_125 = arith.constant 0 : index
    %89 = vector.load %arg7[%c0_124, %c0_125] : memref<288x768xbf16, #tpu.memory_space<vmem>>, vector<288x768xbf16>
    %cst_126 = arith.constant dense<0.000000e+00> : vector<32x768xf32>
    %90 = tpu.matmul %88, %89, %cst_126 {dimension_numbers = #tpu.dot_dimension_numbers<[1], [0], [0], [1], [0, 0, 1, 1], [], []>} : vector<32x288xbf16>, vector<288x768xbf16>, vector<32x768xf32> -> vector<32x768xf32>
    %c2_127 = arith.constant 2 : index
    %c0_128 = arith.constant 0 : index
    %c0_129 = arith.constant 0 : index
    %91 = vector.load %arg3[%c2_127, %c0_128, %c0_129] : memref<10x32x1xf32, #tpu.memory_space<vmem>>, vector<1x32x1xf32>
    %92 = vector.shape_cast %91 : vector<1x32x1xf32> to vector<32x1xf32>
    %93 = vector.broadcast %92 : vector<32x1xf32> to vector<32x768xf32>
    %94 = arith.addf %90, %93 : vector<32x768xf32>
    %cst_130 = arith.constant 0.000000e+00 : f32
    %95 = vector.broadcast %cst_130 : f32 to vector<32x768xf32>
    %96 = arith.maximumf %94, %95 : vector<32x768xf32>
    %97 = arith.mulf %96, %4 : vector<32x768xf32>
    %98 = arith.truncf %97 : vector<32x768xf32> to vector<32x768xbf16>
    %c0_131 = arith.constant 0 : index
    %c128_132 = arith.constant 128 : index
    %99 = vector.load %arg6[%c0_131, %c128_132] : memref<32x1024xbf16, #tpu.memory_space<vmem>>, vector<32x768xbf16>
    tpu.vector_store %arg6[%c0_131, %c128_132], %98 {strides = array<i32>} : memref<32x1024xbf16, #tpu.memory_space<vmem>>, vector<32x768xbf16>,
    %c0_133 = arith.constant 0 : index
    %c109_134 = arith.constant 109 : index
    %100 = vector.load %arg6[%c0_133, %c109_134] : memref<32x1024xbf16, #tpu.memory_space<vmem>>, vector<32x768xbf16>
    %c0_135 = arith.constant 0 : index
    %c0_136 = arith.constant 0 : index
    %101 = vector.load %arg7[%c0_135, %c0_136] : memref<288x768xbf16, #tpu.memory_space<vmem>>, vector<32x768xbf16>
    tpu.vector_store %arg7[%c0_135, %c0_136], %100 {strides = array<i32>} : memref<288x768xbf16, #tpu.memory_space<vmem>>, vector<32x768xbf16>,
    %c0_137 = arith.constant 0 : index
    %c110_138 = arith.constant 110 : index
    %102 = vector.load %arg6[%c0_137, %c110_138] : memref<32x1024xbf16, #tpu.memory_space<vmem>>, vector<32x768xbf16>
    %c32_139 = arith.constant 32 : index
    %c0_140 = arith.constant 0 : index
    %103 = vector.load %arg7[%c32_139, %c0_140] : memref<288x768xbf16, #tpu.memory_space<vmem>>, vector<32x768xbf16>
    tpu.vector_store %arg7[%c32_139, %c0_140], %102 {strides = array<i32>} : memref<288x768xbf16, #tpu.memory_space<vmem>>, vector<32x768xbf16>,
    %c0_141 = arith.constant 0 : index
    %c111_142 = arith.constant 111 : index
    %104 = vector.load %arg6[%c0_141, %c111_142] : memref<32x1024xbf16, #tpu.memory_space<vmem>>, vector<32x768xbf16>
    %c64_143 = arith.constant 64 : index
    %c0_144 = arith.constant 0 : index
    %105 = vector.load %arg7[%c64_143, %c0_144] : memref<288x768xbf16, #tpu.memory_space<vmem>>, vector<32x768xbf16>
    tpu.vector_store %arg7[%c64_143, %c0_144], %104 {strides = array<i32>} : memref<288x768xbf16, #tpu.memory_space<vmem>>, vector<32x768xbf16>,
    %c0_145 = arith.constant 0 : index
    %c127_146 = arith.constant 127 : index
    %106 = vector.load %arg6[%c0_145, %c127_146] : memref<32x1024xbf16, #tpu.memory_space<vmem>>, vector<32x768xbf16>
    %c96_147 = arith.constant 96 : index
    %c0_148 = arith.constant 0 : index
    %107 = vector.load %arg7[%c96_147, %c0_148] : memref<288x768xbf16, #tpu.memory_space<vmem>>, vector<32x768xbf16>
    tpu.vector_store %arg7[%c96_147, %c0_148], %106 {strides = array<i32>} : memref<288x768xbf16, #tpu.memory_space<vmem>>, vector<32x768xbf16>,
    %c0_149 = arith.constant 0 : index
    %c128_150 = arith.constant 128 : index
    %108 = vector.load %arg6[%c0_149, %c128_150] : memref<32x1024xbf16, #tpu.memory_space<vmem>>, vector<32x768xbf16>
    %c128_151 = arith.constant 128 : index
    %c0_152 = arith.constant 0 : index
    %109 = vector.load %arg7[%c128_151, %c0_152] : memref<288x768xbf16, #tpu.memory_space<vmem>>, vector<32x768xbf16>
    tpu.vector_store %arg7[%c128_151, %c0_152], %108 {strides = array<i32>} : memref<288x768xbf16, #tpu.memory_space<vmem>>, vector<32x768xbf16>,
    %c0_153 = arith.constant 0 : index
    %c129_154 = arith.constant 129 : index
    %110 = vector.load %arg6[%c0_153, %c129_154] : memref<32x1024xbf16, #tpu.memory_space<vmem>>, vector<32x768xbf16>
    %c160_155 = arith.constant 160 : index
    %c0_156 = arith.constant 0 : index
    %111 = vector.load %arg7[%c160_155, %c0_156] : memref<288x768xbf16, #tpu.memory_space<vmem>>, vector<32x768xbf16>
    tpu.vector_store %arg7[%c160_155, %c0_156], %110 {strides = array<i32>} : memref<288x768xbf16, #tpu.memory_space<vmem>>, vector<32x768xbf16>,
    %c0_157 = arith.constant 0 : index
    %c145_158 = arith.constant 145 : index
    %112 = vector.load %arg6[%c0_157, %c145_158] : memref<32x1024xbf16, #tpu.memory_space<vmem>>, vector<32x768xbf16>
    %c192_159 = arith.constant 192 : index
    %c0_160 = arith.constant 0 : index
    %113 = vector.load %arg7[%c192_159, %c0_160] : memref<288x768xbf16, #tpu.memory_space<vmem>>, vector<32x768xbf16>
    tpu.vector_store %arg7[%c192_159, %c0_160], %112 {strides = array<i32>} : memref<288x768xbf16, #tpu.memory_space<vmem>>, vector<32x768xbf16>,
    %c0_161 = arith.constant 0 : index
    %c146_162 = arith.constant 146 : index
    %114 = vector.load %arg6[%c0_161, %c146_162] : memref<32x1024xbf16, #tpu.memory_space<vmem>>, vector<32x768xbf16>
    %c224_163 = arith.constant 224 : index
    %c0_164 = arith.constant 0 : index
    %115 = vector.load %arg7[%c224_163, %c0_164] : memref<288x768xbf16, #tpu.memory_space<vmem>>, vector<32x768xbf16>
    tpu.vector_store %arg7[%c224_163, %c0_164], %114 {strides = array<i32>} : memref<288x768xbf16, #tpu.memory_space<vmem>>, vector<32x768xbf16>,
    %c0_165 = arith.constant 0 : index
    %c147_166 = arith.constant 147 : index
    %116 = vector.load %arg6[%c0_165, %c147_166] : memref<32x1024xbf16, #tpu.memory_space<vmem>>, vector<32x768xbf16>
    %c256_167 = arith.constant 256 : index
    %c0_168 = arith.constant 0 : index
    %117 = vector.load %arg7[%c256_167, %c0_168] : memref<288x768xbf16, #tpu.memory_space<vmem>>, vector<32x768xbf16>
    tpu.vector_store %arg7[%c256_167, %c0_168], %116 {strides = array<i32>} : memref<288x768xbf16, #tpu.memory_space<vmem>>, vector<32x768xbf16>,
    %c3 = arith.constant 3 : index
    %c0_169 = arith.constant 0 : index
    %c0_170 = arith.constant 0 : index
    %118 = vector.load %arg2[%c3, %c0_169, %c0_170] : memref<10x32x288xbf16, #tpu.memory_space<vmem>>, vector<1x32x288xbf16>
    %119 = vector.shape_cast %118 : vector<1x32x288xbf16> to vector<32x288xbf16>
    %c0_171 = arith.constant 0 : index
    %c0_172 = arith.constant 0 : index
    %120 = vector.load %arg7[%c0_171, %c0_172] : memref<288x768xbf16, #tpu.memory_space<vmem>>, vector<288x768xbf16>
    %cst_173 = arith.constant dense<0.000000e+00> : vector<32x768xf32>
    %121 = tpu.matmul %119, %120, %cst_173 {dimension_numbers = #tpu.dot_dimension_numbers<[1], [0], [0], [1], [0, 0, 1, 1], [], []>} : vector<32x288xbf16>, vector<288x768xbf16>, vector<32x768xf32> -> vector<32x768xf32>
    %c3_174 = arith.constant 3 : index
    %c0_175 = arith.constant 0 : index
    %c0_176 = arith.constant 0 : index
    %122 = vector.load %arg3[%c3_174, %c0_175, %c0_176] : memref<10x32x1xf32, #tpu.memory_space<vmem>>, vector<1x32x1xf32>
    %123 = vector.shape_cast %122 : vector<1x32x1xf32> to vector<32x1xf32>
    %124 = vector.broadcast %123 : vector<32x1xf32> to vector<32x768xf32>
    %125 = arith.addf %121, %124 : vector<32x768xf32>
    %cst_177 = arith.constant 0.000000e+00 : f32
    %126 = vector.broadcast %cst_177 : f32 to vector<32x768xf32>
    %127 = arith.maximumf %125, %126 : vector<32x768xf32>
    %128 = arith.mulf %127, %4 : vector<32x768xf32>
    %129 = arith.addf %128, %66 : vector<32x768xf32>
    %130 = arith.truncf %129 : vector<32x768xf32> to vector<32x768xbf16>
    %c0_178 = arith.constant 0 : index
    %c128_179 = arith.constant 128 : index
    %131 = vector.load %arg6[%c0_178, %c128_179] : memref<32x1024xbf16, #tpu.memory_space<vmem>>, vector<32x768xbf16>
    tpu.vector_store %arg6[%c0_178, %c128_179], %130 {strides = array<i32>} : memref<32x1024xbf16, #tpu.memory_space<vmem>>, vector<32x768xbf16>,
    %c0_180 = arith.constant 0 : index
    %c109_181 = arith.constant 109 : index
    %132 = vector.load %arg6[%c0_180, %c109_181] : memref<32x1024xbf16, #tpu.memory_space<vmem>>, vector<32x768xbf16>
    %c0_182 = arith.constant 0 : index
    %c0_183 = arith.constant 0 : index
    %133 = vector.load %arg7[%c0_182, %c0_183] : memref<288x768xbf16, #tpu.memory_space<vmem>>, vector<32x768xbf16>
    tpu.vector_store %arg7[%c0_182, %c0_183], %132 {strides = array<i32>} : memref<288x768xbf16, #tpu.memory_space<vmem>>, vector<32x768xbf16>,
    %c0_184 = arith.constant 0 : index
    %c110_185 = arith.constant 110 : index
    %134 = vector.load %arg6[%c0_184, %c110_185] : memref<32x1024xbf16, #tpu.memory_space<vmem>>, vector<32x768xbf16>
    %c32_186 = arith.constant 32 : index
    %c0_187 = arith.constant 0 : index
    %135 = vector.load %arg7[%c32_186, %c0_187] : memref<288x768xbf16, #tpu.memory_space<vmem>>, vector<32x768xbf16>
    tpu.vector_store %arg7[%c32_186, %c0_187], %134 {strides = array<i32>} : memref<288x768xbf16, #tpu.memory_space<vmem>>, vector<32x768xbf16>,
    %c0_188 = arith.constant 0 : index
    %c111_189 = arith.constant 111 : index
    %136 = vector.load %arg6[%c0_188, %c111_189] : memref<32x1024xbf16, #tpu.memory_space<vmem>>, vector<32x768xbf16>
    %c64_190 = arith.constant 64 : index
    %c0_191 = arith.constant 0 : index
    %137 = vector.load %arg7[%c64_190, %c0_191] : memref<288x768xbf16, #tpu.memory_space<vmem>>, vector<32x768xbf16>
    tpu.vector_store %arg7[%c64_190, %c0_191], %136 {strides = array<i32>} : memref<288x768xbf16, #tpu.memory_space<vmem>>, vector<32x768xbf16>,
    %c0_192 = arith.constant 0 : index
    %c127_193 = arith.constant 127 : index
    %138 = vector.load %arg6[%c0_192, %c127_193] : memref<32x1024xbf16, #tpu.memory_space<vmem>>, vector<32x768xbf16>
    %c96_194 = arith.constant 96 : index
    %c0_195 = arith.constant 0 : index
    %139 = vector.load %arg7[%c96_194, %c0_195] : memref<288x768xbf16, #tpu.memory_space<vmem>>, vector<32x768xbf16>
    tpu.vector_store %arg7[%c96_194, %c0_195], %138 {strides = array<i32>} : memref<288x768xbf16, #tpu.memory_space<vmem>>, vector<32x768xbf16>,
    %c0_196 = arith.constant 0 : index
    %c128_197 = arith.constant 128 : index
    %140 = vector.load %arg6[%c0_196, %c128_197] : memref<32x1024xbf16, #tpu.memory_space<vmem>>, vector<32x768xbf16>
    %c128_198 = arith.constant 128 : index
    %c0_199 = arith.constant 0 : index
    %141 = vector.load %arg7[%c128_198, %c0_199] : memref<288x768xbf16, #tpu.memory_space<vmem>>, vector<32x768xbf16>
    tpu.vector_store %arg7[%c128_198, %c0_199], %140 {strides = array<i32>} : memref<288x768xbf16, #tpu.memory_space<vmem>>, vector<32x768xbf16>,
    %c0_200 = arith.constant 0 : index
    %c129_201 = arith.constant 129 : index
    %142 = vector.load %arg6[%c0_200, %c129_201] : memref<32x1024xbf16, #tpu.memory_space<vmem>>, vector<32x768xbf16>
    %c160_202 = arith.constant 160 : index
    %c0_203 = arith.constant 0 : index
    %143 = vector.load %arg7[%c160_202, %c0_203] : memref<288x768xbf16, #tpu.memory_space<vmem>>, vector<32x768xbf16>
    tpu.vector_store %arg7[%c160_202, %c0_203], %142 {strides = array<i32>} : memref<288x768xbf16, #tpu.memory_space<vmem>>, vector<32x768xbf16>,
    %c0_204 = arith.constant 0 : index
    %c145_205 = arith.constant 145 : index
    %144 = vector.load %arg6[%c0_204, %c145_205] : memref<32x1024xbf16, #tpu.memory_space<vmem>>, vector<32x768xbf16>
    %c192_206 = arith.constant 192 : index
    %c0_207 = arith.constant 0 : index
    %145 = vector.load %arg7[%c192_206, %c0_207] : memref<288x768xbf16, #tpu.memory_space<vmem>>, vector<32x768xbf16>
    tpu.vector_store %arg7[%c192_206, %c0_207], %144 {strides = array<i32>} : memref<288x768xbf16, #tpu.memory_space<vmem>>, vector<32x768xbf16>,
    %c0_208 = arith.constant 0 : index
    %c146_209 = arith.constant 146 : index
    %146 = vector.load %arg6[%c0_208, %c146_209] : memref<32x1024xbf16, #tpu.memory_space<vmem>>, vector<32x768xbf16>
    %c224_210 = arith.constant 224 : index
    %c0_211 = arith.constant 0 : index
    %147 = vector.load %arg7[%c224_210, %c0_211] : memref<288x768xbf16, #tpu.memory_space<vmem>>, vector<32x768xbf16>
    tpu.vector_store %arg7[%c224_210, %c0_211], %146 {strides = array<i32>} : memref<288x768xbf16, #tpu.memory_space<vmem>>, vector<32x768xbf16>,
    %c0_212 = arith.constant 0 : index
    %c147_213 = arith.constant 147 : index
    %148 = vector.load %arg6[%c0_212, %c147_213] : memref<32x1024xbf16, #tpu.memory_space<vmem>>, vector<32x768xbf16>
    %c256_214 = arith.constant 256 : index
    %c0_215 = arith.constant 0 : index
    %149 = vector.load %arg7[%c256_214, %c0_215] : memref<288x768xbf16, #tpu.memory_space<vmem>>, vector<32x768xbf16>
    tpu.vector_store %arg7[%c256_214, %c0_215], %148 {strides = array<i32>} : memref<288x768xbf16, #tpu.memory_space<vmem>>, vector<32x768xbf16>,
    %c4 = arith.constant 4 : index
    %c0_216 = arith.constant 0 : index
    %c0_217 = arith.constant 0 : index
    %150 = vector.load %arg2[%c4, %c0_216, %c0_217] : memref<10x32x288xbf16, #tpu.memory_space<vmem>>, vector<1x32x288xbf16>
    %151 = vector.shape_cast %150 : vector<1x32x288xbf16> to vector<32x288xbf16>
    %c0_218 = arith.constant 0 : index
    %c0_219 = arith.constant 0 : index
    %152 = vector.load %arg7[%c0_218, %c0_219] : memref<288x768xbf16, #tpu.memory_space<vmem>>, vector<288x768xbf16>
    %cst_220 = arith.constant dense<0.000000e+00> : vector<32x768xf32>
    %153 = tpu.matmul %151, %152, %cst_220 {dimension_numbers = #tpu.dot_dimension_numbers<[1], [0], [0], [1], [0, 0, 1, 1], [], []>} : vector<32x288xbf16>, vector<288x768xbf16>, vector<32x768xf32> -> vector<32x768xf32>
    %c4_221 = arith.constant 4 : index
    %c0_222 = arith.constant 0 : index
    %c0_223 = arith.constant 0 : index
    %154 = vector.load %arg3[%c4_221, %c0_222, %c0_223] : memref<10x32x1xf32, #tpu.memory_space<vmem>>, vector<1x32x1xf32>
    %155 = vector.shape_cast %154 : vector<1x32x1xf32> to vector<32x1xf32>
    %156 = vector.broadcast %155 : vector<32x1xf32> to vector<32x768xf32>
    %157 = arith.addf %153, %156 : vector<32x768xf32>
    %cst_224 = arith.constant 0.000000e+00 : f32
    %158 = vector.broadcast %cst_224 : f32 to vector<32x768xf32>
    %159 = arith.maximumf %157, %158 : vector<32x768xf32>
    %160 = arith.mulf %159, %4 : vector<32x768xf32>
    %161 = arith.truncf %160 : vector<32x768xf32> to vector<32x768xbf16>
    %c0_225 = arith.constant 0 : index
    %c128_226 = arith.constant 128 : index
    %162 = vector.load %arg6[%c0_225, %c128_226] : memref<32x1024xbf16, #tpu.memory_space<vmem>>, vector<32x768xbf16>
    tpu.vector_store %arg6[%c0_225, %c128_226], %161 {strides = array<i32>} : memref<32x1024xbf16, #tpu.memory_space<vmem>>, vector<32x768xbf16>,
    %c0_227 = arith.constant 0 : index
    %c109_228 = arith.constant 109 : index
    %163 = vector.load %arg6[%c0_227, %c109_228] : memref<32x1024xbf16, #tpu.memory_space<vmem>>, vector<32x768xbf16>
    %c0_229 = arith.constant 0 : index
    %c0_230 = arith.constant 0 : index
    %164 = vector.load %arg7[%c0_229, %c0_230] : memref<288x768xbf16, #tpu.memory_space<vmem>>, vector<32x768xbf16>
    tpu.vector_store %arg7[%c0_229, %c0_230], %163 {strides = array<i32>} : memref<288x768xbf16, #tpu.memory_space<vmem>>, vector<32x768xbf16>,
    %c0_231 = arith.constant 0 : index
    %c110_232 = arith.constant 110 : index
    %165 = vector.load %arg6[%c0_231, %c110_232] : memref<32x1024xbf16, #tpu.memory_space<vmem>>, vector<32x768xbf16>
    %c32_233 = arith.constant 32 : index
    %c0_234 = arith.constant 0 : index
    %166 = vector.load %arg7[%c32_233, %c0_234] : memref<288x768xbf16, #tpu.memory_space<vmem>>, vector<32x768xbf16>
    tpu.vector_store %arg7[%c32_233, %c0_234], %165 {strides = array<i32>} : memref<288x768xbf16, #tpu.memory_space<vmem>>, vector<32x768xbf16>,
    %c0_235 = arith.constant 0 : index
    %c111_236 = arith.constant 111 : index
    %167 = vector.load %arg6[%c0_235, %c111_236] : memref<32x1024xbf16, #tpu.memory_space<vmem>>, vector<32x768xbf16>
    %c64_237 = arith.constant 64 : index
    %c0_238 = arith.constant 0 : index
    %168 = vector.load %arg7[%c64_237, %c0_238] : memref<288x768xbf16, #tpu.memory_space<vmem>>, vector<32x768xbf16>
    tpu.vector_store %arg7[%c64_237, %c0_238], %167 {strides = array<i32>} : memref<288x768xbf16, #tpu.memory_space<vmem>>, vector<32x768xbf16>,
    %c0_239 = arith.constant 0 : index
    %c127_240 = arith.constant 127 : index
    %169 = vector.load %arg6[%c0_239, %c127_240] : memref<32x1024xbf16, #tpu.memory_space<vmem>>, vector<32x768xbf16>
    %c96_241 = arith.constant 96 : index
    %c0_242 = arith.constant 0 : index
    %170 = vector.load %arg7[%c96_241, %c0_242] : memref<288x768xbf16, #tpu.memory_space<vmem>>, vector<32x768xbf16>
    tpu.vector_store %arg7[%c96_241, %c0_242], %169 {strides = array<i32>} : memref<288x768xbf16, #tpu.memory_space<vmem>>, vector<32x768xbf16>,
    %c0_243 = arith.constant 0 : index
    %c128_244 = arith.constant 128 : index
    %171 = vector.load %arg6[%c0_243, %c128_244] : memref<32x1024xbf16, #tpu.memory_space<vmem>>, vector<32x768xbf16>
    %c128_245 = arith.constant 128 : index
    %c0_246 = arith.constant 0 : index
    %172 = vector.load %arg7[%c128_245, %c0_246] : memref<288x768xbf16, #tpu.memory_space<vmem>>, vector<32x768xbf16>
    tpu.vector_store %arg7[%c128_245, %c0_246], %171 {strides = array<i32>} : memref<288x768xbf16, #tpu.memory_space<vmem>>, vector<32x768xbf16>,
    %c0_247 = arith.constant 0 : index
    %c129_248 = arith.constant 129 : index
    %173 = vector.load %arg6[%c0_247, %c129_248] : memref<32x1024xbf16, #tpu.memory_space<vmem>>, vector<32x768xbf16>
    %c160_249 = arith.constant 160 : index
    %c0_250 = arith.constant 0 : index
    %174 = vector.load %arg7[%c160_249, %c0_250] : memref<288x768xbf16, #tpu.memory_space<vmem>>, vector<32x768xbf16>
    tpu.vector_store %arg7[%c160_249, %c0_250], %173 {strides = array<i32>} : memref<288x768xbf16, #tpu.memory_space<vmem>>, vector<32x768xbf16>,
    %c0_251 = arith.constant 0 : index
    %c145_252 = arith.constant 145 : index
    %175 = vector.load %arg6[%c0_251, %c145_252] : memref<32x1024xbf16, #tpu.memory_space<vmem>>, vector<32x768xbf16>
    %c192_253 = arith.constant 192 : index
    %c0_254 = arith.constant 0 : index
    %176 = vector.load %arg7[%c192_253, %c0_254] : memref<288x768xbf16, #tpu.memory_space<vmem>>, vector<32x768xbf16>
    tpu.vector_store %arg7[%c192_253, %c0_254], %175 {strides = array<i32>} : memref<288x768xbf16, #tpu.memory_space<vmem>>, vector<32x768xbf16>,
    %c0_255 = arith.constant 0 : index
    %c146_256 = arith.constant 146 : index
    %177 = vector.load %arg6[%c0_255, %c146_256] : memref<32x1024xbf16, #tpu.memory_space<vmem>>, vector<32x768xbf16>
    %c224_257 = arith.constant 224 : index
    %c0_258 = arith.constant 0 : index
    %178 = vector.load %arg7[%c224_257, %c0_258] : memref<288x768xbf16, #tpu.memory_space<vmem>>, vector<32x768xbf16>
    tpu.vector_store %arg7[%c224_257, %c0_258], %177 {strides = array<i32>} : memref<288x768xbf16, #tpu.memory_space<vmem>>, vector<32x768xbf16>,
    %c0_259 = arith.constant 0 : index
    %c147_260 = arith.constant 147 : index
    %179 = vector.load %arg6[%c0_259, %c147_260] : memref<32x1024xbf16, #tpu.memory_space<vmem>>, vector<32x768xbf16>
    %c256_261 = arith.constant 256 : index
    %c0_262 = arith.constant 0 : index
    %180 = vector.load %arg7[%c256_261, %c0_262] : memref<288x768xbf16, #tpu.memory_space<vmem>>, vector<32x768xbf16>
    tpu.vector_store %arg7[%c256_261, %c0_262], %179 {strides = array<i32>} : memref<288x768xbf16, #tpu.memory_space<vmem>>, vector<32x768xbf16>,
    %c5 = arith.constant 5 : index
    %c0_263 = arith.constant 0 : index
    %c0_264 = arith.constant 0 : index
    %181 = vector.load %arg2[%c5, %c0_263, %c0_264] : memref<10x32x288xbf16, #tpu.memory_space<vmem>>, vector<1x32x288xbf16>
    %182 = vector.shape_cast %181 : vector<1x32x288xbf16> to vector<32x288xbf16>
    %c0_265 = arith.constant 0 : index
    %c0_266 = arith.constant 0 : index
    %183 = vector.load %arg7[%c0_265, %c0_266] : memref<288x768xbf16, #tpu.memory_space<vmem>>, vector<288x768xbf16>
    %cst_267 = arith.constant dense<0.000000e+00> : vector<32x768xf32>
    %184 = tpu.matmul %182, %183, %cst_267 {dimension_numbers = #tpu.dot_dimension_numbers<[1], [0], [0], [1], [0, 0, 1, 1], [], []>} : vector<32x288xbf16>, vector<288x768xbf16>, vector<32x768xf32> -> vector<32x768xf32>
    %c5_268 = arith.constant 5 : index
    %c0_269 = arith.constant 0 : index
    %c0_270 = arith.constant 0 : index
    %185 = vector.load %arg3[%c5_268, %c0_269, %c0_270] : memref<10x32x1xf32, #tpu.memory_space<vmem>>, vector<1x32x1xf32>
    %186 = vector.shape_cast %185 : vector<1x32x1xf32> to vector<32x1xf32>
    %187 = vector.broadcast %186 : vector<32x1xf32> to vector<32x768xf32>
    %188 = arith.addf %184, %187 : vector<32x768xf32>
    %cst_271 = arith.constant 0.000000e+00 : f32
    %189 = vector.broadcast %cst_271 : f32 to vector<32x768xf32>
    %190 = arith.maximumf %188, %189 : vector<32x768xf32>
    %191 = arith.mulf %190, %4 : vector<32x768xf32>
    %192 = arith.addf %191, %129 : vector<32x768xf32>
    %193 = arith.truncf %192 : vector<32x768xf32> to vector<32x768xbf16>
    %c0_272 = arith.constant 0 : index
    %c128_273 = arith.constant 128 : index
    %194 = vector.load %arg6[%c0_272, %c128_273] : memref<32x1024xbf16, #tpu.memory_space<vmem>>, vector<32x768xbf16>
    tpu.vector_store %arg6[%c0_272, %c128_273], %193 {strides = array<i32>} : memref<32x1024xbf16, #tpu.memory_space<vmem>>, vector<32x768xbf16>,
    %c0_274 = arith.constant 0 : index
    %c109_275 = arith.constant 109 : index
    %195 = vector.load %arg6[%c0_274, %c109_275] : memref<32x1024xbf16, #tpu.memory_space<vmem>>, vector<32x768xbf16>
    %c0_276 = arith.constant 0 : index
    %c0_277 = arith.constant 0 : index
    %196 = vector.load %arg7[%c0_276, %c0_277] : memref<288x768xbf16, #tpu.memory_space<vmem>>, vector<32x768xbf16>
    tpu.vector_store %arg7[%c0_276, %c0_277], %195 {strides = array<i32>} : memref<288x768xbf16, #tpu.memory_space<vmem>>, vector<32x768xbf16>,
    %c0_278 = arith.constant 0 : index
    %c110_279 = arith.constant 110 : index
    %197 = vector.load %arg6[%c0_278, %c110_279] : memref<32x1024xbf16, #tpu.memory_space<vmem>>, vector<32x768xbf16>
    %c32_280 = arith.constant 32 : index
    %c0_281 = arith.constant 0 : index
    %198 = vector.load %arg7[%c32_280, %c0_281] : memref<288x768xbf16, #tpu.memory_space<vmem>>, vector<32x768xbf16>
    tpu.vector_store %arg7[%c32_280, %c0_281], %197 {strides = array<i32>} : memref<288x768xbf16, #tpu.memory_space<vmem>>, vector<32x768xbf16>,
    %c0_282 = arith.constant 0 : index
    %c111_283 = arith.constant 111 : index
    %199 = vector.load %arg6[%c0_282, %c111_283] : memref<32x1024xbf16, #tpu.memory_space<vmem>>, vector<32x768xbf16>
    %c64_284 = arith.constant 64 : index
    %c0_285 = arith.constant 0 : index
    %200 = vector.load %arg7[%c64_284, %c0_285] : memref<288x768xbf16, #tpu.memory_space<vmem>>, vector<32x768xbf16>
    tpu.vector_store %arg7[%c64_284, %c0_285], %199 {strides = array<i32>} : memref<288x768xbf16, #tpu.memory_space<vmem>>, vector<32x768xbf16>,
    %c0_286 = arith.constant 0 : index
    %c127_287 = arith.constant 127 : index
    %201 = vector.load %arg6[%c0_286, %c127_287] : memref<32x1024xbf16, #tpu.memory_space<vmem>>, vector<32x768xbf16>
    %c96_288 = arith.constant 96 : index
    %c0_289 = arith.constant 0 : index
    %202 = vector.load %arg7[%c96_288, %c0_289] : memref<288x768xbf16, #tpu.memory_space<vmem>>, vector<32x768xbf16>
    tpu.vector_store %arg7[%c96_288, %c0_289], %201 {strides = array<i32>} : memref<288x768xbf16, #tpu.memory_space<vmem>>, vector<32x768xbf16>,
    %c0_290 = arith.constant 0 : index
    %c128_291 = arith.constant 128 : index
    %203 = vector.load %arg6[%c0_290, %c128_291] : memref<32x1024xbf16, #tpu.memory_space<vmem>>, vector<32x768xbf16>
    %c128_292 = arith.constant 128 : index
    %c0_293 = arith.constant 0 : index
    %204 = vector.load %arg7[%c128_292, %c0_293] : memref<288x768xbf16, #tpu.memory_space<vmem>>, vector<32x768xbf16>
    tpu.vector_store %arg7[%c128_292, %c0_293], %203 {strides = array<i32>} : memref<288x768xbf16, #tpu.memory_space<vmem>>, vector<32x768xbf16>,
    %c0_294 = arith.constant 0 : index
    %c129_295 = arith.constant 129 : index
    %205 = vector.load %arg6[%c0_294, %c129_295] : memref<32x1024xbf16, #tpu.memory_space<vmem>>, vector<32x768xbf16>
    %c160_296 = arith.constant 160 : index
    %c0_297 = arith.constant 0 : index
    %206 = vector.load %arg7[%c160_296, %c0_297] : memref<288x768xbf16, #tpu.memory_space<vmem>>, vector<32x768xbf16>
    tpu.vector_store %arg7[%c160_296, %c0_297], %205 {strides = array<i32>} : memref<288x768xbf16, #tpu.memory_space<vmem>>, vector<32x768xbf16>,
    %c0_298 = arith.constant 0 : index
    %c145_299 = arith.constant 145 : index
    %207 = vector.load %arg6[%c0_298, %c145_299] : memref<32x1024xbf16, #tpu.memory_space<vmem>>, vector<32x768xbf16>
    %c192_300 = arith.constant 192 : index
    %c0_301 = arith.constant 0 : index
    %208 = vector.load %arg7[%c192_300, %c0_301] : memref<288x768xbf16, #tpu.memory_space<vmem>>, vector<32x768xbf16>
    tpu.vector_store %arg7[%c192_300, %c0_301], %207 {strides = array<i32>} : memref<288x768xbf16, #tpu.memory_space<vmem>>, vector<32x768xbf16>,
    %c0_302 = arith.constant 0 : index
    %c146_303 = arith.constant 146 : index
    %209 = vector.load %arg6[%c0_302, %c146_303] : memref<32x1024xbf16, #tpu.memory_space<vmem>>, vector<32x768xbf16>
    %c224_304 = arith.constant 224 : index
    %c0_305 = arith.constant 0 : index
    %210 = vector.load %arg7[%c224_304, %c0_305] : memref<288x768xbf16, #tpu.memory_space<vmem>>, vector<32x768xbf16>
    tpu.vector_store %arg7[%c224_304, %c0_305], %209 {strides = array<i32>} : memref<288x768xbf16, #tpu.memory_space<vmem>>, vector<32x768xbf16>,
    %c0_306 = arith.constant 0 : index
    %c147_307 = arith.constant 147 : index
    %211 = vector.load %arg6[%c0_306, %c147_307] : memref<32x1024xbf16, #tpu.memory_space<vmem>>, vector<32x768xbf16>
    %c256_308 = arith.constant 256 : index
    %c0_309 = arith.constant 0 : index
    %212 = vector.load %arg7[%c256_308, %c0_309] : memref<288x768xbf16, #tpu.memory_space<vmem>>, vector<32x768xbf16>
    tpu.vector_store %arg7[%c256_308, %c0_309], %211 {strides = array<i32>} : memref<288x768xbf16, #tpu.memory_space<vmem>>, vector<32x768xbf16>,
    %c6 = arith.constant 6 : index
    %c0_310 = arith.constant 0 : index
    %c0_311 = arith.constant 0 : index
    %213 = vector.load %arg2[%c6, %c0_310, %c0_311] : memref<10x32x288xbf16, #tpu.memory_space<vmem>>, vector<1x32x288xbf16>
    %214 = vector.shape_cast %213 : vector<1x32x288xbf16> to vector<32x288xbf16>
    %c0_312 = arith.constant 0 : index
    %c0_313 = arith.constant 0 : index
    %215 = vector.load %arg7[%c0_312, %c0_313] : memref<288x768xbf16, #tpu.memory_space<vmem>>, vector<288x768xbf16>
    %cst_314 = arith.constant dense<0.000000e+00> : vector<32x768xf32>
    %216 = tpu.matmul %214, %215, %cst_314 {dimension_numbers = #tpu.dot_dimension_numbers<[1], [0], [0], [1], [0, 0, 1, 1], [], []>} : vector<32x288xbf16>, vector<288x768xbf16>, vector<32x768xf32> -> vector<32x768xf32>
    %c6_315 = arith.constant 6 : index
    %c0_316 = arith.constant 0 : index
    %c0_317 = arith.constant 0 : index
    %217 = vector.load %arg3[%c6_315, %c0_316, %c0_317] : memref<10x32x1xf32, #tpu.memory_space<vmem>>, vector<1x32x1xf32>
    %218 = vector.shape_cast %217 : vector<1x32x1xf32> to vector<32x1xf32>
    %219 = vector.broadcast %218 : vector<32x1xf32> to vector<32x768xf32>
    %220 = arith.addf %216, %219 : vector<32x768xf32>
    %cst_318 = arith.constant 0.000000e+00 : f32
    %221 = vector.broadcast %cst_318 : f32 to vector<32x768xf32>
    %222 = arith.maximumf %220, %221 : vector<32x768xf32>
    %223 = arith.mulf %222, %4 : vector<32x768xf32>
    %224 = arith.truncf %223 : vector<32x768xf32> to vector<32x768xbf16>
    %c0_319 = arith.constant 0 : index
    %c128_320 = arith.constant 128 : index
    %225 = vector.load %arg6[%c0_319, %c128_320] : memref<32x1024xbf16, #tpu.memory_space<vmem>>, vector<32x768xbf16>
    tpu.vector_store %arg6[%c0_319, %c128_320], %224 {strides = array<i32>} : memref<32x1024xbf16, #tpu.memory_space<vmem>>, vector<32x768xbf16>,
    %c0_321 = arith.constant 0 : index
    %c109_322 = arith.constant 109 : index
    %226 = vector.load %arg6[%c0_321, %c109_322] : memref<32x1024xbf16, #tpu.memory_space<vmem>>, vector<32x768xbf16>
    %c0_323 = arith.constant 0 : index
    %c0_324 = arith.constant 0 : index
    %227 = vector.load %arg7[%c0_323, %c0_324] : memref<288x768xbf16, #tpu.memory_space<vmem>>, vector<32x768xbf16>
    tpu.vector_store %arg7[%c0_323, %c0_324], %226 {strides = array<i32>} : memref<288x768xbf16, #tpu.memory_space<vmem>>, vector<32x768xbf16>,
    %c0_325 = arith.constant 0 : index
    %c110_326 = arith.constant 110 : index
    %228 = vector.load %arg6[%c0_325, %c110_326] : memref<32x1024xbf16, #tpu.memory_space<vmem>>, vector<32x768xbf16>
    %c32_327 = arith.constant 32 : index
    %c0_328 = arith.constant 0 : index
    %229 = vector.load %arg7[%c32_327, %c0_328] : memref<288x768xbf16, #tpu.memory_space<vmem>>, vector<32x768xbf16>
    tpu.vector_store %arg7[%c32_327, %c0_328], %228 {strides = array<i32>} : memref<288x768xbf16, #tpu.memory_space<vmem>>, vector<32x768xbf16>,
    %c0_329 = arith.constant 0 : index
    %c111_330 = arith.constant 111 : index
    %230 = vector.load %arg6[%c0_329, %c111_330] : memref<32x1024xbf16, #tpu.memory_space<vmem>>, vector<32x768xbf16>
    %c64_331 = arith.constant 64 : index
    %c0_332 = arith.constant 0 : index
    %231 = vector.load %arg7[%c64_331, %c0_332] : memref<288x768xbf16, #tpu.memory_space<vmem>>, vector<32x768xbf16>
    tpu.vector_store %arg7[%c64_331, %c0_332], %230 {strides = array<i32>} : memref<288x768xbf16, #tpu.memory_space<vmem>>, vector<32x768xbf16>,
    %c0_333 = arith.constant 0 : index
    %c127_334 = arith.constant 127 : index
    %232 = vector.load %arg6[%c0_333, %c127_334] : memref<32x1024xbf16, #tpu.memory_space<vmem>>, vector<32x768xbf16>
    %c96_335 = arith.constant 96 : index
    %c0_336 = arith.constant 0 : index
    %233 = vector.load %arg7[%c96_335, %c0_336] : memref<288x768xbf16, #tpu.memory_space<vmem>>, vector<32x768xbf16>
    tpu.vector_store %arg7[%c96_335, %c0_336], %232 {strides = array<i32>} : memref<288x768xbf16, #tpu.memory_space<vmem>>, vector<32x768xbf16>,
    %c0_337 = arith.constant 0 : index
    %c128_338 = arith.constant 128 : index
    %234 = vector.load %arg6[%c0_337, %c128_338] : memref<32x1024xbf16, #tpu.memory_space<vmem>>, vector<32x768xbf16>
    %c128_339 = arith.constant 128 : index
    %c0_340 = arith.constant 0 : index
    %235 = vector.load %arg7[%c128_339, %c0_340] : memref<288x768xbf16, #tpu.memory_space<vmem>>, vector<32x768xbf16>
    tpu.vector_store %arg7[%c128_339, %c0_340], %234 {strides = array<i32>} : memref<288x768xbf16, #tpu.memory_space<vmem>>, vector<32x768xbf16>,
    %c0_341 = arith.constant 0 : index
    %c129_342 = arith.constant 129 : index
    %236 = vector.load %arg6[%c0_341, %c129_342] : memref<32x1024xbf16, #tpu.memory_space<vmem>>, vector<32x768xbf16>
    %c160_343 = arith.constant 160 : index
    %c0_344 = arith.constant 0 : index
    %237 = vector.load %arg7[%c160_343, %c0_344] : memref<288x768xbf16, #tpu.memory_space<vmem>>, vector<32x768xbf16>
    tpu.vector_store %arg7[%c160_343, %c0_344], %236 {strides = array<i32>} : memref<288x768xbf16, #tpu.memory_space<vmem>>, vector<32x768xbf16>,
    %c0_345 = arith.constant 0 : index
    %c145_346 = arith.constant 145 : index
    %238 = vector.load %arg6[%c0_345, %c145_346] : memref<32x1024xbf16, #tpu.memory_space<vmem>>, vector<32x768xbf16>
    %c192_347 = arith.constant 192 : index
    %c0_348 = arith.constant 0 : index
    %239 = vector.load %arg7[%c192_347, %c0_348] : memref<288x768xbf16, #tpu.memory_space<vmem>>, vector<32x768xbf16>
    tpu.vector_store %arg7[%c192_347, %c0_348], %238 {strides = array<i32>} : memref<288x768xbf16, #tpu.memory_space<vmem>>, vector<32x768xbf16>,
    %c0_349 = arith.constant 0 : index
    %c146_350 = arith.constant 146 : index
    %240 = vector.load %arg6[%c0_349, %c146_350] : memref<32x1024xbf16, #tpu.memory_space<vmem>>, vector<32x768xbf16>
    %c224_351 = arith.constant 224 : index
    %c0_352 = arith.constant 0 : index
    %241 = vector.load %arg7[%c224_351, %c0_352] : memref<288x768xbf16, #tpu.memory_space<vmem>>, vector<32x768xbf16>
    tpu.vector_store %arg7[%c224_351, %c0_352], %240 {strides = array<i32>} : memref<288x768xbf16, #tpu.memory_space<vmem>>, vector<32x768xbf16>,
    %c0_353 = arith.constant 0 : index
    %c147_354 = arith.constant 147 : index
    %242 = vector.load %arg6[%c0_353, %c147_354] : memref<32x1024xbf16, #tpu.memory_space<vmem>>, vector<32x768xbf16>
    %c256_355 = arith.constant 256 : index
    %c0_356 = arith.constant 0 : index
    %243 = vector.load %arg7[%c256_355, %c0_356] : memref<288x768xbf16, #tpu.memory_space<vmem>>, vector<32x768xbf16>
    tpu.vector_store %arg7[%c256_355, %c0_356], %242 {strides = array<i32>} : memref<288x768xbf16, #tpu.memory_space<vmem>>, vector<32x768xbf16>,
    %c7 = arith.constant 7 : index
    %c0_357 = arith.constant 0 : index
    %c0_358 = arith.constant 0 : index
    %244 = vector.load %arg2[%c7, %c0_357, %c0_358] : memref<10x32x288xbf16, #tpu.memory_space<vmem>>, vector<1x32x288xbf16>
    %245 = vector.shape_cast %244 : vector<1x32x288xbf16> to vector<32x288xbf16>
    %c0_359 = arith.constant 0 : index
    %c0_360 = arith.constant 0 : index
    %246 = vector.load %arg7[%c0_359, %c0_360] : memref<288x768xbf16, #tpu.memory_space<vmem>>, vector<288x768xbf16>
    %cst_361 = arith.constant dense<0.000000e+00> : vector<32x768xf32>
    %247 = tpu.matmul %245, %246, %cst_361 {dimension_numbers = #tpu.dot_dimension_numbers<[1], [0], [0], [1], [0, 0, 1, 1], [], []>} : vector<32x288xbf16>, vector<288x768xbf16>, vector<32x768xf32> -> vector<32x768xf32>
    %c7_362 = arith.constant 7 : index
    %c0_363 = arith.constant 0 : index
    %c0_364 = arith.constant 0 : index
    %248 = vector.load %arg3[%c7_362, %c0_363, %c0_364] : memref<10x32x1xf32, #tpu.memory_space<vmem>>, vector<1x32x1xf32>
    %249 = vector.shape_cast %248 : vector<1x32x1xf32> to vector<32x1xf32>
    %250 = vector.broadcast %249 : vector<32x1xf32> to vector<32x768xf32>
    %251 = arith.addf %247, %250 : vector<32x768xf32>
    %cst_365 = arith.constant 0.000000e+00 : f32
    %252 = vector.broadcast %cst_365 : f32 to vector<32x768xf32>
    %253 = arith.maximumf %251, %252 : vector<32x768xf32>
    %254 = arith.mulf %253, %4 : vector<32x768xf32>
    %255 = arith.addf %254, %192 : vector<32x768xf32>
    %256 = arith.truncf %255 : vector<32x768xf32> to vector<32x768xbf16>
    %c0_366 = arith.constant 0 : index
    %c128_367 = arith.constant 128 : index
    %257 = vector.load %arg6[%c0_366, %c128_367] : memref<32x1024xbf16, #tpu.memory_space<vmem>>, vector<32x768xbf16>
    tpu.vector_store %arg6[%c0_366, %c128_367], %256 {strides = array<i32>} : memref<32x1024xbf16, #tpu.memory_space<vmem>>, vector<32x768xbf16>,
    %c0_368 = arith.constant 0 : index
    %c109_369 = arith.constant 109 : index
    %258 = vector.load %arg6[%c0_368, %c109_369] : memref<32x1024xbf16, #tpu.memory_space<vmem>>, vector<32x768xbf16>
    %c0_370 = arith.constant 0 : index
    %c0_371 = arith.constant 0 : index
    %259 = vector.load %arg7[%c0_370, %c0_371] : memref<288x768xbf16, #tpu.memory_space<vmem>>, vector<32x768xbf16>
    tpu.vector_store %arg7[%c0_370, %c0_371], %258 {strides = array<i32>} : memref<288x768xbf16, #tpu.memory_space<vmem>>, vector<32x768xbf16>,
    %c0_372 = arith.constant 0 : index
    %c110_373 = arith.constant 110 : index
    %260 = vector.load %arg6[%c0_372, %c110_373] : memref<32x1024xbf16, #tpu.memory_space<vmem>>, vector<32x768xbf16>
    %c32_374 = arith.constant 32 : index
    %c0_375 = arith.constant 0 : index
    %261 = vector.load %arg7[%c32_374, %c0_375] : memref<288x768xbf16, #tpu.memory_space<vmem>>, vector<32x768xbf16>
    tpu.vector_store %arg7[%c32_374, %c0_375], %260 {strides = array<i32>} : memref<288x768xbf16, #tpu.memory_space<vmem>>, vector<32x768xbf16>,
    %c0_376 = arith.constant 0 : index
    %c111_377 = arith.constant 111 : index
    %262 = vector.load %arg6[%c0_376, %c111_377] : memref<32x1024xbf16, #tpu.memory_space<vmem>>, vector<32x768xbf16>
    %c64_378 = arith.constant 64 : index
    %c0_379 = arith.constant 0 : index
    %263 = vector.load %arg7[%c64_378, %c0_379] : memref<288x768xbf16, #tpu.memory_space<vmem>>, vector<32x768xbf16>
    tpu.vector_store %arg7[%c64_378, %c0_379], %262 {strides = array<i32>} : memref<288x768xbf16, #tpu.memory_space<vmem>>, vector<32x768xbf16>,
    %c0_380 = arith.constant 0 : index
    %c127_381 = arith.constant 127 : index
    %264 = vector.load %arg6[%c0_380, %c127_381] : memref<32x1024xbf16, #tpu.memory_space<vmem>>, vector<32x768xbf16>
    %c96_382 = arith.constant 96 : index
    %c0_383 = arith.constant 0 : index
    %265 = vector.load %arg7[%c96_382, %c0_383] : memref<288x768xbf16, #tpu.memory_space<vmem>>, vector<32x768xbf16>
    tpu.vector_store %arg7[%c96_382, %c0_383], %264 {strides = array<i32>} : memref<288x768xbf16, #tpu.memory_space<vmem>>, vector<32x768xbf16>,
    %c0_384 = arith.constant 0 : index
    %c128_385 = arith.constant 128 : index
    %266 = vector.load %arg6[%c0_384, %c128_385] : memref<32x1024xbf16, #tpu.memory_space<vmem>>, vector<32x768xbf16>
    %c128_386 = arith.constant 128 : index
    %c0_387 = arith.constant 0 : index
    %267 = vector.load %arg7[%c128_386, %c0_387] : memref<288x768xbf16, #tpu.memory_space<vmem>>, vector<32x768xbf16>
    tpu.vector_store %arg7[%c128_386, %c0_387], %266 {strides = array<i32>} : memref<288x768xbf16, #tpu.memory_space<vmem>>, vector<32x768xbf16>,
    %c0_388 = arith.constant 0 : index
    %c129_389 = arith.constant 129 : index
    %268 = vector.load %arg6[%c0_388, %c129_389] : memref<32x1024xbf16, #tpu.memory_space<vmem>>, vector<32x768xbf16>
    %c160_390 = arith.constant 160 : index
    %c0_391 = arith.constant 0 : index
    %269 = vector.load %arg7[%c160_390, %c0_391] : memref<288x768xbf16, #tpu.memory_space<vmem>>, vector<32x768xbf16>
    tpu.vector_store %arg7[%c160_390, %c0_391], %268 {strides = array<i32>} : memref<288x768xbf16, #tpu.memory_space<vmem>>, vector<32x768xbf16>,
    %c0_392 = arith.constant 0 : index
    %c145_393 = arith.constant 145 : index
    %270 = vector.load %arg6[%c0_392, %c145_393] : memref<32x1024xbf16, #tpu.memory_space<vmem>>, vector<32x768xbf16>
    %c192_394 = arith.constant 192 : index
    %c0_395 = arith.constant 0 : index
    %271 = vector.load %arg7[%c192_394, %c0_395] : memref<288x768xbf16, #tpu.memory_space<vmem>>, vector<32x768xbf16>
    tpu.vector_store %arg7[%c192_394, %c0_395], %270 {strides = array<i32>} : memref<288x768xbf16, #tpu.memory_space<vmem>>, vector<32x768xbf16>,
    %c0_396 = arith.constant 0 : index
    %c146_397 = arith.constant 146 : index
    %272 = vector.load %arg6[%c0_396, %c146_397] : memref<32x1024xbf16, #tpu.memory_space<vmem>>, vector<32x768xbf16>
    %c224_398 = arith.constant 224 : index
    %c0_399 = arith.constant 0 : index
    %273 = vector.load %arg7[%c224_398, %c0_399] : memref<288x768xbf16, #tpu.memory_space<vmem>>, vector<32x768xbf16>
    tpu.vector_store %arg7[%c224_398, %c0_399], %272 {strides = array<i32>} : memref<288x768xbf16, #tpu.memory_space<vmem>>, vector<32x768xbf16>,
    %c0_400 = arith.constant 0 : index
    %c147_401 = arith.constant 147 : index
    %274 = vector.load %arg6[%c0_400, %c147_401] : memref<32x1024xbf16, #tpu.memory_space<vmem>>, vector<32x768xbf16>
    %c256_402 = arith.constant 256 : index
    %c0_403 = arith.constant 0 : index
    %275 = vector.load %arg7[%c256_402, %c0_403] : memref<288x768xbf16, #tpu.memory_space<vmem>>, vector<32x768xbf16>
    tpu.vector_store %arg7[%c256_402, %c0_403], %274 {strides = array<i32>} : memref<288x768xbf16, #tpu.memory_space<vmem>>, vector<32x768xbf16>,
    %c8 = arith.constant 8 : index
    %c0_404 = arith.constant 0 : index
    %c0_405 = arith.constant 0 : index
    %276 = vector.load %arg2[%c8, %c0_404, %c0_405] : memref<10x32x288xbf16, #tpu.memory_space<vmem>>, vector<1x32x288xbf16>
    %277 = vector.shape_cast %276 : vector<1x32x288xbf16> to vector<32x288xbf16>
    %c0_406 = arith.constant 0 : index
    %c0_407 = arith.constant 0 : index
    %278 = vector.load %arg7[%c0_406, %c0_407] : memref<288x768xbf16, #tpu.memory_space<vmem>>, vector<288x768xbf16>
    %cst_408 = arith.constant dense<0.000000e+00> : vector<32x768xf32>
    %279 = tpu.matmul %277, %278, %cst_408 {dimension_numbers = #tpu.dot_dimension_numbers<[1], [0], [0], [1], [0, 0, 1, 1], [], []>} : vector<32x288xbf16>, vector<288x768xbf16>, vector<32x768xf32> -> vector<32x768xf32>
    %c8_409 = arith.constant 8 : index
    %c0_410 = arith.constant 0 : index
    %c0_411 = arith.constant 0 : index
    %280 = vector.load %arg3[%c8_409, %c0_410, %c0_411] : memref<10x32x1xf32, #tpu.memory_space<vmem>>, vector<1x32x1xf32>
    %281 = vector.shape_cast %280 : vector<1x32x1xf32> to vector<32x1xf32>
    %282 = vector.broadcast %281 : vector<32x1xf32> to vector<32x768xf32>
    %283 = arith.addf %279, %282 : vector<32x768xf32>
    %cst_412 = arith.constant 0.000000e+00 : f32
    %284 = vector.broadcast %cst_412 : f32 to vector<32x768xf32>
    %285 = arith.maximumf %283, %284 : vector<32x768xf32>
    %286 = arith.mulf %285, %4 : vector<32x768xf32>
    %287 = arith.truncf %286 : vector<32x768xf32> to vector<32x768xbf16>
    %c0_413 = arith.constant 0 : index
    %c128_414 = arith.constant 128 : index
    %288 = vector.load %arg6[%c0_413, %c128_414] : memref<32x1024xbf16, #tpu.memory_space<vmem>>, vector<32x768xbf16>
    tpu.vector_store %arg6[%c0_413, %c128_414], %287 {strides = array<i32>} : memref<32x1024xbf16, #tpu.memory_space<vmem>>, vector<32x768xbf16>,
    %c0_415 = arith.constant 0 : index
    %c109_416 = arith.constant 109 : index
    %289 = vector.load %arg6[%c0_415, %c109_416] : memref<32x1024xbf16, #tpu.memory_space<vmem>>, vector<32x768xbf16>
    %c0_417 = arith.constant 0 : index
    %c0_418 = arith.constant 0 : index
    %290 = vector.load %arg7[%c0_417, %c0_418] : memref<288x768xbf16, #tpu.memory_space<vmem>>, vector<32x768xbf16>
    tpu.vector_store %arg7[%c0_417, %c0_418], %289 {strides = array<i32>} : memref<288x768xbf16, #tpu.memory_space<vmem>>, vector<32x768xbf16>,
    %c0_419 = arith.constant 0 : index
    %c110_420 = arith.constant 110 : index
    %291 = vector.load %arg6[%c0_419, %c110_420] : memref<32x1024xbf16, #tpu.memory_space<vmem>>, vector<32x768xbf16>
    %c32_421 = arith.constant 32 : index
    %c0_422 = arith.constant 0 : index
    %292 = vector.load %arg7[%c32_421, %c0_422] : memref<288x768xbf16, #tpu.memory_space<vmem>>, vector<32x768xbf16>
    tpu.vector_store %arg7[%c32_421, %c0_422], %291 {strides = array<i32>} : memref<288x768xbf16, #tpu.memory_space<vmem>>, vector<32x768xbf16>,
    %c0_423 = arith.constant 0 : index
    %c111_424 = arith.constant 111 : index
    %293 = vector.load %arg6[%c0_423, %c111_424] : memref<32x1024xbf16, #tpu.memory_space<vmem>>, vector<32x768xbf16>
    %c64_425 = arith.constant 64 : index
    %c0_426 = arith.constant 0 : index
    %294 = vector.load %arg7[%c64_425, %c0_426] : memref<288x768xbf16, #tpu.memory_space<vmem>>, vector<32x768xbf16>
    tpu.vector_store %arg7[%c64_425, %c0_426], %293 {strides = array<i32>} : memref<288x768xbf16, #tpu.memory_space<vmem>>, vector<32x768xbf16>,
    %c0_427 = arith.constant 0 : index
    %c127_428 = arith.constant 127 : index
    %295 = vector.load %arg6[%c0_427, %c127_428] : memref<32x1024xbf16, #tpu.memory_space<vmem>>, vector<32x768xbf16>
    %c96_429 = arith.constant 96 : index
    %c0_430 = arith.constant 0 : index
    %296 = vector.load %arg7[%c96_429, %c0_430] : memref<288x768xbf16, #tpu.memory_space<vmem>>, vector<32x768xbf16>
    tpu.vector_store %arg7[%c96_429, %c0_430], %295 {strides = array<i32>} : memref<288x768xbf16, #tpu.memory_space<vmem>>, vector<32x768xbf16>,
    %c0_431 = arith.constant 0 : index
    %c128_432 = arith.constant 128 : index
    %297 = vector.load %arg6[%c0_431, %c128_432] : memref<32x1024xbf16, #tpu.memory_space<vmem>>, vector<32x768xbf16>
    %c128_433 = arith.constant 128 : index
    %c0_434 = arith.constant 0 : index
    %298 = vector.load %arg7[%c128_433, %c0_434] : memref<288x768xbf16, #tpu.memory_space<vmem>>, vector<32x768xbf16>
    tpu.vector_store %arg7[%c128_433, %c0_434], %297 {strides = array<i32>} : memref<288x768xbf16, #tpu.memory_space<vmem>>, vector<32x768xbf16>,
    %c0_435 = arith.constant 0 : index
    %c129_436 = arith.constant 129 : index
    %299 = vector.load %arg6[%c0_435, %c129_436] : memref<32x1024xbf16, #tpu.memory_space<vmem>>, vector<32x768xbf16>
    %c160_437 = arith.constant 160 : index
    %c0_438 = arith.constant 0 : index
    %300 = vector.load %arg7[%c160_437, %c0_438] : memref<288x768xbf16, #tpu.memory_space<vmem>>, vector<32x768xbf16>
    tpu.vector_store %arg7[%c160_437, %c0_438], %299 {strides = array<i32>} : memref<288x768xbf16, #tpu.memory_space<vmem>>, vector<32x768xbf16>,
    %c0_439 = arith.constant 0 : index
    %c145_440 = arith.constant 145 : index
    %301 = vector.load %arg6[%c0_439, %c145_440] : memref<32x1024xbf16, #tpu.memory_space<vmem>>, vector<32x768xbf16>
    %c192_441 = arith.constant 192 : index
    %c0_442 = arith.constant 0 : index
    %302 = vector.load %arg7[%c192_441, %c0_442] : memref<288x768xbf16, #tpu.memory_space<vmem>>, vector<32x768xbf16>
    tpu.vector_store %arg7[%c192_441, %c0_442], %301 {strides = array<i32>} : memref<288x768xbf16, #tpu.memory_space<vmem>>, vector<32x768xbf16>,
    %c0_443 = arith.constant 0 : index
    %c146_444 = arith.constant 146 : index
    %303 = vector.load %arg6[%c0_443, %c146_444] : memref<32x1024xbf16, #tpu.memory_space<vmem>>, vector<32x768xbf16>
    %c224_445 = arith.constant 224 : index
    %c0_446 = arith.constant 0 : index
    %304 = vector.load %arg7[%c224_445, %c0_446] : memref<288x768xbf16, #tpu.memory_space<vmem>>, vector<32x768xbf16>
    tpu.vector_store %arg7[%c224_445, %c0_446], %303 {strides = array<i32>} : memref<288x768xbf16, #tpu.memory_space<vmem>>, vector<32x768xbf16>,
    %c0_447 = arith.constant 0 : index
    %c147_448 = arith.constant 147 : index
    %305 = vector.load %arg6[%c0_447, %c147_448] : memref<32x1024xbf16, #tpu.memory_space<vmem>>, vector<32x768xbf16>
    %c256_449 = arith.constant 256 : index
    %c0_450 = arith.constant 0 : index
    %306 = vector.load %arg7[%c256_449, %c0_450] : memref<288x768xbf16, #tpu.memory_space<vmem>>, vector<32x768xbf16>
    tpu.vector_store %arg7[%c256_449, %c0_450], %305 {strides = array<i32>} : memref<288x768xbf16, #tpu.memory_space<vmem>>, vector<32x768xbf16>,
    %c9 = arith.constant 9 : index
    %c0_451 = arith.constant 0 : index
    %c0_452 = arith.constant 0 : index
    %307 = vector.load %arg2[%c9, %c0_451, %c0_452] : memref<10x32x288xbf16, #tpu.memory_space<vmem>>, vector<1x32x288xbf16>
    %308 = vector.shape_cast %307 : vector<1x32x288xbf16> to vector<32x288xbf16>
    %c0_453 = arith.constant 0 : index
    %c0_454 = arith.constant 0 : index
    %309 = vector.load %arg7[%c0_453, %c0_454] : memref<288x768xbf16, #tpu.memory_space<vmem>>, vector<288x768xbf16>
    %cst_455 = arith.constant dense<0.000000e+00> : vector<32x768xf32>
    %310 = tpu.matmul %308, %309, %cst_455 {dimension_numbers = #tpu.dot_dimension_numbers<[1], [0], [0], [1], [0, 0, 1, 1], [], []>} : vector<32x288xbf16>, vector<288x768xbf16>, vector<32x768xf32> -> vector<32x768xf32>
    %c9_456 = arith.constant 9 : index
    %c0_457 = arith.constant 0 : index
    %c0_458 = arith.constant 0 : index
    %311 = vector.load %arg3[%c9_456, %c0_457, %c0_458] : memref<10x32x1xf32, #tpu.memory_space<vmem>>, vector<1x32x1xf32>
    %312 = vector.shape_cast %311 : vector<1x32x1xf32> to vector<32x1xf32>
    %313 = vector.broadcast %312 : vector<32x1xf32> to vector<32x768xf32>
    %314 = arith.addf %310, %313 : vector<32x768xf32>
    %cst_459 = arith.constant 0.000000e+00 : f32
    %315 = vector.broadcast %cst_459 : f32 to vector<32x768xf32>
    %316 = arith.maximumf %314, %315 : vector<32x768xf32>
    %317 = arith.addf %316, %255 : vector<32x768xf32>
    %c0_460 = arith.constant 0 : index
    %c0_461 = arith.constant 0 : index
    %318 = vector.load %arg5[%c0_460, %c0_461] : memref<32x768xf32, #tpu.memory_space<vmem>>, vector<32x768xf32>
    tpu.vector_store %arg5[%c0_460, %c0_461], %317 {strides = array<i32>} : memref<32x768xf32, #tpu.memory_space<vmem>>, vector<32x768xf32>,
    return
  }
  func.func @transform_0(%arg0: i32) -> (i32, i32) {
    %c0_i32 = arith.constant 0 : i32
    %c0_i32_0 = arith.constant 0 : i32
    %c0_i32_1 = arith.constant 0 : i32
    return %c0_i32, %c0_i32_0 : i32, i32
  }
  func.func @transform_1(%arg0: i32) -> (i32, i32, i32) {
    %c0_i32 = arith.constant 0 : i32
    %c0_i32_0 = arith.constant 0 : i32
    %c0_i32_1 = arith.constant 0 : i32
    %c0_i32_2 = arith.constant 0 : i32
    return %c0_i32, %c0_i32_0, %c0_i32_1 : i32, i32, i32
  }
  func.func @transform_2(%arg0: i32) -> (i32, i32, i32) {
    %c0_i32 = arith.constant 0 : i32
    %c0_i32_0 = arith.constant 0 : i32
    %c0_i32_1 = arith.constant 0 : i32
    %c0_i32_2 = arith.constant 0 : i32
    return %c0_i32, %c0_i32_0, %c0_i32_1 : i32, i32, i32
  }
  func.func @transform_3(%arg0: i32) -> (i32, i32) {
    %c0_i32 = arith.constant 0 : i32
    %c0_i32_0 = arith.constant 0 : i32
    %c0_i32_1 = arith.constant 0 : i32
    return %c0_i32, %c0_i32_0 : i32, i32
  }
  func.func @transform_4(%arg0: i32) -> (i32, i32) {
    %c0_i32 = arith.constant 0 : i32
    %c0_i32_0 = arith.constant 0 : i32
    %c0_i32_1 = arith.constant 0 : i32
    return %c0_i32, %c0_i32_0 : i32, i32
  }
}

</mosaic_0001>

<bundles_post_ra>
// kernel: siam_inconv_pallas.1
= control target key start
LH: loop header
LB: loop body
LE: loop exit
PB: predicated region body
PF: predicated region fallthrough
CT: control target
= control target key end

     0   :  { %v22076_v1 = vmov 0   ;;  %s14553_s17 = smov 19   ;;  %s14554_s24 = smov 18   ;;  %vm206_vm0 = vcmask 154624   ;;  %vm299_vm1 = vcmask 146432   ;;  %vm392_vm2 = vcmask 138240   ;;  %s22071_s0 = inlined_call_operand.vmem [shape: bf16[32,768], index: 0, kind: input, shape index: {}]   ;;  %s22072_s1 = inlined_call_operand.vmem [shape: bf16[10,32,288], index: 1, kind: input, shape index: {}]   ;;  %s22073_s2 = inlined_call_operand.vmem [shape: f32[10,32,1], index: 2, kind: input, shape index: {}]   ;;  %s22074_s3 = inlined_call_operand.vmem [shape: f32[1,768], index: 3, kind: input, shape index: {}]   ;;  %s22075_s4 = inlined_call_operand.vmem [shape: f32[32,768], index: 4, kind: output, shape index: {}]  }
   0x1   :  { %v14589_v0 = vld [vmem:[%s22071_s0] ss:$24 sps:$4 sm:$0xff]   ;;  %14263 = vset.pattern.permute.xlu1 %v22076_v1  ;;  %14262 = vset.pattern.permute.xlu0 %v22076_v1  ;;  %v14600_v2 = vld [vmem:[%s22071_s0 + $0x30] ss:$24 sps:$4 sm:$0xff]   ;;  %v14605_v3 = vld [vmem:[%s22071_s0 + $0x4] ss:$24 sps:$4 sm:$0xff]  }
   0x2   :  { %14243 = vrot.lane.b32.xlu1 %v22076_v1, %s14553_s17  ;;  %180 = vrot.lane.b32.xlu0 %v14589_v0, %s14553_s17  ;;  %v14614_v4 = vld [vmem:[%s22071_s0 + $0x34] ss:$24 sps:$4 sm:$0xff]   ;;  %s14555_s25 = smov 17   ;;  %s14556_s26 = smov 1   ;;  %v14651_v5 = vld [vmem:[%s22071_s0 + $0x8] ss:$24 sps:$4 sm:$0xff]  }
   0x3   :  { %s14557_s29 = smov 127   ;;  %v14660_v6 = vld [vmem:[%s22071_s0 + $0xc] ss:$24 sps:$4 sm:$0xff]   ;;  %v14673_v7 = vld [vmem:[%s22071_s0 + $0x38] ss:$24 sps:$4 sm:$0xff]   ;;  %s14558_s10 = smov 111  }
   0x4   :  { %v14682_v8 = vld [vmem:[%s22071_s0 + $0x3c] ss:$24 sps:$4 sm:$0xff]   ;;  %s14559_s11 = smov 110   ;;  %v14723_v9 = vld [vmem:[%s22072_s1 + $0x4] ss:$12 sps:$4 sm:$0xff]   ;;  %s14560_s14 = smov 109  }
   0x5   :  { %1127 = vmatprep.mubr.bf16.mxu0 %v14723_v9  ;;  %1233 = vmatprep.mubr.bf16.mxu1 %v14723_v9  ;;  %v14754_v12 = vld [vmem:[%s22071_s0 + $0x14] ss:$24 sps:$4 sm:$0xff]   ;;  %v14759_v13 = vld [vmem:[%s22071_s0 + $0x10] ss:$24 sps:$4 sm:$0xff]   ;;  %v14785_v23 = vld [vmem:[%s22071_s0 + $0x44] ss:$24 sps:$4 sm:$0xff]  }
   0x6   :  { %194 = vrot.lane.b32.xlu1 %v14600_v2, %s14553_s17  ;;  %182 = vrot.lane.b32.xlu0 %v14605_v3, %s14553_s17  ;;  %v14790_v24 = vld [vmem:[%s22071_s0 + $0x40] ss:$24 sps:$4 sm:$0xff]   ;;  %vm485_vm3 = vcmask 7168   ;;  %vm602_vm4 = vcmask 1039360   ;;  %vm695_vm5 = vcmask 908288   ;;  %vm788_vm6 = vcmask 900096  }
   0x7   :  { %vm881_vm7 = vcmask 891904   ;;  %vm1088_vm8 = vcmask 261120  }
   0xa   :  { %273 = vrot.lane.b32.xlu1 %v14589_v0, %s14554_s24  ;;  %196 = vrot.lane.b32.xlu0 %v14614_v4, %s14553_s17 }
   0xe   :  { %14248 = vrot.lane.b32.xlu1 %v22076_v1, %s14554_s24  ;;  %275 = vrot.lane.b32.xlu0 %v14605_v3, %s14554_s24 }
  0x12   :  { %289 = vrot.lane.b32.xlu1 %v14614_v4, %s14554_s24  ;;  %287 = vrot.lane.b32.xlu0 %v14600_v2, %s14554_s24 }
  0x16   :  { %368 = vrot.lane.b32.xlu1 %v14605_v3, %s14555_s25  ;;  %366 = vrot.lane.b32.xlu0 %v14589_v0, %s14555_s25 }
  0x1a   :  { %380 = vrot.lane.b32.xlu1 %v14600_v2, %s14555_s25  ;;  %14253 = vrot.lane.b32.xlu0 %v22076_v1, %s14555_s25 }
  0x1e   :  { %459 = vrot.lane.b32.xlu1 %v14589_v0, %s14556_s26  ;;  %382 = vrot.lane.b32.xlu0 %v14614_v4, %s14555_s25 }
  0x22   :  { %14258 = vrot.lane.b32.xlu1 %v22076_v1, %s14556_s26  ;;  %461 = vrot.lane.b32.xlu0 %v14605_v3, %s14556_s26 }
  0x26   :  { %475 = vrot.lane.b32.xlu1 %v14614_v4, %s14556_s26  ;;  %473 = vrot.lane.b32.xlu0 %v14600_v2, %s14556_s26 }
  0x2a   :  { %578 = vrot.lane.b32.xlu1 %v14651_v5, %s14557_s29  ;;  %576 = vrot.lane.b32.xlu0 %v14605_v3, %s14557_s29 }
  0x2e   :  { %186 = vrot.lane.b32.xlu1 %v14660_v6, %s14553_s17  ;;  %184 = vrot.lane.b32.xlu0 %v14651_v5, %s14553_s17 }
  0x32   :  { %590 = vrot.lane.b32.xlu1 %v14614_v4, %s14557_s29  ;;  %574 = vrot.lane.b32.xlu0 %v14589_v0, %s14557_s29 }
  0x36   :  { %198 = vrot.lane.b32.xlu1 %v14673_v7, %s14553_s17  ;;  %592 = vrot.lane.b32.xlu0 %v14673_v7, %s14557_s29 }
  0x3a   :  { %588 = vrot.lane.b32.xlu1 %v14600_v2, %s14557_s29  ;;  %200 = vrot.lane.b32.xlu0 %v14682_v8, %s14553_s17 }
  0x3e   :  { %671 = vrot.lane.b32.xlu1 %v14651_v5, %s14558_s10  ;;  %669 = vrot.lane.b32.xlu0 %v14605_v3, %s14558_s10 }
  0x42   :  { %279 = vrot.lane.b32.xlu1 %v14660_v6, %s14554_s24  ;;  %277 = vrot.lane.b32.xlu0 %v14651_v5, %s14554_s24 }
  0x46   :  { %683 = vrot.lane.b32.xlu1 %v14614_v4, %s14558_s10  ;;  %667 = vrot.lane.b32.xlu0 %v14589_v0, %s14558_s10 }
  0x4a   :  { %291 = vrot.lane.b32.xlu1 %v14673_v7, %s14554_s24  ;;  %685 = vrot.lane.b32.xlu0 %v14673_v7, %s14558_s10 }
  0x4e   :  { %681 = vrot.lane.b32.xlu1 %v14600_v2, %s14558_s10  ;;  %293 = vrot.lane.b32.xlu0 %v14682_v8, %s14554_s24 }
  0x52   :  { %764 = vrot.lane.b32.xlu1 %v14651_v5, %s14559_s11  ;;  %762 = vrot.lane.b32.xlu0 %v14605_v3, %s14559_s11 }
  0x56   :  { %372 = vrot.lane.b32.xlu1 %v14660_v6, %s14555_s25  ;;  %370 = vrot.lane.b32.xlu0 %v14651_v5, %s14555_s25 }
  0x5a   :  { %776 = vrot.lane.b32.xlu1 %v14614_v4, %s14559_s11  ;;  %760 = vrot.lane.b32.xlu0 %v14589_v0, %s14559_s11 }
  0x5e   :  { %384 = vrot.lane.b32.xlu1 %v14673_v7, %s14555_s25  ;;  %778 = vrot.lane.b32.xlu0 %v14673_v7, %s14559_s11 }
  0x62   :  { %774 = vrot.lane.b32.xlu1 %v14600_v2, %s14559_s11  ;;  %386 = vrot.lane.b32.xlu0 %v14682_v8, %s14555_s25 }
  0x66   :  { %465 = vrot.lane.b32.xlu1 %v14660_v6, %s14556_s26  ;;  %463 = vrot.lane.b32.xlu0 %v14651_v5, %s14556_s26 }
  0x6a   :  { %479 = vrot.lane.b32.xlu1 %v14682_v8, %s14556_s26  ;;  %477 = vrot.lane.b32.xlu0 %v14673_v7, %s14556_s26 }
  0x6e   :  { %857 = vrot.lane.b32.xlu1 %v14651_v5, %s14560_s14  ;;  %855 = vrot.lane.b32.xlu0 %v14605_v3, %s14560_s14 }
  0x72   :  { %869 = vrot.lane.b32.xlu1 %v14614_v4, %s14560_s14  ;;  %853 = vrot.lane.b32.xlu0 %v14589_v0, %s14560_s14 }
  0x74   :  { %v14244_v10 = vpop.permute.xlu1 %14243  ;;  %v181_v11 = vpop.permute.xlu0 %180 }
  0x75   :  { %v14245_v14 = vunpack.i.l.bf16 %v14244_v10  ;;  %v14246_v21 = vunpack.i.h.bf16 %v14244_v10 }
  0x76   :  { %867 = vrot.lane.b32.xlu1 %v14600_v2, %s14560_s14  ;;  %871 = vrot.lane.b32.xlu0 %v14673_v7, %s14560_s14 }
  0x77   :  { %v207_v18 = vsel %vm206_vm0, %v14245_v14, %v181_v11 }
  0x78   :  { %v195_v15 = vpop.permute.xlu1 %194  ;;  %v14765_v16 = vpop.permute.xlu0 %182 }
  0x79   :  { %v208_v17 = vsel %vm206_vm0, %v181_v11, %v14765_v16  ;;  %v213_v25 = vsel %vm206_vm0, %v14246_v21, %v195_v15 }
  0x7a   :  { %190 = vrot.lane.b32.xlu1 %v14754_v12, %s14553_s17  ;;  %188 = vrot.lane.b32.xlu0 %v14759_v13, %s14553_s17 }
  0x7b   :  { %1095 = vmatprep.subr.bf16.mxu0 %v208_v17 }
  0x7c   :  { %v274_v19 = vpop.permute.xlu1 %273  ;;  %1096 = vmatpush1.bf16.msra.mxu0 %v207_v18  ;;  %v14774_v20 = vpop.permute.xlu0 %196 }
  0x7d   :  { %v214_v22 = vsel %vm206_vm0, %v195_v15, %v14774_v20 }
  0x7e   :  { %582 = vrot.lane.b32.xlu1 %v14759_v13, %s14557_s29  ;;  %580 = vrot.lane.b32.xlu0 %v14660_v6, %s14557_s29 }
  0x7f   :  { %1097 = vmatprep.subr.bf16.mxu0 %v214_v22 }
  0x80   :  { %v14249_v26 = vpop.permute.xlu1 %14248  ;;  %1098 = vmatpush1.bf16.msra.mxu0 %v213_v25  ;;  %v14793_v27 = vpop.permute.xlu0 %275 }
  0x81   :  { %v14250_v28 = vunpack.i.l.bf16 %v14249_v26  ;;  %v301_v29 = vsel %vm299_vm1, %v274_v19, %v14793_v27  ;;  %v14251_v33 = vunpack.i.h.bf16 %v14249_v26 }
  0x82   :  { %204 = vrot.lane.b32.xlu1 %v14785_v23, %s14553_s17  ;;  %202 = vrot.lane.b32.xlu0 %v14790_v24, %s14553_s17 }
  0x83   :  { %1099 = vmatprep.subr.bf16.mxu0 %v301_v29  ;;  %v300_v30 = vsel %vm299_vm1, %v14250_v28, %v274_v19 }
  0x84   :  { %v14802_v31 = vpop.permute.xlu1 %289  ;;  %1100 = vmatpush1.bf16.msra.mxu0 %v300_v30  ;;  %v288_v32 = vpop.permute.xlu0 %287 }
  0x85   :  { %v307_v34 = vsel %vm299_vm1, %v288_v32, %v14802_v31  ;;  %v306_v35 = vsel %vm299_vm1, %v14251_v33, %v288_v32 }
  0x86   :  { %596 = vrot.lane.b32.xlu1 %v14790_v24, %s14557_s29  ;;  %594 = vrot.lane.b32.xlu0 %v14682_v8, %s14557_s29 }
  0x87   :  { %1101 = vmatprep.subr.bf16.mxu0 %v307_v34 }
  0x88   :  { %v14811_v36 = vpop.permute.xlu1 %368  ;;  %1102 = vmatpush1.bf16.msra.mxu0 %v306_v35  ;;  %v367_v37 = vpop.permute.xlu0 %366 }
  0x89   :  { %v394_v38 = vsel %vm392_vm2, %v367_v37, %v14811_v36 }
  0x8a   :  { %283 = vrot.lane.b32.xlu1 %v14754_v12, %s14554_s24  ;;  %281 = vrot.lane.b32.xlu0 %v14759_v13, %s14554_s24 }
  0x8b   :  { %1103 = vmatprep.subr.bf16.mxu0 %v394_v38 }
  0x8c   :  { %v381_v39 = vpop.permute.xlu1 %380  ;;  %v14254_v40 = vpop.permute.xlu0 %14253 }
  0x8d   :  { %v14255_v41 = vunpack.i.l.bf16 %v14254_v40  ;;  %v14256_v42 = vunpack.i.h.bf16 %v14254_v40 }
  0x8e   :  { %675 = vrot.lane.b32.xlu1 %v14759_v13, %s14558_s10  ;;  %673 = vrot.lane.b32.xlu0 %v14660_v6, %s14558_s10 }
  0x8f   :  { %v393_v43 = vsel %vm392_vm2, %v14255_v41, %v367_v37  ;;  %v399_v47 = vsel %vm392_vm2, %v14256_v42, %v381_v39 }
  0x90   :  { %v460_v44 = vpop.permute.xlu1 %459  ;;  %v14824_v45 = vpop.permute.xlu0 %382  ;;  %1104 = vmatpush1.bf16.msra.mxu0 %v393_v43 }
  0x91   :  { %v400_v46 = vsel %vm392_vm2, %v381_v39, %v14824_v45 }
  0x92   :  { %297 = vrot.lane.b32.xlu1 %v14785_v23, %s14554_s24  ;;  %295 = vrot.lane.b32.xlu0 %v14790_v24, %s14554_s24 }
  0x93   :  { %1105 = vmatprep.subr.bf16.mxu0 %v400_v46 }
  0x94   :  { %v14259_v48 = vpop.permute.xlu1 %14258  ;;  %v14833_v49 = vpop.permute.xlu0 %461  ;;  %1106 = vmatpush1.bf16.msra.mxu0 %v399_v47 }
  0x95   :  { %v14260_v50 = vunpack.i.l.bf16 %v14259_v48  ;;  %v487_v51 = vsel %vm485_vm3, %v460_v44, %v14833_v49  ;;  %v14261_v55 = vunpack.i.h.bf16 %v14259_v48 }
  0x96   :  { %689 = vrot.lane.b32.xlu1 %v14790_v24, %s14558_s10  ;;  %687 = vrot.lane.b32.xlu0 %v14682_v8, %s14558_s10 }
  0x97   :  { %1107 = vmatprep.subr.bf16.mxu0 %v487_v51  ;;  %v486_v52 = vsel %vm485_vm3, %v14260_v50, %v460_v44 }
  0x98   :  { %v14842_v53 = vpop.permute.xlu1 %475  ;;  %v474_v54 = vpop.permute.xlu0 %473  ;;  %1108 = vmatpush1.bf16.msra.mxu0 %v486_v52 }
  0x99   :  { %v493_v56 = vsel %vm485_vm3, %v474_v54, %v14842_v53  ;;  %v492_v57 = vsel %vm485_vm3, %v14261_v55, %v474_v54 }
  0x9a   :  { %376 = vrot.lane.b32.xlu1 %v14754_v12, %s14555_s25  ;;  %374 = vrot.lane.b32.xlu0 %v14759_v13, %s14555_s25 }
  0x9b   :  { %1109 = vmatprep.subr.bf16.mxu0 %v493_v56 }
  0x9c   :  { %v14851_v58 = vpop.permute.xlu1 %578  ;;  %v577_v59 = vpop.permute.xlu0 %576  ;;  %1110 = vmatpush1.bf16.msra.mxu0 %v492_v57 }
  0x9d   :  { %1111 = vmatprep.subr.bf16.mxu0 %v14605_v3 }
  0x9e   :  { %768 = vrot.lane.b32.xlu1 %v14759_v13, %s14559_s11  ;;  %766 = vrot.lane.b32.xlu0 %v14660_v6, %s14559_s11 }
  0xa0   :  { %v14858_v60 = vpop.permute.xlu1 %186  ;;  %v185_v61 = vpop.permute.xlu0 %184  ;;  %1112 = vmatpush1.bf16.msra.mxu0 %v14589_v0  ;;  %v604_v0 = vsel %vm602_vm4, %v577_v59, %v14851_v58 }
  0xa1   :  { %v210_v62 = vsel %vm206_vm0, %v185_v61, %v14858_v60  ;;  %1113 = vmatprep.subr.bf16.mxu0 %v14614_v4  ;;  %v209_v63 = vsel %vm206_vm0, %v14765_v16, %v185_v61 }
  0xa2   :  { %390 = vrot.lane.b32.xlu1 %v14785_v23, %s14555_s25  ;;  %388 = vrot.lane.b32.xlu0 %v14790_v24, %s14555_s25 }
  0xa3   :  { %1201 = vmatprep.subr.bf16.mxu1 %v210_v62  ;;  %v14978_v62 = vld [vmem:[%s22072_s1] ss:$12 sps:$4 sm:$0xff]  }
  0xa4   :  { %v591_v3 = vpop.permute.xlu1 %590  ;;  %1202 = vmatpush1.bf16.msra.mxu1 %v209_v63  ;;  %v575_v10 = vpop.permute.xlu0 %574  ;;  %1114 = vmatpush1.bf16.msra.mxu0 %v14600_v2  ;;  %v14985_v63 = vld [vmem:[%s22072_s1 + $0x1c] ss:$12 sps:$4 sm:$0xff]  }
  0xa5   :  { %1115 = vmatprep.subr.bf16.mxu0 %v604_v0  ;;  %v603_v4 = vsel %vm602_vm4, %v575_v10, %v577_v59 }
  0xa6   :  { %782 = vrot.lane.b32.xlu1 %v14790_v24, %s14559_s11  ;;  %780 = vrot.lane.b32.xlu0 %v14682_v8, %s14559_s11 }
  0xa8   :  { %v199_v11 = vpop.permute.xlu1 %198  ;;  %v14878_v14 = vpop.permute.xlu0 %592  ;;  %1116 = vmatpush1.bf16.msra.mxu0 %v603_v4 }
  0xa9   :  { %v610_v15 = vsel %vm602_vm4, %v591_v3, %v14878_v14  ;;  %v215_v19 = vsel %vm206_vm0, %v14774_v20, %v199_v11 }
  0xaa   :  { %469 = vrot.lane.b32.xlu1 %v14754_v12, %s14556_s26  ;;  %467 = vrot.lane.b32.xlu0 %v14759_v13, %s14556_s26 }
  0xab   :  { %1117 = vmatprep.subr.bf16.mxu0 %v610_v15 }
  0xac   :  { %v589_v2 = vpop.permute.xlu1 %588  ;;  %v14886_v16 = vpop.permute.xlu0 %200 }
  0xad   :  { %v609_v17 = vsel %vm602_vm4, %v589_v2, %v591_v3  ;;  %v216_v18 = vsel %vm206_vm0, %v199_v11, %v14886_v16 }
  0xae   :  { %1118 = vmatpush1.bf16.msra.mxu0 %v609_v17  ;;  %483 = vrot.lane.b32.xlu1 %v14785_v23, %s14556_s26 }
  0xaf   :  { %481 = vrot.lane.b32.xlu0 %v14790_v24, %s14556_s26  ;;  %1203 = vmatprep.subr.bf16.mxu1 %v216_v18  ;;  %v15008_v18 = vld [vmem:[%s22072_s1 + $0x18] ss:$12 sps:$4 sm:$0xff]  }
  0xb0   :  { %v14897_v21 = vpop.permute.xlu1 %671  ;;  %1204 = vmatpush1.bf16.msra.mxu1 %v215_v19  ;;  %v670_v22 = vpop.permute.xlu0 %669 }
  0xb1   :  { %v697_v25 = vsel %vm695_vm5, %v670_v22, %v14897_v21 }
  0xb2   :  { %861 = vrot.lane.b32.xlu1 %v14759_v13, %s14560_s14  ;;  %1119 = vmatprep.subr.bf16.mxu0 %v697_v25  ;;  %v1034_v25 = vld [vmem:[%s22073_s2] sm:$0xff] }
  0xb3   :  { %859 = vrot.lane.b32.xlu0 %v14660_v6, %s14560_s14 }
  0xb4   :  { %v14905_v26 = vpop.permute.xlu1 %279  ;;  %v278_v28 = vpop.permute.xlu0 %277 }
  0xb5   :  { %v303_v20 = vsel %vm299_vm1, %v278_v28, %v14905_v26  ;;  %v302_v29 = vsel %vm299_vm1, %v14793_v27, %v278_v28 }
  0xb6   :  { %875 = vrot.lane.b32.xlu1 %v14790_v24, %s14560_s14  ;;  %1205 = vmatprep.subr.bf16.mxu1 %v303_v20 }
  0xb7   :  { %873 = vrot.lane.b32.xlu0 %v14682_v8, %s14560_s14  ;;  %1206 = vmatpush1.bf16.msra.mxu1 %v302_v29  ;;  %v1036_v29 = vld [vmem:[%s22073_s2 + $0x10] sm:$0xff] }
  0xb8   :  { %v684_v30 = vpop.permute.xlu1 %683  ;;  %v668_v32 = vpop.permute.xlu0 %667 }
  0xb9   :  { %v696_v33 = vsel %vm695_vm5, %v668_v32, %v670_v22  ;;  %v1035_v22 = vld [vmem:[%s22073_s2 + $0x8] sm:$0xff] }
  0xba   :  { %586 = vrot.lane.b32.xlu1 %v22076_v1, %s14557_s29  ;;  %1120 = vmatpush1.bf16.msra.mxu0 %v696_v33 }
  0xbb   :  { %584 = vrot.lane.b32.xlu0 %v14754_v12, %s14557_s29 }
  0xbc   :  { %v292_v27 = vpop.permute.xlu1 %291  ;;  %v14920_v34 = vpop.permute.xlu0 %685 }
  0xbd   :  { %v703_v35 = vsel %vm695_vm5, %v684_v30, %v14920_v34  ;;  %v308_v41 = vsel %vm299_vm1, %v14802_v31, %v292_v27 }
  0xbe   :  { %600 = vrot.lane.b32.xlu1 %v22076_v1, %s14557_s29  ;;  %1121 = vmatprep.subr.bf16.mxu0 %v703_v35  ;;  %v15041_v35 = vld [vmem:[%s22072_s1 + $0x8] ss:$12 sps:$4 sm:$0xff]  }
  0xbf   :  { %598 = vrot.lane.b32.xlu0 %v14785_v23, %s14557_s29 }
  0xc0   :  { %v682_v37 = vpop.permute.xlu1 %681  ;;  %v14928_v38 = vpop.permute.xlu0 %293 }
  0xc1   :  { %v702_v39 = vsel %vm695_vm5, %v682_v37, %v684_v30  ;;  %v309_v40 = vsel %vm299_vm1, %v292_v27, %v14928_v38  ;;  %v1037_v30 = vld [vmem:[%s22073_s2 + $0x18] sm:$0xff] }
  0xc2   :  { %1122 = vmatpush1.bf16.msra.mxu0 %v702_v39  ;;  %679 = vrot.lane.b32.xlu1 %v22076_v1, %s14558_s10 }
  0xc3   :  { %677 = vrot.lane.b32.xlu0 %v14754_v12, %s14558_s10  ;;  %1207 = vmatprep.subr.bf16.mxu1 %v309_v40 }
  0xc4   :  { %v14939_v42 = vpop.permute.xlu1 %764  ;;  %1208 = vmatpush1.bf16.msra.mxu1 %v308_v41  ;;  %v763_v43 = vpop.permute.xlu0 %762 }
  0xc5   :  { %v790_v44 = vsel %vm788_vm6, %v763_v43, %v14939_v42 }
  0xc6   :  { %693 = vrot.lane.b32.xlu1 %v22076_v1, %s14558_s10  ;;  %1123 = vmatprep.subr.bf16.mxu0 %v790_v44 }
  0xc7   :  { %691 = vrot.lane.b32.xlu0 %v14785_v23, %s14558_s10 }
  0xc8   :  { %v14947_v46 = vpop.permute.xlu1 %372  ;;  %v371_v47 = vpop.permute.xlu0 %370 }
  0xc9   :  { %v396_v31 = vsel %vm392_vm2, %v371_v47, %v14947_v46  ;;  %v395_v48 = vsel %vm392_vm2, %v14811_v36, %v371_v47 }
  0xca   :  { %772 = vrot.lane.b32.xlu1 %v22076_v1, %s14559_s11  ;;  %1209 = vmatprep.subr.bf16.mxu1 %v396_v31 }
  0xcb   :  { %770 = vrot.lane.b32.xlu0 %v14754_v12, %s14559_s11  ;;  %1210 = vmatpush1.bf16.msra.mxu1 %v395_v48 }
  0xcc   :  { %v777_v50 = vpop.permute.xlu1 %776  ;;  %v761_v51 = vpop.permute.xlu0 %760 }
  0xcd   :  { %v789_v52 = vsel %vm788_vm6, %v761_v51, %v763_v43 }
  0xce   :  { %786 = vrot.lane.b32.xlu1 %v22076_v1, %s14559_s11  ;;  %1124 = vmatpush1.bf16.msra.mxu0 %v789_v52 }
  0xcf   :  { %784 = vrot.lane.b32.xlu0 %v14785_v23, %s14559_s11 }
  0xd0   :  { %v385_v36 = vpop.permute.xlu1 %384  ;;  %v14962_v54 = vpop.permute.xlu0 %778 }
  0xd1   :  { %v796_v55 = vsel %vm788_vm6, %v777_v50, %v14962_v54  ;;  %v401_v3 = vsel %vm392_vm2, %v14824_v45, %v385_v36 }
  0xd2   :  { %865 = vrot.lane.b32.xlu1 %v22076_v1, %s14560_s14  ;;  %1125 = vmatprep.subr.bf16.mxu0 %v796_v55 }
  0xd3   :  { %863 = vrot.lane.b32.xlu0 %v14754_v12, %s14560_s14 }
  0xd4   :  { %v775_v56 = vpop.permute.xlu1 %774  ;;  %v14970_v57 = vpop.permute.xlu0 %386 }
  0xd5   :  { %v795_v59 = vsel %vm788_vm6, %v775_v56, %v777_v50  ;;  %v402_v61 = vsel %vm392_vm2, %v385_v36, %v14970_v57 }
  0xd6   :  { %1126 = vmatpush1.bf16.msra.mxu0 %v795_v59  ;;  %879 = vrot.lane.b32.xlu1 %v22076_v1, %s14560_s14 }
  0xd7   :  { %877 = vrot.lane.b32.xlu0 %v14785_v23, %s14560_s14  ;;  %1211 = vmatprep.subr.bf16.mxu1 %v402_v61 }
  0xd8   :  { %v14991_v10 = vpop.permute.xlu1 %465  ;;  %1212 = vmatpush1.bf16.msra.mxu1 %v401_v3  ;;  %v464_v0 = vpop.permute.xlu0 %463 }
  0xd9   :  { %v489_v4 = vsel %vm485_vm3, %v464_v0, %v14991_v10  ;;  %v488_v11 = vsel %vm485_vm3, %v14833_v49, %v464_v0  ;;  %1128 = vmatmul.mubr.bf16.vlgmr.msra.gmra.mrb[0].mxu0 %v14978_v62 }
  0xda   :  { %1213 = vmatprep.subr.bf16.mxu1 %v489_v4  ;;  %1137 = vmatprep.mubr.bf16.mxu0 %v14985_v63 }
  0xdb   :  { %1045 = vperm.xlu1 %14263, %v1035_v22   ;;  %1040 = vperm.xlu0 %14262, %v1034_v25  }
  0xdc   :  { %v14999_v15 = vpop.permute.xlu1 %479  ;;  %1214 = vmatpush1.bf16.msra.mxu1 %v488_v11  ;;  %v478_v2 = vpop.permute.xlu0 %477 }
  0xdd   :  { %v495_v45 = vsel %vm485_vm3, %v478_v2, %v14999_v15  ;;  %v494_v17 = vsel %vm485_vm3, %v14842_v53, %v478_v2 }
  0xde   :  { %1215 = vmatprep.subr.bf16.mxu1 %v495_v45 }
  0xdf   :  { %1050 = vperm.xlu1 %14263, %v1036_v29   ;;  %1055 = vperm.xlu0 %14262, %v1037_v30  }
  0xe0   :  { %v15010_v49 = vpop.permute.xlu1 %857  ;;  %1216 = vmatpush1.bf16.msra.mxu1 %v494_v17  ;;  %v856_v19 = vpop.permute.xlu0 %855 }
  0xe1   :  { %v883_v53 = vsel %vm881_vm7, %v856_v19, %v15010_v49  ;;  %1138 = vmatmul.mubr.bf16.gmra.mrb[4].mxu0 %v15008_v18  ;;  %1217 = vmatprep.subr.bf16.mxu1 %v14660_v6 }
  0xe2   :  { %1148 = vmatprep.subr.bf16.mxu0 %v883_v53  ;;  %1180 = vmatprep.mubr.bf16.mxu0 %v22076_v1 }
  0xe3   :  { %14265 = vrot.lane.b32.xlu1 %v22076_v1, %s14553_s17  ;;  %14270 = vrot.lane.b32.xlu0 %v22076_v1, %s14554_s24 }
  0xe4   :  { %v870_v28 = vpop.permute.xlu1 %869  ;;  %v854_v20 = vpop.permute.xlu0 %853  ;;  %1218 = vmatpush1.bf16.msra.mxu1 %v14651_v5 }
  0xe5   :  { %v882_v32 = vsel %vm881_vm7, %v854_v20, %v856_v19  ;;  %1219 = vmatprep.subr.bf16.mxu1 %v14682_v8 }
  0xe6   :  { %1149 = vmatpush1.bf16.msra.mxu0 %v882_v32 }
  0xe7   :  { %14275 = vrot.lane.b32.xlu1 %v22076_v1, %s14555_s25  ;;  %14280 = vrot.lane.b32.xlu0 %v22076_v1, %s14556_s26 }
  0xe8   :  { %v868_v6 = vpop.permute.xlu1 %867  ;;  %v15032_v33 = vpop.permute.xlu0 %871  ;;  %1220 = vmatpush1.bf16.msra.mxu1 %v14673_v7 }
  0xe9   :  { %v888_v5 = vsel %vm881_vm7, %v868_v6, %v870_v28  ;;  %v889_v27 = vsel %vm881_vm7, %v870_v28, %v15032_v33 }
  0xea   :  { %1150 = vmatprep.subr.bf16.mxu0 %v889_v27 }
  0xeb   :  { %1151 = vmatpush1.bf16.msra.mxu0 %v888_v5 }
  0xec   :  { %v191_v8 = vpop.permute.xlu1 %190  ;;  %v189_v37 = vpop.permute.xlu0 %188 }
  0xed   :  { %v212_v39 = vsel %vm206_vm0, %v189_v37, %v191_v8  ;;  %v211_v7 = vsel %vm206_vm0, %v14858_v60, %v189_v37  ;;  %v15058_v60 = vld [vmem:[%s22072_s1 + $0x20] ss:$12 sps:$4 sm:$0xff]  }
  0xee   :  { %1307 = vmatprep.subr.bf16.mxu0 %v212_v39  ;;  %13531 = vmatmul.mubr.msk.bf16.vlgmr.msra.gmra.mrb[0].mxu0 %vm1088_vm8, %v15041_v35 }
  0xef   :  { %1308 = vmatpush1.bf16.msra.mxu0 %v211_v7  ;;  %1190 = vmatprep.mubr.bf16.mxu0 %v22076_v1 }
  0xf0   :  { %v15049_v40 = vpop.permute.xlu1 %582  ;;  %v581_v41 = vpop.permute.xlu0 %580 }
  0xf1   :  { %v606_v43 = vsel %vm602_vm4, %v581_v41, %v15049_v40  ;;  %v605_v44 = vsel %vm602_vm4, %v14851_v58, %v581_v41 }
  0xf2   :  { %1221 = vmatprep.subr.bf16.mxu1 %v606_v43 }
  0xf3   :  { %1222 = vmatpush1.bf16.msra.mxu1 %v605_v44 }
  0xf4   :  { %v205_v47 = vpop.permute.xlu1 %204  ;;  %v203_v31 = vpop.permute.xlu0 %202 }
  0xf5   :  { %v218_v48 = vsel %vm206_vm0, %v203_v31, %v205_v47  ;;  %v217_v50 = vsel %vm206_vm0, %v14886_v16, %v203_v31 }
  0xf6   :  { %1309 = vmatprep.subr.bf16.mxu0 %v218_v48  ;;  %13532 = vmatmul.mubr.msk.bf16.gmra.mrb[4].mxu0 %vm1088_vm8, %v15058_v60 }
  0xf7   :  { %1310 = vmatpush1.bf16.msra.mxu0 %v217_v50  ;;  %1339 = vmatprep.mubr.bf16.mxu0 %v14723_v9 }
  0xf8   :  { %v15066_v58 = vpop.permute.xlu1 %596  ;;  %v595_v51 = vpop.permute.xlu0 %594 }
  0xf9   :  { %v612_v52 = vsel %vm602_vm4, %v595_v51, %v15066_v58  ;;  %v611_v36 = vsel %vm602_vm4, %v14878_v14, %v595_v51 }
  0xfa   :  { %1223 = vmatprep.subr.bf16.mxu1 %v612_v52 }
  0xfb   :  { %1224 = vmatpush1.bf16.msra.mxu1 %v611_v36 }
  0xfc   :  { %v284_v55 = vpop.permute.xlu1 %283  ;;  %v282_v16 = vpop.permute.xlu0 %281 }
  0xfd   :  { %v305_v56 = vsel %vm299_vm1, %v282_v16, %v284_v55  ;;  %v304_v59 = vsel %vm299_vm1, %v14905_v26, %v282_v16 }
  0xfe   :  { %1311 = vmatprep.subr.bf16.mxu0 %v305_v56 }
  0xff   :  { %1312 = vmatpush1.bf16.msra.mxu0 %v304_v59 }
 0x100   :  { %v15075_v9 = vpop.permute.xlu1 %675  ;;  %v674_v61 = vpop.permute.xlu0 %673 }
 0x101   :  { %v699_v3 = vsel %vm695_vm5, %v674_v61, %v15075_v9  ;;  %v698_v14 = vsel %vm695_vm5, %v14897_v21, %v674_v61 }
 0x102   :  { %1225 = vmatprep.subr.bf16.mxu1 %v699_v3 }
 0x103   :  { %1226 = vmatpush1.bf16.msra.mxu1 %v698_v14 }
 0x104   :  { %v298_v0 = vpop.permute.xlu1 %297  ;;  %v296_v4 = vpop.permute.xlu0 %295 }
 0x105   :  { %v311_v11 = vsel %vm299_vm1, %v296_v4, %v298_v0  ;;  %v310_v26 = vsel %vm299_vm1, %v14928_v38, %v296_v4 }
 0x106   :  { %1313 = vmatprep.subr.bf16.mxu0 %v311_v11 }
 0x107   :  { %1314 = vmatpush1.bf16.msra.mxu0 %v310_v26 }
 0x108   :  { %v15084_v2 = vpop.permute.xlu1 %689  ;;  %v688_v45 = vpop.permute.xlu0 %687 }
 0x109   :  { %v705_v17 = vsel %vm695_vm5, %v688_v45, %v15084_v2  ;;  %v704_v21 = vsel %vm695_vm5, %v14920_v34, %v688_v45 }
 0x10a   :  { %1227 = vmatprep.subr.bf16.mxu1 %v705_v17 }
 0x10b   :  { %1228 = vmatpush1.bf16.msra.mxu1 %v704_v21 }
 0x10c   :  { %v377_v19 = vpop.permute.xlu1 %376  ;;  %v375_v22 = vpop.permute.xlu0 %374 }
 0x10d   :  { %v398_v25 = vsel %vm392_vm2, %v375_v22, %v377_v19  ;;  %v397_v38 = vsel %vm392_vm2, %v14947_v46, %v375_v22 }
 0x10e   :  { %1315 = vmatprep.subr.bf16.mxu0 %v398_v25 }
 0x10f   :  { %1316 = vmatpush1.bf16.msra.mxu0 %v397_v38 }
 0x110   :  { %v15093_v53 = vpop.permute.xlu1 %768  ;;  %v767_v28 = vpop.permute.xlu0 %766 }
 0x111   :  { %v792_v20 = vsel %vm788_vm6, %v767_v28, %v15093_v53  ;;  %v791_v34 = vsel %vm788_vm6, %v14939_v42, %v767_v28 }
 0x112   :  { %1229 = vmatprep.subr.bf16.mxu1 %v792_v20 }
 0x113   :  { %1230 = vmatpush1.bf16.msra.mxu1 %v791_v34  ;;  %v15180_v34 = vld [vmem:[%s22074_s3] sm:$0x3f] }
 0x114   :  { %v391_v29 = vpop.permute.xlu1 %390  ;;  %v389_v30 = vpop.permute.xlu0 %388 }
 0x115   :  { %v404_v32 = vsel %vm392_vm2, %v389_v30, %v391_v29  ;;  %v403_v46 = vsel %vm392_vm2, %v14970_v57, %v389_v30 }
 0x116   :  { %1317 = vmatprep.subr.bf16.mxu0 %v404_v32 }
 0x117   :  { %1318 = vmatpush1.bf16.msra.mxu0 %v403_v46 }
 0x118   :  { %v15102_v6 = vpop.permute.xlu1 %782  ;;  %v781_v5 = vpop.permute.xlu0 %780 }
 0x119   :  { %v798_v27 = vsel %vm788_vm6, %v781_v5, %v15102_v6  ;;  %v797_v42 = vsel %vm788_vm6, %v14962_v54, %v781_v5 }
 0x11a   :  { %1231 = vmatprep.subr.bf16.mxu1 %v798_v27 }
 0x11b   :  { %1232 = vmatpush1.bf16.msra.mxu1 %v797_v42 }
 0x11c   :  { %v470_v8 = vpop.permute.xlu1 %469  ;;  %v468_v37 = vpop.permute.xlu0 %467 }
 0x11d   :  { %v491_v39 = vsel %vm485_vm3, %v468_v37, %v470_v8  ;;  %v490_v57 = vsel %vm485_vm3, %v14991_v10, %v468_v37 }
 0x11e   :  { %1234 = vmatmul.mubr.bf16.vlgmr.msra.gmra.mrb[0].mxu1 %v14978_v62  ;;  %1319 = vmatprep.subr.bf16.mxu0 %v491_v39 }
 0x11f   :  { %1320 = vmatpush1.bf16.msra.mxu0 %v490_v57  ;;  %1243 = vmatprep.mubr.bf16.mxu1 %v14985_v63 }
 0x120   :  { %v484_v7 = vpop.permute.xlu1 %483 }
 0x121   :  { %v482_v41 = vpop.permute.xlu0 %481 }
 0x122   :  { %v497_v43 = vsel %vm485_vm3, %v482_v41, %v484_v7  ;;  %v496_v54 = vsel %vm485_vm3, %v14999_v15, %v482_v41 }
 0x123   :  { %1321 = vmatprep.subr.bf16.mxu0 %v497_v43 }
 0x124   :  { %1322 = vmatpush1.bf16.msra.mxu0 %v496_v54  ;;  %v862_v44 = vpop.permute.xlu1 %861 }
 0x125   :  { %v860_v47 = vpop.permute.xlu0 %859  ;;  %1323 = vmatprep.subr.bf16.mxu0 %v14754_v12 }
 0x126   :  { %1244 = vmatmul.mubr.bf16.gmra.mrb[4].mxu1 %v15008_v18  ;;  %v885_v10 = vsel %vm881_vm7, %v860_v47, %v862_v44  ;;  %v884_v31 = vsel %vm881_vm7, %v15010_v49, %v860_v47 }
 0x127   :  { %1254 = vmatprep.subr.bf16.mxu1 %v885_v10  ;;  %1286 = vmatprep.mubr.bf16.mxu1 %v22076_v1 }
 0x128   :  { %1255 = vmatpush1.bf16.msra.mxu1 %v884_v31  ;;  %1324 = vmatpush1.bf16.msra.mxu0 %v14759_v13  ;;  %v876_v15 = vpop.permute.xlu1 %875 }
 0x129   :  { %v874_v48 = vpop.permute.xlu0 %873  ;;  %1325 = vmatprep.subr.bf16.mxu0 %v14785_v23 }
 0x12a   :  { %v891_v50 = vsel %vm881_vm7, %v874_v48, %v876_v15  ;;  %v890_v12 = vsel %vm881_vm7, %v15032_v33, %v874_v48 }
 0x12b   :  { %1256 = vmatprep.subr.bf16.mxu1 %v891_v50 }
 0x12c   :  { %1257 = vmatpush1.bf16.msra.mxu1 %v890_v12  ;;  %1326 = vmatpush1.bf16.msra.mxu0 %v14790_v24  ;;  %v587_v49 = vpop.permute.xlu1 %586 }
 0x12d   :  { %v585_v51 = vpop.permute.xlu0 %584 }
 0x12e   :  { %v608_v52 = vsel %vm602_vm4, %v585_v51, %v587_v49  ;;  %v607_v13 = vsel %vm602_vm4, %v15049_v40, %v585_v51 }
 0x12f   :  { %13533 = vmatmul.mubr.msk.bf16.vlgmr.msra.gmra.mrb[0].mxu1 %vm1088_vm8, %v15041_v35  ;;  %1327 = vmatprep.subr.bf16.mxu0 %v608_v52 }
 0x130   :  { %1328 = vmatpush1.bf16.msra.mxu0 %v607_v13  ;;  %v601_v23 = vpop.permute.xlu1 %600  ;;  %1296 = vmatprep.mubr.bf16.mxu1 %v22076_v1 }
 0x131   :  { %v599_v33 = vpop.permute.xlu0 %598 }
 0x132   :  { %v614_v36 = vsel %vm602_vm4, %v599_v33, %v601_v23  ;;  %v613_v24 = vsel %vm602_vm4, %v15066_v58, %v599_v33 }
 0x133   :  { %1329 = vmatprep.subr.bf16.mxu0 %v614_v36 }
 0x134   :  { %1330 = vmatpush1.bf16.msra.mxu0 %v613_v24  ;;  %v680_v55 = vpop.permute.xlu1 %679 }
 0x135   :  { %v678_v16 = vpop.permute.xlu0 %677 }
 0x136   :  { %v701_v40 = vsel %vm695_vm5, %v678_v16, %v680_v55  ;;  %v700_v56 = vsel %vm695_vm5, %v15075_v9, %v678_v16 }
 0x137   :  { %13534 = vmatmul.mubr.msk.bf16.gmra.mrb[4].mxu1 %vm1088_vm8, %v15058_v60  ;;  %1331 = vmatprep.subr.bf16.mxu0 %v701_v40 }
 0x138   :  { %1332 = vmatpush1.bf16.msra.mxu0 %v700_v56  ;;  %v694_v59 = vpop.permute.xlu1 %693 }
 0x139   :  { %v692_v61 = vpop.permute.xlu0 %691 }
 0x13a   :  { %v707_v3 = vsel %vm695_vm5, %v692_v61, %v694_v59  ;;  %v706_v58 = vsel %vm695_vm5, %v15084_v2, %v692_v61 }
 0x13b   :  { %1333 = vmatprep.subr.bf16.mxu0 %v707_v3 }
 0x13c   :  { %1334 = vmatpush1.bf16.msra.mxu0 %v706_v58  ;;  %v773_v14 = vpop.permute.xlu1 %772 }
 0x13d   :  { %v771_v0 = vpop.permute.xlu0 %770 }
 0x13e   :  { %v794_v4 = vsel %vm788_vm6, %v771_v0, %v773_v14  ;;  %v793_v9 = vsel %vm788_vm6, %v15093_v53, %v771_v0 }
 0x13f   :  { %1335 = vmatprep.subr.bf16.mxu0 %v794_v4 }
 0x140   :  { %1336 = vmatpush1.bf16.msra.mxu0 %v793_v9  ;;  %v787_v11 = vpop.permute.xlu1 %786 }
 0x141   :  { %v785_v26 = vpop.permute.xlu0 %784 }
 0x142   :  { %v800_v45 = vsel %vm788_vm6, %v785_v26, %v787_v11  ;;  %v799_v17 = vsel %vm788_vm6, %v15102_v6, %v785_v26 }
 0x143   :  { %1337 = vmatprep.subr.bf16.mxu0 %v800_v45 }
 0x144   :  { %1338 = vmatpush1.bf16.msra.mxu0 %v799_v17  ;;  %v866_v2 = vpop.permute.xlu1 %865 }
 0x145   :  { %v864_v21 = vpop.permute.xlu0 %863 }
 0x146   :  { %v887_v19 = vsel %vm881_vm7, %v864_v21, %v866_v2  ;;  %v886_v22 = vsel %vm881_vm7, %v862_v44, %v864_v21 }
 0x147   :  { %1340 = vmatmul.mubr.bf16.vlgmr.msra.gmra.mrb[8].mxu0 %v14978_v62  ;;  %1360 = vmatprep.subr.bf16.mxu0 %v887_v19  ;;  %v36_v62 = vlaneseq }
 0x148   :  { %1361 = vmatpush1.bf16.msra.mxu0 %v886_v22  ;;  %v880_v25 = vpop.permute.xlu1 %879  ;;  %1349 = vmatprep.mubr.bf16.mxu0 %v14985_v63 }
 0x149   :  { %v878_v38 = vpop.permute.xlu0 %877  ;;  %v15172_v63 = vshrl.u32 %v36_v62, 7 }
 0x14a   :  { %v893_v53 = vsel %vm881_vm7, %v878_v38, %v880_v25  ;;  %v892_v28 = vsel %vm881_vm7, %v876_v15, %v878_v38 }
 0x14b   :  { %1362 = vmatprep.subr.bf16.mxu0 %v893_v53  ;;  %v42_v29 = vsub.s32 1, %v15172_v63  ;;  %v46_v14 = vsub.s32 2, %v15172_v63  ;;  %v50_v4 = vsub.s32 3, %v15172_v63 }
 0x14c   :  { %1363 = vmatpush1.bf16.msra.mxu0 %v892_v28 }
 0x14d   :  { %v15190_v5 = vrot.slane %v15180_v34, %v42_v29  ;;  %v15232_v17 = vrot.slane %v15180_v34, %v46_v14  ;;  %v15236_v22 = vrot.slane %v15180_v34, %v50_v4 }
 0x14f   :  { %1350 = vmatmul.mubr.bf16.gmra.mrb[12].mxu0 %v15008_v18  ;;  %v38_v18 = vsub.s32 0, %v15172_v63 }
 0x150   :  { %1392 = vmatprep.mubr.bf16.mxu0 %v22076_v1 }
 0x157   :  { %13535 = vmatmul.mubr.msk.bf16.vlgmr.msra.gmra.mrb[8].mxu0 %vm1088_vm8, %v15041_v35 }
 0x158   :  { %1402 = vmatprep.mubr.bf16.mxu0 %v22076_v1 }
 0x15a   :  { %v15175_v20 = vpop.permute.xlu0 %1040  ;;  %v15183_v30 = vpop.permute.xlu1 %1045 }
 0x15e   :  { %v15197_v44 = vpop.permute.xlu1 %1050  ;;  %v15201_v15 = vpop.permute.xlu0 %1055 }
 0x15f   :  { %13536 = vmatmul.mubr.msk.bf16.gmra.mrb[12].mxu0 %vm1088_vm8, %v15058_v60  ;;  %v15186_v60 = vrot.slane %v15180_v34, %v38_v18 }
 0x1c1   :  { %v1182_v35 = vpop.f32.mrb[0].mxu0 }
 0x1c2   :  { %v1184_v32 = vpop.f32.mrb[1].mxu0  ;;  %v13753_v46 = vadd.f32 %v1182_v35, %v15175_v20 }
 0x1c3   :  { %v1186_v6 = vpop.f32.mrb[2].mxu0  ;;  %v13754_v27 = vadd.f32 %v1184_v32, %v15175_v20 }
 0x1c4   :  { %v13755_v42 = vadd.f32 %v1186_v6, %v15183_v30  ;;  %v1413_v8 = vmax.f32 %v13753_v46, 0.0  ;;  %v1188_v37 = vpop.f32.mrb[3].mxu0 }
 0x1c5   :  { %v13756_v39 = vadd.f32 %v1188_v37, %v15183_v30  ;;  %v1414_v57 = vmax.f32 %v13754_v27, 0.0 }
 0x1c6   :  { %v1419_v7 = vmax.f32 %v13755_v42, 0.0  ;;  %v1437_v41 = vmul.f32 %v1413_v8, %v15186_v60 }
 0x1c7   :  { %v1420_v43 = vmax.f32 %v13756_v39, 0.0  ;;  %v1438_v54 = vmul.f32 %v1414_v57, %v15190_v5 }
 0x1c8   :  { %v1443_v47 = vmul.f32 %v1419_v7, %v15186_v60 }
 0x1c9   :  { %v1444_v10 = vmul.f32 %v1420_v43, %v15190_v5  ;;  %v1192_v31 = vpop.f32.mrb[4].mxu0 }
 0x1ca   :  { %v15203_v48 = vpack.c.bf16 %v1443_v47, %v1437_v41  ;;  %v1194_v50 = vpop.f32.mrb[5].mxu0  ;;  %v13757_v12 = vadd.f32 %v1192_v31, %v15197_v44 }
 0x1cb   :  { %v15206_v49 = vpack.c.bf16 %v1444_v10, %v1438_v54  ;;  %v1196_v51 = vpop.f32.mrb[6].mxu0  ;;  %v13758_v52 = vadd.f32 %v1194_v50, %v15197_v44 }
 0x1cc   :  { %1607 = vrot.lane.b32.xlu0 %v15203_v48, %s14554_s24  ;;  %1515 = vrot.lane.b32.xlu1 %v15203_v48, %s14553_s17  ;;  %v1425_v13 = vmax.f32 %v13757_v12, 0.0  ;;  %v13759_v23 = vadd.f32 %v1196_v51, %v15201_v15  ;;  %v1198_v33 = vpop.f32.mrb[7].mxu0 }
 0x1cd   :  { %v13760_v36 = vadd.f32 %v1198_v33, %v15201_v15  ;;  %v1426_v24 = vmax.f32 %v13758_v52, 0.0  ;;  %v58_v33 = vsub.s32 5, %v15172_v63 }
 0x1ce   :  { %v1449_v55 = vmul.f32 %v1425_v13, %v15186_v60  ;;  %v1431_v16 = vmax.f32 %v13759_v23, 0.0  ;;  %v54_v13 = vsub.s32 4, %v15172_v63 }
 0x1cf   :  { %v1432_v40 = vmax.f32 %v13760_v36, 0.0  ;;  %v1450_v56 = vmul.f32 %v1426_v24, %v15190_v5  ;;  %v15304_v63 = vrot.slane %v15180_v34, %v58_v33 }
 0x1d0   :  { %v1455_v59 = vmul.f32 %v1431_v16, %v15186_v60  ;;  %1791 = vrot.lane.b32.xlu0 %v15203_v48, %s14556_s26  ;;  %1699 = vrot.lane.b32.xlu1 %v15203_v48, %s14555_s25 }
 0x1d1   :  { %v1456_v61 = vmul.f32 %v1432_v40, %v15190_v5  ;;  %v15296_v40 = vrot.slane %v15180_v34, %v54_v13 }
 0x1d2   :  { %v15223_v3 = vpack.c.bf16 %v1455_v59, %v1449_v55 }
 0x1d3   :  { %v15225_v58 = vpack.c.bf16 %v1456_v61, %v1450_v56 }
 0x202   :  { %v1288_v0 = vpop.f32.mrb[0].mxu1 }
 0x203   :  { %v13761_v9 = vadd.f32 %v1288_v0, %v15175_v20  ;;  %v1290_v11 = vpop.f32.mrb[1].mxu1 }
 0x204   :  { %v13762_v26 = vadd.f32 %v1290_v11, %v15175_v20  ;;  %v1292_v45 = vpop.f32.mrb[2].mxu1 }
 0x205   :  { %v1415_v2 = vmax.f32 %v13761_v9, 0.0  ;;  %v13763_v21 = vadd.f32 %v1292_v45, %v15183_v30  ;;  %v1294_v19 = vpop.f32.mrb[3].mxu1 }
 0x206   :  { %v1416_v25 = vmax.f32 %v13762_v26, 0.0  ;;  %v13764_v38 = vadd.f32 %v1294_v19, %v15183_v30 }
 0x207   :  { %v1421_v53 = vmax.f32 %v13763_v21, 0.0  ;;  %v1439_v62 = vmul.f32 %v1415_v2, %v15232_v17 }
 0x208   :  { %v1422_v28 = vmax.f32 %v13764_v38, 0.0  ;;  %v1440_v29 = vmul.f32 %v1416_v25, %v15236_v22 }
 0x209   :  { %v1445_v18 = vmul.f32 %v1421_v53, %v15232_v17 }
 0x20a   :  { %v1446_v35 = vmul.f32 %v1422_v28, %v15236_v22  ;;  %v1298_v32 = vpop.f32.mrb[4].mxu1 }
 0x20b   :  { %v15243_v46 = vpack.c.bf16 %v1445_v18, %v1439_v62  ;;  %v13765_v6 = vadd.f32 %v1298_v32, %v15197_v44  ;;  %v1300_v27 = vpop.f32.mrb[5].mxu1 }
 0x20c   :  { %v15246_v42 = vpack.c.bf16 %v1446_v35, %v1440_v29  ;;  %v13766_v8 = vadd.f32 %v1300_v27, %v15197_v44  ;;  %v1302_v37 = vpop.f32.mrb[6].mxu1 }
 0x20d   :  { %v1427_v39 = vmax.f32 %v13765_v6, 0.0  ;;  %v13767_v57 = vadd.f32 %v1302_v37, %v15201_v15  ;;  %v1304_v7 = vpop.f32.mrb[7].mxu1  ;;  %1909 = vrot.lane.b32.xlu0 %v15243_v46, %s14557_s29  ;;  %1519 = vrot.lane.b32.xlu1 %v15243_v46, %s14553_s17 }
 0x20e   :  { %v1428_v41 = vmax.f32 %v13766_v8, 0.0  ;;  %v13768_v43 = vadd.f32 %v1304_v7, %v15201_v15 }
 0x20f   :  { %v1433_v54 = vmax.f32 %v13767_v57, 0.0  ;;  %v1451_v10 = vmul.f32 %v1427_v39, %v15232_v17  ;;  %v15385_v57 = vpop.permute.xlu0 %14270 }
 0x210   :  { %v1434_v47 = vmax.f32 %v13768_v43, 0.0  ;;  %v1452_v50 = vmul.f32 %v1428_v41, %v15236_v22  ;;  %v15402_v43 = vld [vmem:[%s22072_s1 + $0x34] ss:$12 sps:$4 sm:$0xff]  }
 0x211   :  { %v1457_v31 = vmul.f32 %v1433_v54, %v15232_v17  ;;  %2001 = vrot.lane.b32.xlu0 %v15243_v46, %s14558_s10  ;;  %1905 = vrot.lane.b32.xlu1 %v15203_v48, %s14557_s29 }
 0x212   :  { %v1458_v12 = vmul.f32 %v1434_v47, %v15236_v22  ;;  %2455 = vmatprep.mubr.bf16.mxu1 %v15402_v43  ;;  %2561 = vmatprep.mubr.bf16.mxu0 %v15402_v43 }
 0x213   :  { %v15263_v51 = vpack.c.bf16 %v1457_v31, %v1451_v10  ;;  %v15397_v41 = vpop.permute.xlu0 %14280 }
 0x214   :  { %v15265_v52 = vpack.c.bf16 %v1458_v12, %v1452_v50 }
 0x215   :  { %2093 = vrot.lane.b32.xlu0 %v15243_v46, %s14559_s11  ;;  %1611 = vrot.lane.b32.xlu1 %v15243_v46, %s14554_s24 }
 0x219   :  { %1517 = vrot.lane.b32.xlu0 %v15206_v49, %s14553_s17  ;;  %1997 = vrot.lane.b32.xlu1 %v15203_v48, %s14558_s10 }
 0x21d   :  { %1701 = vrot.lane.b32.xlu0 %v15206_v49, %s14555_s25  ;;  %1609 = vrot.lane.b32.xlu1 %v15206_v49, %s14554_s24 }
 0x221   :  { %1521 = vrot.lane.b32.xlu0 %v15246_v42, %s14553_s17  ;;  %1793 = vrot.lane.b32.xlu1 %v15206_v49, %s14556_s26 }
 0x225   :  { %1613 = vrot.lane.b32.xlu0 %v15246_v42, %s14554_s24  ;;  %1907 = vrot.lane.b32.xlu1 %v15206_v49, %s14557_s29 }
 0x229   :  { %1529 = vrot.lane.b32.xlu0 %v15223_v3, %s14553_s17  ;;  %1999 = vrot.lane.b32.xlu1 %v15206_v49, %s14558_s10 }
 0x22a   :  { %v1394_v23 = vpop.f32.mrb[8].mxu0 }
 0x22b   :  { %v13769_v36 = vadd.f32 %v1394_v23, %v15175_v20  ;;  %v1396_v24 = vpop.f32.mrb[9].mxu0 }
 0x22c   :  { %v13770_v55 = vadd.f32 %v1396_v24, %v15175_v20  ;;  %v1398_v16 = vpop.f32.mrb[10].mxu0 }
 0x22d   :  { %v1417_v56 = vmax.f32 %v13769_v36, 0.0  ;;  %v13771_v59 = vadd.f32 %v1398_v16, %v15183_v30  ;;  %v1400_v61 = vpop.f32.mrb[11].mxu0  ;;  %1713 = vrot.lane.b32.xlu0 %v15223_v3, %s14555_s25  ;;  %2091 = vrot.lane.b32.xlu1 %v15206_v49, %s14559_s11 }
 0x22e   :  { %v1418_v14 = vmax.f32 %v13770_v55, 0.0  ;;  %v13772_v20 = vadd.f32 %v1400_v61, %v15183_v30 }
 0x22f   :  { %v1423_v0 = vmax.f32 %v13771_v59, 0.0  ;;  %v1441_v9 = vmul.f32 %v1417_v56, %v15296_v40 }
 0x230   :  { %v1424_v4 = vmax.f32 %v13772_v20, 0.0  ;;  %v1442_v26 = vmul.f32 %v1418_v14, %v15304_v63 }
 0x231   :  { %v1447_v11 = vmul.f32 %v1423_v0, %v15296_v40  ;;  %1533 = vrot.lane.b32.xlu0 %v15263_v51, %s14553_s17  ;;  %1621 = vrot.lane.b32.xlu1 %v15223_v3, %s14554_s24 }
 0x232   :  { %v1448_v34 = vmul.f32 %v1424_v4, %v15304_v63  ;;  %v1404_v45 = vpop.f32.mrb[12].mxu0 }
 0x233   :  { %v15315_v2 = vpack.c.bf16 %v1447_v11, %v1441_v9  ;;  %v13773_v30 = vadd.f32 %v1404_v45, %v15197_v44  ;;  %v1406_v21 = vpop.f32.mrb[13].mxu0 }
 0x234   :  { %v15318_v19 = vpack.c.bf16 %v1448_v34, %v1442_v26  ;;  %v13774_v25 = vadd.f32 %v1406_v21, %v15197_v44  ;;  %v1408_v38 = vpop.f32.mrb[14].mxu0 }
 0x235   :  { %v1429_v53 = vmax.f32 %v13773_v30, 0.0  ;;  %v13775_v28 = vadd.f32 %v1408_v38, %v15201_v15  ;;  %v1410_v62 = vpop.f32.mrb[15].mxu0  ;;  %1919 = vrot.lane.b32.xlu0 %v15223_v3, %s14557_s29  ;;  %1805 = vrot.lane.b32.xlu1 %v15223_v3, %s14556_s26 }
 0x236   :  { %v1430_v18 = vmax.f32 %v13774_v25, 0.0  ;;  %v13776_v29 = vadd.f32 %v1410_v62, %v15201_v15  ;;  %v15383_v15 = vpop.permute.xlu1 %14265 }
 0x237   :  { %v1435_v35 = vmax.f32 %v13775_v28, 0.0  ;;  %v1453_v6 = vmul.f32 %v1429_v53, %v15296_v40  ;;  %v14267_v24 = vunpack.i.l.bf16 %v15383_v15 }
 0x238   :  { %v1436_v32 = vmax.f32 %v13776_v29, 0.0  ;;  %v1454_v27 = vmul.f32 %v1430_v18, %v15304_v63 }
 0x239   :  { %v1459_v44 = vmul.f32 %v1435_v35, %v15296_v40  ;;  %1625 = vrot.lane.b32.xlu0 %v15263_v51, %s14554_s24  ;;  %1923 = vrot.lane.b32.xlu1 %v15263_v51, %s14557_s29 }
 0x23a   :  { %v1460_v8 = vmul.f32 %v1436_v32, %v15304_v63  ;;  %v15395_v7 = vpop.permute.xlu1 %14275 }
 0x23b   :  { %v15335_v37 = vpack.c.bf16 %v1459_v44, %v1453_v6  ;;  %v14268_v44 = vunpack.i.h.bf16 %v15383_v15 }
 0x23c   :  { %v15337_v39 = vpack.c.bf16 %v1460_v8, %v1454_v27  ;;  %v14272_v8 = vunpack.i.l.bf16 %v15385_v57 }
 0x23d   :  { %2011 = vrot.lane.b32.xlu0 %v15223_v3, %s14558_s10  ;;  %2015 = vrot.lane.b32.xlu1 %v15263_v51, %s14558_s10 }
 0x23e   :  { %v15410_v54 = vpop.permute.xlu0 %1607  ;;  %v1516_v47 = vpop.permute.xlu1 %1515 }
 0x23f   :  { %v1541_v59 = vsel %vm206_vm0, %v14267_v24, %v1516_v47 }
 0x241   :  { %1705 = vrot.lane.b32.xlu0 %v15246_v42, %s14555_s25  ;;  %1531 = vrot.lane.b32.xlu1 %v15225_v58, %s14553_s17 }
 0x242   :  { %v15420_v10 = vpop.permute.xlu0 %1791  ;;  %v15422_v31 = vpop.permute.xlu1 %1699 }
 0x245   :  { %1717 = vrot.lane.b32.xlu0 %v15263_v51, %s14555_s25  ;;  %1703 = vrot.lane.b32.xlu1 %v15243_v46, %s14555_s25 }
 0x249   :  { %1623 = vrot.lane.b32.xlu0 %v15225_v58, %s14554_s24  ;;  %2089 = vrot.lane.b32.xlu1 %v15203_v48, %s14559_s11 }
 0x24d   :  { %2103 = vrot.lane.b32.xlu0 %v15223_v3, %s14559_s11  ;;  %2107 = vrot.lane.b32.xlu1 %v15263_v51, %s14559_s11 }
 0x251   :  { %1797 = vrot.lane.b32.xlu0 %v15246_v42, %s14556_s26  ;;  %1715 = vrot.lane.b32.xlu1 %v15225_v58, %s14555_s25 }
 0x255   :  { %2185 = vrot.lane.b32.xlu0 %v15243_v46, %s14560_s14  ;;  %1795 = vrot.lane.b32.xlu1 %v15243_v46, %s14556_s26 }
 0x259   :  { %1807 = vrot.lane.b32.xlu0 %v15225_v58, %s14556_s26  ;;  %1809 = vrot.lane.b32.xlu1 %v15263_v51, %s14556_s26 }
 0x25d   :  { %2195 = vrot.lane.b32.xlu0 %v15223_v3, %s14560_s14  ;;  %2183 = vrot.lane.b32.xlu1 %v15206_v49, %s14560_s14 }
 0x261   :  { %1921 = vrot.lane.b32.xlu0 %v15225_v58, %s14557_s29  ;;  %2181 = vrot.lane.b32.xlu1 %v15203_v48, %s14560_s14 }
 0x265   :  { %2013 = vrot.lane.b32.xlu0 %v15225_v58, %s14558_s10  ;;  %2199 = vrot.lane.b32.xlu1 %v15263_v51, %s14560_s14 }
 0x269   :  { %2105 = vrot.lane.b32.xlu0 %v15225_v58, %s14559_s11  ;;  %1535 = vrot.lane.b32.xlu1 %v15265_v52, %s14553_s17 }
 0x26d   :  { %1811 = vrot.lane.b32.xlu0 %v15265_v52, %s14556_s26  ;;  %1911 = vrot.lane.b32.xlu1 %v15246_v42, %s14557_s29 }
 0x271   :  { %2197 = vrot.lane.b32.xlu0 %v15225_v58, %s14560_s14  ;;  %1627 = vrot.lane.b32.xlu1 %v15265_v52, %s14554_s24 }
 0x275   :  { %1913 = vrot.lane.b32.xlu0 %v15315_v2, %s14557_s29  ;;  %2003 = vrot.lane.b32.xlu1 %v15246_v42, %s14558_s10 }
 0x279   :  { %2005 = vrot.lane.b32.xlu0 %v15315_v2, %s14558_s10  ;;  %1719 = vrot.lane.b32.xlu1 %v15265_v52, %s14555_s25 }
 0x27d   :  { %1525 = vrot.lane.b32.xlu0 %v15318_v19, %s14553_s17  ;;  %1925 = vrot.lane.b32.xlu1 %v15265_v52, %s14557_s29 }
 0x27f   :  { %v15428_v50 = vpop.permute.xlu0 %1909  ;;  %v1520_v12 = vpop.permute.xlu1 %1519 }
 0x281   :  { %1617 = vrot.lane.b32.xlu0 %v15318_v19, %s14554_s24  ;;  %2017 = vrot.lane.b32.xlu1 %v15265_v52, %s14558_s10 }
 0x283   :  { %v15434_v13 = vpop.permute.xlu0 %2001  ;;  %v15436_v23 = vpop.permute.xlu1 %1905 }
 0x285   :  { %1709 = vrot.lane.b32.xlu0 %v15318_v19, %s14555_s25  ;;  %1523 = vrot.lane.b32.xlu1 %v15315_v2, %s14553_s17 }
 0x287   :  { %v15442_v33 = vpop.permute.xlu0 %2093  ;;  %v15444_v36 = vpop.permute.xlu1 %1611 }
 0x289   :  { %1927 = vrot.lane.b32.xlu0 %v15335_v37, %s14557_s29  ;;  %1615 = vrot.lane.b32.xlu1 %v15315_v2, %s14554_s24 }
 0x28b   :  { %v1518_v55 = vpop.permute.xlu0 %1517  ;;  %v15451_v16 = vpop.permute.xlu1 %1997 }
 0x28c   :  { %v1542_v56 = vsel %vm206_vm0, %v1516_v47, %v1518_v55  ;;  %v1543_v9 = vsel %vm206_vm0, %v1518_v55, %v1520_v12  ;;  %v1633_v55 = vsel %vm299_vm1, %v14272_v8, %v15410_v54 }
 0x28d   :  { %2019 = vrot.lane.b32.xlu0 %v15335_v37, %s14558_s10  ;;  %1707 = vrot.lane.b32.xlu1 %v15315_v2, %s14555_s25 }
 0x28e   :  { %2423 = vmatprep.subr.bf16.mxu1 %v1542_v56 }
 0x28f   :  { %2424 = vmatpush1.bf16.msra.mxu1 %v1541_v59  ;;  %v15459_v61 = vpop.permute.xlu0 %1701  ;;  %v15461_v14 = vpop.permute.xlu1 %1609 }
 0x290   :  { %v1634_v15 = vsel %vm299_vm1, %v15410_v54, %v15461_v14 }
 0x291   :  { %1539 = vrot.lane.b32.xlu0 %v15337_v39, %s14553_s17  ;;  %1537 = vrot.lane.b32.xlu1 %v15335_v37, %s14553_s17 }
 0x293   :  { %v15467_v20 = vpop.permute.xlu0 %1521  ;;  %v15469_v0 = vpop.permute.xlu1 %1793 }
 0x294   :  { %v1544_v4 = vsel %vm206_vm0, %v1520_v12, %v15467_v20 }
 0x295   :  { %2097 = vrot.lane.b32.xlu0 %v15315_v2, %s14559_s11  ;;  %2095 = vrot.lane.b32.xlu1 %v15246_v42, %s14559_s11 }
 0x296   :  { %2529 = vmatprep.subr.bf16.mxu0 %v1544_v4  ;;  %v14273_v4 = vunpack.i.h.bf16 %v15385_v57  ;;  %v1726_v57 = vsel %vm392_vm2, %v15422_v31, %v15459_v61 }
 0x297   :  { %2530 = vmatpush1.bf16.msra.mxu0 %v1543_v9  ;;  %v15478_v11 = vpop.permute.xlu0 %1613  ;;  %v15480_v26 = vpop.permute.xlu1 %1907 }
 0x299   :  { %1631 = vrot.lane.b32.xlu0 %v15337_v39, %s14554_s24  ;;  %1629 = vrot.lane.b32.xlu1 %v15335_v37, %s14554_s24 }
 0x29b   :  { %v1530_v34 = vpop.permute.xlu0 %1529  ;;  %v15486_v45 = vpop.permute.xlu1 %1999 }
 0x29c   :  { %v1547_v47 = vsel %vm206_vm0, %v14268_v44, %v1530_v34 }
 0x29d   :  { %2111 = vrot.lane.b32.xlu0 %v15335_v37, %s14559_s11  ;;  %1721 = vrot.lane.b32.xlu1 %v15335_v37, %s14555_s25 }
 0x29f   :  { %v15492_v30 = vpop.permute.xlu0 %1713  ;;  %v15494_v21 = vpop.permute.xlu1 %2091 }
 0x2a1   :  { %1723 = vrot.lane.b32.xlu0 %v15337_v39, %s14555_s25  ;;  %2109 = vrot.lane.b32.xlu1 %v15265_v52, %s14559_s11 }
 0x2a3   :  { %v15500_v25 = vpop.permute.xlu0 %1533  ;;  %v1622_v38 = vpop.permute.xlu1 %1621 }
 0x2a4   :  { %v1639_v54 = vsel %vm299_vm1, %v14273_v4, %v1622_v38  ;;  %v14282_v4 = vunpack.i.l.bf16 %v15397_v41 }
 0x2a5   :  { %1801 = vrot.lane.b32.xlu0 %v15318_v19, %s14556_s26  ;;  %1799 = vrot.lane.b32.xlu1 %v15315_v2, %s14556_s26 }
 0x2a7   :  { %v15506_v53 = vpop.permute.xlu0 %1919  ;;  %v15508_v28 = vpop.permute.xlu1 %1805 }
 0x2a9   :  { %1815 = vrot.lane.b32.xlu0 %v15337_v39, %s14556_s26  ;;  %1813 = vrot.lane.b32.xlu1 %v15335_v37, %s14556_s26 }
 0x2ab   :  { %v15514_v62 = vpop.permute.xlu0 %1625  ;;  %v15516_v18 = vpop.permute.xlu1 %1923 }
 0x2ad   :  { %2189 = vrot.lane.b32.xlu0 %v15315_v2, %s14560_s14  ;;  %2187 = vrot.lane.b32.xlu1 %v15246_v42, %s14560_s14 }
 0x2af   :  { %v15522_v29 = vpop.permute.xlu0 %2011  ;;  %v15524_v35 = vpop.permute.xlu1 %2015 }
 0x2b1   :  { %2203 = vrot.lane.b32.xlu0 %v15335_v37, %s14560_s14  ;;  %2201 = vrot.lane.b32.xlu1 %v15265_v52, %s14560_s14 }
 0x2b3   :  { %v15530_v32 = vpop.permute.xlu0 %1705  ;;  %v15532_v6 = vpop.permute.xlu1 %1531 }
 0x2b4   :  { %v1548_v27 = vsel %vm206_vm0, %v1530_v34, %v15532_v6  ;;  %v14277_v34 = vunpack.i.l.bf16 %v15395_v7 }
 0x2b5   :  { %1917 = vrot.lane.b32.xlu0 %v22076_v1, %s14557_s29  ;;  %1915 = vrot.lane.b32.xlu1 %v15318_v19, %s14557_s29 }
 0x2b6   :  { %2425 = vmatprep.subr.bf16.mxu1 %v1548_v27  ;;  %v1725_v8 = vsel %vm392_vm2, %v14277_v34, %v15422_v31 }
 0x2b7   :  { %2426 = vmatpush1.bf16.msra.mxu1 %v1547_v47  ;;  %v15543_v12 = vpop.permute.xlu0 %1717  ;;  %v15548_v24 = vpop.permute.xlu1 %1703 }
 0x2b8   :  { %2427 = vmatprep.subr.bf16.mxu1 %v1634_v15  ;;  %v14278_v15 = vunpack.i.h.bf16 %v15395_v7  ;;  %v1818_v7 = vsel %vm485_vm3, %v15420_v10, %v15469_v0 }
 0x2b9   :  { %1931 = vrot.lane.b32.xlu0 %v22076_v1, %s14557_s29  ;;  %1929 = vrot.lane.b32.xlu1 %v15337_v39, %s14557_s29 }
 0x2ba   :  { %v1731_v31 = vsel %vm392_vm2, %v14278_v15, %v15492_v30 }
 0x2bb   :  { %2428 = vmatpush1.bf16.msra.mxu1 %v1633_v55  ;;  %v15556_v56 = vpop.permute.xlu0 %1623  ;;  %v15558_v59 = vpop.permute.xlu1 %2089 }
 0x2bc   :  { %v1640_v9 = vsel %vm299_vm1, %v1622_v38, %v15556_v56 }
 0x2bd   :  { %2009 = vrot.lane.b32.xlu0 %v22076_v1, %s14558_s10  ;;  %2007 = vrot.lane.b32.xlu1 %v15318_v19, %s14558_s10 }
 0x2be   :  { %2429 = vmatprep.subr.bf16.mxu1 %v1640_v9 }
 0x2bf   :  { %2430 = vmatpush1.bf16.msra.mxu1 %v1639_v54  ;;  %v15569_v44 = vpop.permute.xlu0 %2103  ;;  %v15574_v27 = vpop.permute.xlu1 %2107  ;;  %v1817_v54 = vsel %vm485_vm3, %v14282_v4, %v15420_v10 }
 0x2c0   :  { %2431 = vmatprep.subr.bf16.mxu1 %v1726_v57 }
 0x2c1   :  { %2023 = vrot.lane.b32.xlu0 %v22076_v1, %s14558_s10  ;;  %2021 = vrot.lane.b32.xlu1 %v15337_v39, %s14558_s10 }
 0x2c3   :  { %2432 = vmatpush1.bf16.msra.mxu1 %v1725_v8  ;;  %v15582_v38 = vpop.permute.xlu0 %1797  ;;  %v15584_v47 = vpop.permute.xlu1 %1715  ;;  %v14283_v8 = vunpack.i.h.bf16 %v15397_v41  ;;  %v13546_v41 = vld [vmem:[%s22073_s2 + $0x28] sm:$0xff] }
 0x2c4   :  { %v1732_v55 = vsel %vm392_vm2, %v15492_v30, %v15584_v47 }
 0x2c5   :  { %2101 = vrot.lane.b32.xlu0 %v22076_v1, %s14559_s11  ;;  %2099 = vrot.lane.b32.xlu1 %v15318_v19, %s14559_s11  ;;  %v1823_v10 = vsel %vm485_vm3, %v14283_v8, %v15508_v28 }
 0x2c6   :  { %2433 = vmatprep.subr.bf16.mxu1 %v1732_v55 }
 0x2c7   :  { %2434 = vmatpush1.bf16.msra.mxu1 %v1731_v31  ;;  %v15597_v9 = vpop.permute.xlu0 %2185  ;;  %v15602_v34 = vpop.permute.xlu1 %1795 }
 0x2c8   :  { %2435 = vmatprep.subr.bf16.mxu1 %v1818_v7 }
 0x2c9   :  { %2115 = vrot.lane.b32.xlu0 %v22076_v1, %s14559_s11  ;;  %2113 = vrot.lane.b32.xlu1 %v15337_v39, %s14559_s11 }
 0x2cb   :  { %2436 = vmatpush1.bf16.msra.mxu1 %v1817_v54  ;;  %v15610_v30 = vpop.permute.xlu0 %1807  ;;  %v15612_v57 = vpop.permute.xlu1 %1809  ;;  %v13547_v54 = vld [vmem:[%s22073_s2 + $0x30] sm:$0xff] }
 0x2cc   :  { %v1824_v15 = vsel %vm485_vm3, %v15508_v28, %v15610_v30  ;;  %v13545_v28 = vld [vmem:[%s22073_s2 + $0x20] sm:$0xff] }
 0x2cd   :  { %2193 = vrot.lane.b32.xlu0 %v22076_v1, %s14560_s14  ;;  %2191 = vrot.lane.b32.xlu1 %v15318_v19, %s14560_s14 }
 0x2ce   :  { %2437 = vmatprep.subr.bf16.mxu1 %v1824_v15 }
 0x2cf   :  { %2438 = vmatpush1.bf16.msra.mxu1 %v1823_v10  ;;  %v15624_v55 = vpop.permute.xlu0 %2195  ;;  %v15626_v4 = vpop.permute.xlu1 %2183 }
 0x2d0   :  { %2439 = vmatprep.subr.bf16.mxu1 %v15206_v49  ;;  %v13548_v49 = vld [vmem:[%s22073_s2 + $0x38] sm:$0xff] }
 0x2d1   :  { %2207 = vrot.lane.b32.xlu0 %v22076_v1, %s14560_s14  ;;  %2205 = vrot.lane.b32.xlu1 %v15337_v39, %s14560_s14 }
 0x2d3   :  { %2440 = vmatpush1.bf16.msra.mxu1 %v15203_v48  ;;  %v1922_v31 = vpop.permute.xlu0 %1921  ;;  %v15640_v7 = vpop.permute.xlu1 %2181  ;;  %v1934_v48 = vsel %vm602_vm4, %v15480_v26, %v15428_v50 }
 0x2d4   :  { %2441 = vmatprep.subr.bf16.mxu1 %v15225_v58  ;;  %v1933_v58 = vsel %vm602_vm4, %v15436_v23, %v15480_v26  ;;  %v1939_v23 = vsel %vm602_vm4, %v15506_v53, %v1922_v31  ;;  %v1636_v26 = vsel %vm299_vm1, %v15444_v36, %v15478_v11  ;;  %v2025_v53 = vsel %vm695_vm5, %v15451_v16, %v15486_v45 }
 0x2d5   :  { %2374 = vperm.xlu0 %14262, %v13546_v41   ;;  %2369 = vperm.xlu1 %14263, %v13545_v28   ;;  %v1940_v41 = vsel %vm602_vm4, %v1922_v31, %v15516_v18 }
 0x2d7   :  { %2442 = vmatpush1.bf16.msra.mxu1 %v15223_v3  ;;  %v2014_v8 = vpop.permute.xlu0 %2013  ;;  %v15653_v15 = vpop.permute.xlu1 %2199 }
 0x2d8   :  { %2443 = vmatprep.subr.bf16.mxu1 %v1934_v48  ;;  %v2026_v48 = vsel %vm695_vm5, %v15486_v45, %v15434_v13  ;;  %v2032_v31 = vsel %vm695_vm5, %v2014_v8, %v15524_v35  ;;  %v2031_v16 = vsel %vm695_vm5, %v15522_v29, %v2014_v8  ;;  %v2117_v29 = vsel %vm788_vm6, %v15558_v59, %v15494_v21  ;;  %v15734_v59 = vld [vmem:[%s22072_s1 + $0x30] ss:$12 sps:$4 sm:$0xff]  }
 0x2d9   :  { %2384 = vperm.xlu0 %14262, %v13548_v49   ;;  %2379 = vperm.xlu1 %14263, %v13547_v54   ;;  %v1549_v49 = vsel %vm206_vm0, %v15532_v6, %v15500_v25 }
 0x2db   :  { %2444 = vmatpush1.bf16.msra.mxu1 %v1933_v58  ;;  %v2106_v10 = vpop.permute.xlu0 %2105  ;;  %v15660_v3 = vpop.permute.xlu1 %1535 }
 0x2dc   :  { %2445 = vmatprep.subr.bf16.mxu1 %v1940_v41  ;;  %v1550_v28 = vsel %vm206_vm0, %v15500_v25, %v15660_v3  ;;  %v1635_v25 = vsel %vm299_vm1, %v15461_v14, %v15444_v36  ;;  %v1641_v36 = vsel %vm299_vm1, %v15556_v56, %v15514_v62  ;;  %v1728_v14 = vsel %vm392_vm2, %v15548_v24, %v15530_v32 }
 0x2dd   :  { %2531 = vmatprep.subr.bf16.mxu0 %v1550_v28  ;;  %v2124_v8 = vsel %vm788_vm6, %v2106_v10, %v15574_v27  ;;  %14290 = vrot.lane.b32.xlu0 %v22076_v1, %s14554_s24 }
 0x2de   :  { %2532 = vmatpush1.bf16.msra.mxu0 %v1549_v49  ;;  %v2118_v49 = vsel %vm788_vm6, %v15494_v21, %v15442_v33  ;;  %v2123_v21 = vsel %vm788_vm6, %v15569_v44, %v2106_v10  ;;  %v15742_v44 = vld [vmem:[%s22072_s1 + $0x4c] ss:$12 sps:$4 sm:$0xff]   ;;  %v2209_v10 = vsel %vm881_vm7, %v15640_v7, %v15626_v4  ;;  %14285 = vrot.lane.b32.xlu1 %v22076_v1, %s14553_s17 }
 0x2df   :  { %2446 = vmatpush1.bf16.msra.mxu1 %v1939_v23  ;;  %v15673_v54 = vpop.permute.xlu0 %1811  ;;  %2533 = vmatprep.subr.bf16.mxu0 %v1636_v26  ;;  %v15678_v58 = vpop.permute.xlu1 %1911 }
 0x2e0   :  { %2447 = vmatprep.subr.bf16.mxu1 %v2026_v48 }
 0x2e1   :  { %14300 = vrot.lane.b32.xlu0 %v22076_v1, %s14556_s26 }
 0x2e2   :  { %2534 = vmatpush1.bf16.msra.mxu0 %v1635_v25  ;;  %14295 = vrot.lane.b32.xlu1 %v22076_v1, %s14555_s25 }
 0x2e3   :  { %2448 = vmatpush1.bf16.msra.mxu1 %v2025_v53  ;;  %v2198_v6 = vpop.permute.xlu0 %2197  ;;  %v15688_v41 = vpop.permute.xlu1 %1627  ;;  %v2210_v53 = vsel %vm881_vm7, %v15626_v4, %v15597_v9  ;;  %v15765_v4 = vld [vmem:[%s22072_s1 + $0x48] ss:$12 sps:$4 sm:$0xff]  }
 0x2e4   :  { %2449 = vmatprep.subr.bf16.mxu1 %v2032_v31  ;;  %v1642_v28 = vsel %vm299_vm1, %v15514_v62, %v15688_v41  ;;  %v1727_v62 = vsel %vm392_vm2, %v15459_v61, %v15548_v24  ;;  %v1733_v61 = vsel %vm392_vm2, %v15584_v47, %v15543_v12  ;;  %v1820_v24 = vsel %vm485_vm3, %v15602_v34, %v15582_v38 }
 0x2e5   :  { %2535 = vmatprep.subr.bf16.mxu0 %v1642_v28  ;;  %v1819_v47 = vsel %vm485_vm3, %v15469_v0, %v15602_v34  ;;  %v1826_v31 = vsel %vm485_vm3, %v15612_v57, %v15673_v54  ;;  %v1825_v0 = vsel %vm485_vm3, %v15610_v30, %v15612_v57  ;;  %v2215_v34 = vsel %vm881_vm7, %v15624_v55, %v2198_v6  ;;  %v15782_v55 = vld [vmem:[%s22072_s1 + $0x38] ss:$12 sps:$4 sm:$0xff]  }
 0x2e6   :  { %2536 = vmatpush1.bf16.msra.mxu0 %v1641_v36  ;;  %v2216_v36 = vsel %vm881_vm7, %v2198_v6, %v15653_v15 }
 0x2e7   :  { %2450 = vmatpush1.bf16.msra.mxu1 %v2031_v16  ;;  %v15701_v45 = vpop.permute.xlu0 %1913  ;;  %2537 = vmatprep.subr.bf16.mxu0 %v1728_v14  ;;  %v15706_v23 = vpop.permute.xlu1 %2003 }
 0x2e8   :  { %2451 = vmatprep.subr.bf16.mxu1 %v2118_v49 }
 0x2ea   :  { %2538 = vmatpush1.bf16.msra.mxu0 %v1727_v62 }
 0x2eb   :  { %2452 = vmatpush1.bf16.msra.mxu1 %v2117_v29  ;;  %v15714_v56 = vpop.permute.xlu0 %2005  ;;  %v15718_v26 = vpop.permute.xlu1 %1719 }
 0x2ec   :  { %2453 = vmatprep.subr.bf16.mxu1 %v2124_v8  ;;  %v1734_v48 = vsel %vm392_vm2, %v15543_v12, %v15718_v26 }
 0x2ed   :  { %2539 = vmatprep.subr.bf16.mxu0 %v1734_v48 }
 0x2ee   :  { %2540 = vmatpush1.bf16.msra.mxu0 %v1733_v61 }
 0x2ef   :  { %2454 = vmatpush1.bf16.msra.mxu1 %v2123_v21  ;;  %v1526_v25 = vpop.permute.xlu0 %1525  ;;  %2541 = vmatprep.subr.bf16.mxu0 %v1820_v24  ;;  %v1926_v12 = vpop.permute.xlu1 %1925 }
 0x2f0   :  { %2476 = vmatprep.subr.bf16.mxu1 %v2210_v53 }
 0x2f2   :  { %2456 = vmatmul.mubr.bf16.vlgmr.msra.gmra.mrb[8].mxu1 %v15734_v59  ;;  %2542 = vmatpush1.bf16.msra.mxu0 %v1819_v47 }
 0x2f3   :  { %2477 = vmatpush1.bf16.msra.mxu1 %v2209_v10  ;;  %v1618_v28 = vpop.permute.xlu0 %1617  ;;  %2543 = vmatprep.subr.bf16.mxu0 %v1826_v31  ;;  %v2018_v16 = vpop.permute.xlu1 %2017 }
 0x2f4   :  { %2478 = vmatprep.subr.bf16.mxu1 %v2216_v36  ;;  %2465 = vmatprep.mubr.bf16.mxu1 %v15742_v44 }
 0x2f6   :  { %2544 = vmatpush1.bf16.msra.mxu0 %v1825_v0 }
 0x2f7   :  { %2479 = vmatpush1.bf16.msra.mxu1 %v2215_v34  ;;  %v1710_v7 = vpop.permute.xlu0 %1709  ;;  %2545 = vmatprep.subr.bf16.mxu0 %v15246_v42  ;;  %v1524_v14 = vpop.permute.xlu1 %1523  ;;  %v1936_v42 = vsel %vm602_vm4, %v15678_v58, %v15701_v45 }
 0x2f8   :  { %v1546_v49 = vsel %vm206_vm0, %v1524_v14, %v1526_v25 }
 0x2f9   :  { %2635 = vmatprep.subr.bf16.mxu1 %v1546_v49 }
 0x2fa   :  { %2466 = vmatmul.mubr.bf16.gmra.mrb[12].mxu1 %v15765_v4  ;;  %2546 = vmatpush1.bf16.msra.mxu0 %v15243_v46 }
 0x2fb   :  { %v15771_v30 = vpop.permute.xlu0 %1927  ;;  %2547 = vmatprep.subr.bf16.mxu0 %v15265_v52  ;;  %v1616_v57 = vpop.permute.xlu1 %1615  ;;  %2508 = vmatprep.mubr.bf16.mxu1 %v22076_v1  ;;  %v1935_v52 = vsel %vm602_vm4, %v15428_v50, %v15678_v58  ;;  %v1941_v50 = vsel %vm602_vm4, %v15516_v18, %v1926_v12  ;;  %v15807_v58 = vld [vmem:[%s22072_s1 + $0x50] ss:$12 sps:$4 sm:$0xff]   ;;  %v2027_v18 = vsel %vm695_vm5, %v15434_v13, %v15706_v23 }
 0x2fc   :  { %v1942_v62 = vsel %vm602_vm4, %v1926_v12, %v15771_v30  ;;  %v1637_v25 = vsel %vm299_vm1, %v15478_v11, %v1616_v57  ;;  %v2033_v13 = vsel %vm695_vm5, %v15524_v35, %v2018_v16 }
 0x2fe   :  { %2548 = vmatpush1.bf16.msra.mxu0 %v15263_v51  ;;  %v1545_v51 = vsel %vm206_vm0, %v15467_v20, %v1524_v14  ;;  %v2028_v20 = vsel %vm695_vm5, %v15706_v23, %v15714_v56 }
 0x2ff   :  { %v15784_v6 = vpop.permute.xlu0 %2019  ;;  %2549 = vmatprep.subr.bf16.mxu0 %v1936_v42  ;;  %v1708_v46 = vpop.permute.xlu1 %1707 }
 0x300   :  { %v2034_v53 = vsel %vm695_vm5, %v2018_v16, %v15784_v6 }
 0x302   :  { %13555 = vmatmul.mubr.msk.bf16.vlgmr.msra.gmra.mrb[8].mxu1 %vm1088_vm8, %v15782_v55  ;;  %2550 = vmatpush1.bf16.msra.mxu0 %v1935_v52 }
 0x303   :  { %2636 = vmatpush1.bf16.msra.mxu1 %v1545_v51  ;;  %v1540_v29 = vpop.permute.xlu0 %1539  ;;  %2551 = vmatprep.subr.bf16.mxu0 %v1942_v62  ;;  %v1538_v8 = vpop.permute.xlu1 %1537 }
 0x304   :  { %v1552_v48 = vsel %vm206_vm0, %v1538_v8, %v1540_v29  ;;  %v1551_v61 = vsel %vm206_vm0, %v15660_v3, %v1538_v8  ;;  %2518 = vmatprep.mubr.bf16.mxu1 %v22076_v1  ;;  %v1638_v3 = vsel %vm299_vm1, %v1616_v57, %v1618_v28  ;;  %v1730_v28 = vsel %vm392_vm2, %v1708_v46, %v1710_v7 }
 0x305   :  { %2637 = vmatprep.subr.bf16.mxu1 %v1552_v48 }
 0x306   :  { %2552 = vmatpush1.bf16.msra.mxu0 %v1941_v50 }
 0x307   :  { %2638 = vmatpush1.bf16.msra.mxu1 %v1551_v61  ;;  %v15809_v21 = vpop.permute.xlu0 %2097  ;;  %2553 = vmatprep.subr.bf16.mxu0 %v2028_v20  ;;  %v2096_v24 = vpop.permute.xlu1 %2095 }
 0x308   :  { %2639 = vmatprep.subr.bf16.mxu1 %v1638_v3  ;;  %v2120_v11 = vsel %vm788_vm6, %v2096_v24, %v15809_v21 }
 0x30a   :  { %13556 = vmatmul.mubr.msk.bf16.gmra.mrb[12].mxu1 %vm1088_vm8, %v15807_v58  ;;  %2554 = vmatpush1.bf16.msra.mxu0 %v2027_v18 }
 0x30b   :  { %2640 = vmatpush1.bf16.msra.mxu1 %v1637_v25  ;;  %v1632_v12 = vpop.permute.xlu0 %1631  ;;  %2555 = vmatprep.subr.bf16.mxu0 %v2034_v53  ;;  %v1630_v47 = vpop.permute.xlu1 %1629 }
 0x30c   :  { %v1644_v10 = vsel %vm299_vm1, %v1630_v47, %v1632_v12  ;;  %v1643_v31 = vsel %vm299_vm1, %v15688_v41, %v1630_v47  ;;  %2667 = vmatprep.mubr.bf16.mxu1 %v15402_v43  ;;  %v2119_v41 = vsel %vm788_vm6, %v15442_v33, %v2096_v24  ;;  %v1729_v43 = vsel %vm392_vm2, %v15530_v32, %v1708_v46 }
 0x30d   :  { %2641 = vmatprep.subr.bf16.mxu1 %v1644_v10 }
 0x30e   :  { %2556 = vmatpush1.bf16.msra.mxu0 %v2033_v13 }
 0x30f   :  { %2642 = vmatpush1.bf16.msra.mxu1 %v1643_v31  ;;  %v15829_v23 = vpop.permute.xlu0 %2111  ;;  %2557 = vmatprep.subr.bf16.mxu0 %v2120_v11  ;;  %v1722_v36 = vpop.permute.xlu1 %1721 }
 0x310   :  { %2643 = vmatprep.subr.bf16.mxu1 %v1730_v28  ;;  %v1735_v33 = vsel %vm392_vm2, %v15718_v26, %v1722_v36 }
 0x312   :  { %2558 = vmatpush1.bf16.msra.mxu0 %v2119_v41 }
 0x313   :  { %2644 = vmatpush1.bf16.msra.mxu1 %v1729_v43  ;;  %v1724_v35 = vpop.permute.xlu0 %1723  ;;  %v2110_v16 = vpop.permute.xlu1 %2109 }
 0x314   :  { %v2126_v0 = vsel %vm788_vm6, %v2110_v16, %v15829_v23  ;;  %v1736_v34 = vsel %vm392_vm2, %v1722_v36, %v1724_v35  ;;  %v2125_v7 = vsel %vm788_vm6, %v15574_v27, %v2110_v16 }
 0x315   :  { %2559 = vmatprep.subr.bf16.mxu0 %v2126_v0  ;;  %2645 = vmatprep.subr.bf16.mxu1 %v1736_v34 }
 0x316   :  { %2560 = vmatpush1.bf16.msra.mxu0 %v2125_v7 }
 0x317   :  { %2646 = vmatpush1.bf16.msra.mxu1 %v1735_v33  ;;  %v1802_v14 = vpop.permute.xlu0 %1801  ;;  %v1800_v32 = vpop.permute.xlu1 %1799 }
 0x318   :  { %v1822_v49 = vsel %vm485_vm3, %v1800_v32, %v1802_v14  ;;  %v1821_v57 = vsel %vm485_vm3, %v15582_v38, %v1800_v32 }
 0x319   :  { %2562 = vmatmul.mubr.bf16.vlgmr.msra.gmra.mrb[16].mxu0 %v15734_v59  ;;  %2647 = vmatprep.subr.bf16.mxu1 %v1822_v49 }
 0x31a   :  { %2571 = vmatprep.mubr.bf16.mxu0 %v15742_v44 }
 0x31b   :  { %2648 = vmatpush1.bf16.msra.mxu1 %v1821_v57  ;;  %v1816_v27 = vpop.permute.xlu0 %1815  ;;  %v1814_v42 = vpop.permute.xlu1 %1813 }
 0x31c   :  { %v1828_v46 = vsel %vm485_vm3, %v1814_v42, %v1816_v27  ;;  %v1827_v26 = vsel %vm485_vm3, %v15673_v54, %v1814_v42 }
 0x31d   :  { %2649 = vmatprep.subr.bf16.mxu1 %v1828_v46 }
 0x31f   :  { %2650 = vmatpush1.bf16.msra.mxu1 %v1827_v26  ;;  %v2190_v52 = vpop.permute.xlu0 %2189  ;;  %v2188_v51 = vpop.permute.xlu1 %2187 }
 0x320   :  { %2651 = vmatprep.subr.bf16.mxu1 %v15318_v19  ;;  %v2212_v38 = vsel %vm881_vm7, %v2188_v51, %v2190_v52  ;;  %v2211_v62 = vsel %vm881_vm7, %v15597_v9, %v2188_v51 }
 0x321   :  { %2572 = vmatmul.mubr.bf16.gmra.mrb[20].mxu0 %v15765_v4  ;;  %2582 = vmatprep.subr.bf16.mxu0 %v2212_v38 }
 0x322   :  { %2583 = vmatpush1.bf16.msra.mxu0 %v2211_v62  ;;  %2614 = vmatprep.mubr.bf16.mxu0 %v22076_v1 }
 0x323   :  { %2652 = vmatpush1.bf16.msra.mxu1 %v15315_v2  ;;  %v2204_v54 = vpop.permute.xlu0 %2203  ;;  %v2202_v29 = vpop.permute.xlu1 %2201 }
 0x324   :  { %2653 = vmatprep.subr.bf16.mxu1 %v15337_v39  ;;  %v2218_v8 = vsel %vm881_vm7, %v2202_v29, %v2204_v54  ;;  %v2217_v19 = vsel %vm881_vm7, %v15653_v15, %v2202_v29 }
 0x325   :  { %2584 = vmatprep.subr.bf16.mxu0 %v2218_v8 }
 0x326   :  { %2585 = vmatpush1.bf16.msra.mxu0 %v2217_v19 }
 0x327   :  { %2654 = vmatpush1.bf16.msra.mxu1 %v15335_v37  ;;  %v1918_v9 = vpop.permute.xlu0 %1917  ;;  %v1916_v48 = vpop.permute.xlu1 %1915 }
 0x328   :  { %v1938_v61 = vsel %vm602_vm4, %v1916_v48, %v1918_v9  ;;  %v1937_v2 = vsel %vm602_vm4, %v15701_v45, %v1916_v48 }
 0x329   :  { %13557 = vmatmul.mubr.msk.bf16.vlgmr.msra.gmra.mrb[16].mxu0 %vm1088_vm8, %v15782_v55  ;;  %2655 = vmatprep.subr.bf16.mxu1 %v1938_v61 }
 0x32a   :  { %2624 = vmatprep.mubr.bf16.mxu0 %v22076_v1 }
 0x32b   :  { %2656 = vmatpush1.bf16.msra.mxu1 %v1937_v2  ;;  %v1932_v39 = vpop.permute.xlu0 %1931  ;;  %v1930_v15 = vpop.permute.xlu1 %1929 }
 0x32c   :  { %v1944_v50 = vsel %vm602_vm4, %v1930_v15, %v1932_v39  ;;  %v1943_v37 = vsel %vm602_vm4, %v15771_v30, %v1930_v15 }
 0x32d   :  { %2657 = vmatprep.subr.bf16.mxu1 %v1944_v50 }
 0x32f   :  { %2658 = vmatpush1.bf16.msra.mxu1 %v1943_v37  ;;  %v2010_v20 = vpop.permute.xlu0 %2009  ;;  %v2008_v3 = vpop.permute.xlu1 %2007 }
 0x330   :  { %v2030_v45 = vsel %vm695_vm5, %v2008_v3, %v2010_v20  ;;  %v2029_v24 = vsel %vm695_vm5, %v15714_v56, %v2008_v3 }
 0x331   :  { %13558 = vmatmul.mubr.msk.bf16.gmra.mrb[20].mxu0 %vm1088_vm8, %v15807_v58  ;;  %2659 = vmatprep.subr.bf16.mxu1 %v2030_v45 }
 0x333   :  { %2660 = vmatpush1.bf16.msra.mxu1 %v2029_v24  ;;  %v2024_v18 = vpop.permute.xlu0 %2023  ;;  %v2022_v25 = vpop.permute.xlu1 %2021 }
 0x334   :  { %v2036_v53 = vsel %vm695_vm5, %v2022_v25, %v2024_v18  ;;  %v2035_v30 = vsel %vm695_vm5, %v15784_v6, %v2022_v25 }
 0x335   :  { %2661 = vmatprep.subr.bf16.mxu1 %v2036_v53 }
 0x337   :  { %2662 = vmatpush1.bf16.msra.mxu1 %v2035_v30  ;;  %v2102_v12 = vpop.permute.xlu0 %2101  ;;  %v2100_v47 = vpop.permute.xlu1 %2099 }
 0x338   :  { %v2122_v10 = vsel %vm788_vm6, %v2100_v47, %v2102_v12  ;;  %v2121_v56 = vsel %vm788_vm6, %v15809_v21, %v2100_v47 }
 0x339   :  { %2663 = vmatprep.subr.bf16.mxu1 %v2122_v10 }
 0x33b   :  { %2664 = vmatpush1.bf16.msra.mxu1 %v2121_v56  ;;  %v2116_v31 = vpop.permute.xlu0 %2115  ;;  %v2114_v13 = vpop.permute.xlu1 %2113 }
 0x33c   :  { %v2128_v11 = vsel %vm788_vm6, %v2114_v13, %v2116_v31  ;;  %v2127_v28 = vsel %vm788_vm6, %v15829_v23, %v2114_v13 }
 0x33d   :  { %2665 = vmatprep.subr.bf16.mxu1 %v2128_v11 }
 0x33f   :  { %2666 = vmatpush1.bf16.msra.mxu1 %v2127_v28  ;;  %v2194_v6 = vpop.permute.xlu0 %2193  ;;  %v2192_v36 = vpop.permute.xlu1 %2191 }
 0x340   :  { %v2214_v41 = vsel %vm881_vm7, %v2192_v36, %v2194_v6  ;;  %v2213_v43 = vsel %vm881_vm7, %v2190_v52, %v2192_v36 }
 0x341   :  { %2688 = vmatprep.subr.bf16.mxu1 %v2214_v41 }
 0x342   :  { %2668 = vmatmul.mubr.bf16.vlgmr.msra.gmra.mrb[16].mxu1 %v15734_v59 }
 0x343   :  { %2689 = vmatpush1.bf16.msra.mxu1 %v2213_v43  ;;  %v2208_v21 = vpop.permute.xlu0 %2207  ;;  %v2206_v35 = vpop.permute.xlu1 %2205  ;;  %2677 = vmatprep.mubr.bf16.mxu1 %v15742_v44 }
 0x344   :  { %v2220_v16 = vsel %vm881_vm7, %v2206_v35, %v2208_v21  ;;  %v2219_v23 = vsel %vm881_vm7, %v2204_v54, %v2206_v35 }
 0x345   :  { %2690 = vmatprep.subr.bf16.mxu1 %v2220_v16 }
 0x347   :  { %2691 = vmatpush1.bf16.msra.mxu1 %v2219_v23 }
 0x34a   :  { %2678 = vmatmul.mubr.bf16.gmra.mrb[20].mxu1 %v15765_v4 }
 0x34b   :  { %2720 = vmatprep.mubr.bf16.mxu1 %v22076_v1 }
 0x352   :  { %13559 = vmatmul.mubr.msk.bf16.vlgmr.msra.gmra.mrb[16].mxu1 %vm1088_vm8, %v15782_v55 }
 0x353   :  { %2730 = vmatprep.mubr.bf16.mxu1 %v22076_v1 }
 0x354   :  { %v15907_v59 = vpop.permute.xlu1 %2369  ;;  %v15910_v0 = vpop.permute.xlu0 %2374 }
 0x358   :  { %v15929_v54 = vpop.permute.xlu0 %2384  ;;  %v15935_v19 = vpop.permute.xlu1 %2379 }
 0x35a   :  { %13560 = vmatmul.mubr.msk.bf16.gmra.mrb[20].mxu1 %vm1088_vm8, %v15807_v58 }
 0x3d5   :  { %v2510_v44 = vpop.f32.mrb[8].mxu1 }
 0x3d6   :  { %v13777_v4 = vadd.f32 %v2510_v44, %v15907_v59  ;;  %v2512_v55 = vpop.f32.mrb[9].mxu1 }
 0x3d7   :  { %v2514_v34 = vpop.f32.mrb[10].mxu1  ;;  %v13778_v57 = vadd.f32 %v2512_v55, %v15907_v59 }
 0x3d8   :  { %v2741_v7 = vmax.f32 %v13777_v4, 0.0  ;;  %v13779_v33 = vadd.f32 %v2514_v34, %v15910_v0  ;;  %v2516_v14 = vpop.f32.mrb[11].mxu1 }
 0x3d9   :  { %v13780_v32 = vadd.f32 %v2516_v14, %v15910_v0  ;;  %v2742_v38 = vmax.f32 %v13778_v57, 0.0 }
 0x3da   :  { %v2747_v58 = vmax.f32 %v13779_v33, 0.0  ;;  %v15915_v49 = vmul.f32 %v2741_v7, %v15186_v60 }
 0x3db   :  { %v2748_v26 = vmax.f32 %v13780_v32, 0.0  ;;  %v15938_v9 = vmul.f32 %v2742_v38, %v15190_v5 }
 0x3dc   :  { %v15919_v27 = vmul.f32 %v2747_v58, %v15186_v60 }
 0x3dd   :  { %v2520_v42 = vpop.f32.mrb[12].mxu1  ;;  %v15932_v29 = vmul.f32 %v2748_v26, %v15190_v5  ;;  %22167 = vst [vmem:[#allocation5_spill] sm:$0xff] %v15938_v9 }
 0x3de   :  { %v15923_v46 = vpack.c.bf16 %v15919_v27, %v15915_v49  ;;  %v2522_v52 = vpop.f32.mrb[13].mxu1  ;;  %v13781_v48 = vadd.f32 %v2520_v42, %v15935_v19 }
 0x3df   :  { %v2524_v51 = vpop.f32.mrb[14].mxu1  ;;  %22166 = vst [vmem:[#allocation4_spill] sm:$0xff] %v15932_v29  ;;  %v15947_v61 = vpack.c.bf16 %v15932_v29, %v15938_v9  ;;  %v13782_v3 = vadd.f32 %v2522_v52, %v15935_v19 }
 0x3e0   :  { %v2526_v62 = vpop.f32.mrb[15].mxu1  ;;  %2935 = vrot.lane.b32.xlu0 %v15923_v46, %s14554_s24  ;;  %2843 = vrot.lane.b32.xlu1 %v15923_v46, %s14553_s17  ;;  %v13783_v8 = vadd.f32 %v2524_v51, %v15929_v54  ;;  %v2753_v39 = vmax.f32 %v13781_v48, 0.0 }
 0x3e1   :  { %v13784_v20 = vadd.f32 %v2526_v62, %v15929_v54  ;;  %v2754_v30 = vmax.f32 %v13782_v3, 0.0 }
 0x3e2   :  { %v2759_v2 = vmax.f32 %v13783_v8, 0.0  ;;  %v15957_v50 = vmul.f32 %v2753_v39, %v15186_v60 }
 0x3e3   :  { %v2760_v18 = vmax.f32 %v13784_v20, 0.0  ;;  %v15993_v47 = vmul.f32 %v2754_v30, %v15190_v5 }
 0x3e4   :  { %3119 = vrot.lane.b32.xlu0 %v15923_v46, %s14556_s26  ;;  %3027 = vrot.lane.b32.xlu1 %v15923_v46, %s14555_s25  ;;  %v15954_v15 = vmul.f32 %v2759_v2, %v15186_v60  ;;  %22169 = vst [vmem:[#allocation7_spill] sm:$0xff] %v15957_v50 }
 0x3e5   :  { %v15990_v12 = vmul.f32 %v2760_v18, %v15190_v5  ;;  %22171 = vst [vmem:[#allocation9_spill] sm:$0xff] %v15993_v47 }
 0x3e6   :  { %22168 = vst [vmem:[#allocation6_spill] sm:$0xff] %v15954_v15  ;;  %v15965_v37 = vpack.c.bf16 %v15954_v15, %v15957_v50  ;;  %v22188_v50 = vmov 0  }
 0x3e7   :  { %22170 = vst [vmem:[#allocation8_spill] sm:$0xff] %v15990_v12  ;;  %v16001_v31 = vpack.c.bf16 %v15990_v12, %v15993_v47 }
 0x3e8   :  { %2845 = vrot.lane.b32.xlu0 %v15947_v61, %s14553_s17  ;;  %3233 = vrot.lane.b32.xlu1 %v15923_v46, %s14557_s29 }
 0x3ec   :  { %3029 = vrot.lane.b32.xlu0 %v15947_v61, %s14555_s25  ;;  %3325 = vrot.lane.b32.xlu1 %v15923_v46, %s14558_s10 }
 0x3f0   :  { %3417 = vrot.lane.b32.xlu1 %v15923_v46, %s14559_s11  ;;  %2857 = vrot.lane.b32.xlu0 %v15965_v37, %s14553_s17 }
 0x3f4   :  { %3509 = vrot.lane.b32.xlu1 %v15923_v46, %s14560_s14  ;;  %3041 = vrot.lane.b32.xlu0 %v15965_v37, %s14555_s25 }
 0x3f8   :  { %2937 = vrot.lane.b32.xlu1 %v15947_v61, %s14554_s24  ;;  %3247 = vrot.lane.b32.xlu0 %v15965_v37, %s14557_s29 }
 0x3fc   :  { %3121 = vrot.lane.b32.xlu1 %v15947_v61, %s14556_s26  ;;  %3339 = vrot.lane.b32.xlu0 %v15965_v37, %s14558_s10  ;;  %v2616_v45 = vpop.f32.mrb[16].mxu0 }
 0x3fd   :  { %v2618_v24 = vpop.f32.mrb[17].mxu0  ;;  %v13785_v6 = vadd.f32 %v2616_v45, %v15907_v59 }
 0x3fe   :  { %v2620_v25 = vpop.f32.mrb[18].mxu0  ;;  %v13786_v44 = vadd.f32 %v2618_v24, %v15907_v59 }
 0x3ff   :  { %v2622_v53 = vpop.f32.mrb[19].mxu0  ;;  %v13787_v28 = vadd.f32 %v2620_v25, %v15910_v0  ;;  %v2743_v41 = vmax.f32 %v13785_v6, 0.0 }
 0x400   :  { %3235 = vrot.lane.b32.xlu1 %v15947_v61, %s14557_s29  ;;  %3431 = vrot.lane.b32.xlu0 %v15965_v37, %s14559_s11  ;;  %v13788_v16 = vadd.f32 %v2622_v53, %v15910_v0  ;;  %v2744_v58 = vmax.f32 %v13786_v44, 0.0 }
 0x401   :  { %v2749_v36 = vmax.f32 %v13787_v28, 0.0  ;;  %v16029_v21 = vmul.f32 %v2743_v41, %v15232_v17  ;;  %v16128_v28 = vld [vmem:[%s22072_s1 + $0x64] ss:$12 sps:$4 sm:$0xff]  }
 0x402   :  { %v2750_v34 = vmax.f32 %v13788_v16, 0.0  ;;  %v16062_v52 = vmul.f32 %v2744_v58, %v15236_v22  ;;  %3783 = vmatprep.mubr.bf16.mxu0 %v16128_v28  ;;  %3889 = vmatprep.mubr.bf16.mxu1 %v16128_v28 }
 0x403   :  { %v16026_v43 = vmul.f32 %v2749_v36, %v15232_v17  ;;  %22173 = vst [vmem:[#allocation11_spill] sm:$0xff] %v16029_v21 }
 0x404   :  { %3327 = vrot.lane.b32.xlu1 %v15947_v61, %s14558_s10  ;;  %3523 = vrot.lane.b32.xlu0 %v15965_v37, %s14560_s14  ;;  %v2626_v10 = vpop.f32.mrb[20].mxu0  ;;  %v16056_v42 = vmul.f32 %v2750_v34, %v15236_v22  ;;  %22176 = vst [vmem:[#allocation14_spill] sm:$0xff] %v16062_v52 }
 0x405   :  { %v2628_v56 = vpop.f32.mrb[21].mxu0  ;;  %22172 = vst [vmem:[#allocation10_spill] sm:$0xff] %v16026_v43  ;;  %v16037_v35 = vpack.c.bf16 %v16026_v43, %v16029_v21  ;;  %v13789_v4 = vadd.f32 %v2626_v10, %v15935_v19 }
 0x406   :  { %v2630_v13 = vpop.f32.mrb[22].mxu0  ;;  %22174 = vst [vmem:[#allocation12_spill] sm:$0xff] %v16056_v42  ;;  %v16073_v62 = vpack.c.bf16 %v16056_v42, %v16062_v52  ;;  %v13790_v3 = vadd.f32 %v2628_v56, %v15935_v19 }
 0x407   :  { %v2632_v11 = vpop.f32.mrb[23].mxu0  ;;  %v13791_v23 = vadd.f32 %v2630_v13, %v15929_v54  ;;  %v2755_v32 = vmax.f32 %v13789_v4, 0.0  ;;  %v16121_v13 = vpop.permute.xlu0 %14290 }
 0x408   :  { %3419 = vrot.lane.b32.xlu1 %v15947_v61, %s14559_s11  ;;  %2951 = vrot.lane.b32.xlu0 %v16001_v31, %s14554_s24  ;;  %v13792_v20 = vadd.f32 %v2632_v11, %v15929_v54  ;;  %v2756_v24 = vmax.f32 %v13790_v3, 0.0  ;;  %v16123_v11 = vpop.permute.xlu1 %14285  ;;  %v14292_v21 = vunpack.i.l.bf16 %v16121_v13  ;;  %v14293_v15 = vunpack.i.h.bf16 %v16121_v13 }
 0x409   :  { %v2761_v7 = vmax.f32 %v13791_v23, 0.0  ;;  %v16065_v51 = vmul.f32 %v2755_v32, %v15232_v17 }
 0x40a   :  { %v2762_v45 = vmax.f32 %v13792_v20, 0.0  ;;  %v16105_v25 = vmul.f32 %v2756_v24, %v15236_v22 }
 0x40b   :  { %v16059_v26 = vmul.f32 %v2761_v7, %v15232_v17  ;;  %22177 = vst [vmem:[#allocation15_spill] sm:$0xff] %v16065_v51  ;;  %v16148_v44 = vpop.permute.xlu0 %14300 }
 0x40c   :  { %3511 = vrot.lane.b32.xlu1 %v15947_v61, %s14560_s14  ;;  %3135 = vrot.lane.b32.xlu0 %v16001_v31, %s14556_s26  ;;  %v16102_v18 = vmul.f32 %v2762_v45, %v15236_v22  ;;  %22179 = vst [vmem:[#allocation17_spill] sm:$0xff] %v16105_v25  ;;  %v16150_v4 = vpop.permute.xlu1 %14295 }
 0x40d   :  { %22175 = vst [vmem:[#allocation13_spill] sm:$0xff] %v16059_v26  ;;  %v16077_v8 = vpack.c.bf16 %v16059_v26, %v16065_v51  ;;  %v14288_v26 = vunpack.i.h.bf16 %v16123_v11  ;;  %v14297_v13 = vunpack.i.l.bf16 %v16150_v4 }
 0x40e   :  { %22178 = vst [vmem:[#allocation16_spill] sm:$0xff] %v16102_v18  ;;  %v16113_v53 = vpack.c.bf16 %v16102_v18, %v16105_v25 }
 0x410   :  { %2949 = vrot.lane.b32.xlu1 %v15965_v37, %s14554_s24  ;;  %3249 = vrot.lane.b32.xlu0 %v16001_v31, %s14557_s29 }
 0x414   :  { %3133 = vrot.lane.b32.xlu1 %v15965_v37, %s14556_s26  ;;  %3341 = vrot.lane.b32.xlu0 %v16001_v31, %s14558_s10 }
 0x418   :  { %2859 = vrot.lane.b32.xlu1 %v16001_v31, %s14553_s17  ;;  %3433 = vrot.lane.b32.xlu0 %v16001_v31, %s14559_s11 }
 0x41c   :  { %3043 = vrot.lane.b32.xlu1 %v16001_v31, %s14555_s25  ;;  %3525 = vrot.lane.b32.xlu0 %v16001_v31, %s14560_s14 }
 0x420   :  { %2847 = vrot.lane.b32.xlu1 %v16037_v35, %s14553_s17  ;;  %3237 = vrot.lane.b32.xlu0 %v16037_v35, %s14557_s29 }
 0x424   :  { %2939 = vrot.lane.b32.xlu1 %v16037_v35, %s14554_s24  ;;  %3329 = vrot.lane.b32.xlu0 %v16037_v35, %s14558_s10 }
 0x425   :  { %v2722_v55 = vpop.f32.mrb[16].mxu1 }
 0x426   :  { %v2724_v33 = vpop.f32.mrb[17].mxu1  ;;  %v13793_v10 = vadd.f32 %v2722_v55, %v15907_v59 }
 0x427   :  { %v2726_v14 = vpop.f32.mrb[18].mxu1  ;;  %v13794_v23 = vadd.f32 %v2724_v33, %v15907_v59 }
 0x428   :  { %v2728_v57 = vpop.f32.mrb[19].mxu1  ;;  %3031 = vrot.lane.b32.xlu1 %v16037_v35, %s14555_s25  ;;  %3421 = vrot.lane.b32.xlu0 %v16037_v35, %s14559_s11  ;;  %v13795_v30 = vadd.f32 %v2726_v14, %v15910_v0  ;;  %v2745_v6 = vmax.f32 %v13793_v10, 0.0  ;;  %v14287_v10 = vunpack.i.l.bf16 %v16123_v11 }
 0x429   :  { %v13796_v41 = vadd.f32 %v2728_v57, %v15910_v0  ;;  %v2746_v34 = vmax.f32 %v13794_v23, 0.0 }
 0x42a   :  { %v2751_v56 = vmax.f32 %v13795_v30, 0.0  ;;  %v16141_v16 = vmul.f32 %v2745_v6, %v15296_v40 }
 0x42b   :  { %v2752_v0 = vmax.f32 %v13796_v41, 0.0  ;;  %v16166_v14 = vmul.f32 %v2746_v34, %v15304_v63 }
 0x42c   :  { %3123 = vrot.lane.b32.xlu1 %v16037_v35, %s14556_s26  ;;  %3513 = vrot.lane.b32.xlu0 %v16037_v35, %s14560_s14  ;;  %v16137_v36 = vmul.f32 %v2751_v56, %v15296_v40  ;;  %22181 = vst [vmem:[#allocation19_spill] sm:$0xff] %v16141_v16 }
 0x42d   :  { %v2732_v38 = vpop.f32.mrb[20].mxu1  ;;  %v16161_v59 = vmul.f32 %v2752_v0, %v15304_v63  ;;  %22183 = vst [vmem:[#allocation21_spill] sm:$0xff] %v16166_v14 }
 0x42e   :  { %v16079_v48 = vpop.f32.mrb[21].mxu1  ;;  %22180 = vst [vmem:[#allocation18_spill] sm:$0xff] %v16137_v36  ;;  %v16154_v55 = vpack.c.bf16 %v16137_v36, %v16141_v16  ;;  %v13797_v3 = vadd.f32 %v2732_v38, %v15935_v19 }
 0x42f   :  { %v2736_v2 = vpop.f32.mrb[22].mxu1  ;;  %22182 = vst [vmem:[#allocation20_spill] sm:$0xff] %v16161_v59  ;;  %v16174_v58 = vpack.c.bf16 %v16161_v59, %v16166_v14 }
 0x430   :  { %v16081_v39 = vpop.f32.mrb[23].mxu1  ;;  %3251 = vrot.lane.b32.xlu1 %v16077_v8, %s14557_s29  ;;  %2849 = vrot.lane.b32.xlu0 %v16073_v62, %s14553_s17  ;;  %v13799_v32 = vadd.f32 %v2736_v2, %v15929_v54  ;;  %v2757_v56 = vmax.f32 %v13797_v3, 0.0 }
 0x431   :  { %v13800_v41 = vadd.f32 %v16081_v39, %v15929_v54 }
 0x432   :  { %v2763_v45 = vmax.f32 %v13799_v32, 0.0  ;;  %v16208_v34 = vmul.f32 %v2757_v56, %v15296_v40  ;;  %v13798_v32 = vadd.f32 %v16079_v48, %v15935_v19 }
 0x433   :  { %v2764_v39 = vmax.f32 %v13800_v41, 0.0 }
 0x434   :  { %3343 = vrot.lane.b32.xlu1 %v16077_v8, %s14558_s10  ;;  %2941 = vrot.lane.b32.xlu0 %v16073_v62, %s14554_s24  ;;  %v16199_v6 = vmul.f32 %v2763_v45, %v15296_v40  ;;  %22185 = vst [vmem:[#allocation23_spill] sm:$0xff] %v16208_v34  ;;  %v2758_v45 = vmax.f32 %v13798_v32, 0.0 }
 0x435   :  { %v16227_v19 = vmul.f32 %v2764_v39, %v15304_v63 }
 0x436   :  { %22184 = vst [vmem:[#allocation22_spill] sm:$0xff] %v16199_v6  ;;  %v16218_v54 = vpack.c.bf16 %v16199_v6, %v16208_v34 }
 0x437   :  { %22186 = vst [vmem:[#allocation24_spill] sm:$0xff] %v16227_v19 }
 0x438   :  { %3435 = vrot.lane.b32.xlu1 %v16077_v8, %s14559_s11  ;;  %3033 = vrot.lane.b32.xlu0 %v16073_v62, %s14555_s25 }
 0x43c   :  { %3137 = vrot.lane.b32.xlu1 %v16077_v8, %s14556_s26  ;;  %3125 = vrot.lane.b32.xlu0 %v16073_v62, %s14556_s26 }
 0x440   :  { %3527 = vrot.lane.b32.xlu1 %v16077_v8, %s14560_s14  ;;  %2861 = vrot.lane.b32.xlu0 %v16077_v8, %s14553_s17 }
 0x444   :  { %2863 = vrot.lane.b32.xlu1 %v16113_v53, %s14553_s17  ;;  %2953 = vrot.lane.b32.xlu0 %v16077_v8, %s14554_s24 }
 0x448   :  { %3239 = vrot.lane.b32.xlu1 %v16073_v62, %s14557_s29  ;;  %3045 = vrot.lane.b32.xlu0 %v16077_v8, %s14555_s25 }
 0x44c   :  { %2955 = vrot.lane.b32.xlu1 %v16113_v53, %s14554_s24  ;;  %3139 = vrot.lane.b32.xlu0 %v16113_v53, %s14556_s26 }
 0x450   :  { %3331 = vrot.lane.b32.xlu1 %v16073_v62, %s14558_s10  ;;  %3241 = vrot.lane.b32.xlu0 %v16154_v55, %s14557_s29 }
 0x452   :  { %v16163_v7 = vpop.permute.xlu0 %2935  ;;  %v2844_v33 = vpop.permute.xlu1 %2843 }
 0x453   :  { %v2869_v38 = vsel %vm206_vm0, %v14287_v10, %v2844_v33 }
 0x454   :  { %3047 = vrot.lane.b32.xlu1 %v16113_v53, %s14555_s25  ;;  %3333 = vrot.lane.b32.xlu0 %v16154_v55, %s14558_s10 }
 0x456   :  { %v16177_v57 = vpop.permute.xlu0 %3119  ;;  %v16179_v20 = vpop.permute.xlu1 %3027 }
 0x458   :  { %3253 = vrot.lane.b32.xlu1 %v16113_v53, %s14557_s29  ;;  %2853 = vrot.lane.b32.xlu0 %v16174_v58, %s14553_s17 }
 0x45a   :  { %v16186_v24 = vpop.permute.xlu0 %2845  ;;  %v16188_v30 = vpop.permute.xlu1 %3233 }
 0x45b   :  { %v2870_v2 = vsel %vm206_vm0, %v2844_v33, %v16186_v24 }
 0x45c   :  { %3345 = vrot.lane.b32.xlu1 %v16113_v53, %s14558_s10  ;;  %2945 = vrot.lane.b32.xlu0 %v16174_v58, %s14554_s24 }
 0x45d   :  { %3751 = vmatprep.subr.bf16.mxu0 %v2870_v2  ;;  %v16234_v2 = vmul.f32 %v2758_v45, %v15304_v63 }
 0x45e   :  { %3752 = vmatpush1.bf16.msra.mxu0 %v2869_v38  ;;  %v16203_v23 = vpop.permute.xlu0 %3029  ;;  %v16205_v0 = vpop.permute.xlu1 %3325 }
 0x45f   :  { %22187 = vst [vmem:[#allocation25_spill] sm:$0xff] %v16234_v2  ;;  %v16242_v56 = vpack.c.bf16 %v16227_v19, %v16234_v2 }
 0x460   :  { %2851 = vrot.lane.b32.xlu1 %v16154_v55, %s14553_s17  ;;  %3037 = vrot.lane.b32.xlu0 %v16174_v58, %s14555_s25 }
 0x462   :  { %v2858_v33 = vpop.permute.xlu0 %2857  ;;  %v16220_v3 = vpop.permute.xlu1 %3417 }
 0x463   :  { %v2875_v43 = vsel %vm206_vm0, %v14288_v26, %v2858_v33 }
 0x464   :  { %2943 = vrot.lane.b32.xlu1 %v16154_v55, %s14554_s24  ;;  %3255 = vrot.lane.b32.xlu0 %v16218_v54, %s14557_s29 }
 0x466   :  { %v16229_v48 = vpop.permute.xlu0 %3041  ;;  %v16231_v10 = vpop.permute.xlu1 %3509 }
 0x468   :  { %3035 = vrot.lane.b32.xlu1 %v16154_v55, %s14555_s25  ;;  %3347 = vrot.lane.b32.xlu0 %v16218_v54, %s14558_s10 }
 0x46a   :  { %v16244_v38 = vpop.permute.xlu0 %3247  ;;  %v16246_v41 = vpop.permute.xlu1 %2937 }
 0x46b   :  { %v2962_v11 = vsel %vm299_vm1, %v16163_v7, %v16246_v41 }
 0x46c   :  { %2865 = vrot.lane.b32.xlu1 %v16218_v54, %s14553_s17  ;;  %2867 = vrot.lane.b32.xlu0 %v16242_v56, %s14553_s17 }
 0x46e   :  { %v16252_v32 = vpop.permute.xlu0 %3339  ;;  %v16254_v39 = vpop.permute.xlu1 %3121 }
 0x470   :  { %3423 = vrot.lane.b32.xlu1 %v16073_v62, %s14559_s11  ;;  %3425 = vrot.lane.b32.xlu0 %v16154_v55, %s14559_s11 }
 0x472   :  { %v16260_v45 = vpop.permute.xlu0 %3431  ;;  %v16262_v1 = vpop.permute.xlu1 %3235 }
 0x474   :  { %2957 = vrot.lane.b32.xlu1 %v16218_v54, %s14554_s24  ;;  %2959 = vrot.lane.b32.xlu0 %v16242_v56, %s14554_s24 }
 0x476   :  { %v16268_v2 = vpop.permute.xlu0 %3523  ;;  %v16270_v19 = vpop.permute.xlu1 %3327 }
 0x478   :  { %3049 = vrot.lane.b32.xlu1 %v16218_v54, %s14555_s25  ;;  %3439 = vrot.lane.b32.xlu0 %v16218_v54, %s14559_s11 }
 0x47a   :  { %v16276_v34 = vpop.permute.xlu0 %2951  ;;  %v16278_v6 = vpop.permute.xlu1 %3419 }
 0x47c   :  { %3437 = vrot.lane.b32.xlu1 %v16113_v53, %s14559_s11  ;;  %3051 = vrot.lane.b32.xlu0 %v16242_v56, %s14555_s25 }
 0x47e   :  { %v16284_v14 = vpop.permute.xlu0 %3135  ;;  %v16286_v59 = vpop.permute.xlu1 %3511 }
 0x480   :  { %3127 = vrot.lane.b32.xlu1 %v16154_v55, %s14556_s26  ;;  %3129 = vrot.lane.b32.xlu0 %v16174_v58, %s14556_s26 }
 0x482   :  { %v16292_v16 = vpop.permute.xlu0 %3249  ;;  %v2950_v36 = vpop.permute.xlu1 %2949 }
 0x484   :  { %3141 = vrot.lane.b32.xlu1 %v16218_v54, %s14556_s26  ;;  %3143 = vrot.lane.b32.xlu0 %v16242_v56, %s14556_s26 }
 0x486   :  { %v16298_v25 = vpop.permute.xlu0 %3341  ;;  %v16300_v18 = vpop.permute.xlu1 %3133 }
 0x488   :  { %3515 = vrot.lane.b32.xlu1 %v16073_v62, %s14560_s14  ;;  %3517 = vrot.lane.b32.xlu0 %v16154_v55, %s14560_s14 }
 0x48a   :  { %v16306_v51 = vpop.permute.xlu0 %3433  ;;  %v16308_v52 = vpop.permute.xlu1 %2859 }
 0x48b   :  { %v2876_v42 = vsel %vm206_vm0, %v2858_v33, %v16308_v52  ;;  %v2968_v33 = vsel %vm299_vm1, %v2950_v36, %v16276_v34 }
 0x48c   :  { %3529 = vrot.lane.b32.xlu1 %v16113_v53, %s14560_s14  ;;  %3531 = vrot.lane.b32.xlu0 %v16218_v54, %s14560_s14 }
 0x48d   :  { %3753 = vmatprep.subr.bf16.mxu0 %v2876_v42  ;;  %v2961_v42 = vsel %vm299_vm1, %v14292_v21, %v16163_v7 }
 0x48e   :  { %3754 = vmatpush1.bf16.msra.mxu0 %v2875_v43  ;;  %v16319_v47 = vpop.permute.xlu0 %3525  ;;  %v16321_v12 = vpop.permute.xlu1 %3043 }
 0x48f   :  { %3755 = vmatprep.subr.bf16.mxu0 %v2962_v11  ;;  %v2967_v11 = vsel %vm299_vm1, %v14293_v15, %v2950_v36  ;;  %v3053_v15 = vsel %vm392_vm2, %v14297_v13, %v16179_v20 }
 0x490   :  { %3243 = vrot.lane.b32.xlu1 %v16174_v58, %s14557_s29  ;;  %3245 = vrot.lane.b32.xlu0 %v22188_v50, %s14557_s29 }
 0x492   :  { %3756 = vmatpush1.bf16.msra.mxu0 %v2961_v42  ;;  %v16332_v43 = vpop.permute.xlu0 %3237  ;;  %v2848_v26 = vpop.permute.xlu1 %2847  ;;  %v3054_v42 = vsel %vm392_vm2, %v16179_v20, %v16203_v23  ;;  %v14302_v20 = vunpack.i.l.bf16 %v16148_v44 }
 0x493   :  { %3757 = vmatprep.subr.bf16.mxu0 %v2968_v33 }
 0x494   :  { %3257 = vrot.lane.b32.xlu1 %v16242_v56, %s14557_s29  ;;  %3259 = vrot.lane.b32.xlu0 %v22188_v50, %s14557_s29 }
 0x496   :  { %3758 = vmatpush1.bf16.msra.mxu0 %v2967_v11  ;;  %v16342_v21 = vpop.permute.xlu0 %3329  ;;  %v16344_v7 = vpop.permute.xlu1 %2939  ;;  %v3060_v11 = vsel %vm392_vm2, %v16229_v48, %v16321_v12 }
 0x497   :  { %3759 = vmatprep.subr.bf16.mxu0 %v3054_v42  ;;  %v14298_v42 = vunpack.i.h.bf16 %v16150_v4  ;;  %v3146_v4 = vsel %vm485_vm3, %v16177_v57, %v16254_v39 }
 0x498   :  { %3335 = vrot.lane.b32.xlu1 %v16174_v58, %s14558_s10  ;;  %3337 = vrot.lane.b32.xlu0 %v22188_v50, %s14558_s10 }
 0x499   :  { %v3059_v13 = vsel %vm392_vm2, %v14298_v42, %v16229_v48 }
 0x49a   :  { %3760 = vmatpush1.bf16.msra.mxu0 %v3053_v15  ;;  %v16356_v36 = vpop.permute.xlu0 %3421  ;;  %v16358_v33 = vpop.permute.xlu1 %3031 }
 0x49b   :  { %3761 = vmatprep.subr.bf16.mxu0 %v3060_v11  ;;  %v3145_v11 = vsel %vm485_vm3, %v14302_v20, %v16177_v57  ;;  %v2871_v20 = vsel %vm206_vm0, %v16186_v24, %v2848_v26 }
 0x49c   :  { %3351 = vrot.lane.b32.xlu0 %v22188_v50, %s14558_s10  ;;  %3349 = vrot.lane.b32.xlu1 %v16242_v56, %s14558_s10 }
 0x49e   :  { %3762 = vmatpush1.bf16.msra.mxu0 %v3059_v13  ;;  %v16371_v15 = vpop.permute.xlu0 %3513  ;;  %v16373_v9 = vpop.permute.xlu1 %3123  ;;  %v3152_v13 = vsel %vm485_vm3, %v16300_v18, %v16284_v14 }
 0x49f   :  { %3763 = vmatprep.subr.bf16.mxu0 %v3146_v4  ;;  %v14303_v4 = vunpack.i.h.bf16 %v16148_v44 }
 0x4a0   :  { %3429 = vrot.lane.b32.xlu0 %v22188_v50, %s14559_s11  ;;  %3427 = vrot.lane.b32.xlu1 %v16174_v58, %s14559_s11 }
 0x4a1   :  { %v3151_v57 = vsel %vm485_vm3, %v14303_v4, %v16300_v18  ;;  %v13572_v4 = vld [vmem:[%s22073_s2 + $0x58] sm:$0xff] }
 0x4a2   :  { %3764 = vmatpush1.bf16.msra.mxu0 %v3145_v11  ;;  %v16384_v48 = vpop.permute.xlu0 %2849  ;;  %v16386_v42 = vpop.permute.xlu1 %3251 }
 0x4a3   :  { %3765 = vmatprep.subr.bf16.mxu0 %v3152_v13  ;;  %v2872_v29 = vsel %vm206_vm0, %v2848_v26, %v16384_v48  ;;  %v3261_v13 = vsel %vm602_vm4, %v16188_v30, %v16262_v1 }
 0x4a4   :  { %3443 = vrot.lane.b32.xlu0 %v22188_v50, %s14559_s11  ;;  %3441 = vrot.lane.b32.xlu1 %v16242_v56, %s14559_s11 }
 0x4a5   :  { %3857 = vmatprep.subr.bf16.mxu1 %v2872_v29 }
 0x4a6   :  { %3766 = vmatpush1.bf16.msra.mxu0 %v3151_v57  ;;  %3858 = vmatpush1.bf16.msra.mxu1 %v2871_v20  ;;  %v16402_v44 = vpop.permute.xlu0 %2941  ;;  %v16404_v11 = vpop.permute.xlu1 %3343 }
 0x4a7   :  { %3767 = vmatprep.subr.bf16.mxu0 %v15947_v61  ;;  %v13570_v61 = vld [vmem:[%s22073_s2 + $0x48] sm:$0xff] }
 0x4a8   :  { %3521 = vrot.lane.b32.xlu0 %v22188_v50, %s14560_s14  ;;  %3519 = vrot.lane.b32.xlu1 %v16174_v58, %s14560_s14 }
 0x4aa   :  { %3768 = vmatpush1.bf16.msra.mxu0 %v15923_v46  ;;  %v16412_v29 = vpop.permute.xlu0 %3033  ;;  %v16414_v18 = vpop.permute.xlu1 %3435  ;;  %v13569_v46 = vld [vmem:[%s22073_s2 + $0x40] sm:$0xff] }
 0x4ab   :  { %3769 = vmatprep.subr.bf16.mxu0 %v16001_v31  ;;  %v3262_v31 = vsel %vm602_vm4, %v16262_v1, %v16332_v43  ;;  %v3267_v1 = vsel %vm602_vm4, %v16244_v38, %v16292_v16  ;;  %v2964_v38 = vsel %vm299_vm1, %v16344_v7, %v16402_v44 }
 0x4ac   :  { %3535 = vrot.lane.b32.xlu0 %v22188_v50, %s14560_s14  ;;  %3533 = vrot.lane.b32.xlu1 %v16242_v56, %s14560_s14 }
 0x4ae   :  { %3770 = vmatpush1.bf16.msra.mxu0 %v15965_v37  ;;  %v16428_v24 = vpop.permute.xlu0 %3125  ;;  %v16430_v26 = vpop.permute.xlu1 %3137  ;;  %v13571_v37 = vld [vmem:[%s22073_s2 + $0x50] sm:$0xff] }
 0x4af   :  { %3771 = vmatprep.subr.bf16.mxu0 %v3262_v31  ;;  %v3354_v31 = vsel %vm695_vm5, %v16270_v19, %v16342_v21 }
 0x4b0   :  { %3702 = vperm.xlu0 %14262, %v13570_v61   ;;  %3697 = vperm.xlu1 %14263, %v13569_v46   ;;  %v3268_v61 = vsel %vm602_vm4, %v16292_v16, %v16386_v42  ;;  %v3353_v16 = vsel %vm695_vm5, %v16205_v0, %v16270_v19  ;;  %v3359_v0 = vsel %vm695_vm5, %v16252_v32, %v16298_v25 }
 0x4b1   :  { %v3056_v32 = vsel %vm392_vm2, %v16358_v33, %v16412_v29 }
 0x4b2   :  { %3772 = vmatpush1.bf16.msra.mxu0 %v3261_v13  ;;  %v2862_v57 = vpop.permute.xlu0 %2861  ;;  %v16444_v20 = vpop.permute.xlu1 %3527 }
 0x4b3   :  { %3773 = vmatprep.subr.bf16.mxu0 %v3268_v61 }
 0x4b4   :  { %3712 = vperm.xlu0 %14262, %v13572_v4   ;;  %3707 = vperm.xlu1 %14263, %v13571_v37   ;;  %v2877_v4 = vsel %vm206_vm0, %v16308_v52, %v2862_v57  ;;  %v2963_v52 = vsel %vm299_vm1, %v16246_v41, %v16344_v7 }
 0x4b6   :  { %3774 = vmatpush1.bf16.msra.mxu0 %v3267_v1  ;;  %v2954_v30 = vpop.permute.xlu0 %2953  ;;  %v16452_v46 = vpop.permute.xlu1 %2863  ;;  %v3360_v1 = vsel %vm695_vm5, %v16298_v25, %v16404_v11  ;;  %v3445_v25 = vsel %vm788_vm6, %v16220_v3, %v16278_v6  ;;  %v16511_v3 = vld [vmem:[%s22072_s1 + $0x60] ss:$12 sps:$4 sm:$0xff]  }
 0x4b7   :  { %3775 = vmatprep.subr.bf16.mxu0 %v3354_v31  ;;  %v2878_v13 = vsel %vm206_vm0, %v2862_v57, %v16452_v46  ;;  %v3446_v31 = vsel %vm788_vm6, %v16278_v6, %v16356_v36  ;;  %v2969_v41 = vsel %vm299_vm1, %v16276_v34, %v2954_v30  ;;  %v3055_v6 = vsel %vm392_vm2, %v16203_v23, %v16358_v33 }
 0x4b8   :  { %3859 = vmatprep.subr.bf16.mxu1 %v2878_v13  ;;  %v3451_v34 = vsel %vm788_vm6, %v16260_v45, %v16306_v51  ;;  %v3537_v33 = vsel %vm881_vm7, %v16231_v10, %v16286_v59  ;;  %14310 = vrot.lane.b32.xlu0 %v22188_v50, %s14554_s24 }
 0x4b9   :  { %3860 = vmatpush1.bf16.msra.mxu1 %v2877_v4  ;;  %14305 = vrot.lane.b32.xlu1 %v22188_v50, %s14553_s17 }
 0x4ba   :  { %3776 = vmatpush1.bf16.msra.mxu0 %v3353_v16  ;;  %v3046_v37 = vpop.permute.xlu0 %3045  ;;  %3861 = vmatprep.subr.bf16.mxu1 %v2964_v38  ;;  %v16467_v61 = vpop.permute.xlu1 %3239  ;;  %v3452_v16 = vsel %vm788_vm6, %v16306_v51, %v16414_v18  ;;  %v16525_v51 = vld [vmem:[%s22072_s1 + $0x7c] ss:$12 sps:$4 sm:$0xff]  }
 0x4bb   :  { %3777 = vmatprep.subr.bf16.mxu0 %v3360_v1  ;;  %v3538_v1 = vsel %vm881_vm7, %v16286_v59, %v16371_v15  ;;  %v3061_v45 = vsel %vm392_vm2, %v16321_v12, %v3046_v37  ;;  %v3147_v12 = vsel %vm485_vm3, %v16254_v39, %v16373_v9  ;;  %v3543_v59 = vsel %vm881_vm7, %v16268_v2, %v16319_v47 }
 0x4bc   :  { %14320 = vrot.lane.b32.xlu0 %v22188_v50, %s14556_s26 }
 0x4bd   :  { %3862 = vmatpush1.bf16.msra.mxu1 %v2963_v52  ;;  %v3148_v52 = vsel %vm485_vm3, %v16373_v9, %v16428_v24  ;;  %v3153_v9 = vsel %vm485_vm3, %v16284_v14, %v16430_v26  ;;  %14315 = vrot.lane.b32.xlu1 %v22188_v50, %s14555_s25 }
 0x4be   :  { %3778 = vmatpush1.bf16.msra.mxu0 %v3359_v0  ;;  %v16478_v19 = vpop.permute.xlu0 %3139  ;;  %v16480_v57 = vpop.permute.xlu1 %2955 }
 0x4bf   :  { %3779 = vmatprep.subr.bf16.mxu0 %v3446_v31  ;;  %v2970_v13 = vsel %vm299_vm1, %v2954_v30, %v16480_v57  ;;  %v3154_v10 = vsel %vm485_vm3, %v16430_v26, %v16478_v19 }
 0x4c0   :  { %3863 = vmatprep.subr.bf16.mxu1 %v2970_v13  ;;  %v3544_v13 = vsel %vm881_vm7, %v16319_v47, %v16444_v20 }
 0x4c1   :  { %3864 = vmatpush1.bf16.msra.mxu1 %v2969_v41 }
 0x4c2   :  { %3780 = vmatpush1.bf16.msra.mxu0 %v3445_v25  ;;  %v16495_v7 = vpop.permute.xlu0 %3241  ;;  %3865 = vmatprep.subr.bf16.mxu1 %v3056_v32  ;;  %v16497_v4 = vpop.permute.xlu1 %3331  ;;  %v16565_v32 = vld [vmem:[%s22072_s1 + $0x68] ss:$12 sps:$4 sm:$0xff]  }
 0x4c3   :  { %3781 = vmatprep.subr.bf16.mxu0 %v3452_v16 }
 0x4c5   :  { %3866 = vmatpush1.bf16.msra.mxu1 %v3055_v6 }
 0x4c6   :  { %3782 = vmatpush1.bf16.msra.mxu0 %v3451_v34  ;;  %v16513_v30 = vpop.permute.xlu0 %3333  ;;  %v16515_v38 = vpop.permute.xlu1 %3047 }
 0x4c7   :  { %3804 = vmatprep.subr.bf16.mxu0 %v3538_v1  ;;  %v3062_v23 = vsel %vm392_vm2, %v3046_v37, %v16515_v38  ;;  %v16552_v37 = vld [vmem:[%s22072_s1 + $0x78] ss:$12 sps:$4 sm:$0xff]  }
 0x4c8   :  { %3867 = vmatprep.subr.bf16.mxu1 %v3062_v23 }
 0x4c9   :  { %3784 = vmatmul.mubr.bf16.vlgmr.msra.gmra.mrb[24].mxu0 %v16511_v3  ;;  %3868 = vmatpush1.bf16.msra.mxu1 %v3061_v45 }
 0x4ca   :  { %3805 = vmatpush1.bf16.msra.mxu0 %v3537_v33  ;;  %v2854_v0 = vpop.permute.xlu0 %2853  ;;  %3869 = vmatprep.subr.bf16.mxu1 %v3148_v52  ;;  %v3254_v31 = vpop.permute.xlu1 %3253 }
 0x4cb   :  { %3806 = vmatprep.subr.bf16.mxu0 %v3544_v13  ;;  %3793 = vmatprep.mubr.bf16.mxu0 %v16525_v51 }
 0x4cd   :  { %3870 = vmatpush1.bf16.msra.mxu1 %v3147_v12 }
 0x4ce   :  { %3807 = vmatpush1.bf16.msra.mxu0 %v3543_v59  ;;  %v2946_v41 = vpop.permute.xlu0 %2945  ;;  %3871 = vmatprep.subr.bf16.mxu1 %v3154_v10  ;;  %v3346_v25 = vpop.permute.xlu1 %3345 }
 0x4d1   :  { %3794 = vmatmul.mubr.bf16.gmra.mrb[28].mxu0 %v16552_v37  ;;  %3872 = vmatpush1.bf16.msra.mxu1 %v3153_v9 }
 0x4d2   :  { %v3038_v47 = vpop.permute.xlu0 %3037  ;;  %3873 = vmatprep.subr.bf16.mxu1 %v16073_v62  ;;  %v2852_v2 = vpop.permute.xlu1 %2851  ;;  %3836 = vmatprep.mubr.bf16.mxu0 %v22188_v50 }
 0x4d3   :  { %v2874_v39 = vsel %vm206_vm0, %v2852_v2, %v2854_v0  ;;  %v2873_v62 = vsel %vm206_vm0, %v16384_v48, %v2852_v2 }
 0x4d4   :  { %3963 = vmatprep.subr.bf16.mxu0 %v2874_v39 }
 0x4d5   :  { %3874 = vmatpush1.bf16.msra.mxu1 %v16037_v35  ;;  %v3264_v35 = vsel %vm602_vm4, %v16467_v61, %v16495_v7 }
 0x4d6   :  { %v16567_v14 = vpop.permute.xlu0 %3255  ;;  %3875 = vmatprep.subr.bf16.mxu1 %v16113_v53  ;;  %v2944_v26 = vpop.permute.xlu1 %2943  ;;  %v3263_v53 = vsel %vm602_vm4, %v16332_v43, %v16467_v61  ;;  %v3269_v43 = vsel %vm602_vm4, %v16386_v42, %v3254_v31  ;;  %v3356_v61 = vsel %vm695_vm5, %v16497_v4, %v16513_v30  ;;  %v3355_v42 = vsel %vm695_vm5, %v16342_v21, %v16497_v4 }
 0x4d7   :  { %v3270_v48 = vsel %vm602_vm4, %v3254_v31, %v16567_v14  ;;  %v2966_v0 = vsel %vm299_vm1, %v2944_v26, %v2946_v41  ;;  %v3361_v21 = vsel %vm695_vm5, %v16404_v11, %v3346_v25 }
 0x4d9   :  { %13579 = vmatmul.mubr.msk.bf16.vlgmr.msra.gmra.mrb[24].mxu0 %vm1088_vm8, %v16565_v32  ;;  %3876 = vmatpush1.bf16.msra.mxu1 %v16077_v8  ;;  %v16589_v8 = vld [vmem:[%s22072_s1 + $0x80] ss:$12 sps:$4 sm:$0xff]  }
 0x4da   :  { %3964 = vmatpush1.bf16.msra.mxu0 %v2873_v62  ;;  %v16578_v16 = vpop.permute.xlu0 %3347  ;;  %3877 = vmatprep.subr.bf16.mxu1 %v3264_v35  ;;  %v3036_v6 = vpop.permute.xlu1 %3035 }
 0x4db   :  { %3846 = vmatprep.mubr.bf16.mxu0 %v22188_v50  ;;  %v3362_v31 = vsel %vm695_vm5, %v3346_v25, %v16578_v16  ;;  %v3058_v41 = vsel %vm392_vm2, %v3036_v6, %v3038_v47 }
 0x4dd   :  { %3878 = vmatpush1.bf16.msra.mxu1 %v3263_v53 }
 0x4de   :  { %v2868_v34 = vpop.permute.xlu0 %2867  ;;  %3879 = vmatprep.subr.bf16.mxu1 %v3270_v48  ;;  %v2866_v1 = vpop.permute.xlu1 %2865 }
 0x4df   :  { %v2880_v23 = vsel %vm206_vm0, %v2866_v1, %v2868_v34  ;;  %v2879_v45 = vsel %vm206_vm0, %v16452_v46, %v2866_v1  ;;  %v2965_v46 = vsel %vm299_vm1, %v16402_v44, %v2944_v26 }
 0x4e0   :  { %3965 = vmatprep.subr.bf16.mxu0 %v2880_v23 }
 0x4e1   :  { %13580 = vmatmul.mubr.msk.bf16.gmra.mrb[28].mxu0 %vm1088_vm8, %v16589_v8  ;;  %3880 = vmatpush1.bf16.msra.mxu1 %v3269_v43 }
 0x4e2   :  { %3966 = vmatpush1.bf16.msra.mxu0 %v2879_v45  ;;  %v16601_v33 = vpop.permute.xlu0 %3425  ;;  %3881 = vmatprep.subr.bf16.mxu1 %v3356_v61  ;;  %v3424_v52 = vpop.permute.xlu1 %3423 }
 0x4e3   :  { %3967 = vmatprep.subr.bf16.mxu0 %v2966_v0  ;;  %3995 = vmatprep.mubr.bf16.mxu0 %v16128_v28  ;;  %v3448_v44 = vsel %vm788_vm6, %v3424_v52, %v16601_v33  ;;  %v3447_v9 = vsel %vm788_vm6, %v16356_v36, %v3424_v52 }
 0x4e5   :  { %3882 = vmatpush1.bf16.msra.mxu1 %v3355_v42 }
 0x4e6   :  { %3968 = vmatpush1.bf16.msra.mxu0 %v2965_v46  ;;  %v2960_v13 = vpop.permute.xlu0 %2959  ;;  %3883 = vmatprep.subr.bf16.mxu1 %v3362_v31  ;;  %v2958_v12 = vpop.permute.xlu1 %2957 }
 0x4e7   :  { %v2972_v59 = vsel %vm299_vm1, %v2958_v12, %v2960_v13  ;;  %v2971_v28 = vsel %vm299_vm1, %v16480_v57, %v2958_v12  ;;  %v3057_v57 = vsel %vm392_vm2, %v16412_v29, %v3036_v6 }
 0x4e8   :  { %3969 = vmatprep.subr.bf16.mxu0 %v2972_v59 }
 0x4e9   :  { %3884 = vmatpush1.bf16.msra.mxu1 %v3361_v21 }
 0x4ea   :  { %3970 = vmatpush1.bf16.msra.mxu0 %v2971_v28  ;;  %v16619_v4 = vpop.permute.xlu0 %3439  ;;  %3885 = vmatprep.subr.bf16.mxu1 %v3448_v44  ;;  %v3050_v10 = vpop.permute.xlu1 %3049 }
 0x4eb   :  { %3971 = vmatprep.subr.bf16.mxu0 %v3058_v41  ;;  %v3063_v36 = vsel %vm392_vm2, %v16515_v38, %v3050_v10 }
 0x4ed   :  { %3886 = vmatpush1.bf16.msra.mxu1 %v3447_v9 }
 0x4ee   :  { %3972 = vmatpush1.bf16.msra.mxu0 %v3057_v57  ;;  %v3052_v11 = vpop.permute.xlu0 %3051  ;;  %v3438_v25 = vpop.permute.xlu1 %3437 }
 0x4ef   :  { %v3454_v2 = vsel %vm788_vm6, %v3438_v25, %v16619_v4  ;;  %v3064_v39 = vsel %vm392_vm2, %v3050_v10, %v3052_v11  ;;  %v3453_v26 = vsel %vm788_vm6, %v16414_v18, %v3438_v25 }
 0x4f0   :  { %3887 = vmatprep.subr.bf16.mxu1 %v3454_v2  ;;  %3973 = vmatprep.subr.bf16.mxu0 %v3064_v39 }
 0x4f1   :  { %3888 = vmatpush1.bf16.msra.mxu1 %v3453_v26 }
 0x4f2   :  { %3974 = vmatpush1.bf16.msra.mxu0 %v3063_v36  ;;  %v3130_v47 = vpop.permute.xlu0 %3129  ;;  %v3128_v29 = vpop.permute.xlu1 %3127 }
 0x4f3   :  { %v3150_v62 = vsel %vm485_vm3, %v3128_v29, %v3130_v47  ;;  %v3149_v35 = vsel %vm485_vm3, %v16428_v24, %v3128_v29 }
 0x4f4   :  { %3890 = vmatmul.mubr.bf16.vlgmr.msra.gmra.mrb[24].mxu1 %v16511_v3  ;;  %3975 = vmatprep.subr.bf16.mxu0 %v3150_v62 }
 0x4f5   :  { %3899 = vmatprep.mubr.bf16.mxu1 %v16525_v51 }
 0x4f6   :  { %3976 = vmatpush1.bf16.msra.mxu0 %v3149_v35  ;;  %v3144_v18 = vpop.permute.xlu0 %3143  ;;  %v3142_v6 = vpop.permute.xlu1 %3141 }
 0x4f7   :  { %v3156_v53 = vsel %vm485_vm3, %v3142_v6, %v3144_v18  ;;  %v3155_v38 = vsel %vm485_vm3, %v16478_v19, %v3142_v6 }
 0x4f8   :  { %3977 = vmatprep.subr.bf16.mxu0 %v3156_v53 }
 0x4fa   :  { %3978 = vmatpush1.bf16.msra.mxu0 %v3155_v38  ;;  %v3518_v48 = vpop.permute.xlu0 %3517  ;;  %v3516_v34 = vpop.permute.xlu1 %3515 }
 0x4fb   :  { %3979 = vmatprep.subr.bf16.mxu0 %v16174_v58  ;;  %v3540_v24 = vsel %vm881_vm7, %v3516_v34, %v3518_v48  ;;  %v3539_v1 = vsel %vm881_vm7, %v16371_v15, %v3516_v34 }
 0x4fc   :  { %3900 = vmatmul.mubr.bf16.gmra.mrb[28].mxu1 %v16552_v37  ;;  %3910 = vmatprep.subr.bf16.mxu1 %v3540_v24 }
 0x4fd   :  { %3911 = vmatpush1.bf16.msra.mxu1 %v3539_v1  ;;  %3942 = vmatprep.mubr.bf16.mxu1 %v22188_v50 }
 0x4fe   :  { %3980 = vmatpush1.bf16.msra.mxu0 %v16154_v55  ;;  %v3532_v19 = vpop.permute.xlu0 %3531  ;;  %v3530_v23 = vpop.permute.xlu1 %3529 }
 0x4ff   :  { %3981 = vmatprep.subr.bf16.mxu0 %v16242_v56  ;;  %v3546_v45 = vsel %vm881_vm7, %v3530_v23, %v3532_v19  ;;  %v3545_v58 = vsel %vm881_vm7, %v16444_v20, %v3530_v23 }
 0x500   :  { %3912 = vmatprep.subr.bf16.mxu1 %v3546_v45 }
 0x501   :  { %3913 = vmatpush1.bf16.msra.mxu1 %v3545_v58 }
 0x502   :  { %3982 = vmatpush1.bf16.msra.mxu0 %v16218_v54  ;;  %v3246_v15 = vpop.permute.xlu0 %3245  ;;  %v3244_v43 = vpop.permute.xlu1 %3243 }
 0x503   :  { %v3266_v61 = vsel %vm602_vm4, %v3244_v43, %v3246_v15  ;;  %v3265_v55 = vsel %vm602_vm4, %v16495_v7, %v3244_v43 }
 0x504   :  { %13581 = vmatmul.mubr.msk.bf16.vlgmr.msra.gmra.mrb[24].mxu1 %vm1088_vm8, %v16565_v32  ;;  %3983 = vmatprep.subr.bf16.mxu0 %v3266_v61 }
 0x505   :  { %3952 = vmatprep.mubr.bf16.mxu1 %v22188_v50 }
 0x506   :  { %3984 = vmatpush1.bf16.msra.mxu0 %v3265_v55  ;;  %v3260_v56 = vpop.permute.xlu0 %3259  ;;  %v3258_v20 = vpop.permute.xlu1 %3257 }
 0x507   :  { %v3272_v52 = vsel %vm602_vm4, %v3258_v20, %v3260_v56  ;;  %v3271_v54 = vsel %vm602_vm4, %v16567_v14, %v3258_v20 }
 0x508   :  { %3985 = vmatprep.subr.bf16.mxu0 %v3272_v52 }
 0x50a   :  { %3986 = vmatpush1.bf16.msra.mxu0 %v3271_v54  ;;  %v3338_v0 = vpop.permute.xlu0 %3337  ;;  %v3336_v42 = vpop.permute.xlu1 %3335 }
 0x50b   :  { %v3358_v7 = vsel %vm695_vm5, %v3336_v42, %v3338_v0  ;;  %v3357_v46 = vsel %vm695_vm5, %v16513_v30, %v3336_v42 }
 0x50c   :  { %13582 = vmatmul.mubr.msk.bf16.gmra.mrb[28].mxu1 %vm1088_vm8, %v16589_v8  ;;  %3987 = vmatprep.subr.bf16.mxu0 %v3358_v7 }
 0x50e   :  { %3988 = vmatpush1.bf16.msra.mxu0 %v3357_v46  ;;  %v3352_v31 = vpop.permute.xlu0 %3351  ;;  %v3350_v13 = vpop.permute.xlu1 %3349 }
 0x50f   :  { %v3364_v12 = vsel %vm695_vm5, %v3350_v13, %v3352_v31  ;;  %v3363_v14 = vsel %vm695_vm5, %v16578_v16, %v3350_v13 }
 0x510   :  { %3989 = vmatprep.subr.bf16.mxu0 %v3364_v12 }
 0x512   :  { %3990 = vmatpush1.bf16.msra.mxu0 %v3363_v14  ;;  %v3430_v59 = vpop.permute.xlu0 %3429  ;;  %v3428_v28 = vpop.permute.xlu1 %3427 }
 0x513   :  { %v3450_v21 = vsel %vm788_vm6, %v3428_v28, %v3430_v59  ;;  %v3449_v30 = vsel %vm788_vm6, %v16601_v33, %v3428_v28 }
 0x514   :  { %3991 = vmatprep.subr.bf16.mxu0 %v3450_v21 }
 0x516   :  { %3992 = vmatpush1.bf16.msra.mxu0 %v3449_v30  ;;  %v3444_v44 = vpop.permute.xlu0 %3443  ;;  %v3442_v10 = vpop.permute.xlu1 %3441 }
 0x517   :  { %v3456_v41 = vsel %vm788_vm6, %v3442_v10, %v3444_v44  ;;  %v3455_v9 = vsel %vm788_vm6, %v16619_v4, %v3442_v10 }
 0x518   :  { %3993 = vmatprep.subr.bf16.mxu0 %v3456_v41 }
 0x51a   :  { %3994 = vmatpush1.bf16.msra.mxu0 %v3455_v9  ;;  %v3522_v16 = vpop.permute.xlu0 %3521  ;;  %v3520_v57 = vpop.permute.xlu1 %3519 }
 0x51b   :  { %v3542_v11 = vsel %vm881_vm7, %v3520_v57, %v3522_v16  ;;  %v3541_v25 = vsel %vm881_vm7, %v3518_v48, %v3520_v57 }
 0x51c   :  { %4016 = vmatprep.subr.bf16.mxu0 %v3542_v11 }
 0x51d   :  { %3996 = vmatmul.mubr.bf16.vlgmr.msra.gmra.mrb[32].mxu0 %v16511_v3 }
 0x51e   :  { %4017 = vmatpush1.bf16.msra.mxu0 %v3541_v25  ;;  %v3536_v33 = vpop.permute.xlu0 %3535  ;;  %v3534_v2 = vpop.permute.xlu1 %3533  ;;  %4005 = vmatprep.mubr.bf16.mxu0 %v16525_v51 }
 0x51f   :  { %v3548_v39 = vsel %vm881_vm7, %v3534_v2, %v3536_v33  ;;  %v3547_v4 = vsel %vm881_vm7, %v3532_v19, %v3534_v2 }
 0x520   :  { %4018 = vmatprep.subr.bf16.mxu0 %v3548_v39 }
 0x522   :  { %4019 = vmatpush1.bf16.msra.mxu0 %v3547_v4 }
 0x525   :  { %4006 = vmatmul.mubr.bf16.gmra.mrb[36].mxu0 %v16552_v37 }
 0x526   :  { %4048 = vmatprep.mubr.bf16.mxu0 %v22188_v50 }
 0x52d   :  { %13583 = vmatmul.mubr.msk.bf16.vlgmr.msra.gmra.mrb[32].mxu0 %vm1088_vm8, %v16565_v32 }
 0x52e   :  { %4058 = vmatprep.mubr.bf16.mxu0 %v22188_v50 }
 0x52f   :  { %v16697_v3 = vpop.permute.xlu1 %3697  ;;  %v16700_v26 = vpop.permute.xlu0 %3702 }
 0x533   :  { %v16707_v34 = vpop.permute.xlu1 %3707  ;;  %v16714_v15 = vpop.permute.xlu0 %3712 }
 0x535   :  { %13584 = vmatmul.mubr.msk.bf16.gmra.mrb[36].mxu0 %vm1088_vm8, %v16589_v8 }
 0x5ac   :  { %v3838_v51 = vpop.f32.mrb[24].mxu0 }
 0x5ad   :  { %v13801_v37 = vadd.f32 %v3838_v51, %v16697_v3  ;;  %v3840_v32 = vpop.f32.mrb[25].mxu0 }
 0x5ae   :  { %v13802_v36 = vadd.f32 %v3840_v32, %v16697_v3  ;;  %v3842_v47 = vpop.f32.mrb[26].mxu0 }
 0x5af   :  { %v4069_v29 = vmax.f32 %v13801_v37, 0.0  ;;  %v13803_v62 = vadd.f32 %v3842_v47, %v16700_v26  ;;  %v3844_v35 = vpop.f32.mrb[27].mxu0 }
 0x5b0   :  { %v4070_v18 = vmax.f32 %v13802_v36, 0.0  ;;  %v13804_v6 = vadd.f32 %v3844_v35, %v16700_v26 }
 0x5b1   :  { %v4075_v53 = vmax.f32 %v13803_v62, 0.0  ;;  %v4093_v38 = vmul.f32 %v4069_v29, %v15186_v60 }
 0x5b2   :  { %v4076_v8 = vmax.f32 %v13804_v6, 0.0  ;;  %v4094_v24 = vmul.f32 %v4070_v18, %v15190_v5 }
 0x5b3   :  { %v4099_v48 = vmul.f32 %v4075_v53, %v15186_v60 }
 0x5b4   :  { %v4100_v1 = vmul.f32 %v4076_v8, %v15190_v5  ;;  %v3848_v19 = vpop.f32.mrb[28].mxu0 }
 0x5b5   :  { %v16711_v23 = vpack.c.bf16 %v4099_v48, %v4093_v38  ;;  %v13805_v45 = vadd.f32 %v3848_v19, %v16707_v34  ;;  %v3850_v58 = vpop.f32.mrb[29].mxu0 }
 0x5b6   :  { %v16716_v43 = vpack.c.bf16 %v4100_v1, %v4094_v24  ;;  %v13806_v61 = vadd.f32 %v3850_v58, %v16707_v34  ;;  %v3852_v55 = vpop.f32.mrb[30].mxu0 }
 0x5b7   :  { %v4081_v56 = vmax.f32 %v13805_v45, 0.0  ;;  %v13807_v20 = vadd.f32 %v3852_v55, %v16714_v15  ;;  %v3854_v52 = vpop.f32.mrb[31].mxu0  ;;  %4263 = vrot.lane.b32.xlu0 %v16711_v23, %s14554_s24  ;;  %4171 = vrot.lane.b32.xlu1 %v16711_v23, %s14553_s17 }
 0x5b8   :  { %v4082_v54 = vmax.f32 %v13806_v61, 0.0  ;;  %v13808_v0 = vadd.f32 %v3854_v52, %v16714_v15 }
 0x5b9   :  { %v4087_v42 = vmax.f32 %v13807_v20, 0.0  ;;  %v4105_v46 = vmul.f32 %v4081_v56, %v15186_v60 }
 0x5ba   :  { %v4088_v7 = vmax.f32 %v13808_v0, 0.0  ;;  %v4106_v13 = vmul.f32 %v4082_v54, %v15190_v5 }
 0x5bb   :  { %v4111_v31 = vmul.f32 %v4087_v42, %v15186_v60  ;;  %4447 = vrot.lane.b32.xlu0 %v16711_v23, %s14556_s26  ;;  %4355 = vrot.lane.b32.xlu1 %v16711_v23, %s14555_s25 }
 0x5bc   :  { %v4112_v12 = vmul.f32 %v4088_v7, %v15190_v5 }
 0x5bd   :  { %v16733_v14 = vpack.c.bf16 %v4111_v31, %v4105_v46 }
 0x5be   :  { %v16735_v59 = vpack.c.bf16 %v4112_v12, %v4106_v13 }
 0x5bf   :  { %4173 = vrot.lane.b32.xlu0 %v16716_v43, %s14553_s17  ;;  %4561 = vrot.lane.b32.xlu1 %v16711_v23, %s14557_s29 }
 0x5c3   :  { %4357 = vrot.lane.b32.xlu0 %v16716_v43, %s14555_s25  ;;  %4653 = vrot.lane.b32.xlu1 %v16711_v23, %s14558_s10 }
 0x5c7   :  { %4185 = vrot.lane.b32.xlu0 %v16733_v14, %s14553_s17  ;;  %4745 = vrot.lane.b32.xlu1 %v16711_v23, %s14559_s11 }
 0x5cb   :  { %4369 = vrot.lane.b32.xlu0 %v16733_v14, %s14555_s25  ;;  %4837 = vrot.lane.b32.xlu1 %v16711_v23, %s14560_s14 }
 0x5cf   :  { %4575 = vrot.lane.b32.xlu0 %v16733_v14, %s14557_s29  ;;  %4265 = vrot.lane.b32.xlu1 %v16716_v43, %s14554_s24 }
 0x5d3   :  { %4667 = vrot.lane.b32.xlu0 %v16733_v14, %s14558_s10  ;;  %4449 = vrot.lane.b32.xlu1 %v16716_v43, %s14556_s26 }
 0x5d7   :  { %4759 = vrot.lane.b32.xlu0 %v16733_v14, %s14559_s11  ;;  %4563 = vrot.lane.b32.xlu1 %v16716_v43, %s14557_s29  ;;  %v3944_v28 = vpop.f32.mrb[24].mxu1 }
 0x5d8   :  { %v13809_v21 = vadd.f32 %v3944_v28, %v16697_v3  ;;  %v3946_v30 = vpop.f32.mrb[25].mxu1 }
 0x5d9   :  { %v13810_v44 = vadd.f32 %v3946_v30, %v16697_v3  ;;  %v3948_v10 = vpop.f32.mrb[26].mxu1 }
 0x5da   :  { %v4071_v41 = vmax.f32 %v13809_v21, 0.0  ;;  %v13811_v9 = vadd.f32 %v3948_v10, %v16700_v26  ;;  %v3950_v16 = vpop.f32.mrb[27].mxu1 }
 0x5db   :  { %v4072_v57 = vmax.f32 %v13810_v44, 0.0  ;;  %v13812_v11 = vadd.f32 %v3950_v16, %v16700_v26  ;;  %4851 = vrot.lane.b32.xlu0 %v16733_v14, %s14560_s14  ;;  %4655 = vrot.lane.b32.xlu1 %v16716_v43, %s14558_s10 }
 0x5dc   :  { %v4077_v25 = vmax.f32 %v13811_v9, 0.0  ;;  %v4095_v2 = vmul.f32 %v4071_v41, %v15232_v17 }
 0x5dd   :  { %v4078_v33 = vmax.f32 %v13812_v11, 0.0  ;;  %v4096_v4 = vmul.f32 %v4072_v57, %v15236_v22 }
 0x5de   :  { %v4101_v39 = vmul.f32 %v4077_v25, %v15232_v17 }
 0x5df   :  { %v4102_v51 = vmul.f32 %v4078_v33, %v15236_v22  ;;  %4279 = vrot.lane.b32.xlu0 %v16735_v59, %s14554_s24  ;;  %4747 = vrot.lane.b32.xlu1 %v16716_v43, %s14559_s11  ;;  %v3954_v37 = vpop.f32.mrb[28].mxu1 }
 0x5e0   :  { %v16781_v32 = vpack.c.bf16 %v4101_v39, %v4095_v2  ;;  %v13813_v36 = vadd.f32 %v3954_v37, %v16707_v34  ;;  %v3956_v47 = vpop.f32.mrb[29].mxu1 }
 0x5e1   :  { %v16784_v29 = vpack.c.bf16 %v4102_v51, %v4096_v4  ;;  %v13814_v62 = vadd.f32 %v3956_v47, %v16707_v34  ;;  %v3958_v35 = vpop.f32.mrb[30].mxu1 }
 0x5e2   :  { %v4083_v18 = vmax.f32 %v13813_v36, 0.0  ;;  %v13815_v6 = vadd.f32 %v3958_v35, %v16714_v15  ;;  %v3960_v53 = vpop.f32.mrb[31].mxu1 }
 0x5e3   :  { %v4084_v8 = vmax.f32 %v13814_v62, 0.0  ;;  %v13816_v38 = vadd.f32 %v3960_v53, %v16714_v15  ;;  %4463 = vrot.lane.b32.xlu0 %v16735_v59, %s14556_s26  ;;  %4839 = vrot.lane.b32.xlu1 %v16716_v43, %s14560_s14  ;;  %v16888_v53 = vld [vmem:[%s22072_s1 + $0x94] ss:$12 sps:$4 sm:$0xff]  }
 0x5e4   :  { %v4089_v48 = vmax.f32 %v13815_v6, 0.0  ;;  %v4107_v1 = vmul.f32 %v4083_v18, %v15232_v17  ;;  %v16883_v6 = vpop.permute.xlu1 %14305  ;;  %5111 = vmatprep.mubr.bf16.mxu1 %v16888_v53  ;;  %5217 = vmatprep.mubr.bf16.mxu0 %v16888_v53 }
 0x5e5   :  { %v4090_v24 = vmax.f32 %v13816_v38, 0.0  ;;  %v4108_v45 = vmul.f32 %v4084_v8, %v15236_v22 }
 0x5e6   :  { %v4113_v19 = vmul.f32 %v4089_v48, %v15232_v17 }
 0x5e7   :  { %v4114_v58 = vmul.f32 %v4090_v24, %v15236_v22  ;;  %4577 = vrot.lane.b32.xlu0 %v16735_v59, %s14557_s29  ;;  %4277 = vrot.lane.b32.xlu1 %v16733_v14, %s14554_s24 }
 0x5e8   :  { %v16801_v61 = vpack.c.bf16 %v4113_v19, %v4107_v1  ;;  %v16902_v38 = vpop.permute.xlu1 %14315 }
 0x5e9   :  { %v16803_v55 = vpack.c.bf16 %v4114_v58, %v4108_v45 }
 0x5eb   :  { %4669 = vrot.lane.b32.xlu0 %v16735_v59, %s14558_s10  ;;  %4461 = vrot.lane.b32.xlu1 %v16733_v14, %s14556_s26 }
 0x5ef   :  { %4761 = vrot.lane.b32.xlu0 %v16735_v59, %s14559_s11  ;;  %4187 = vrot.lane.b32.xlu1 %v16735_v59, %s14553_s17 }
 0x5f3   :  { %4853 = vrot.lane.b32.xlu0 %v16735_v59, %s14560_s14  ;;  %4371 = vrot.lane.b32.xlu1 %v16735_v59, %s14555_s25 }
 0x5f7   :  { %4565 = vrot.lane.b32.xlu0 %v16781_v32, %s14557_s29  ;;  %4175 = vrot.lane.b32.xlu1 %v16781_v32, %s14553_s17 }
 0x5fb   :  { %4657 = vrot.lane.b32.xlu0 %v16781_v32, %s14558_s10  ;;  %4267 = vrot.lane.b32.xlu1 %v16781_v32, %s14554_s24 }
 0x5ff   :  { %4749 = vrot.lane.b32.xlu0 %v16781_v32, %s14559_s11  ;;  %4359 = vrot.lane.b32.xlu1 %v16781_v32, %s14555_s25 }
 0x600   :  { %v4050_v56 = vpop.f32.mrb[32].mxu0 }
 0x601   :  { %v13817_v20 = vadd.f32 %v4050_v56, %v16697_v3  ;;  %v4052_v52 = vpop.f32.mrb[33].mxu0  ;;  %v14307_v56 = vunpack.i.l.bf16 %v16883_v6 }
 0x602   :  { %v13818_v54 = vadd.f32 %v4052_v52, %v16697_v3  ;;  %v4054_v0 = vpop.f32.mrb[34].mxu0 }
 0x603   :  { %v4073_v42 = vmax.f32 %v13817_v20, 0.0  ;;  %v13819_v7 = vadd.f32 %v4054_v0, %v16700_v26  ;;  %v4056_v46 = vpop.f32.mrb[35].mxu0  ;;  %4841 = vrot.lane.b32.xlu0 %v16781_v32, %s14560_s14  ;;  %4451 = vrot.lane.b32.xlu1 %v16781_v32, %s14556_s26 }
 0x604   :  { %v4074_v31 = vmax.f32 %v13818_v54, 0.0  ;;  %v13820_v13 = vadd.f32 %v4056_v46, %v16700_v26 }
 0x605   :  { %v4079_v12 = vmax.f32 %v13819_v7, 0.0  ;;  %v4097_v21 = vmul.f32 %v4073_v42, %v15296_v40 }
 0x606   :  { %v4080_v28 = vmax.f32 %v13820_v13, 0.0  ;;  %v4098_v30 = vmul.f32 %v4074_v31, %v15304_v63 }
 0x607   :  { %v4103_v3 = vmul.f32 %v4079_v12, %v15296_v40  ;;  %4177 = vrot.lane.b32.xlu0 %v16784_v29, %s14553_s17  ;;  %4579 = vrot.lane.b32.xlu1 %v16801_v61, %s14557_s29 }
 0x608   :  { %v4104_v44 = vmul.f32 %v4080_v28, %v15304_v63  ;;  %v4060_v10 = vpop.f32.mrb[36].mxu0 }
 0x609   :  { %v16845_v41 = vpack.c.bf16 %v4103_v3, %v4097_v21  ;;  %v13821_v26 = vadd.f32 %v4060_v10, %v16707_v34  ;;  %v4062_v9 = vpop.f32.mrb[37].mxu0 }
 0x60a   :  { %v16848_v16 = vpack.c.bf16 %v4104_v44, %v4098_v30  ;;  %v13822_v57 = vadd.f32 %v4062_v9, %v16707_v34  ;;  %v4064_v11 = vpop.f32.mrb[38].mxu0 }
 0x60b   :  { %v4085_v25 = vmax.f32 %v13821_v26, 0.0  ;;  %v13823_v33 = vadd.f32 %v4064_v11, %v16714_v15  ;;  %v4066_v2 = vpop.f32.mrb[39].mxu0  ;;  %4269 = vrot.lane.b32.xlu0 %v16784_v29, %s14554_s24  ;;  %4671 = vrot.lane.b32.xlu1 %v16801_v61, %s14558_s10 }
 0x60c   :  { %v4086_v39 = vmax.f32 %v13822_v57, 0.0  ;;  %v13824_v4 = vadd.f32 %v4066_v2, %v16714_v15  ;;  %v16881_v15 = vpop.permute.xlu0 %14310 }
 0x60d   :  { %v4091_v51 = vmax.f32 %v13823_v33, 0.0  ;;  %v4109_v36 = vmul.f32 %v4085_v25, %v15296_v40 }
 0x60e   :  { %v4092_v37 = vmax.f32 %v13824_v4, 0.0  ;;  %v4110_v47 = vmul.f32 %v4086_v39, %v15304_v63 }
 0x60f   :  { %v4115_v34 = vmul.f32 %v4091_v51, %v15296_v40  ;;  %4361 = vrot.lane.b32.xlu0 %v16784_v29, %s14555_s25  ;;  %4763 = vrot.lane.b32.xlu1 %v16801_v61, %s14559_s11 }
 0x610   :  { %v4116_v62 = vmul.f32 %v4092_v37, %v15304_v63  ;;  %v16900_v8 = vpop.permute.xlu0 %14320  ;;  %v14308_v37 = vunpack.i.h.bf16 %v16883_v6 }
 0x611   :  { %v16865_v35 = vpack.c.bf16 %v4115_v34, %v4109_v36  ;;  %v14312_v34 = vunpack.i.l.bf16 %v16881_v15 }
 0x612   :  { %v16867_v18 = vpack.c.bf16 %v4116_v62, %v4110_v47 }
 0x613   :  { %4453 = vrot.lane.b32.xlu0 %v16784_v29, %s14556_s26  ;;  %4465 = vrot.lane.b32.xlu1 %v16801_v61, %s14556_s26 }
 0x617   :  { %4189 = vrot.lane.b32.xlu0 %v16801_v61, %s14553_s17  ;;  %4855 = vrot.lane.b32.xlu1 %v16801_v61, %s14560_s14 }
 0x61b   :  { %4281 = vrot.lane.b32.xlu0 %v16801_v61, %s14554_s24  ;;  %4191 = vrot.lane.b32.xlu1 %v16803_v55, %s14553_s17 }
 0x61f   :  { %4373 = vrot.lane.b32.xlu0 %v16801_v61, %s14555_s25  ;;  %4567 = vrot.lane.b32.xlu1 %v16784_v29, %s14557_s29 }
 0x623   :  { %4467 = vrot.lane.b32.xlu0 %v16803_v55, %s14556_s26  ;;  %4283 = vrot.lane.b32.xlu1 %v16803_v55, %s14554_s24 }
 0x627   :  { %4569 = vrot.lane.b32.xlu0 %v16845_v41, %s14557_s29  ;;  %4659 = vrot.lane.b32.xlu1 %v16784_v29, %s14558_s10 }
 0x629   :  { %v16908_v48 = vpop.permute.xlu0 %4263  ;;  %v4172_v24 = vpop.permute.xlu1 %4171 }
 0x62a   :  { %v4197_v52 = vsel %vm206_vm0, %v14307_v56, %v4172_v24  ;;  %v4289_v56 = vsel %vm299_vm1, %v14312_v34, %v16908_v48 }
 0x62b   :  { %4661 = vrot.lane.b32.xlu0 %v16845_v41, %s14558_s10  ;;  %4375 = vrot.lane.b32.xlu1 %v16803_v55, %s14555_s25 }
 0x62d   :  { %v16914_v1 = vpop.permute.xlu0 %4447  ;;  %v16916_v19 = vpop.permute.xlu1 %4355 }
 0x62f   :  { %4181 = vrot.lane.b32.xlu0 %v16848_v16, %s14553_s17  ;;  %4581 = vrot.lane.b32.xlu1 %v16803_v55, %s14557_s29 }
 0x631   :  { %v16922_v45 = vpop.permute.xlu0 %4173  ;;  %v16924_v58 = vpop.permute.xlu1 %4561 }
 0x632   :  { %v4198_v20 = vsel %vm206_vm0, %v4172_v24, %v16922_v45 }
 0x633   :  { %4273 = vrot.lane.b32.xlu0 %v16848_v16, %s14554_s24  ;;  %4673 = vrot.lane.b32.xlu1 %v16803_v55, %s14558_s10 }
 0x634   :  { %5079 = vmatprep.subr.bf16.mxu1 %v4198_v20 }
 0x635   :  { %5080 = vmatpush1.bf16.msra.mxu1 %v4197_v52  ;;  %v16934_v54 = vpop.permute.xlu0 %4357  ;;  %v16936_v0 = vpop.permute.xlu1 %4653 }
 0x636   :  { %v4382_v34 = vsel %vm392_vm2, %v16916_v19, %v16934_v54 }
 0x637   :  { %4365 = vrot.lane.b32.xlu0 %v16848_v16, %s14555_s25  ;;  %4179 = vrot.lane.b32.xlu1 %v16845_v41, %s14553_s17 }
 0x639   :  { %v4186_v42 = vpop.permute.xlu0 %4185  ;;  %v16942_v7 = vpop.permute.xlu1 %4745 }
 0x63a   :  { %v4203_v47 = vsel %vm206_vm0, %v14308_v37, %v4186_v42  ;;  %v14313_v37 = vunpack.i.h.bf16 %v16881_v15  ;;  %v14317_v15 = vunpack.i.l.bf16 %v16902_v38 }
 0x63b   :  { %4583 = vrot.lane.b32.xlu0 %v16865_v35, %s14557_s29  ;;  %4271 = vrot.lane.b32.xlu1 %v16845_v41, %s14554_s24 }
 0x63d   :  { %v16948_v46 = vpop.permute.xlu0 %4369  ;;  %v16950_v31 = vpop.permute.xlu1 %4837 }
 0x63f   :  { %4675 = vrot.lane.b32.xlu0 %v16865_v35, %s14558_s10  ;;  %4363 = vrot.lane.b32.xlu1 %v16845_v41, %s14555_s25 }
 0x641   :  { %v16956_v13 = vpop.permute.xlu0 %4575  ;;  %v16958_v12 = vpop.permute.xlu1 %4265 }
 0x642   :  { %v4290_v6 = vsel %vm299_vm1, %v16908_v48, %v16958_v12 }
 0x643   :  { %4195 = vrot.lane.b32.xlu0 %v16867_v18, %s14553_s17  ;;  %4193 = vrot.lane.b32.xlu1 %v16865_v35, %s14553_s17 }
 0x645   :  { %v16964_v28 = vpop.permute.xlu0 %4667  ;;  %v16966_v21 = vpop.permute.xlu1 %4449 }
 0x647   :  { %4753 = vrot.lane.b32.xlu0 %v16845_v41, %s14559_s11  ;;  %4751 = vrot.lane.b32.xlu1 %v16784_v29, %s14559_s11 }
 0x649   :  { %v16972_v3 = vpop.permute.xlu0 %4759  ;;  %v16974_v30 = vpop.permute.xlu1 %4563 }
 0x64b   :  { %4287 = vrot.lane.b32.xlu0 %v16867_v18, %s14554_s24  ;;  %4285 = vrot.lane.b32.xlu1 %v16865_v35, %s14554_s24 }
 0x64d   :  { %v16980_v44 = vpop.permute.xlu0 %4851  ;;  %v16982_v10 = vpop.permute.xlu1 %4655 }
 0x64f   :  { %4767 = vrot.lane.b32.xlu0 %v16865_v35, %s14559_s11  ;;  %4377 = vrot.lane.b32.xlu1 %v16865_v35, %s14555_s25 }
 0x651   :  { %v16988_v26 = vpop.permute.xlu0 %4279  ;;  %v16990_v9 = vpop.permute.xlu1 %4747 }
 0x653   :  { %4379 = vrot.lane.b32.xlu0 %v16867_v18, %s14555_s25  ;;  %4765 = vrot.lane.b32.xlu1 %v16803_v55, %s14559_s11 }
 0x655   :  { %v16996_v57 = vpop.permute.xlu0 %4463  ;;  %v16998_v11 = vpop.permute.xlu1 %4839 }
 0x657   :  { %4457 = vrot.lane.b32.xlu0 %v16848_v16, %s14556_s26  ;;  %4455 = vrot.lane.b32.xlu1 %v16845_v41, %s14556_s26 }
 0x659   :  { %v17004_v25 = vpop.permute.xlu0 %4577  ;;  %v4278_v33 = vpop.permute.xlu1 %4277 }
 0x65a   :  { %v4296_v52 = vsel %vm299_vm1, %v4278_v33, %v16988_v26 }
 0x65b   :  { %4471 = vrot.lane.b32.xlu0 %v16867_v18, %s14556_s26  ;;  %4469 = vrot.lane.b32.xlu1 %v16865_v35, %s14556_s26 }
 0x65d   :  { %v17010_v2 = vpop.permute.xlu0 %4669  ;;  %v17012_v39 = vpop.permute.xlu1 %4461 }
 0x65f   :  { %4845 = vrot.lane.b32.xlu0 %v16845_v41, %s14560_s14  ;;  %4843 = vrot.lane.b32.xlu1 %v16784_v29, %s14560_s14 }
 0x661   :  { %v17018_v4 = vpop.permute.xlu0 %4761  ;;  %v17020_v51 = vpop.permute.xlu1 %4187 }
 0x662   :  { %v4204_v36 = vsel %vm206_vm0, %v4186_v42, %v17020_v51 }
 0x663   :  { %4859 = vrot.lane.b32.xlu0 %v16865_v35, %s14560_s14  ;;  %4857 = vrot.lane.b32.xlu1 %v16803_v55, %s14560_s14 }
 0x664   :  { %5081 = vmatprep.subr.bf16.mxu1 %v4204_v36  ;;  %v4295_v36 = vsel %vm299_vm1, %v14313_v37, %v4278_v33  ;;  %v4381_v33 = vsel %vm392_vm2, %v14317_v15, %v16916_v19  ;;  %v14318_v37 = vunpack.i.h.bf16 %v16902_v38  ;;  %v14322_v19 = vunpack.i.l.bf16 %v16900_v8 }
 0x665   :  { %5082 = vmatpush1.bf16.msra.mxu1 %v4203_v47  ;;  %v17031_v62 = vpop.permute.xlu0 %4853  ;;  %v17036_v24 = vpop.permute.xlu1 %4371  ;;  %v4474_v15 = vsel %vm485_vm3, %v16914_v1, %v16966_v21 }
 0x666   :  { %5083 = vmatprep.subr.bf16.mxu1 %v4290_v6 }
 0x667   :  { %4573 = vrot.lane.b32.xlu0 %v22188_v50, %s14557_s29  ;;  %4571 = vrot.lane.b32.xlu1 %v16848_v16, %s14557_s29 }
 0x669   :  { %5084 = vmatpush1.bf16.msra.mxu1 %v4289_v56  ;;  %v17044_v20 = vpop.permute.xlu0 %4565  ;;  %v4176_v42 = vpop.permute.xlu1 %4175  ;;  %v4388_v56 = vsel %vm392_vm2, %v16948_v46, %v17036_v24 }
 0x66a   :  { %5085 = vmatprep.subr.bf16.mxu1 %v4296_v52 }
 0x66b   :  { %4587 = vrot.lane.b32.xlu0 %v22188_v50, %s14557_s29  ;;  %4585 = vrot.lane.b32.xlu1 %v16867_v18, %s14557_s29 }
 0x66d   :  { %5086 = vmatpush1.bf16.msra.mxu1 %v4295_v36  ;;  %v17054_v48 = vpop.permute.xlu0 %4657  ;;  %v17059_v47 = vpop.permute.xlu1 %4267  ;;  %v4387_v36 = vsel %vm392_vm2, %v14318_v37, %v16948_v46 }
 0x66e   :  { %5087 = vmatprep.subr.bf16.mxu1 %v4382_v34 }
 0x66f   :  { %4665 = vrot.lane.b32.xlu0 %v22188_v50, %s14558_s10  ;;  %4663 = vrot.lane.b32.xlu1 %v16848_v16, %s14558_s10 }
 0x671   :  { %5088 = vmatpush1.bf16.msra.mxu1 %v4381_v33  ;;  %v17068_v6 = vpop.permute.xlu0 %4749  ;;  %v17073_v52 = vpop.permute.xlu1 %4359  ;;  %v4473_v33 = vsel %vm485_vm3, %v14322_v19, %v16914_v1  ;;  %v4199_v19 = vsel %vm206_vm0, %v16922_v45, %v4176_v42 }
 0x672   :  { %5089 = vmatprep.subr.bf16.mxu1 %v4388_v56  ;;  %v4480_v56 = vsel %vm485_vm3, %v17012_v39, %v16996_v57 }
 0x673   :  { %4679 = vrot.lane.b32.xlu0 %v22188_v50, %s14558_s10  ;;  %4677 = vrot.lane.b32.xlu1 %v16867_v18, %s14558_s10 }
 0x675   :  { %5090 = vmatpush1.bf16.msra.mxu1 %v4387_v36  ;;  %v17083_v34 = vpop.permute.xlu0 %4841  ;;  %v17088_v38 = vpop.permute.xlu1 %4451  ;;  %v14323_v36 = vunpack.i.h.bf16 %v16900_v8 }
 0x676   :  { %5091 = vmatprep.subr.bf16.mxu1 %v4474_v15 }
 0x677   :  { %4757 = vrot.lane.b32.xlu0 %v22188_v50, %s14559_s11  ;;  %4755 = vrot.lane.b32.xlu1 %v16848_v16, %s14559_s11  ;;  %v4479_v1 = vsel %vm485_vm3, %v14323_v36, %v17012_v39  ;;  %v4589_v36 = vsel %vm602_vm4, %v16924_v58, %v16974_v30  ;;  %v4595_v58 = vsel %vm602_vm4, %v16956_v13, %v17004_v25 }
 0x678   :  { %v4681_v13 = vsel %vm695_vm5, %v16936_v0, %v16982_v10  ;;  %v4687_v0 = vsel %vm695_vm5, %v16964_v28, %v17010_v2  ;;  %v4773_v28 = vsel %vm788_vm6, %v16942_v7, %v16990_v9  ;;  %v4383_v7 = vsel %vm392_vm2, %v16934_v54, %v17073_v52 }
 0x679   :  { %5092 = vmatpush1.bf16.msra.mxu1 %v4473_v33  ;;  %v17096_v46 = vpop.permute.xlu0 %4177  ;;  %v17101_v37 = vpop.permute.xlu1 %4579 }
 0x67a   :  { %5093 = vmatprep.subr.bf16.mxu1 %v4480_v56  ;;  %v4200_v15 = vsel %vm206_vm0, %v4176_v42, %v17096_v46 }
 0x67b   :  { %4771 = vrot.lane.b32.xlu0 %v22188_v50, %s14559_s11  ;;  %4769 = vrot.lane.b32.xlu1 %v16867_v18, %s14559_s11 }
 0x67c   :  { %5185 = vmatprep.subr.bf16.mxu0 %v4200_v15  ;;  %v13596_v15 = vld [vmem:[%s22073_s2 + $0x78] sm:$0xff] }
 0x67d   :  { %5094 = vmatpush1.bf16.msra.mxu1 %v4479_v1  ;;  %5186 = vmatpush1.bf16.msra.mxu0 %v4199_v19  ;;  %v17114_v8 = vpop.permute.xlu0 %4269  ;;  %v17116_v33 = vpop.permute.xlu1 %4671  ;;  %v4596_v19 = vsel %vm602_vm4, %v17004_v25, %v17101_v37 }
 0x67e   :  { %5095 = vmatprep.subr.bf16.mxu1 %v16716_v43  ;;  %v13594_v43 = vld [vmem:[%s22073_s2 + $0x68] sm:$0xff]  ;;  %v4292_v25 = vsel %vm299_vm1, %v17059_v47, %v17114_v8 }
 0x67f   :  { %4849 = vrot.lane.b32.xlu0 %v22188_v50, %s14560_s14  ;;  %4847 = vrot.lane.b32.xlu1 %v16848_v16, %s14560_s14 }
 0x681   :  { %5096 = vmatpush1.bf16.msra.mxu1 %v16711_v23  ;;  %v17124_v39 = vpop.permute.xlu0 %4361  ;;  %v17126_v56 = vpop.permute.xlu1 %4763  ;;  %v13593_v23 = vld [vmem:[%s22073_s2 + $0x60] sm:$0xff] }
 0x682   :  { %5097 = vmatprep.subr.bf16.mxu1 %v16735_v59  ;;  %v4590_v59 = vsel %vm602_vm4, %v16974_v30, %v17044_v20 }
 0x683   :  { %4863 = vrot.lane.b32.xlu0 %v22188_v50, %s14560_s14  ;;  %4861 = vrot.lane.b32.xlu1 %v16867_v18, %s14560_s14 }
 0x685   :  { %5098 = vmatpush1.bf16.msra.mxu1 %v16733_v14  ;;  %v17140_v45 = vpop.permute.xlu0 %4453  ;;  %v17145_v42 = vpop.permute.xlu1 %4465  ;;  %v13595_v14 = vld [vmem:[%s22073_s2 + $0x70] sm:$0xff] }
 0x686   :  { %5099 = vmatprep.subr.bf16.mxu1 %v4590_v59 }
 0x687   :  { %5030 = vperm.xlu0 %14262, %v13594_v43   ;;  %5025 = vperm.xlu1 %14263, %v13593_v23   ;;  %v4682_v23 = vsel %vm695_vm5, %v16982_v10, %v17054_v48 }
 0x689   :  { %5100 = vmatpush1.bf16.msra.mxu1 %v4589_v36  ;;  %v4190_v1 = vpop.permute.xlu0 %4189  ;;  %v17159_v43 = vpop.permute.xlu1 %4855 }
 0x68a   :  { %5101 = vmatprep.subr.bf16.mxu1 %v4596_v19  ;;  %v4688_v19 = vsel %vm695_vm5, %v17010_v2, %v17116_v33  ;;  %v4384_v2 = vsel %vm392_vm2, %v17073_v52, %v17124_v39  ;;  %v4865_v52 = vsel %vm881_vm7, %v16950_v31, %v16998_v11  ;;  %v4475_v31 = vsel %vm485_vm3, %v16966_v21, %v17088_v38 }
 0x68b   :  { %5040 = vperm.xlu0 %14262, %v13596_v15   ;;  %5035 = vperm.xlu1 %14263, %v13595_v14   ;;  %v4205_v15 = vsel %vm206_vm0, %v17020_v51, %v4190_v1  ;;  %v4291_v51 = vsel %vm299_vm1, %v16958_v12, %v17059_v47  ;;  %v4481_v21 = vsel %vm485_vm3, %v16996_v57, %v17145_v42 }
 0x68d   :  { %5102 = vmatpush1.bf16.msra.mxu1 %v4595_v58  ;;  %v4282_v30 = vpop.permute.xlu0 %4281  ;;  %v17167_v59 = vpop.permute.xlu1 %4191 }
 0x68e   :  { %5103 = vmatprep.subr.bf16.mxu1 %v4682_v23  ;;  %v4206_v36 = vsel %vm206_vm0, %v4190_v1, %v17167_v59  ;;  %v4774_v1 = vsel %vm788_vm6, %v16990_v9, %v17068_v6  ;;  %v4297_v12 = vsel %vm299_vm1, %v16988_v26, %v4282_v30  ;;  %v4779_v26 = vsel %vm788_vm6, %v16972_v3, %v17018_v4  ;;  %v17223_v9 = vld [vmem:[%s22072_s1 + $0x90] ss:$12 sps:$4 sm:$0xff]   ;;  %v17237_v3 = vld [vmem:[%s22072_s1 + $0xac] ss:$12 sps:$4 sm:$0xff]  }
 0x68f   :  { %5187 = vmatprep.subr.bf16.mxu0 %v4206_v36  ;;  %14330 = vrot.lane.b32.xlu0 %v22188_v50, %s14554_s24 }
 0x690   :  { %5188 = vmatpush1.bf16.msra.mxu0 %v4205_v15  ;;  %v4780_v15 = vsel %vm788_vm6, %v17018_v4, %v17126_v56  ;;  %14325 = vrot.lane.b32.xlu1 %v22188_v50, %s14553_s17 }
 0x691   :  { %5104 = vmatpush1.bf16.msra.mxu1 %v4681_v13  ;;  %v4374_v14 = vpop.permute.xlu0 %4373  ;;  %5189 = vmatprep.subr.bf16.mxu0 %v4292_v25  ;;  %v17182_v58 = vpop.permute.xlu1 %4567  ;;  %v4866_v25 = vsel %vm881_vm7, %v16998_v11, %v17083_v34  ;;  %v4871_v11 = vsel %vm881_vm7, %v16980_v44, %v17031_v62 }
 0x692   :  { %5105 = vmatprep.subr.bf16.mxu1 %v4688_v19  ;;  %v4389_v4 = vsel %vm392_vm2, %v17036_v24, %v4374_v14 }
 0x693   :  { %14340 = vrot.lane.b32.xlu0 %v22188_v50, %s14556_s26 }
 0x694   :  { %5190 = vmatpush1.bf16.msra.mxu0 %v4291_v51  ;;  %v4476_v51 = vsel %vm485_vm3, %v17088_v38, %v17140_v45  ;;  %14335 = vrot.lane.b32.xlu1 %v22188_v50, %s14555_s25 }
 0x695   :  { %5106 = vmatpush1.bf16.msra.mxu1 %v4687_v0  ;;  %v17190_v10 = vpop.permute.xlu0 %4467  ;;  %v17195_v23 = vpop.permute.xlu1 %4283 }
 0x696   :  { %5107 = vmatprep.subr.bf16.mxu1 %v4774_v1  ;;  %v4298_v36 = vsel %vm299_vm1, %v4282_v30, %v17195_v23  ;;  %v4872_v1 = vsel %vm881_vm7, %v17031_v62, %v17159_v43  ;;  %v4482_v24 = vsel %vm485_vm3, %v17145_v42, %v17190_v10 }
 0x697   :  { %5191 = vmatprep.subr.bf16.mxu0 %v4298_v36 }
 0x698   :  { %5192 = vmatpush1.bf16.msra.mxu0 %v4297_v12 }
 0x699   :  { %5108 = vmatpush1.bf16.msra.mxu1 %v4773_v28  ;;  %v17207_v47 = vpop.permute.xlu0 %4569  ;;  %5193 = vmatprep.subr.bf16.mxu0 %v4384_v2  ;;  %v17212_v13 = vpop.permute.xlu1 %4659  ;;  %v17277_v2 = vld [vmem:[%s22072_s1 + $0x98] ss:$12 sps:$4 sm:$0xff]  }
 0x69a   :  { %5109 = vmatprep.subr.bf16.mxu1 %v4780_v15 }
 0x69c   :  { %5194 = vmatpush1.bf16.msra.mxu0 %v4383_v7 }
 0x69d   :  { %5110 = vmatpush1.bf16.msra.mxu1 %v4779_v26  ;;  %v17225_v30 = vpop.permute.xlu0 %4661  ;;  %v17230_v19 = vpop.permute.xlu1 %4375 }
 0x69e   :  { %5132 = vmatprep.subr.bf16.mxu1 %v4866_v25  ;;  %v4390_v54 = vsel %vm392_vm2, %v4374_v14, %v17230_v19  ;;  %v17264_v14 = vld [vmem:[%s22072_s1 + $0xa8] ss:$12 sps:$4 sm:$0xff]  }
 0x69f   :  { %5195 = vmatprep.subr.bf16.mxu0 %v4390_v54 }
 0x6a0   :  { %5112 = vmatmul.mubr.bf16.vlgmr.msra.gmra.mrb[32].mxu1 %v17223_v9  ;;  %5196 = vmatpush1.bf16.msra.mxu0 %v4389_v4 }
 0x6a1   :  { %5133 = vmatpush1.bf16.msra.mxu1 %v4865_v52  ;;  %v4182_v0 = vpop.permute.xlu0 %4181  ;;  %5197 = vmatprep.subr.bf16.mxu0 %v4476_v51  ;;  %v4582_v36 = vpop.permute.xlu1 %4581 }
 0x6a2   :  { %5134 = vmatprep.subr.bf16.mxu1 %v4872_v1  ;;  %5121 = vmatprep.mubr.bf16.mxu1 %v17237_v3 }
 0x6a4   :  { %5198 = vmatpush1.bf16.msra.mxu0 %v4475_v31 }
 0x6a5   :  { %5135 = vmatpush1.bf16.msra.mxu1 %v4871_v11  ;;  %v4274_v12 = vpop.permute.xlu0 %4273  ;;  %5199 = vmatprep.subr.bf16.mxu0 %v4482_v24  ;;  %v4674_v28 = vpop.permute.xlu1 %4673 }
 0x6a8   :  { %5122 = vmatmul.mubr.bf16.gmra.mrb[36].mxu1 %v17264_v14  ;;  %5200 = vmatpush1.bf16.msra.mxu0 %v4481_v21 }
 0x6a9   :  { %v4366_v44 = vpop.permute.xlu0 %4365  ;;  %5201 = vmatprep.subr.bf16.mxu0 %v16784_v29  ;;  %v4180_v62 = vpop.permute.xlu1 %4179  ;;  %5164 = vmatprep.mubr.bf16.mxu1 %v22188_v50 }
 0x6aa   :  { %v4202_v38 = vsel %vm206_vm0, %v4180_v62, %v4182_v0  ;;  %v4201_v29 = vsel %vm206_vm0, %v17096_v46, %v4180_v62 }
 0x6ab   :  { %5291 = vmatprep.subr.bf16.mxu1 %v4202_v38 }
 0x6ac   :  { %5202 = vmatpush1.bf16.msra.mxu0 %v16781_v32  ;;  %v4592_v32 = vsel %vm602_vm4, %v17182_v58, %v17207_v47 }
 0x6ad   :  { %v17279_v57 = vpop.permute.xlu0 %4583  ;;  %5203 = vmatprep.subr.bf16.mxu0 %v16803_v55  ;;  %v4272_v42 = vpop.permute.xlu1 %4271  ;;  %v4591_v55 = vsel %vm602_vm4, %v17044_v20, %v17182_v58  ;;  %v4597_v20 = vsel %vm602_vm4, %v17101_v37, %v4582_v36  ;;  %v4684_v58 = vsel %vm695_vm5, %v17212_v13, %v17225_v30  ;;  %v4683_v37 = vsel %vm695_vm5, %v17054_v48, %v17212_v13 }
 0x6ae   :  { %v4598_v46 = vsel %vm602_vm4, %v4582_v36, %v17279_v57  ;;  %v4294_v51 = vsel %vm299_vm1, %v4272_v42, %v4274_v12  ;;  %v4689_v48 = vsel %vm695_vm5, %v17116_v33, %v4674_v28 }
 0x6b0   :  { %13603 = vmatmul.mubr.msk.bf16.vlgmr.msra.gmra.mrb[32].mxu1 %vm1088_vm8, %v17277_v2  ;;  %5204 = vmatpush1.bf16.msra.mxu0 %v16801_v61  ;;  %v17301_v61 = vld [vmem:[%s22072_s1 + $0xb0] ss:$12 sps:$4 sm:$0xff]  }
 0x6b1   :  { %5292 = vmatpush1.bf16.msra.mxu1 %v4201_v29  ;;  %v17290_v15 = vpop.permute.xlu0 %4675  ;;  %5205 = vmatprep.subr.bf16.mxu0 %v4592_v32  ;;  %v4364_v7 = vpop.permute.xlu1 %4363 }
 0x6b2   :  { %5174 = vmatprep.mubr.bf16.mxu1 %v22188_v50  ;;  %v4690_v1 = vsel %vm695_vm5, %v4674_v28, %v17290_v15  ;;  %v4386_v24 = vsel %vm392_vm2, %v4364_v7, %v4366_v44 }
 0x6b4   :  { %5206 = vmatpush1.bf16.msra.mxu0 %v4591_v55 }
 0x6b5   :  { %v4196_v26 = vpop.permute.xlu0 %4195  ;;  %5207 = vmatprep.subr.bf16.mxu0 %v4598_v46  ;;  %v4194_v25 = vpop.permute.xlu1 %4193 }
 0x6b6   :  { %v4208_v54 = vsel %vm206_vm0, %v4194_v25, %v4196_v26  ;;  %v4207_v4 = vsel %vm206_vm0, %v17167_v59, %v4194_v25  ;;  %v4293_v59 = vsel %vm299_vm1, %v17114_v8, %v4272_v42 }
 0x6b7   :  { %5293 = vmatprep.subr.bf16.mxu1 %v4208_v54 }
 0x6b8   :  { %13604 = vmatmul.mubr.msk.bf16.gmra.mrb[36].mxu1 %vm1088_vm8, %v17301_v61  ;;  %5208 = vmatpush1.bf16.msra.mxu0 %v4597_v20 }
 0x6b9   :  { %5294 = vmatpush1.bf16.msra.mxu1 %v4207_v4  ;;  %v17313_v52 = vpop.permute.xlu0 %4753  ;;  %5209 = vmatprep.subr.bf16.mxu0 %v4684_v58  ;;  %v4752_v0 = vpop.permute.xlu1 %4751 }
 0x6ba   :  { %5295 = vmatprep.subr.bf16.mxu1 %v4294_v51  ;;  %5323 = vmatprep.mubr.bf16.mxu1 %v16888_v53  ;;  %v4776_v8 = vsel %vm788_vm6, %v4752_v0, %v17313_v52  ;;  %v4775_v21 = vsel %vm788_vm6, %v17068_v6, %v4752_v0 }
 0x6bc   :  { %5210 = vmatpush1.bf16.msra.mxu0 %v4683_v37 }
 0x6bd   :  { %5296 = vmatpush1.bf16.msra.mxu1 %v4293_v59  ;;  %v4288_v36 = vpop.permute.xlu0 %4287  ;;  %5211 = vmatprep.subr.bf16.mxu0 %v4690_v1  ;;  %v4286_v31 = vpop.permute.xlu1 %4285 }
 0x6be   :  { %v4300_v11 = vsel %vm299_vm1, %v4286_v31, %v4288_v36  ;;  %v4299_v53 = vsel %vm299_vm1, %v17195_v23, %v4286_v31  ;;  %v4385_v23 = vsel %vm392_vm2, %v17124_v39, %v4364_v7 }
 0x6bf   :  { %5297 = vmatprep.subr.bf16.mxu1 %v4300_v11 }
 0x6c0   :  { %5212 = vmatpush1.bf16.msra.mxu0 %v4689_v48 }
 0x6c1   :  { %5298 = vmatpush1.bf16.msra.mxu1 %v4299_v53  ;;  %v17331_v13 = vpop.permute.xlu0 %4767  ;;  %5213 = vmatprep.subr.bf16.mxu0 %v4776_v8  ;;  %v4378_v12 = vpop.permute.xlu1 %4377 }
 0x6c2   :  { %5299 = vmatprep.subr.bf16.mxu1 %v4386_v24  ;;  %v4391_v6 = vsel %vm392_vm2, %v17230_v19, %v4378_v12 }
 0x6c4   :  { %5214 = vmatpush1.bf16.msra.mxu0 %v4775_v21 }
 0x6c5   :  { %5300 = vmatpush1.bf16.msra.mxu1 %v4385_v23  ;;  %v4380_v33 = vpop.permute.xlu0 %4379  ;;  %v4766_v28 = vpop.permute.xlu1 %4765 }
 0x6c6   :  { %v4782_v62 = vsel %vm788_vm6, %v4766_v28, %v17331_v13  ;;  %v4392_v38 = vsel %vm392_vm2, %v4378_v12, %v4380_v33  ;;  %v4781_v44 = vsel %vm788_vm6, %v17126_v56, %v4766_v28 }
 0x6c7   :  { %5215 = vmatprep.subr.bf16.mxu0 %v4782_v62  ;;  %5301 = vmatprep.subr.bf16.mxu1 %v4392_v38 }
 0x6c8   :  { %5216 = vmatpush1.bf16.msra.mxu0 %v4781_v44 }
 0x6c9   :  { %5302 = vmatpush1.bf16.msra.mxu1 %v4391_v6  ;;  %v4458_v42 = vpop.permute.xlu0 %4457  ;;  %v4456_v39 = vpop.permute.xlu1 %4455 }
 0x6ca   :  { %v4478_v29 = vsel %vm485_vm3, %v4456_v39, %v4458_v42  ;;  %v4477_v32 = vsel %vm485_vm3, %v17140_v45, %v4456_v39 }
 0x6cb   :  { %5218 = vmatmul.mubr.bf16.vlgmr.msra.gmra.mrb[40].mxu0 %v17223_v9  ;;  %5303 = vmatprep.subr.bf16.mxu1 %v4478_v29 }
 0x6cc   :  { %5227 = vmatprep.mubr.bf16.mxu0 %v17237_v3 }
 0x6cd   :  { %5304 = vmatpush1.bf16.msra.mxu1 %v4477_v32  ;;  %v4472_v56 = vpop.permute.xlu0 %4471  ;;  %v4470_v7 = vpop.permute.xlu1 %4469 }
 0x6ce   :  { %v4484_v55 = vsel %vm485_vm3, %v4470_v7, %v4472_v56  ;;  %v4483_v19 = vsel %vm485_vm3, %v17190_v10, %v4470_v7 }
 0x6cf   :  { %5305 = vmatprep.subr.bf16.mxu1 %v4484_v55 }
 0x6d1   :  { %5306 = vmatpush1.bf16.msra.mxu1 %v4483_v19  ;;  %v4846_v46 = vpop.permute.xlu0 %4845  ;;  %v4844_v26 = vpop.permute.xlu1 %4843 }
 0x6d2   :  { %5307 = vmatprep.subr.bf16.mxu1 %v16848_v16  ;;  %v4868_v45 = vsel %vm881_vm7, %v4844_v26, %v4846_v46  ;;  %v4867_v25 = vsel %vm881_vm7, %v17083_v34, %v4844_v26 }
 0x6d3   :  { %5228 = vmatmul.mubr.bf16.gmra.mrb[44].mxu0 %v17264_v14  ;;  %5238 = vmatprep.subr.bf16.mxu0 %v4868_v45 }
 0x6d4   :  { %5239 = vmatpush1.bf16.msra.mxu0 %v4867_v25  ;;  %5270 = vmatprep.mubr.bf16.mxu0 %v22188_v50 }
 0x6d5   :  { %5308 = vmatpush1.bf16.msra.mxu1 %v16845_v41  ;;  %v4860_v10 = vpop.permute.xlu0 %4859  ;;  %v4858_v54 = vpop.permute.xlu1 %4857 }
 0x6d6   :  { %5309 = vmatprep.subr.bf16.mxu1 %v16867_v18  ;;  %v4874_v4 = vsel %vm881_vm7, %v4858_v54, %v4860_v10  ;;  %v4873_v16 = vsel %vm881_vm7, %v17159_v43, %v4858_v54 }
 0x6d7   :  { %5240 = vmatprep.subr.bf16.mxu0 %v4874_v4 }
 0x6d8   :  { %5241 = vmatpush1.bf16.msra.mxu0 %v4873_v16 }
 0x6d9   :  { %5310 = vmatpush1.bf16.msra.mxu1 %v16865_v35  ;;  %v4574_v34 = vpop.permute.xlu0 %4573  ;;  %v4572_v20 = vpop.permute.xlu1 %4571 }
 0x6da   :  { %v4594_v58 = vsel %vm602_vm4, %v4572_v20, %v4574_v34  ;;  %v4593_v41 = vsel %vm602_vm4, %v17207_v47, %v4572_v20 }
 0x6db   :  { %13605 = vmatmul.mubr.msk.bf16.vlgmr.msra.gmra.mrb[40].mxu0 %vm1088_vm8, %v17277_v2  ;;  %5311 = vmatprep.subr.bf16.mxu1 %v4594_v58 }
 0x6dc   :  { %5280 = vmatprep.mubr.bf16.mxu0 %v22188_v50 }
 0x6dd   :  { %5312 = vmatpush1.bf16.msra.mxu1 %v4593_v41  ;;  %v4588_v18 = vpop.permute.xlu0 %4587  ;;  %v4586_v43 = vpop.permute.xlu1 %4585 }
 0x6de   :  { %v4600_v51 = vsel %vm602_vm4, %v4586_v43, %v4588_v18  ;;  %v4599_v35 = vsel %vm602_vm4, %v17279_v57, %v4586_v43  ;;  %v22189_v18 = vld [vmem:[#allocation4_spill] sm:$0xff] }
 0x6df   :  { %5313 = vmatprep.subr.bf16.mxu1 %v4600_v51 }
 0x6e1   :  { %5314 = vmatpush1.bf16.msra.mxu1 %v4599_v35  ;;  %v4666_v0 = vpop.permute.xlu0 %4665  ;;  %v4664_v37 = vpop.permute.xlu1 %4663  ;;  %v22191_v35 = vld [vmem:[#allocation5_spill] sm:$0xff] }
 0x6e2   :  { %v4686_v47 = vsel %vm695_vm5, %v4664_v37, %v4666_v0  ;;  %v4685_v59 = vsel %vm695_vm5, %v17225_v30, %v4664_v37 }
 0x6e3   :  { %13606 = vmatmul.mubr.msk.bf16.gmra.mrb[44].mxu0 %vm1088_vm8, %v17301_v61  ;;  %5315 = vmatprep.subr.bf16.mxu1 %v4686_v47 }
 0x6e5   :  { %5316 = vmatpush1.bf16.msra.mxu1 %v4685_v59  ;;  %v4680_v1 = vpop.permute.xlu0 %4679  ;;  %v4678_v36 = vpop.permute.xlu1 %4677 }
 0x6e6   :  { %v4692_v31 = vsel %vm695_vm5, %v4678_v36, %v4680_v1  ;;  %v4691_v57 = vsel %vm695_vm5, %v17290_v15, %v4678_v36  ;;  %v22193_v36 = vld [vmem:[#allocation6_spill] sm:$0xff] }
 0x6e7   :  { %5317 = vmatprep.subr.bf16.mxu1 %v4692_v31 }
 0x6e9   :  { %5318 = vmatpush1.bf16.msra.mxu1 %v4691_v57  ;;  %v4758_v11 = vpop.permute.xlu0 %4757  ;;  %v4756_v53 = vpop.permute.xlu1 %4755  ;;  %v22195_v57 = vld [vmem:[#allocation7_spill] sm:$0xff] }
 0x6ea   :  { %v4778_v48 = vsel %vm788_vm6, %v4756_v53, %v4758_v11  ;;  %v4777_v30 = vsel %vm788_vm6, %v17313_v52, %v4756_v53 }
 0x6eb   :  { %5319 = vmatprep.subr.bf16.mxu1 %v4778_v48 }
 0x6ed   :  { %5320 = vmatpush1.bf16.msra.mxu1 %v4777_v30  ;;  %v4772_v8 = vpop.permute.xlu0 %4771  ;;  %v4770_v24 = vpop.permute.xlu1 %4769 }
 0x6ee   :  { %v4784_v12 = vsel %vm788_vm6, %v4770_v24, %v4772_v8  ;;  %v4783_v21 = vsel %vm788_vm6, %v17331_v13, %v4770_v24 }
 0x6ef   :  { %5321 = vmatprep.subr.bf16.mxu1 %v4784_v12 }
 0x6f1   :  { %5322 = vmatpush1.bf16.msra.mxu1 %v4783_v21  ;;  %v4850_v15 = vpop.permute.xlu0 %4849  ;;  %v4848_v23 = vpop.permute.xlu1 %4847 }
 0x6f2   :  { %v4870_v33 = vsel %vm881_vm7, %v4848_v23, %v4850_v15  ;;  %v4869_v28 = vsel %vm881_vm7, %v4846_v46, %v4848_v23 }
 0x6f3   :  { %5344 = vmatprep.subr.bf16.mxu1 %v4870_v33 }
 0x6f4   :  { %5324 = vmatmul.mubr.bf16.vlgmr.msra.gmra.mrb[40].mxu1 %v17223_v9 }
 0x6f5   :  { %5345 = vmatpush1.bf16.msra.mxu1 %v4869_v28  ;;  %v4864_v52 = vpop.permute.xlu0 %4863  ;;  %v4862_v62 = vpop.permute.xlu1 %4861  ;;  %5333 = vmatprep.mubr.bf16.mxu1 %v17237_v3 }
 0x6f6   :  { %v4876_v38 = vsel %vm881_vm7, %v4862_v62, %v4864_v52  ;;  %v4875_v13 = vsel %vm881_vm7, %v4860_v10, %v4862_v62  ;;  %v22197_v52 = vld [vmem:[#allocation8_spill] sm:$0xff] }
 0x6f7   :  { %5346 = vmatprep.subr.bf16.mxu1 %v4876_v38  ;;  %v22199_v38 = vld [vmem:[#allocation9_spill] sm:$0xff] }
 0x6f9   :  { %5347 = vmatpush1.bf16.msra.mxu1 %v4875_v13 }
 0x6fc   :  { %5334 = vmatmul.mubr.bf16.gmra.mrb[44].mxu1 %v17264_v14 }
 0x6fd   :  { %5376 = vmatprep.mubr.bf16.mxu1 %v22188_v50 }
 0x704   :  { %13607 = vmatmul.mubr.msk.bf16.vlgmr.msra.gmra.mrb[40].mxu1 %vm1088_vm8, %v17277_v2 }
 0x705   :  { %5386 = vmatprep.mubr.bf16.mxu1 %v22188_v50 }
 0x706   :  { %v17409_v9 = vpop.permute.xlu1 %5025  ;;  %v17412_v44 = vpop.permute.xlu0 %5030 }
 0x70a   :  { %v17425_v54 = vpop.permute.xlu0 %5040  ;;  %v17433_v41 = vpop.permute.xlu1 %5035 }
 0x70c   :  { %13608 = vmatmul.mubr.msk.bf16.gmra.mrb[44].mxu1 %vm1088_vm8, %v17301_v61 }
 0x783   :  { %v5166_v3 = vpop.f32.mrb[32].mxu1 }
 0x784   :  { %v13825_v14 = vadd.f32 %v5166_v3, %v17409_v9  ;;  %v5168_v2 = vpop.f32.mrb[33].mxu1 }
 0x785   :  { %v5170_v6 = vpop.f32.mrb[34].mxu1  ;;  %v13826_v56 = vadd.f32 %v5168_v2, %v17409_v9 }
 0x786   :  { %v5397_v42 = vmax.f32 %v13825_v14, 0.0  ;;  %v13827_v39 = vadd.f32 %v5170_v6, %v17412_v44  ;;  %v5172_v29 = vpop.f32.mrb[35].mxu1 }
 0x787   :  { %v13828_v61 = vadd.f32 %v5172_v29, %v17412_v44  ;;  %v5398_v45 = vmax.f32 %v13826_v56, 0.0 }
 0x788   :  { %v5421_v32 = vmul.f32 %v5397_v42, %v15186_v60  ;;  %v5403_v7 = vmax.f32 %v13827_v39, 0.0 }
 0x789   :  { %v5404_v19 = vmax.f32 %v13828_v61, 0.0 }
 0x78a   :  { %v5427_v55 = vmul.f32 %v5403_v7, %v15186_v60  ;;  %v17420_v26 = vadd.f32 %v5421_v32, %v15915_v49  ;;  %v5422_v49 = vmul.f32 %v5398_v45, %v15190_v5 }
 0x78b   :  { %v5176_v46 = vpop.f32.mrb[36].mxu1  ;;  %v5428_v34 = vmul.f32 %v5404_v19, %v15190_v5 }
 0x78c   :  { %v17423_v25 = vadd.f32 %v5427_v55, %v15919_v27  ;;  %v5178_v10 = vpop.f32.mrb[37].mxu1  ;;  %v13829_v27 = vadd.f32 %v5176_v46, %v17433_v41  ;;  %v17445_v0 = vadd.f32 %v5422_v49, %v22191_v35  ;;  %v22201_v55 = vld [vmem:[#allocation10_spill] sm:$0xff]  ;;  %v22203_v46 = vld [vmem:[#allocation11_spill] sm:$0xff] }
 0x78d   :  { %v5180_v4 = vpop.f32.mrb[38].mxu1  ;;  %v17442_v43 = vadd.f32 %v5428_v34, %v22189_v18  ;;  %v13830_v30 = vadd.f32 %v5178_v10, %v17433_v41 }
 0x78e   :  { %v17429_v16 = vpack.c.bf16 %v17423_v25, %v17420_v26  ;;  %v13831_v20 = vadd.f32 %v5180_v4, %v17425_v54  ;;  %v5182_v58 = vpop.f32.mrb[39].mxu1  ;;  %22192 = vst [vmem:[#allocation5_spill] sm:$0xff] %v17445_v0  ;;  %v5409_v37 = vmax.f32 %v13829_v27, 0.0 }
 0x78f   :  { %22190 = vst [vmem:[#allocation4_spill] sm:$0xff] %v17442_v43  ;;  %v17453_v47 = vpack.c.bf16 %v17442_v43, %v17445_v0  ;;  %v13832_v48 = vadd.f32 %v5182_v58, %v17425_v54  ;;  %v5410_v24 = vmax.f32 %v13830_v30, 0.0  ;;  %v22205_v30 = vld [vmem:[#allocation12_spill] sm:$0xff] }
 0x790   :  { %5615 = vrot.lane.b32.xlu0 %v17429_v16, %s14554_s24  ;;  %5523 = vrot.lane.b32.xlu1 %v17429_v16, %s14553_s17  ;;  %v5415_v51 = vmax.f32 %v13831_v20, 0.0  ;;  %v5433_v1 = vmul.f32 %v5409_v37, %v15186_v60 }
 0x791   :  { %v5416_v8 = vmax.f32 %v13832_v48, 0.0  ;;  %v5434_v23 = vmul.f32 %v5410_v24, %v15190_v5  ;;  %v22207_v24 = vld [vmem:[#allocation13_spill] sm:$0xff] }
 0x792   :  { %v5439_v59 = vmul.f32 %v5415_v51, %v15186_v60  ;;  %v17465_v11 = vadd.f32 %v5433_v1, %v22195_v57 }
 0x793   :  { %v5440_v12 = vmul.f32 %v5416_v8, %v15190_v5  ;;  %v17503_v13 = vadd.f32 %v5434_v23, %v22199_v38 }
 0x794   :  { %5799 = vrot.lane.b32.xlu0 %v17429_v16, %s14556_s26  ;;  %5707 = vrot.lane.b32.xlu1 %v17429_v16, %s14555_s25  ;;  %v17462_v31 = vadd.f32 %v5439_v59, %v22193_v36  ;;  %22196 = vst [vmem:[#allocation7_spill] sm:$0xff] %v17465_v11 }
 0x795   :  { %v17500_v62 = vadd.f32 %v5440_v12, %v22197_v52  ;;  %22200 = vst [vmem:[#allocation9_spill] sm:$0xff] %v17503_v13 }
 0x796   :  { %22194 = vst [vmem:[#allocation6_spill] sm:$0xff] %v17462_v31  ;;  %v17473_v53 = vpack.c.bf16 %v17462_v31, %v17465_v11 }
 0x797   :  { %22198 = vst [vmem:[#allocation8_spill] sm:$0xff] %v17500_v62  ;;  %v17511_v3 = vpack.c.bf16 %v17500_v62, %v17503_v13 }
 0x798   :  { %5525 = vrot.lane.b32.xlu0 %v17453_v47, %s14553_s17  ;;  %5913 = vrot.lane.b32.xlu1 %v17429_v16, %s14557_s29 }
 0x79c   :  { %5709 = vrot.lane.b32.xlu0 %v17453_v47, %s14555_s25  ;;  %6005 = vrot.lane.b32.xlu1 %v17429_v16, %s14558_s10 }
 0x7a0   :  { %6097 = vrot.lane.b32.xlu1 %v17429_v16, %s14559_s11  ;;  %5537 = vrot.lane.b32.xlu0 %v17473_v53, %s14553_s17 }
 0x7a4   :  { %6189 = vrot.lane.b32.xlu1 %v17429_v16, %s14560_s14  ;;  %5721 = vrot.lane.b32.xlu0 %v17473_v53, %s14555_s25 }
 0x7a8   :  { %5617 = vrot.lane.b32.xlu1 %v17453_v47, %s14554_s24  ;;  %5927 = vrot.lane.b32.xlu0 %v17473_v53, %s14557_s29 }
 0x7ac   :  { %5801 = vrot.lane.b32.xlu1 %v17453_v47, %s14556_s26  ;;  %6019 = vrot.lane.b32.xlu0 %v17473_v53, %s14558_s10 }
 0x7ae   :  { %v5272_v21 = vpop.f32.mrb[40].mxu0 }
 0x7af   :  { %v5274_v15 = vpop.f32.mrb[41].mxu0  ;;  %v13833_v29 = vadd.f32 %v5272_v21, %v17409_v9 }
 0x7b0   :  { %5915 = vrot.lane.b32.xlu1 %v17453_v47, %s14557_s29  ;;  %6111 = vrot.lane.b32.xlu0 %v17473_v53, %s14559_s11  ;;  %v5276_v33 = vpop.f32.mrb[42].mxu0  ;;  %v13834_v20 = vadd.f32 %v5274_v15, %v17409_v9  ;;  %v22209_v15 = vld [vmem:[#allocation14_spill] sm:$0xff] }
 0x7b1   :  { %v5278_v28 = vpop.f32.mrb[43].mxu0  ;;  %v13835_v39 = vadd.f32 %v5276_v33, %v17412_v44  ;;  %v5399_v32 = vmax.f32 %v13833_v29, 0.0  ;;  %v22211_v33 = vld [vmem:[#allocation15_spill] sm:$0xff] }
 0x7b2   :  { %v13836_v4 = vadd.f32 %v5278_v28, %v17412_v44  ;;  %v5400_v18 = vmax.f32 %v13834_v20, 0.0 }
 0x7b3   :  { %v5405_v61 = vmax.f32 %v13835_v39, 0.0  ;;  %v5423_v7 = vmul.f32 %v5399_v32, %v15232_v17 }
 0x7b4   :  { %6007 = vrot.lane.b32.xlu1 %v17453_v47, %s14558_s10  ;;  %6203 = vrot.lane.b32.xlu0 %v17473_v53, %s14560_s14  ;;  %v5406_v49 = vmax.f32 %v13836_v4, 0.0  ;;  %v5424_v1 = vmul.f32 %v5400_v18, %v15236_v22 }
 0x7b5   :  { %v5429_v56 = vmul.f32 %v5405_v61, %v15232_v17  ;;  %v17541_v45 = vadd.f32 %v5423_v7, %v22203_v46 }
 0x7b6   :  { %v5282_v14 = vpop.f32.mrb[44].mxu0  ;;  %v5430_v35 = vmul.f32 %v5406_v49, %v15236_v22  ;;  %v17578_v23 = vadd.f32 %v5424_v1, %v22209_v15  ;;  %v17648_v1 = vld [vmem:[%s22072_s1 + $0xc4] ss:$12 sps:$4 sm:$0xff]  }
 0x7b7   :  { %v5284_v2 = vpop.f32.mrb[45].mxu0  ;;  %v17538_v19 = vadd.f32 %v5429_v56, %v22201_v55  ;;  %22204 = vst [vmem:[#allocation11_spill] sm:$0xff] %v17541_v45  ;;  %v13837_v58 = vadd.f32 %v5282_v14, %v17433_v41  ;;  %6463 = vmatprep.mubr.bf16.mxu0 %v17648_v1  ;;  %6569 = vmatprep.mubr.bf16.mxu1 %v17648_v1 }
 0x7b8   :  { %6099 = vrot.lane.b32.xlu1 %v17453_v47, %s14559_s11  ;;  %5631 = vrot.lane.b32.xlu0 %v17511_v3, %s14554_s24  ;;  %v5286_v6 = vpop.f32.mrb[46].mxu0  ;;  %v17572_v8 = vadd.f32 %v5430_v35, %v22205_v30  ;;  %22210 = vst [vmem:[#allocation14_spill] sm:$0xff] %v17578_v23  ;;  %v13838_v32 = vadd.f32 %v5284_v2, %v17433_v41  ;;  %v22213_v2 = vld [vmem:[#allocation16_spill] sm:$0xff] }
 0x7b9   :  { %v5288_v42 = vpop.f32.mrb[47].mxu0  ;;  %22202 = vst [vmem:[#allocation10_spill] sm:$0xff] %v17538_v19  ;;  %v17549_v10 = vpack.c.bf16 %v17538_v19, %v17541_v45  ;;  %v13839_v34 = vadd.f32 %v5286_v6, %v17425_v54  ;;  %v5411_v51 = vmax.f32 %v13837_v58, 0.0 }
 0x7ba   :  { %22206 = vst [vmem:[#allocation12_spill] sm:$0xff] %v17572_v8  ;;  %v17589_v52 = vpack.c.bf16 %v17572_v8, %v17578_v23  ;;  %v13840_v29 = vadd.f32 %v5288_v42, %v17425_v54  ;;  %v5412_v7 = vmax.f32 %v13838_v32, 0.0 }
 0x7bb   :  { %v5417_v27 = vmax.f32 %v13839_v34, 0.0  ;;  %v5435_v36 = vmul.f32 %v5411_v51, %v15232_v17  ;;  %v22215_v34 = vld [vmem:[#allocation17_spill] sm:$0xff] }
 0x7bc   :  { %6191 = vrot.lane.b32.xlu1 %v17453_v47, %s14560_s14  ;;  %5815 = vrot.lane.b32.xlu0 %v17511_v3, %s14556_s26  ;;  %v5418_v56 = vmax.f32 %v13840_v29, 0.0  ;;  %v5436_v55 = vmul.f32 %v5412_v7, %v15236_v22  ;;  %v22221_v7 = vld [vmem:[#allocation20_spill] sm:$0xff] }
 0x7bd   :  { %v5441_v37 = vmul.f32 %v5417_v27, %v15232_v17  ;;  %v17581_v28 = vadd.f32 %v5435_v36, %v22211_v33 }
 0x7be   :  { %v5442_v42 = vmul.f32 %v5418_v56, %v15236_v22  ;;  %v17624_v20 = vadd.f32 %v5436_v55, %v22215_v34  ;;  %v22223_v34 = vld [vmem:[#allocation21_spill] sm:$0xff] }
 0x7bf   :  { %v17575_v12 = vadd.f32 %v5441_v37, %v22207_v24  ;;  %22212 = vst [vmem:[#allocation15_spill] sm:$0xff] %v17581_v28  ;;  %v17641_v37 = vpop.permute.xlu0 %14330 }
 0x7c0   :  { %5629 = vrot.lane.b32.xlu1 %v17473_v53, %s14554_s24  ;;  %5929 = vrot.lane.b32.xlu0 %v17511_v3, %s14557_s29  ;;  %v17620_v46 = vadd.f32 %v5442_v42, %v22213_v2  ;;  %22216 = vst [vmem:[#allocation17_spill] sm:$0xff] %v17624_v20  ;;  %v14332_v19 = vunpack.i.l.bf16 %v17641_v37  ;;  %v14333_v31 = vunpack.i.h.bf16 %v17641_v37 }
 0x7c1   :  { %22208 = vst [vmem:[#allocation13_spill] sm:$0xff] %v17575_v12  ;;  %v17593_v38 = vpack.c.bf16 %v17575_v12, %v17581_v28 }
 0x7c2   :  { %22214 = vst [vmem:[#allocation16_spill] sm:$0xff] %v17620_v46  ;;  %v17633_v49 = vpack.c.bf16 %v17620_v46, %v17624_v20 }
 0x7c4   :  { %5813 = vrot.lane.b32.xlu1 %v17473_v53, %s14556_s26  ;;  %6021 = vrot.lane.b32.xlu0 %v17511_v3, %s14558_s10 }
 0x7c8   :  { %5539 = vrot.lane.b32.xlu1 %v17511_v3, %s14553_s17  ;;  %6113 = vrot.lane.b32.xlu0 %v17511_v3, %s14559_s11 }
 0x7cc   :  { %5723 = vrot.lane.b32.xlu1 %v17511_v3, %s14555_s25  ;;  %6205 = vrot.lane.b32.xlu0 %v17511_v3, %s14560_s14 }
 0x7d0   :  { %5527 = vrot.lane.b32.xlu1 %v17549_v10, %s14553_s17  ;;  %5917 = vrot.lane.b32.xlu0 %v17549_v10, %s14557_s29 }
 0x7d4   :  { %5619 = vrot.lane.b32.xlu1 %v17549_v10, %s14554_s24  ;;  %6009 = vrot.lane.b32.xlu0 %v17549_v10, %s14558_s10 }
 0x7d7   :  { %v5378_v59 = vpop.f32.mrb[40].mxu1 }
 0x7d8   :  { %v5380_v57 = vpop.f32.mrb[41].mxu1  ;;  %5711 = vrot.lane.b32.xlu1 %v17549_v10, %s14555_s25  ;;  %6101 = vrot.lane.b32.xlu0 %v17549_v10, %s14559_s11  ;;  %v13841_v58 = vadd.f32 %v5378_v59, %v17409_v9  ;;  %v17643_v59 = vpop.permute.xlu1 %14325 }
 0x7d9   :  { %v5382_v48 = vpop.f32.mrb[42].mxu1  ;;  %v14328_v8 = vunpack.i.h.bf16 %v17643_v59 }
 0x7da   :  { %v5384_v21 = vpop.f32.mrb[43].mxu1  ;;  %v13843_v4 = vadd.f32 %v5382_v48, %v17412_v44  ;;  %v5401_v18 = vmax.f32 %v13841_v58, 0.0  ;;  %v13842_v48 = vadd.f32 %v5380_v57, %v17409_v9  ;;  %v17668_v9 = vpop.permute.xlu0 %14340 }
 0x7db   :  { %v13844_v35 = vadd.f32 %v5384_v21, %v17412_v44  ;;  %v22217_v44 = vld [vmem:[#allocation18_spill] sm:$0xff]  ;;  %v22219_v21 = vld [vmem:[#allocation19_spill] sm:$0xff] }
 0x7dc   :  { %5803 = vrot.lane.b32.xlu1 %v17549_v10, %s14556_s26  ;;  %6193 = vrot.lane.b32.xlu0 %v17549_v10, %s14560_s14  ;;  %v5407_v27 = vmax.f32 %v13843_v4, 0.0  ;;  %v5425_v36 = vmul.f32 %v5401_v18, %v15296_v40  ;;  %v5402_v33 = vmax.f32 %v13842_v48, 0.0  ;;  %v17670_v57 = vpop.permute.xlu1 %14335 }
 0x7dd   :  { %v5408_v24 = vmax.f32 %v13844_v35, 0.0  ;;  %v14337_v37 = vunpack.i.l.bf16 %v17670_v57 }
 0x7de   :  { %v5431_v51 = vmul.f32 %v5407_v27, %v15296_v40  ;;  %v17662_v15 = vadd.f32 %v5425_v36, %v22219_v21  ;;  %v5426_v56 = vmul.f32 %v5402_v33, %v15304_v63  ;;  %v14327_v21 = vunpack.i.l.bf16 %v17643_v59 }
 0x7df   :  { %v5388_v14 = vpop.f32.mrb[44].mxu1  ;;  %v5432_v32 = vmul.f32 %v5408_v24, %v15304_v63 }
 0x7e0   :  { %v17595_v6 = vpop.f32.mrb[45].mxu1  ;;  %5931 = vrot.lane.b32.xlu1 %v17593_v38, %s14557_s29  ;;  %5529 = vrot.lane.b32.xlu0 %v17589_v52, %s14553_s17  ;;  %v17659_v30 = vadd.f32 %v5431_v51, %v22217_v44  ;;  %22220 = vst [vmem:[#allocation19_spill] sm:$0xff] %v17662_v15  ;;  %v17689_v58 = vadd.f32 %v5426_v56, %v22223_v34 }
 0x7e1   :  { %v5392_v39 = vpop.f32.mrb[46].mxu1  ;;  %v17683_v42 = vadd.f32 %v5432_v32, %v22221_v7  ;;  %v13845_v27 = vadd.f32 %v5388_v14, %v17433_v41  ;;  %v13846_v56 = vadd.f32 %v17595_v6, %v17433_v41 }
 0x7e2   :  { %v17602_v61 = vpop.f32.mrb[47].mxu1  ;;  %22218 = vst [vmem:[#allocation18_spill] sm:$0xff] %v17659_v30  ;;  %v17674_v29 = vpack.c.bf16 %v17659_v30, %v17662_v15  ;;  %v13847_v55 = vadd.f32 %v5392_v39, %v17425_v54  ;;  %22224 = vst [vmem:[#allocation21_spill] sm:$0xff] %v17689_v58 }
 0x7e3   :  { %22222 = vst [vmem:[#allocation20_spill] sm:$0xff] %v17683_v42  ;;  %v17698_v18 = vpack.c.bf16 %v17683_v42, %v17689_v58  ;;  %v5413_v36 = vmax.f32 %v13845_v27, 0.0  ;;  %v13848_v48 = vadd.f32 %v17602_v61, %v17425_v54  ;;  %v22225_v61 = vld [vmem:[#allocation22_spill] sm:$0xff]  ;;  %v5414_v6 = vmax.f32 %v13846_v56, 0.0 }
 0x7e4   :  { %6023 = vrot.lane.b32.xlu1 %v17593_v38, %s14558_s10  ;;  %5621 = vrot.lane.b32.xlu0 %v17589_v52, %s14554_s24  ;;  %v5419_v51 = vmax.f32 %v13847_v55, 0.0 }
 0x7e5   :  { %v5437_v32 = vmul.f32 %v5413_v36, %v15296_v40  ;;  %v5420_v55 = vmax.f32 %v13848_v48, 0.0 }
 0x7e6   :  { %v5443_v14 = vmul.f32 %v5419_v51, %v15296_v40  ;;  %v22227_v51 = vld [vmem:[#allocation23_spill] sm:$0xff] }
 0x7e7   :  { %v17734_v41 = vadd.f32 %v5437_v32, %v22227_v51  ;;  %v5444_v36 = vmul.f32 %v5420_v55, %v15304_v63 }
 0x7e8   :  { %6115 = vrot.lane.b32.xlu1 %v17593_v38, %s14559_s11  ;;  %5713 = vrot.lane.b32.xlu0 %v17589_v52, %s14555_s25  ;;  %v17727_v7 = vadd.f32 %v5443_v14, %v22225_v61  ;;  %v22231_v61 = vld [vmem:[#allocation25_spill] sm:$0xff] }
 0x7e9   :  { %22228 = vst [vmem:[#allocation23_spill] sm:$0xff] %v17734_v41 }
 0x7ea   :  { %22226 = vst [vmem:[#allocation22_spill] sm:$0xff] %v17727_v7 }
 0x7ec   :  { %5817 = vrot.lane.b32.xlu1 %v17593_v38, %s14556_s26  ;;  %5805 = vrot.lane.b32.xlu0 %v17589_v52, %s14556_s26 }
 0x7f0   :  { %6207 = vrot.lane.b32.xlu1 %v17593_v38, %s14560_s14  ;;  %5541 = vrot.lane.b32.xlu0 %v17593_v38, %s14553_s17 }
 0x7f4   :  { %5543 = vrot.lane.b32.xlu1 %v17633_v49, %s14553_s17  ;;  %5633 = vrot.lane.b32.xlu0 %v17593_v38, %s14554_s24 }
 0x7f8   :  { %5919 = vrot.lane.b32.xlu1 %v17589_v52, %s14557_s29  ;;  %5725 = vrot.lane.b32.xlu0 %v17593_v38, %s14555_s25 }
 0x7fc   :  { %5635 = vrot.lane.b32.xlu1 %v17633_v49, %s14554_s24  ;;  %5819 = vrot.lane.b32.xlu0 %v17633_v49, %s14556_s26 }
 0x800   :  { %6011 = vrot.lane.b32.xlu1 %v17589_v52, %s14558_s10  ;;  %5921 = vrot.lane.b32.xlu0 %v17674_v29, %s14557_s29 }
 0x802   :  { %v17686_v2 = vpop.permute.xlu0 %5615  ;;  %v5524_v4 = vpop.permute.xlu1 %5523 }
 0x803   :  { %v5549_v54 = vsel %vm206_vm0, %v14327_v21, %v5524_v4  ;;  %v5438_v21 = vmul.f32 %v5414_v6, %v15304_v63 }
 0x804   :  { %5727 = vrot.lane.b32.xlu1 %v17633_v49, %s14555_s25  ;;  %6013 = vrot.lane.b32.xlu0 %v17674_v29, %s14558_s10 }
 0x805   :  { %v17760_v55 = vadd.f32 %v5438_v21, %v22231_v61 }
 0x806   :  { %v17700_v39 = vpop.permute.xlu0 %5799  ;;  %v17702_v35 = vpop.permute.xlu1 %5707 }
 0x807   :  { %22232 = vst [vmem:[#allocation25_spill] sm:$0xff] %v17760_v55 }
 0x808   :  { %5933 = vrot.lane.b32.xlu1 %v17633_v49, %s14557_s29  ;;  %5533 = vrot.lane.b32.xlu0 %v17698_v18, %s14553_s17 }
 0x80a   :  { %v17711_v44 = vpop.permute.xlu0 %5525  ;;  %v17713_v24 = vpop.permute.xlu1 %5913 }
 0x80b   :  { %v5550_v33 = vsel %vm206_vm0, %v5524_v4, %v17711_v44  ;;  %v17742_v4 = vpack.c.bf16 %v17727_v7, %v17734_v41 }
 0x80c   :  { %6025 = vrot.lane.b32.xlu1 %v17633_v49, %s14558_s10  ;;  %5625 = vrot.lane.b32.xlu0 %v17698_v18, %s14554_s24 }
 0x80d   :  { %6431 = vmatprep.subr.bf16.mxu0 %v5550_v33  ;;  %v22229_v33 = vld [vmem:[#allocation24_spill] sm:$0xff] }
 0x80e   :  { %6432 = vmatpush1.bf16.msra.mxu0 %v5549_v54  ;;  %v17729_v34 = vpop.permute.xlu0 %5709  ;;  %v17731_v27 = vpop.permute.xlu1 %6005  ;;  %v17753_v32 = vadd.f32 %v5444_v36, %v22229_v33 }
 0x810   :  { %5531 = vrot.lane.b32.xlu1 %v17674_v29, %s14553_s17  ;;  %5717 = vrot.lane.b32.xlu0 %v17698_v18, %s14555_s25  ;;  %22230 = vst [vmem:[#allocation24_spill] sm:$0xff] %v17753_v32  ;;  %v17768_v51 = vpack.c.bf16 %v17753_v32, %v17760_v55 }
 0x812   :  { %v5538_v14 = vpop.permute.xlu0 %5537  ;;  %v17745_v48 = vpop.permute.xlu1 %6097 }
 0x813   :  { %v5555_v13 = vsel %vm206_vm0, %v14328_v8, %v5538_v14 }
 0x814   :  { %5623 = vrot.lane.b32.xlu1 %v17674_v29, %s14554_s24  ;;  %5935 = vrot.lane.b32.xlu0 %v17742_v4, %s14557_s29 }
 0x816   :  { %v17755_v56 = vpop.permute.xlu0 %5721  ;;  %v17757_v54 = vpop.permute.xlu1 %6189 }
 0x818   :  { %5715 = vrot.lane.b32.xlu1 %v17674_v29, %s14555_s25  ;;  %6027 = vrot.lane.b32.xlu0 %v17742_v4, %s14558_s10 }
 0x81a   :  { %v17770_v6 = vpop.permute.xlu0 %5927  ;;  %v17772_v36 = vpop.permute.xlu1 %5617 }
 0x81b   :  { %v5642_v59 = vsel %vm299_vm1, %v17686_v2, %v17772_v36 }
 0x81c   :  { %5545 = vrot.lane.b32.xlu1 %v17742_v4, %s14553_s17  ;;  %5547 = vrot.lane.b32.xlu0 %v17768_v51, %s14553_s17 }
 0x81e   :  { %v17778_v21 = vpop.permute.xlu0 %6019  ;;  %v17780_v33 = vpop.permute.xlu1 %5801 }
 0x820   :  { %6103 = vrot.lane.b32.xlu1 %v17589_v52, %s14559_s11  ;;  %6105 = vrot.lane.b32.xlu0 %v17674_v29, %s14559_s11 }
 0x822   :  { %v17786_v61 = vpop.permute.xlu0 %6111  ;;  %v17788_v55 = vpop.permute.xlu1 %5915 }
 0x824   :  { %5637 = vrot.lane.b32.xlu1 %v17742_v4, %s14554_s24  ;;  %5639 = vrot.lane.b32.xlu0 %v17768_v51, %s14554_s24 }
 0x826   :  { %v17794_v32 = vpop.permute.xlu0 %6203  ;;  %v17796_v41 = vpop.permute.xlu1 %6007 }
 0x828   :  { %5729 = vrot.lane.b32.xlu1 %v17742_v4, %s14555_s25  ;;  %6119 = vrot.lane.b32.xlu0 %v17742_v4, %s14559_s11 }
 0x82a   :  { %v17802_v7 = vpop.permute.xlu0 %5631  ;;  %v17804_v58 = vpop.permute.xlu1 %6099 }
 0x82c   :  { %6117 = vrot.lane.b32.xlu1 %v17633_v49, %s14559_s11  ;;  %5731 = vrot.lane.b32.xlu0 %v17768_v51, %s14555_s25 }
 0x82e   :  { %v17810_v42 = vpop.permute.xlu0 %5815  ;;  %v17812_v15 = vpop.permute.xlu1 %6191 }
 0x830   :  { %5807 = vrot.lane.b32.xlu1 %v17674_v29, %s14556_s26  ;;  %5809 = vrot.lane.b32.xlu0 %v17698_v18, %s14556_s26 }
 0x832   :  { %v17818_v30 = vpop.permute.xlu0 %5929  ;;  %v5630_v20 = vpop.permute.xlu1 %5629 }
 0x834   :  { %5821 = vrot.lane.b32.xlu1 %v17742_v4, %s14556_s26  ;;  %5823 = vrot.lane.b32.xlu0 %v17768_v51, %s14556_s26 }
 0x836   :  { %v17824_v46 = vpop.permute.xlu0 %6021  ;;  %v17826_v28 = vpop.permute.xlu1 %5813 }
 0x838   :  { %6195 = vrot.lane.b32.xlu1 %v17589_v52, %s14560_s14  ;;  %6197 = vrot.lane.b32.xlu0 %v17674_v29, %s14560_s14 }
 0x83a   :  { %v17832_v23 = vpop.permute.xlu0 %6113  ;;  %v17834_v12 = vpop.permute.xlu1 %5539 }
 0x83b   :  { %v5556_v45 = vsel %vm206_vm0, %v5538_v14, %v17834_v12  ;;  %v5648_v14 = vsel %vm299_vm1, %v5630_v20, %v17802_v7 }
 0x83c   :  { %6209 = vrot.lane.b32.xlu1 %v17633_v49, %s14560_s14  ;;  %6211 = vrot.lane.b32.xlu0 %v17742_v4, %s14560_s14 }
 0x83d   :  { %6433 = vmatprep.subr.bf16.mxu0 %v5556_v45  ;;  %v5641_v45 = vsel %vm299_vm1, %v14332_v19, %v17686_v2 }
 0x83e   :  { %6434 = vmatpush1.bf16.msra.mxu0 %v5555_v13  ;;  %v17845_v62 = vpop.permute.xlu0 %6205  ;;  %v17847_v11 = vpop.permute.xlu1 %5723 }
 0x83f   :  { %6435 = vmatprep.subr.bf16.mxu0 %v5642_v59  ;;  %v5647_v59 = vsel %vm299_vm1, %v14333_v31, %v5630_v20  ;;  %v5733_v31 = vsel %vm392_vm2, %v14337_v37, %v17702_v35 }
 0x840   :  { %5923 = vrot.lane.b32.xlu1 %v17698_v18, %s14557_s29  ;;  %5925 = vrot.lane.b32.xlu0 %v22188_v50, %s14557_s29 }
 0x842   :  { %6436 = vmatpush1.bf16.msra.mxu0 %v5641_v45  ;;  %v17858_v13 = vpop.permute.xlu0 %5917  ;;  %v5528_v8 = vpop.permute.xlu1 %5527  ;;  %v5734_v45 = vsel %vm392_vm2, %v17702_v35, %v17729_v34  ;;  %v14342_v35 = vunpack.i.l.bf16 %v17668_v9 }
 0x843   :  { %6437 = vmatprep.subr.bf16.mxu0 %v5648_v14 }
 0x844   :  { %5937 = vrot.lane.b32.xlu1 %v17768_v51, %s14557_s29  ;;  %5939 = vrot.lane.b32.xlu0 %v22188_v50, %s14557_s29 }
 0x846   :  { %6438 = vmatpush1.bf16.msra.mxu0 %v5647_v59  ;;  %v17868_v19 = vpop.permute.xlu0 %6009  ;;  %v17870_v2 = vpop.permute.xlu1 %5619  ;;  %v5740_v59 = vsel %vm392_vm2, %v17755_v56, %v17847_v11 }
 0x847   :  { %6439 = vmatprep.subr.bf16.mxu0 %v5734_v45  ;;  %v14338_v45 = vunpack.i.h.bf16 %v17670_v57  ;;  %v5826_v57 = vsel %vm485_vm3, %v17700_v39, %v17780_v33 }
 0x848   :  { %6015 = vrot.lane.b32.xlu1 %v17698_v18, %s14558_s10  ;;  %6017 = vrot.lane.b32.xlu0 %v22188_v50, %s14558_s10 }
 0x849   :  { %v5739_v37 = vsel %vm392_vm2, %v14338_v45, %v17755_v56 }
 0x84a   :  { %6440 = vmatpush1.bf16.msra.mxu0 %v5733_v31  ;;  %v17882_v20 = vpop.permute.xlu0 %6101  ;;  %v17884_v14 = vpop.permute.xlu1 %5711 }
 0x84b   :  { %6441 = vmatprep.subr.bf16.mxu0 %v5740_v59  ;;  %v5825_v59 = vsel %vm485_vm3, %v14342_v35, %v17700_v39  ;;  %v5551_v35 = vsel %vm206_vm0, %v17711_v44, %v5528_v8 }
 0x84c   :  { %6031 = vrot.lane.b32.xlu0 %v22188_v50, %s14558_s10  ;;  %6029 = vrot.lane.b32.xlu1 %v17768_v51, %s14558_s10 }
 0x84e   :  { %6442 = vmatpush1.bf16.msra.mxu0 %v5739_v37  ;;  %v17897_v31 = vpop.permute.xlu0 %6193  ;;  %v17899_v0 = vpop.permute.xlu1 %5803  ;;  %v5832_v37 = vsel %vm485_vm3, %v17826_v28, %v17810_v42 }
 0x84f   :  { %6443 = vmatprep.subr.bf16.mxu0 %v5826_v57  ;;  %v14343_v57 = vunpack.i.h.bf16 %v17668_v9 }
 0x850   :  { %6109 = vrot.lane.b32.xlu0 %v22188_v50, %s14559_s11  ;;  %6107 = vrot.lane.b32.xlu1 %v17698_v18, %s14559_s11 }
 0x851   :  { %v5831_v39 = vsel %vm485_vm3, %v14343_v57, %v17826_v28  ;;  %v13620_v57 = vld [vmem:[%s22073_s2 + $0x98] sm:$0xff] }
 0x852   :  { %6444 = vmatpush1.bf16.msra.mxu0 %v5825_v59  ;;  %v17910_v56 = vpop.permute.xlu0 %5529  ;;  %v17912_v45 = vpop.permute.xlu1 %5931 }
 0x853   :  { %6445 = vmatprep.subr.bf16.mxu0 %v5832_v37  ;;  %v5552_v43 = vsel %vm206_vm0, %v5528_v8, %v17910_v56  ;;  %v5941_v37 = vsel %vm602_vm4, %v17713_v24, %v17788_v55  ;;  %v5947_v24 = vsel %vm602_vm4, %v17770_v6, %v17818_v30 }
 0x854   :  { %6123 = vrot.lane.b32.xlu0 %v22188_v50, %s14559_s11  ;;  %6121 = vrot.lane.b32.xlu1 %v17768_v51, %s14559_s11 }
 0x855   :  { %6537 = vmatprep.subr.bf16.mxu1 %v5552_v43 }
 0x856   :  { %6446 = vmatpush1.bf16.msra.mxu0 %v5831_v39  ;;  %6538 = vmatpush1.bf16.msra.mxu1 %v5551_v35  ;;  %v17928_v9 = vpop.permute.xlu0 %5621  ;;  %v17930_v59 = vpop.permute.xlu1 %6023 }
 0x857   :  { %6447 = vmatprep.subr.bf16.mxu0 %v17453_v47  ;;  %v13618_v47 = vld [vmem:[%s22073_s2 + $0x88] sm:$0xff]  ;;  %v5644_v6 = vsel %vm299_vm1, %v17870_v2, %v17928_v9 }
 0x858   :  { %6201 = vrot.lane.b32.xlu0 %v22188_v50, %s14560_s14  ;;  %6199 = vrot.lane.b32.xlu1 %v17698_v18, %s14560_s14 }
 0x85a   :  { %6448 = vmatpush1.bf16.msra.mxu0 %v17429_v16  ;;  %v17938_v43 = vpop.permute.xlu0 %5713  ;;  %v17940_v28 = vpop.permute.xlu1 %6115  ;;  %v13617_v16 = vld [vmem:[%s22073_s2 + $0x80] sm:$0xff] }
 0x85b   :  { %6449 = vmatprep.subr.bf16.mxu0 %v17511_v3  ;;  %v5942_v3 = vsel %vm602_vm4, %v17788_v55, %v17858_v13 }
 0x85c   :  { %6215 = vrot.lane.b32.xlu0 %v22188_v50, %s14560_s14  ;;  %6213 = vrot.lane.b32.xlu1 %v17768_v51, %s14560_s14 }
 0x85e   :  { %6450 = vmatpush1.bf16.msra.mxu0 %v17473_v53  ;;  %v17954_v44 = vpop.permute.xlu0 %5805  ;;  %v17956_v8 = vpop.permute.xlu1 %5817  ;;  %v13619_v53 = vld [vmem:[%s22073_s2 + $0x90] sm:$0xff] }
 0x85f   :  { %6451 = vmatprep.subr.bf16.mxu0 %v5942_v3  ;;  %v6034_v3 = vsel %vm695_vm5, %v17796_v41, %v17868_v19 }
 0x860   :  { %6382 = vperm.xlu0 %14262, %v13618_v47   ;;  %6377 = vperm.xlu1 %14263, %v13617_v16   ;;  %v5948_v47 = vsel %vm602_vm4, %v17818_v30, %v17912_v45  ;;  %v6033_v30 = vsel %vm695_vm5, %v17731_v27, %v17796_v41  ;;  %v6039_v27 = vsel %vm695_vm5, %v17778_v21, %v17824_v46 }
 0x861   :  { %v5736_v21 = vsel %vm392_vm2, %v17884_v14, %v17938_v43 }
 0x862   :  { %6452 = vmatpush1.bf16.msra.mxu0 %v5941_v37  ;;  %v5542_v39 = vpop.permute.xlu0 %5541  ;;  %v17970_v35 = vpop.permute.xlu1 %6207 }
 0x863   :  { %6453 = vmatprep.subr.bf16.mxu0 %v5948_v47 }
 0x864   :  { %6392 = vperm.xlu0 %14262, %v13620_v57   ;;  %6387 = vperm.xlu1 %14263, %v13619_v53   ;;  %v5557_v57 = vsel %vm206_vm0, %v17834_v12, %v5542_v39  ;;  %v5643_v12 = vsel %vm299_vm1, %v17772_v36, %v17870_v2 }
 0x866   :  { %6454 = vmatpush1.bf16.msra.mxu0 %v5947_v24  ;;  %v5634_v55 = vpop.permute.xlu0 %5633  ;;  %v17978_v16 = vpop.permute.xlu1 %5543  ;;  %v6040_v24 = vsel %vm695_vm5, %v17824_v46, %v17930_v59  ;;  %v6125_v46 = vsel %vm788_vm6, %v17745_v48, %v17804_v58  ;;  %v18037_v48 = vld [vmem:[%s22072_s1 + $0xc0] ss:$12 sps:$4 sm:$0xff]  }
 0x867   :  { %6455 = vmatprep.subr.bf16.mxu0 %v6034_v3  ;;  %v5558_v37 = vsel %vm206_vm0, %v5542_v39, %v17978_v16  ;;  %v6126_v3 = vsel %vm788_vm6, %v17804_v58, %v17882_v20  ;;  %v5649_v36 = vsel %vm299_vm1, %v17802_v7, %v5634_v55  ;;  %v5735_v58 = vsel %vm392_vm2, %v17729_v34, %v17884_v14 }
 0x868   :  { %6539 = vmatprep.subr.bf16.mxu1 %v5558_v37  ;;  %v6131_v7 = vsel %vm788_vm6, %v17786_v61, %v17832_v23  ;;  %v6217_v14 = vsel %vm881_vm7, %v17757_v54, %v17812_v15  ;;  %14350 = vrot.lane.b32.xlu0 %v22188_v50, %s14554_s24 }
 0x869   :  { %6540 = vmatpush1.bf16.msra.mxu1 %v5557_v57  ;;  %14345 = vrot.lane.b32.xlu1 %v22188_v50, %s14553_s17 }
 0x86a   :  { %6456 = vmatpush1.bf16.msra.mxu0 %v6033_v30  ;;  %v5726_v53 = vpop.permute.xlu0 %5725  ;;  %6541 = vmatprep.subr.bf16.mxu1 %v5644_v6  ;;  %v17993_v47 = vpop.permute.xlu1 %5919  ;;  %v6132_v30 = vsel %vm788_vm6, %v17832_v23, %v17940_v28  ;;  %v18051_v23 = vld [vmem:[%s22072_s1 + $0xdc] ss:$12 sps:$4 sm:$0xff]  }
 0x86b   :  { %6457 = vmatprep.subr.bf16.mxu0 %v6040_v24  ;;  %v6218_v24 = vsel %vm881_vm7, %v17812_v15, %v17897_v31  ;;  %v5741_v61 = vsel %vm392_vm2, %v17847_v11, %v5726_v53  ;;  %v5827_v11 = vsel %vm485_vm3, %v17780_v33, %v17899_v0  ;;  %v6223_v15 = vsel %vm881_vm7, %v17794_v32, %v17845_v62 }
 0x86c   :  { %14360 = vrot.lane.b32.xlu0 %v22188_v50, %s14556_s26 }
 0x86d   :  { %6542 = vmatpush1.bf16.msra.mxu1 %v5643_v12  ;;  %v5828_v12 = vsel %vm485_vm3, %v17899_v0, %v17954_v44  ;;  %v5833_v0 = vsel %vm485_vm3, %v17810_v42, %v17956_v8  ;;  %14355 = vrot.lane.b32.xlu1 %v22188_v50, %s14555_s25 }
 0x86e   :  { %6458 = vmatpush1.bf16.msra.mxu0 %v6039_v27  ;;  %v18004_v41 = vpop.permute.xlu0 %5819  ;;  %v18006_v39 = vpop.permute.xlu1 %5635 }
 0x86f   :  { %6459 = vmatprep.subr.bf16.mxu0 %v6126_v3  ;;  %v5650_v37 = vsel %vm299_vm1, %v5634_v55, %v18006_v39  ;;  %v5834_v54 = vsel %vm485_vm3, %v17956_v8, %v18004_v41 }
 0x870   :  { %6543 = vmatprep.subr.bf16.mxu1 %v5650_v37  ;;  %v6224_v37 = vsel %vm881_vm7, %v17845_v62, %v17970_v35 }
 0x871   :  { %6544 = vmatpush1.bf16.msra.mxu1 %v5649_v36 }
 0x872   :  { %6460 = vmatpush1.bf16.msra.mxu0 %v6125_v46  ;;  %v18021_v2 = vpop.permute.xlu0 %5921  ;;  %6545 = vmatprep.subr.bf16.mxu1 %v5736_v21  ;;  %v18023_v57 = vpop.permute.xlu1 %6011  ;;  %v18091_v21 = vld [vmem:[%s22072_s1 + $0xc8] ss:$12 sps:$4 sm:$0xff]  }
 0x873   :  { %6461 = vmatprep.subr.bf16.mxu0 %v6132_v30 }
 0x875   :  { %6546 = vmatpush1.bf16.msra.mxu1 %v5735_v58 }
 0x876   :  { %6462 = vmatpush1.bf16.msra.mxu0 %v6131_v7  ;;  %v18039_v55 = vpop.permute.xlu0 %6013  ;;  %v18041_v6 = vpop.permute.xlu1 %5727 }
 0x877   :  { %6484 = vmatprep.subr.bf16.mxu0 %v6218_v24  ;;  %v5742_v34 = vsel %vm392_vm2, %v5726_v53, %v18041_v6  ;;  %v18078_v53 = vld [vmem:[%s22072_s1 + $0xd8] ss:$12 sps:$4 sm:$0xff]  }
 0x878   :  { %6547 = vmatprep.subr.bf16.mxu1 %v5742_v34 }
 0x879   :  { %6464 = vmatmul.mubr.bf16.vlgmr.msra.gmra.mrb[48].mxu0 %v18037_v48  ;;  %6548 = vmatpush1.bf16.msra.mxu1 %v5741_v61 }
 0x87a   :  { %6485 = vmatpush1.bf16.msra.mxu0 %v6217_v14  ;;  %v5534_v27 = vpop.permute.xlu0 %5533  ;;  %6549 = vmatprep.subr.bf16.mxu1 %v5828_v12  ;;  %v5934_v3 = vpop.permute.xlu1 %5933 }
 0x87b   :  { %6486 = vmatprep.subr.bf16.mxu0 %v6224_v37  ;;  %6473 = vmatprep.mubr.bf16.mxu0 %v18051_v23 }
 0x87d   :  { %6550 = vmatpush1.bf16.msra.mxu1 %v5827_v11 }
 0x87e   :  { %6487 = vmatpush1.bf16.msra.mxu0 %v6223_v15  ;;  %v5626_v36 = vpop.permute.xlu0 %5625  ;;  %6551 = vmatprep.subr.bf16.mxu1 %v5834_v54  ;;  %v6026_v46 = vpop.permute.xlu1 %6025 }
 0x881   :  { %6474 = vmatmul.mubr.bf16.gmra.mrb[52].mxu0 %v18078_v53  ;;  %6552 = vmatpush1.bf16.msra.mxu1 %v5833_v0 }
 0x882   :  { %v5718_v62 = vpop.permute.xlu0 %5717  ;;  %6553 = vmatprep.subr.bf16.mxu1 %v17589_v52  ;;  %v5532_v32 = vpop.permute.xlu1 %5531  ;;  %6516 = vmatprep.mubr.bf16.mxu0 %v22188_v50 }
 0x883   :  { %v5554_v33 = vsel %vm206_vm0, %v5532_v32, %v5534_v27  ;;  %v5553_v52 = vsel %vm206_vm0, %v17910_v56, %v5532_v32 }
 0x884   :  { %6643 = vmatprep.subr.bf16.mxu0 %v5554_v33 }
 0x885   :  { %6554 = vmatpush1.bf16.msra.mxu1 %v17549_v10  ;;  %v5944_v10 = vsel %vm602_vm4, %v17993_v47, %v18021_v2 }
 0x886   :  { %v18093_v42 = vpop.permute.xlu0 %5935  ;;  %6555 = vmatprep.subr.bf16.mxu1 %v17633_v49  ;;  %v5624_v8 = vpop.permute.xlu1 %5623  ;;  %v5943_v49 = vsel %vm602_vm4, %v17858_v13, %v17993_v47  ;;  %v5949_v13 = vsel %vm602_vm4, %v17912_v45, %v5934_v3  ;;  %v6036_v47 = vsel %vm695_vm5, %v18023_v57, %v18039_v55  ;;  %v6035_v45 = vsel %vm695_vm5, %v17868_v19, %v18023_v57 }
 0x887   :  { %v5950_v56 = vsel %vm602_vm4, %v5934_v3, %v18093_v42  ;;  %v5646_v27 = vsel %vm299_vm1, %v5624_v8, %v5626_v36  ;;  %v6041_v19 = vsel %vm695_vm5, %v17930_v59, %v6026_v46 }
 0x889   :  { %13627 = vmatmul.mubr.msk.bf16.vlgmr.msra.gmra.mrb[48].mxu0 %vm1088_vm8, %v18091_v21  ;;  %6556 = vmatpush1.bf16.msra.mxu1 %v17593_v38  ;;  %v18115_v38 = vld [vmem:[%s22072_s1 + $0xe0] ss:$12 sps:$4 sm:$0xff]  }
 0x88a   :  { %6644 = vmatpush1.bf16.msra.mxu0 %v5553_v52  ;;  %v18104_v30 = vpop.permute.xlu0 %6027  ;;  %6557 = vmatprep.subr.bf16.mxu1 %v5944_v10  ;;  %v5716_v58 = vpop.permute.xlu1 %5715 }
 0x88b   :  { %6526 = vmatprep.mubr.bf16.mxu0 %v22188_v50  ;;  %v6042_v3 = vsel %vm695_vm5, %v6026_v46, %v18104_v30  ;;  %v5738_v36 = vsel %vm392_vm2, %v5716_v58, %v5718_v62 }
 0x88d   :  { %6558 = vmatpush1.bf16.msra.mxu1 %v5943_v49 }
 0x88e   :  { %v5548_v7 = vpop.permute.xlu0 %5547  ;;  %6559 = vmatprep.subr.bf16.mxu1 %v5950_v56  ;;  %v5546_v24 = vpop.permute.xlu1 %5545 }
 0x88f   :  { %v5560_v34 = vsel %vm206_vm0, %v5546_v24, %v5548_v7  ;;  %v5559_v61 = vsel %vm206_vm0, %v17978_v16, %v5546_v24  ;;  %v5645_v16 = vsel %vm299_vm1, %v17928_v9, %v5624_v8 }
 0x890   :  { %6645 = vmatprep.subr.bf16.mxu0 %v5560_v34 }
 0x891   :  { %13628 = vmatmul.mubr.msk.bf16.gmra.mrb[52].mxu0 %vm1088_vm8, %v18115_v38  ;;  %6560 = vmatpush1.bf16.msra.mxu1 %v5949_v13 }
 0x892   :  { %6646 = vmatpush1.bf16.msra.mxu0 %v5559_v61  ;;  %v18127_v14 = vpop.permute.xlu0 %6105  ;;  %6561 = vmatprep.subr.bf16.mxu1 %v6036_v47  ;;  %v6104_v12 = vpop.permute.xlu1 %6103 }
 0x893   :  { %6647 = vmatprep.subr.bf16.mxu0 %v5646_v27  ;;  %6675 = vmatprep.mubr.bf16.mxu0 %v17648_v1  ;;  %v6128_v9 = vsel %vm788_vm6, %v6104_v12, %v18127_v14  ;;  %v6127_v0 = vsel %vm788_vm6, %v17882_v20, %v6104_v12 }
 0x895   :  { %6562 = vmatpush1.bf16.msra.mxu1 %v6035_v45 }
 0x896   :  { %6648 = vmatpush1.bf16.msra.mxu0 %v5645_v16  ;;  %v5640_v37 = vpop.permute.xlu0 %5639  ;;  %6563 = vmatprep.subr.bf16.mxu1 %v6042_v3  ;;  %v5638_v11 = vpop.permute.xlu1 %5637 }
 0x897   :  { %v5652_v15 = vsel %vm299_vm1, %v5638_v11, %v5640_v37  ;;  %v5651_v1 = vsel %vm299_vm1, %v18006_v39, %v5638_v11  ;;  %v5737_v39 = vsel %vm392_vm2, %v17938_v43, %v5716_v58 }
 0x898   :  { %6649 = vmatprep.subr.bf16.mxu0 %v5652_v15 }
 0x899   :  { %6564 = vmatpush1.bf16.msra.mxu1 %v6041_v19 }
 0x89a   :  { %6650 = vmatpush1.bf16.msra.mxu0 %v5651_v1  ;;  %v18145_v57 = vpop.permute.xlu0 %6119  ;;  %6565 = vmatprep.subr.bf16.mxu1 %v6128_v9  ;;  %v5730_v54 = vpop.permute.xlu1 %5729 }
 0x89b   :  { %6651 = vmatprep.subr.bf16.mxu0 %v5738_v36  ;;  %v5743_v20 = vsel %vm392_vm2, %v18041_v6, %v5730_v54 }
 0x89d   :  { %6566 = vmatpush1.bf16.msra.mxu1 %v6127_v0 }
 0x89e   :  { %6652 = vmatpush1.bf16.msra.mxu0 %v5737_v39  ;;  %v5732_v59 = vpop.permute.xlu0 %5731  ;;  %v6118_v46 = vpop.permute.xlu1 %6117 }
 0x89f   :  { %v6134_v32 = vsel %vm788_vm6, %v6118_v46, %v18145_v57  ;;  %v5744_v33 = vsel %vm392_vm2, %v5730_v54, %v5732_v59  ;;  %v6133_v8 = vsel %vm788_vm6, %v17940_v28, %v6118_v46 }
 0x8a0   :  { %6567 = vmatprep.subr.bf16.mxu1 %v6134_v32  ;;  %6653 = vmatprep.subr.bf16.mxu0 %v5744_v33 }
 0x8a1   :  { %6568 = vmatpush1.bf16.msra.mxu1 %v6133_v8 }
 0x8a2   :  { %6654 = vmatpush1.bf16.msra.mxu0 %v5743_v20  ;;  %v5810_v62 = vpop.permute.xlu0 %5809  ;;  %v5808_v43 = vpop.permute.xlu1 %5807 }
 0x8a3   :  { %v5830_v52 = vsel %vm485_vm3, %v5808_v43, %v5810_v62  ;;  %v5829_v10 = vsel %vm485_vm3, %v17954_v44, %v5808_v43 }
 0x8a4   :  { %6570 = vmatmul.mubr.bf16.vlgmr.msra.gmra.mrb[48].mxu1 %v18037_v48  ;;  %6655 = vmatprep.subr.bf16.mxu0 %v5830_v52 }
 0x8a5   :  { %6579 = vmatprep.mubr.bf16.mxu1 %v18051_v23 }
 0x8a6   :  { %6656 = vmatpush1.bf16.msra.mxu0 %v5829_v10  ;;  %v5824_v28 = vpop.permute.xlu0 %5823  ;;  %v5822_v58 = vpop.permute.xlu1 %5821 }
 0x8a7   :  { %v5836_v49 = vsel %vm485_vm3, %v5822_v58, %v5824_v28  ;;  %v5835_v6 = vsel %vm485_vm3, %v18004_v41, %v5822_v58 }
 0x8a8   :  { %6657 = vmatprep.subr.bf16.mxu0 %v5836_v49 }
 0x8aa   :  { %6658 = vmatpush1.bf16.msra.mxu0 %v5835_v6  ;;  %v6198_v56 = vpop.permute.xlu0 %6197  ;;  %v6196_v7 = vpop.permute.xlu1 %6195 }
 0x8ab   :  { %6659 = vmatprep.subr.bf16.mxu0 %v17698_v18  ;;  %v6220_v44 = vsel %vm881_vm7, %v6196_v7, %v6198_v56  ;;  %v6219_v24 = vsel %vm881_vm7, %v17897_v31, %v6196_v7 }
 0x8ac   :  { %6580 = vmatmul.mubr.bf16.gmra.mrb[52].mxu1 %v18078_v53  ;;  %6590 = vmatprep.subr.bf16.mxu1 %v6220_v44 }
 0x8ad   :  { %6591 = vmatpush1.bf16.msra.mxu1 %v6219_v24  ;;  %6622 = vmatprep.mubr.bf16.mxu1 %v22188_v50 }
 0x8ae   :  { %6660 = vmatpush1.bf16.msra.mxu0 %v17674_v29  ;;  %v6212_v41 = vpop.permute.xlu0 %6211  ;;  %v6210_v34 = vpop.permute.xlu1 %6209 }
 0x8af   :  { %6661 = vmatprep.subr.bf16.mxu0 %v17768_v51  ;;  %v6226_v61 = vsel %vm881_vm7, %v6210_v34, %v6212_v41  ;;  %v6225_v18 = vsel %vm881_vm7, %v17970_v35, %v6210_v34 }
 0x8b0   :  { %6592 = vmatprep.subr.bf16.mxu1 %v6226_v61 }
 0x8b1   :  { %6593 = vmatpush1.bf16.msra.mxu1 %v6225_v18 }
 0x8b2   :  { %6662 = vmatpush1.bf16.msra.mxu0 %v17742_v4  ;;  %v5926_v31 = vpop.permute.xlu0 %5925  ;;  %v5924_v13 = vpop.permute.xlu1 %5923 }
 0x8b3   :  { %v5946_v47 = vsel %vm602_vm4, %v5924_v13, %v5926_v31  ;;  %v5945_v29 = vsel %vm602_vm4, %v18021_v2, %v5924_v13 }
 0x8b4   :  { %13629 = vmatmul.mubr.msk.bf16.vlgmr.msra.gmra.mrb[48].mxu1 %vm1088_vm8, %v18091_v21  ;;  %6663 = vmatprep.subr.bf16.mxu0 %v5946_v47 }
 0x8b5   :  { %6632 = vmatprep.mubr.bf16.mxu1 %v22188_v50 }
 0x8b6   :  { %6664 = vmatpush1.bf16.msra.mxu0 %v5945_v29  ;;  %v5940_v51 = vpop.permute.xlu0 %5939  ;;  %v5938_v35 = vpop.permute.xlu1 %5937 }
 0x8b7   :  { %v5952_v12 = vsel %vm602_vm4, %v5938_v35, %v5940_v51  ;;  %v5951_v4 = vsel %vm602_vm4, %v18093_v42, %v5938_v35 }
 0x8b8   :  { %6665 = vmatprep.subr.bf16.mxu0 %v5952_v12 }
 0x8ba   :  { %6666 = vmatpush1.bf16.msra.mxu0 %v5951_v4  ;;  %v6018_v27 = vpop.permute.xlu0 %6017  ;;  %v6016_v45 = vpop.permute.xlu1 %6015 }
 0x8bb   :  { %v6038_v2 = vsel %vm695_vm5, %v6016_v45, %v6018_v27  ;;  %v6037_v16 = vsel %vm695_vm5, %v18039_v55, %v6016_v45 }
 0x8bc   :  { %13630 = vmatmul.mubr.msk.bf16.gmra.mrb[52].mxu1 %vm1088_vm8, %v18115_v38  ;;  %6667 = vmatprep.subr.bf16.mxu0 %v6038_v2 }
 0x8be   :  { %6668 = vmatpush1.bf16.msra.mxu0 %v6037_v16  ;;  %v6032_v3 = vpop.permute.xlu0 %6031  ;;  %v6030_v37 = vpop.permute.xlu1 %6029 }
 0x8bf   :  { %v6044_v11 = vsel %vm695_vm5, %v6030_v37, %v6032_v3  ;;  %v6043_v42 = vsel %vm695_vm5, %v18104_v30, %v6030_v37 }
 0x8c0   :  { %6669 = vmatprep.subr.bf16.mxu0 %v6044_v11 }
 0x8c2   :  { %6670 = vmatpush1.bf16.msra.mxu0 %v6043_v42  ;;  %v6110_v15 = vpop.permute.xlu0 %6109  ;;  %v6108_v1 = vpop.permute.xlu1 %6107 }
 0x8c3   :  { %v6130_v19 = vsel %vm788_vm6, %v6108_v1, %v6110_v15  ;;  %v6129_v55 = vsel %vm788_vm6, %v18127_v14, %v6108_v1 }
 0x8c4   :  { %6671 = vmatprep.subr.bf16.mxu0 %v6130_v19 }
 0x8c6   :  { %6672 = vmatpush1.bf16.msra.mxu0 %v6129_v55  ;;  %v6124_v9 = vpop.permute.xlu0 %6123  ;;  %v6122_v54 = vpop.permute.xlu1 %6121 }
 0x8c7   :  { %v6136_v36 = vsel %vm788_vm6, %v6122_v54, %v6124_v9  ;;  %v6135_v0 = vsel %vm788_vm6, %v18145_v57, %v6122_v54 }
 0x8c8   :  { %6673 = vmatprep.subr.bf16.mxu0 %v6136_v36 }
 0x8ca   :  { %6674 = vmatpush1.bf16.msra.mxu0 %v6135_v0  ;;  %v6202_v30 = vpop.permute.xlu0 %6201  ;;  %v6200_v39 = vpop.permute.xlu1 %6199 }
 0x8cb   :  { %v6222_v59 = vsel %vm881_vm7, %v6200_v39, %v6202_v30  ;;  %v6221_v46 = vsel %vm881_vm7, %v6198_v56, %v6200_v39 }
 0x8cc   :  { %6696 = vmatprep.subr.bf16.mxu0 %v6222_v59 }
 0x8cd   :  { %6676 = vmatmul.mubr.bf16.vlgmr.msra.gmra.mrb[56].mxu0 %v18037_v48 }
 0x8ce   :  { %6697 = vmatpush1.bf16.msra.mxu0 %v6221_v46  ;;  %v6216_v14 = vpop.permute.xlu0 %6215  ;;  %v6214_v32 = vpop.permute.xlu1 %6213  ;;  %6685 = vmatprep.mubr.bf16.mxu0 %v18051_v23 }
 0x8cf   :  { %v6228_v33 = vsel %vm881_vm7, %v6214_v32, %v6216_v14  ;;  %v6227_v57 = vsel %vm881_vm7, %v6212_v41, %v6214_v32 }
 0x8d0   :  { %6698 = vmatprep.subr.bf16.mxu0 %v6228_v33 }
 0x8d2   :  { %6699 = vmatpush1.bf16.msra.mxu0 %v6227_v57 }
 0x8d5   :  { %6686 = vmatmul.mubr.bf16.gmra.mrb[60].mxu0 %v18078_v53 }
 0x8d6   :  { %6728 = vmatprep.mubr.bf16.mxu0 %v22188_v50 }
 0x8dd   :  { %13631 = vmatmul.mubr.msk.bf16.vlgmr.msra.gmra.mrb[56].mxu0 %vm1088_vm8, %v18091_v21 }
 0x8de   :  { %6738 = vmatprep.mubr.bf16.mxu0 %v22188_v50 }
 0x8df   :  { %v18223_v48 = vpop.permute.xlu1 %6377  ;;  %v18226_v8 = vpop.permute.xlu0 %6382 }
 0x8e3   :  { %v18233_v7 = vpop.permute.xlu1 %6387  ;;  %v18240_v31 = vpop.permute.xlu0 %6392 }
 0x8e5   :  { %13632 = vmatmul.mubr.msk.bf16.gmra.mrb[60].mxu0 %vm1088_vm8, %v18115_v38 }
 0x95c   :  { %v6518_v23 = vpop.f32.mrb[48].mxu0 }
 0x95d   :  { %v13849_v53 = vadd.f32 %v6518_v23, %v18223_v48  ;;  %v6520_v21 = vpop.f32.mrb[49].mxu0 }
 0x95e   :  { %v13850_v20 = vadd.f32 %v6520_v21, %v18223_v48  ;;  %v6522_v62 = vpop.f32.mrb[50].mxu0 }
 0x95f   :  { %v6749_v43 = vmax.f32 %v13849_v53, 0.0  ;;  %v13851_v52 = vadd.f32 %v6522_v62, %v18226_v8  ;;  %v6524_v10 = vpop.f32.mrb[51].mxu0 }
 0x960   :  { %v6750_v28 = vmax.f32 %v13850_v20, 0.0  ;;  %v13852_v58 = vadd.f32 %v6524_v10, %v18226_v8 }
 0x961   :  { %v6755_v49 = vmax.f32 %v13851_v52, 0.0  ;;  %v6773_v6 = vmul.f32 %v6749_v43, %v15186_v60 }
 0x962   :  { %v6756_v38 = vmax.f32 %v13852_v58, 0.0  ;;  %v6774_v44 = vmul.f32 %v6750_v28, %v15190_v5 }
 0x963   :  { %v6779_v56 = vmul.f32 %v6755_v49, %v15186_v60 }
 0x964   :  { %v6780_v24 = vmul.f32 %v6756_v38, %v15190_v5  ;;  %v6528_v41 = vpop.f32.mrb[52].mxu0 }
 0x965   :  { %v18237_v34 = vpack.c.bf16 %v6779_v56, %v6773_v6  ;;  %v13853_v61 = vadd.f32 %v6528_v41, %v18233_v7  ;;  %v6530_v18 = vpop.f32.mrb[53].mxu0 }
 0x966   :  { %v18242_v13 = vpack.c.bf16 %v6780_v24, %v6774_v44  ;;  %v13854_v47 = vadd.f32 %v6530_v18, %v18233_v7  ;;  %v6532_v29 = vpop.f32.mrb[54].mxu0 }
 0x967   :  { %v6761_v51 = vmax.f32 %v13853_v61, 0.0  ;;  %v13855_v35 = vadd.f32 %v6532_v29, %v18240_v31  ;;  %v6534_v12 = vpop.f32.mrb[55].mxu0  ;;  %6943 = vrot.lane.b32.xlu0 %v18237_v34, %s14554_s24  ;;  %6851 = vrot.lane.b32.xlu1 %v18237_v34, %s14553_s17 }
 0x968   :  { %v6762_v4 = vmax.f32 %v13854_v47, 0.0  ;;  %v13856_v27 = vadd.f32 %v6534_v12, %v18240_v31 }
 0x969   :  { %v6767_v45 = vmax.f32 %v13855_v35, 0.0  ;;  %v6785_v16 = vmul.f32 %v6761_v51, %v15186_v60 }
 0x96a   :  { %v6768_v2 = vmax.f32 %v13856_v27, 0.0  ;;  %v6786_v37 = vmul.f32 %v6762_v4, %v15190_v5 }
 0x96b   :  { %v6791_v3 = vmul.f32 %v6767_v45, %v15186_v60  ;;  %7127 = vrot.lane.b32.xlu0 %v18237_v34, %s14556_s26  ;;  %7035 = vrot.lane.b32.xlu1 %v18237_v34, %s14555_s25 }
 0x96c   :  { %v6792_v11 = vmul.f32 %v6768_v2, %v15190_v5 }
 0x96d   :  { %v18259_v42 = vpack.c.bf16 %v6791_v3, %v6785_v16 }
 0x96e   :  { %v18261_v15 = vpack.c.bf16 %v6792_v11, %v6786_v37 }
 0x96f   :  { %6853 = vrot.lane.b32.xlu0 %v18242_v13, %s14553_s17  ;;  %7241 = vrot.lane.b32.xlu1 %v18237_v34, %s14557_s29 }
 0x973   :  { %7037 = vrot.lane.b32.xlu0 %v18242_v13, %s14555_s25  ;;  %7333 = vrot.lane.b32.xlu1 %v18237_v34, %s14558_s10 }
 0x977   :  { %6865 = vrot.lane.b32.xlu0 %v18259_v42, %s14553_s17  ;;  %7425 = vrot.lane.b32.xlu1 %v18237_v34, %s14559_s11 }
 0x97b   :  { %7049 = vrot.lane.b32.xlu0 %v18259_v42, %s14555_s25  ;;  %7517 = vrot.lane.b32.xlu1 %v18237_v34, %s14560_s14 }
 0x97f   :  { %7255 = vrot.lane.b32.xlu0 %v18259_v42, %s14557_s29  ;;  %6945 = vrot.lane.b32.xlu1 %v18242_v13, %s14554_s24 }
 0x983   :  { %7347 = vrot.lane.b32.xlu0 %v18259_v42, %s14558_s10  ;;  %7129 = vrot.lane.b32.xlu1 %v18242_v13, %s14556_s26 }
 0x987   :  { %7439 = vrot.lane.b32.xlu0 %v18259_v42, %s14559_s11  ;;  %7243 = vrot.lane.b32.xlu1 %v18242_v13, %s14557_s29  ;;  %v6624_v1 = vpop.f32.mrb[48].mxu1 }
 0x988   :  { %v13857_v19 = vadd.f32 %v6624_v1, %v18223_v48  ;;  %v6626_v55 = vpop.f32.mrb[49].mxu1 }
 0x989   :  { %v13858_v9 = vadd.f32 %v6626_v55, %v18223_v48  ;;  %v6628_v54 = vpop.f32.mrb[50].mxu1 }
 0x98a   :  { %v6751_v36 = vmax.f32 %v13857_v19, 0.0  ;;  %v13859_v0 = vadd.f32 %v6628_v54, %v18226_v8  ;;  %v6630_v30 = vpop.f32.mrb[51].mxu1 }
 0x98b   :  { %v6752_v39 = vmax.f32 %v13858_v9, 0.0  ;;  %v13860_v59 = vadd.f32 %v6630_v30, %v18226_v8  ;;  %7531 = vrot.lane.b32.xlu0 %v18259_v42, %s14560_s14  ;;  %7335 = vrot.lane.b32.xlu1 %v18242_v13, %s14558_s10 }
 0x98c   :  { %v6757_v46 = vmax.f32 %v13859_v0, 0.0  ;;  %v6775_v32 = vmul.f32 %v6751_v36, %v15232_v17 }
 0x98d   :  { %v6758_v14 = vmax.f32 %v13860_v59, 0.0  ;;  %v6776_v57 = vmul.f32 %v6752_v39, %v15236_v22 }
 0x98e   :  { %v6781_v33 = vmul.f32 %v6757_v46, %v15232_v17 }
 0x98f   :  { %v6782_v23 = vmul.f32 %v6758_v14, %v15236_v22  ;;  %6959 = vrot.lane.b32.xlu0 %v18261_v15, %s14554_s24  ;;  %7427 = vrot.lane.b32.xlu1 %v18242_v13, %s14559_s11  ;;  %v6634_v53 = vpop.f32.mrb[52].mxu1 }
 0x990   :  { %v18307_v21 = vpack.c.bf16 %v6781_v33, %v6775_v32  ;;  %v13861_v20 = vadd.f32 %v6634_v53, %v18233_v7  ;;  %v6636_v62 = vpop.f32.mrb[53].mxu1 }
 0x991   :  { %v18310_v43 = vpack.c.bf16 %v6782_v23, %v6776_v57  ;;  %v13862_v52 = vadd.f32 %v6636_v62, %v18233_v7  ;;  %v6638_v10 = vpop.f32.mrb[54].mxu1 }
 0x992   :  { %v6763_v28 = vmax.f32 %v13861_v20, 0.0  ;;  %v13863_v58 = vadd.f32 %v6638_v10, %v18240_v31  ;;  %v6640_v49 = vpop.f32.mrb[55].mxu1 }
 0x993   :  { %v6764_v38 = vmax.f32 %v13862_v52, 0.0  ;;  %v13864_v6 = vadd.f32 %v6640_v49, %v18240_v31  ;;  %7143 = vrot.lane.b32.xlu0 %v18261_v15, %s14556_s26  ;;  %7519 = vrot.lane.b32.xlu1 %v18242_v13, %s14560_s14  ;;  %v18414_v49 = vld [vmem:[%s22072_s1 + $0xf4] ss:$12 sps:$4 sm:$0xff]  }
 0x994   :  { %v6769_v56 = vmax.f32 %v13863_v58, 0.0  ;;  %v6787_v24 = vmul.f32 %v6763_v28, %v15232_v17  ;;  %v18409_v58 = vpop.permute.xlu1 %14345  ;;  %7791 = vmatprep.mubr.bf16.mxu1 %v18414_v49  ;;  %7897 = vmatprep.mubr.bf16.mxu0 %v18414_v49 }
 0x995   :  { %v6770_v44 = vmax.f32 %v13864_v6, 0.0  ;;  %v6788_v61 = vmul.f32 %v6764_v38, %v15236_v22 }
 0x996   :  { %v6793_v41 = vmul.f32 %v6769_v56, %v15232_v17 }
 0x997   :  { %v6794_v18 = vmul.f32 %v6770_v44, %v15236_v22  ;;  %7257 = vrot.lane.b32.xlu0 %v18261_v15, %s14557_s29  ;;  %6957 = vrot.lane.b32.xlu1 %v18259_v42, %s14554_s24 }
 0x998   :  { %v18327_v47 = vpack.c.bf16 %v6793_v41, %v6787_v24  ;;  %v18428_v6 = vpop.permute.xlu1 %14355 }
 0x999   :  { %v18329_v29 = vpack.c.bf16 %v6794_v18, %v6788_v61 }
 0x99b   :  { %7349 = vrot.lane.b32.xlu0 %v18261_v15, %s14558_s10  ;;  %7141 = vrot.lane.b32.xlu1 %v18259_v42, %s14556_s26 }
 0x99f   :  { %7441 = vrot.lane.b32.xlu0 %v18261_v15, %s14559_s11  ;;  %6867 = vrot.lane.b32.xlu1 %v18261_v15, %s14553_s17 }
 0x9a3   :  { %7533 = vrot.lane.b32.xlu0 %v18261_v15, %s14560_s14  ;;  %7051 = vrot.lane.b32.xlu1 %v18261_v15, %s14555_s25 }
 0x9a7   :  { %7245 = vrot.lane.b32.xlu0 %v18307_v21, %s14557_s29  ;;  %6855 = vrot.lane.b32.xlu1 %v18307_v21, %s14553_s17 }
 0x9ab   :  { %7337 = vrot.lane.b32.xlu0 %v18307_v21, %s14558_s10  ;;  %6947 = vrot.lane.b32.xlu1 %v18307_v21, %s14554_s24 }
 0x9af   :  { %7429 = vrot.lane.b32.xlu0 %v18307_v21, %s14559_s11  ;;  %7039 = vrot.lane.b32.xlu1 %v18307_v21, %s14555_s25 }
 0x9b0   :  { %v6730_v51 = vpop.f32.mrb[56].mxu0 }
 0x9b1   :  { %v13865_v35 = vadd.f32 %v6730_v51, %v18223_v48  ;;  %v6732_v12 = vpop.f32.mrb[57].mxu0  ;;  %v14347_v51 = vunpack.i.l.bf16 %v18409_v58 }
 0x9b2   :  { %v13866_v4 = vadd.f32 %v6732_v12, %v18223_v48  ;;  %v6734_v27 = vpop.f32.mrb[58].mxu0 }
 0x9b3   :  { %v6753_v45 = vmax.f32 %v13865_v35, 0.0  ;;  %v13867_v2 = vadd.f32 %v6734_v27, %v18226_v8  ;;  %v6736_v16 = vpop.f32.mrb[59].mxu0  ;;  %7521 = vrot.lane.b32.xlu0 %v18307_v21, %s14560_s14  ;;  %7131 = vrot.lane.b32.xlu1 %v18307_v21, %s14556_s26 }
 0x9b4   :  { %v6754_v3 = vmax.f32 %v13866_v4, 0.0  ;;  %v13868_v37 = vadd.f32 %v6736_v16, %v18226_v8 }
 0x9b5   :  { %v6759_v11 = vmax.f32 %v13867_v2, 0.0  ;;  %v6777_v19 = vmul.f32 %v6753_v45, %v15296_v40 }
 0x9b6   :  { %v6760_v1 = vmax.f32 %v13868_v37, 0.0  ;;  %v6778_v55 = vmul.f32 %v6754_v3, %v15304_v63 }
 0x9b7   :  { %v6783_v48 = vmul.f32 %v6759_v11, %v15296_v40  ;;  %6857 = vrot.lane.b32.xlu0 %v18310_v43, %s14553_s17  ;;  %7259 = vrot.lane.b32.xlu1 %v18327_v47, %s14557_s29 }
 0x9b8   :  { %v6784_v9 = vmul.f32 %v6760_v1, %v15304_v63  ;;  %v6740_v54 = vpop.f32.mrb[60].mxu0 }
 0x9b9   :  { %v18371_v36 = vpack.c.bf16 %v6783_v48, %v6777_v19  ;;  %v13869_v8 = vadd.f32 %v6740_v54, %v18233_v7  ;;  %v6742_v0 = vpop.f32.mrb[61].mxu0 }
 0x9ba   :  { %v18374_v30 = vpack.c.bf16 %v6784_v9, %v6778_v55  ;;  %v13870_v39 = vadd.f32 %v6742_v0, %v18233_v7  ;;  %v6744_v59 = vpop.f32.mrb[62].mxu0 }
 0x9bb   :  { %v6765_v46 = vmax.f32 %v13869_v8, 0.0  ;;  %v13871_v14 = vadd.f32 %v6744_v59, %v18240_v31  ;;  %v6746_v32 = vpop.f32.mrb[63].mxu0  ;;  %6949 = vrot.lane.b32.xlu0 %v18310_v43, %s14554_s24  ;;  %7351 = vrot.lane.b32.xlu1 %v18327_v47, %s14558_s10 }
 0x9bc   :  { %v6766_v33 = vmax.f32 %v13870_v39, 0.0  ;;  %v13872_v57 = vadd.f32 %v6746_v32, %v18240_v31  ;;  %v18407_v31 = vpop.permute.xlu0 %14350 }
 0x9bd   :  { %v6771_v23 = vmax.f32 %v13871_v14, 0.0  ;;  %v6789_v20 = vmul.f32 %v6765_v46, %v15296_v40 }
 0x9be   :  { %v6772_v53 = vmax.f32 %v13872_v57, 0.0  ;;  %v6790_v62 = vmul.f32 %v6766_v33, %v15304_v63 }
 0x9bf   :  { %v6795_v7 = vmul.f32 %v6771_v23, %v15296_v40  ;;  %7041 = vrot.lane.b32.xlu0 %v18310_v43, %s14555_s25  ;;  %7443 = vrot.lane.b32.xlu1 %v18327_v47, %s14559_s11 }
 0x9c0   :  { %v6796_v52 = vmul.f32 %v6772_v53, %v15304_v63  ;;  %v18426_v38 = vpop.permute.xlu0 %14360  ;;  %v14348_v53 = vunpack.i.h.bf16 %v18409_v58 }
 0x9c1   :  { %v18391_v10 = vpack.c.bf16 %v6795_v7, %v6789_v20  ;;  %v14352_v7 = vunpack.i.l.bf16 %v18407_v31 }
 0x9c2   :  { %v18393_v28 = vpack.c.bf16 %v6796_v52, %v6790_v62 }
 0x9c3   :  { %7133 = vrot.lane.b32.xlu0 %v18310_v43, %s14556_s26  ;;  %7145 = vrot.lane.b32.xlu1 %v18327_v47, %s14556_s26 }
 0x9c7   :  { %6869 = vrot.lane.b32.xlu0 %v18327_v47, %s14553_s17  ;;  %7535 = vrot.lane.b32.xlu1 %v18327_v47, %s14560_s14 }
 0x9cb   :  { %6961 = vrot.lane.b32.xlu0 %v18327_v47, %s14554_s24  ;;  %6871 = vrot.lane.b32.xlu1 %v18329_v29, %s14553_s17 }
 0x9cf   :  { %7053 = vrot.lane.b32.xlu0 %v18327_v47, %s14555_s25  ;;  %7247 = vrot.lane.b32.xlu1 %v18310_v43, %s14557_s29 }
 0x9d3   :  { %7147 = vrot.lane.b32.xlu0 %v18329_v29, %s14556_s26  ;;  %6963 = vrot.lane.b32.xlu1 %v18329_v29, %s14554_s24 }
 0x9d7   :  { %7249 = vrot.lane.b32.xlu0 %v18371_v36, %s14557_s29  ;;  %7339 = vrot.lane.b32.xlu1 %v18310_v43, %s14558_s10 }
 0x9d9   :  { %v18434_v56 = vpop.permute.xlu0 %6943  ;;  %v6852_v44 = vpop.permute.xlu1 %6851 }
 0x9da   :  { %v6877_v12 = vsel %vm206_vm0, %v14347_v51, %v6852_v44  ;;  %v6969_v51 = vsel %vm299_vm1, %v14352_v7, %v18434_v56 }
 0x9db   :  { %7341 = vrot.lane.b32.xlu0 %v18371_v36, %s14558_s10  ;;  %7055 = vrot.lane.b32.xlu1 %v18329_v29, %s14555_s25 }
 0x9dd   :  { %v18440_v24 = vpop.permute.xlu0 %7127  ;;  %v18442_v41 = vpop.permute.xlu1 %7035 }
 0x9df   :  { %6861 = vrot.lane.b32.xlu0 %v18374_v30, %s14553_s17  ;;  %7261 = vrot.lane.b32.xlu1 %v18329_v29, %s14557_s29 }
 0x9e1   :  { %v18448_v61 = vpop.permute.xlu0 %6853  ;;  %v18450_v18 = vpop.permute.xlu1 %7241 }
 0x9e2   :  { %v6878_v35 = vsel %vm206_vm0, %v6852_v44, %v18448_v61 }
 0x9e3   :  { %6953 = vrot.lane.b32.xlu0 %v18374_v30, %s14554_s24  ;;  %7353 = vrot.lane.b32.xlu1 %v18329_v29, %s14558_s10 }
 0x9e4   :  { %7759 = vmatprep.subr.bf16.mxu1 %v6878_v35 }
 0x9e5   :  { %7760 = vmatpush1.bf16.msra.mxu1 %v6877_v12  ;;  %v18460_v4 = vpop.permute.xlu0 %7037  ;;  %v18462_v27 = vpop.permute.xlu1 %7333 }
 0x9e6   :  { %v7062_v7 = vsel %vm392_vm2, %v18442_v41, %v18460_v4 }
 0x9e7   :  { %7045 = vrot.lane.b32.xlu0 %v18374_v30, %s14555_s25  ;;  %6859 = vrot.lane.b32.xlu1 %v18371_v36, %s14553_s17 }
 0x9e9   :  { %v6866_v45 = vpop.permute.xlu0 %6865  ;;  %v18468_v2 = vpop.permute.xlu1 %7425 }
 0x9ea   :  { %v6883_v62 = vsel %vm206_vm0, %v14348_v53, %v6866_v45  ;;  %v14353_v53 = vunpack.i.h.bf16 %v18407_v31  ;;  %v14357_v31 = vunpack.i.l.bf16 %v18428_v6 }
 0x9eb   :  { %7263 = vrot.lane.b32.xlu0 %v18391_v10, %s14557_s29  ;;  %6951 = vrot.lane.b32.xlu1 %v18371_v36, %s14554_s24 }
 0x9ed   :  { %v18474_v16 = vpop.permute.xlu0 %7049  ;;  %v18476_v3 = vpop.permute.xlu1 %7517 }
 0x9ef   :  { %7355 = vrot.lane.b32.xlu0 %v18391_v10, %s14558_s10  ;;  %7043 = vrot.lane.b32.xlu1 %v18371_v36, %s14555_s25 }
 0x9f1   :  { %v18482_v37 = vpop.permute.xlu0 %7255  ;;  %v18484_v11 = vpop.permute.xlu1 %6945 }
 0x9f2   :  { %v6970_v58 = vsel %vm299_vm1, %v18434_v56, %v18484_v11 }
 0x9f3   :  { %6875 = vrot.lane.b32.xlu0 %v18393_v28, %s14553_s17  ;;  %6873 = vrot.lane.b32.xlu1 %v18391_v10, %s14553_s17 }
 0x9f5   :  { %v18490_v1 = vpop.permute.xlu0 %7347  ;;  %v18492_v19 = vpop.permute.xlu1 %7129 }
 0x9f7   :  { %7433 = vrot.lane.b32.xlu0 %v18371_v36, %s14559_s11  ;;  %7431 = vrot.lane.b32.xlu1 %v18310_v43, %s14559_s11 }
 0x9f9   :  { %v18498_v48 = vpop.permute.xlu0 %7439  ;;  %v18500_v55 = vpop.permute.xlu1 %7243 }
 0x9fb   :  { %6967 = vrot.lane.b32.xlu0 %v18393_v28, %s14554_s24  ;;  %6965 = vrot.lane.b32.xlu1 %v18391_v10, %s14554_s24 }
 0x9fd   :  { %v18506_v9 = vpop.permute.xlu0 %7531  ;;  %v18508_v54 = vpop.permute.xlu1 %7335 }
 0x9ff   :  { %7447 = vrot.lane.b32.xlu0 %v18391_v10, %s14559_s11  ;;  %7057 = vrot.lane.b32.xlu1 %v18391_v10, %s14555_s25 }
 0xa01   :  { %v18514_v8 = vpop.permute.xlu0 %6959  ;;  %v18516_v0 = vpop.permute.xlu1 %7427 }
 0xa03   :  { %7059 = vrot.lane.b32.xlu0 %v18393_v28, %s14555_s25  ;;  %7445 = vrot.lane.b32.xlu1 %v18329_v29, %s14559_s11 }
 0xa05   :  { %v18522_v39 = vpop.permute.xlu0 %7143  ;;  %v18524_v59 = vpop.permute.xlu1 %7519 }
 0xa07   :  { %7137 = vrot.lane.b32.xlu0 %v18374_v30, %s14556_s26  ;;  %7135 = vrot.lane.b32.xlu1 %v18371_v36, %s14556_s26 }
 0xa09   :  { %v18530_v46 = vpop.permute.xlu0 %7257  ;;  %v6958_v14 = vpop.permute.xlu1 %6957 }
 0xa0a   :  { %v6976_v12 = vsel %vm299_vm1, %v6958_v14, %v18514_v8 }
 0xa0b   :  { %7151 = vrot.lane.b32.xlu0 %v18393_v28, %s14556_s26  ;;  %7149 = vrot.lane.b32.xlu1 %v18391_v10, %s14556_s26 }
 0xa0d   :  { %v18536_v32 = vpop.permute.xlu0 %7349  ;;  %v18538_v33 = vpop.permute.xlu1 %7141 }
 0xa0f   :  { %7525 = vrot.lane.b32.xlu0 %v18371_v36, %s14560_s14  ;;  %7523 = vrot.lane.b32.xlu1 %v18310_v43, %s14560_s14 }
 0xa11   :  { %v18544_v57 = vpop.permute.xlu0 %7441  ;;  %v18546_v23 = vpop.permute.xlu1 %6867 }
 0xa12   :  { %v6884_v20 = vsel %vm206_vm0, %v6866_v45, %v18546_v23 }
 0xa13   :  { %7539 = vrot.lane.b32.xlu0 %v18391_v10, %s14560_s14  ;;  %7537 = vrot.lane.b32.xlu1 %v18329_v29, %s14560_s14 }
 0xa14   :  { %7761 = vmatprep.subr.bf16.mxu1 %v6884_v20  ;;  %v6975_v20 = vsel %vm299_vm1, %v14353_v53, %v6958_v14  ;;  %v7061_v14 = vsel %vm392_vm2, %v14357_v31, %v18442_v41  ;;  %v14358_v53 = vunpack.i.h.bf16 %v18428_v6  ;;  %v14362_v41 = vunpack.i.l.bf16 %v18426_v38 }
 0xa15   :  { %7762 = vmatpush1.bf16.msra.mxu1 %v6883_v62  ;;  %v18557_v52 = vpop.permute.xlu0 %7533  ;;  %v18562_v44 = vpop.permute.xlu1 %7051  ;;  %v7154_v31 = vsel %vm485_vm3, %v18440_v24, %v18492_v19 }
 0xa16   :  { %7763 = vmatprep.subr.bf16.mxu1 %v6970_v58 }
 0xa17   :  { %7253 = vrot.lane.b32.xlu0 %v22188_v50, %s14557_s29  ;;  %7251 = vrot.lane.b32.xlu1 %v18374_v30, %s14557_s29 }
 0xa19   :  { %7764 = vmatpush1.bf16.msra.mxu1 %v6969_v51  ;;  %v18570_v35 = vpop.permute.xlu0 %7245  ;;  %v6856_v45 = vpop.permute.xlu1 %6855  ;;  %v7068_v51 = vsel %vm392_vm2, %v18474_v16, %v18562_v44 }
 0xa1a   :  { %7765 = vmatprep.subr.bf16.mxu1 %v6976_v12 }
 0xa1b   :  { %7267 = vrot.lane.b32.xlu0 %v22188_v50, %s14557_s29  ;;  %7265 = vrot.lane.b32.xlu1 %v18393_v28, %s14557_s29 }
 0xa1d   :  { %7766 = vmatpush1.bf16.msra.mxu1 %v6975_v20  ;;  %v18580_v56 = vpop.permute.xlu0 %7337  ;;  %v18585_v62 = vpop.permute.xlu1 %6947  ;;  %v7067_v20 = vsel %vm392_vm2, %v14358_v53, %v18474_v16 }
 0xa1e   :  { %7767 = vmatprep.subr.bf16.mxu1 %v7062_v7 }
 0xa1f   :  { %7345 = vrot.lane.b32.xlu0 %v22188_v50, %s14558_s10  ;;  %7343 = vrot.lane.b32.xlu1 %v18374_v30, %s14558_s10 }
 0xa21   :  { %7768 = vmatpush1.bf16.msra.mxu1 %v7061_v14  ;;  %v18594_v58 = vpop.permute.xlu0 %7429  ;;  %v18599_v12 = vpop.permute.xlu1 %7039  ;;  %v7153_v14 = vsel %vm485_vm3, %v14362_v41, %v18440_v24  ;;  %v6879_v41 = vsel %vm206_vm0, %v18448_v61, %v6856_v45 }
 0xa22   :  { %7769 = vmatprep.subr.bf16.mxu1 %v7068_v51  ;;  %v7160_v51 = vsel %vm485_vm3, %v18538_v33, %v18522_v39 }
 0xa23   :  { %7359 = vrot.lane.b32.xlu0 %v22188_v50, %s14558_s10  ;;  %7357 = vrot.lane.b32.xlu1 %v18393_v28, %s14558_s10 }
 0xa25   :  { %7770 = vmatpush1.bf16.msra.mxu1 %v7067_v20  ;;  %v18609_v7 = vpop.permute.xlu0 %7521  ;;  %v18614_v6 = vpop.permute.xlu1 %7131  ;;  %v14363_v20 = vunpack.i.h.bf16 %v18426_v38 }
 0xa26   :  { %7771 = vmatprep.subr.bf16.mxu1 %v7154_v31 }
 0xa27   :  { %7437 = vrot.lane.b32.xlu0 %v22188_v50, %s14559_s11  ;;  %7435 = vrot.lane.b32.xlu1 %v18374_v30, %s14559_s11  ;;  %v7159_v24 = vsel %vm485_vm3, %v14363_v20, %v18538_v33  ;;  %v7269_v20 = vsel %vm602_vm4, %v18450_v18, %v18500_v55  ;;  %v7275_v18 = vsel %vm602_vm4, %v18482_v37, %v18530_v46 }
 0xa28   :  { %v7361_v37 = vsel %vm695_vm5, %v18462_v27, %v18508_v54  ;;  %v7367_v27 = vsel %vm695_vm5, %v18490_v1, %v18536_v32  ;;  %v7453_v1 = vsel %vm788_vm6, %v18468_v2, %v18516_v0  ;;  %v7063_v2 = vsel %vm392_vm2, %v18460_v4, %v18599_v12 }
 0xa29   :  { %7772 = vmatpush1.bf16.msra.mxu1 %v7153_v14  ;;  %v18622_v16 = vpop.permute.xlu0 %6857  ;;  %v18627_v53 = vpop.permute.xlu1 %7259 }
 0xa2a   :  { %7773 = vmatprep.subr.bf16.mxu1 %v7160_v51  ;;  %v6880_v31 = vsel %vm206_vm0, %v6856_v45, %v18622_v16 }
 0xa2b   :  { %7451 = vrot.lane.b32.xlu0 %v22188_v50, %s14559_s11  ;;  %7449 = vrot.lane.b32.xlu1 %v18393_v28, %s14559_s11 }
 0xa2c   :  { %7865 = vmatprep.subr.bf16.mxu0 %v6880_v31  ;;  %v13644_v31 = vld [vmem:[%s22073_s2 + $0xb8] sm:$0xff] }
 0xa2d   :  { %7774 = vmatpush1.bf16.msra.mxu1 %v7159_v24  ;;  %7866 = vmatpush1.bf16.msra.mxu0 %v6879_v41  ;;  %v18640_v38 = vpop.permute.xlu0 %6949  ;;  %v18642_v14 = vpop.permute.xlu1 %7351  ;;  %v7276_v41 = vsel %vm602_vm4, %v18530_v46, %v18627_v53 }
 0xa2e   :  { %7775 = vmatprep.subr.bf16.mxu1 %v18242_v13  ;;  %v13642_v13 = vld [vmem:[%s22073_s2 + $0xa8] sm:$0xff]  ;;  %v6972_v46 = vsel %vm299_vm1, %v18585_v62, %v18640_v38 }
 0xa2f   :  { %7529 = vrot.lane.b32.xlu0 %v22188_v50, %s14560_s14  ;;  %7527 = vrot.lane.b32.xlu1 %v18374_v30, %s14560_s14 }
 0xa31   :  { %7776 = vmatpush1.bf16.msra.mxu1 %v18237_v34  ;;  %v18650_v33 = vpop.permute.xlu0 %7041  ;;  %v18652_v51 = vpop.permute.xlu1 %7443  ;;  %v13641_v34 = vld [vmem:[%s22073_s2 + $0xa0] sm:$0xff] }
 0xa32   :  { %7777 = vmatprep.subr.bf16.mxu1 %v18261_v15  ;;  %v7270_v15 = vsel %vm602_vm4, %v18500_v55, %v18570_v35 }
 0xa33   :  { %7543 = vrot.lane.b32.xlu0 %v22188_v50, %s14560_s14  ;;  %7541 = vrot.lane.b32.xlu1 %v18393_v28, %s14560_s14 }
 0xa35   :  { %7778 = vmatpush1.bf16.msra.mxu1 %v18259_v42  ;;  %v18666_v61 = vpop.permute.xlu0 %7133  ;;  %v18671_v45 = vpop.permute.xlu1 %7145  ;;  %v13643_v42 = vld [vmem:[%s22073_s2 + $0xb0] sm:$0xff] }
 0xa36   :  { %7779 = vmatprep.subr.bf16.mxu1 %v7270_v15 }
 0xa37   :  { %7710 = vperm.xlu0 %14262, %v13642_v13   ;;  %7705 = vperm.xlu1 %14263, %v13641_v34   ;;  %v7362_v34 = vsel %vm695_vm5, %v18508_v54, %v18580_v56 }
 0xa39   :  { %7780 = vmatpush1.bf16.msra.mxu1 %v7269_v20  ;;  %v6870_v24 = vpop.permute.xlu0 %6869  ;;  %v18685_v13 = vpop.permute.xlu1 %7535 }
 0xa3a   :  { %7781 = vmatprep.subr.bf16.mxu1 %v7276_v41  ;;  %v7368_v41 = vsel %vm695_vm5, %v18536_v32, %v18642_v14  ;;  %v7064_v32 = vsel %vm392_vm2, %v18599_v12, %v18650_v33  ;;  %v7545_v12 = vsel %vm881_vm7, %v18476_v3, %v18524_v59  ;;  %v7155_v3 = vsel %vm485_vm3, %v18492_v19, %v18614_v6 }
 0xa3b   :  { %7720 = vperm.xlu0 %14262, %v13644_v31   ;;  %7715 = vperm.xlu1 %14263, %v13643_v42   ;;  %v6885_v31 = vsel %vm206_vm0, %v18546_v23, %v6870_v24  ;;  %v6971_v23 = vsel %vm299_vm1, %v18484_v11, %v18585_v62  ;;  %v7161_v19 = vsel %vm485_vm3, %v18522_v39, %v18671_v45 }
 0xa3d   :  { %7782 = vmatpush1.bf16.msra.mxu1 %v7275_v18  ;;  %v6962_v55 = vpop.permute.xlu0 %6961  ;;  %v18693_v15 = vpop.permute.xlu1 %6871 }
 0xa3e   :  { %7783 = vmatprep.subr.bf16.mxu1 %v7362_v34  ;;  %v6886_v20 = vsel %vm206_vm0, %v6870_v24, %v18693_v15  ;;  %v7454_v24 = vsel %vm788_vm6, %v18516_v0, %v18594_v58  ;;  %v6977_v11 = vsel %vm299_vm1, %v18514_v8, %v6962_v55  ;;  %v7459_v8 = vsel %vm788_vm6, %v18498_v48, %v18544_v57  ;;  %v18749_v0 = vld [vmem:[%s22072_s1 + $0xf0] ss:$12 sps:$4 sm:$0xff]   ;;  %v18763_v48 = vld [vmem:[%s22072_s1 + $0x10c] ss:$12 sps:$4 sm:$0xff]  }
 0xa3f   :  { %7867 = vmatprep.subr.bf16.mxu0 %v6886_v20  ;;  %14370 = vrot.lane.b32.xlu0 %v22188_v50, %s14554_s24 }
 0xa40   :  { %7868 = vmatpush1.bf16.msra.mxu0 %v6885_v31  ;;  %v7460_v31 = vsel %vm788_vm6, %v18544_v57, %v18652_v51  ;;  %14365 = vrot.lane.b32.xlu1 %v22188_v50, %s14553_s17 }
 0xa41   :  { %7784 = vmatpush1.bf16.msra.mxu1 %v7361_v37  ;;  %v7054_v42 = vpop.permute.xlu0 %7053  ;;  %7869 = vmatprep.subr.bf16.mxu0 %v6972_v46  ;;  %v18708_v18 = vpop.permute.xlu1 %7247  ;;  %v7546_v46 = vsel %vm881_vm7, %v18524_v59, %v18609_v7  ;;  %v7551_v59 = vsel %vm881_vm7, %v18506_v9, %v18557_v52 }
 0xa42   :  { %7785 = vmatprep.subr.bf16.mxu1 %v7368_v41  ;;  %v7069_v57 = vsel %vm392_vm2, %v18562_v44, %v7054_v42 }
 0xa43   :  { %14380 = vrot.lane.b32.xlu0 %v22188_v50, %s14556_s26 }
 0xa44   :  { %7870 = vmatpush1.bf16.msra.mxu0 %v6971_v23  ;;  %v7156_v23 = vsel %vm485_vm3, %v18614_v6, %v18666_v61  ;;  %14375 = vrot.lane.b32.xlu1 %v22188_v50, %s14555_s25 }
 0xa45   :  { %7786 = vmatpush1.bf16.msra.mxu1 %v7367_v27  ;;  %v18716_v54 = vpop.permute.xlu0 %7147  ;;  %v18721_v34 = vpop.permute.xlu1 %6963 }
 0xa46   :  { %7787 = vmatprep.subr.bf16.mxu1 %v7454_v24  ;;  %v6978_v20 = vsel %vm299_vm1, %v6962_v55, %v18721_v34  ;;  %v7552_v24 = vsel %vm881_vm7, %v18557_v52, %v18685_v13  ;;  %v7162_v44 = vsel %vm485_vm3, %v18671_v45, %v18716_v54 }
 0xa47   :  { %7871 = vmatprep.subr.bf16.mxu0 %v6978_v20 }
 0xa48   :  { %7872 = vmatpush1.bf16.msra.mxu0 %v6977_v11 }
 0xa49   :  { %7788 = vmatpush1.bf16.msra.mxu1 %v7453_v1  ;;  %v18733_v62 = vpop.permute.xlu0 %7249  ;;  %7873 = vmatprep.subr.bf16.mxu0 %v7064_v32  ;;  %v18738_v37 = vpop.permute.xlu1 %7339  ;;  %v18803_v32 = vld [vmem:[%s22072_s1 + $0xf8] ss:$12 sps:$4 sm:$0xff]  }
 0xa4a   :  { %7789 = vmatprep.subr.bf16.mxu1 %v7460_v31 }
 0xa4c   :  { %7874 = vmatpush1.bf16.msra.mxu0 %v7063_v2 }
 0xa4d   :  { %7790 = vmatpush1.bf16.msra.mxu1 %v7459_v8  ;;  %v18751_v55 = vpop.permute.xlu0 %7341  ;;  %v18756_v41 = vpop.permute.xlu1 %7055 }
 0xa4e   :  { %7812 = vmatprep.subr.bf16.mxu1 %v7546_v46  ;;  %v7070_v4 = vsel %vm392_vm2, %v7054_v42, %v18756_v41  ;;  %v18790_v42 = vld [vmem:[%s22072_s1 + $0x108] ss:$12 sps:$4 sm:$0xff]  }
 0xa4f   :  { %7875 = vmatprep.subr.bf16.mxu0 %v7070_v4 }
 0xa50   :  { %7792 = vmatmul.mubr.bf16.vlgmr.msra.gmra.mrb[56].mxu1 %v18749_v0  ;;  %7876 = vmatpush1.bf16.msra.mxu0 %v7069_v57 }
 0xa51   :  { %7813 = vmatpush1.bf16.msra.mxu1 %v7545_v12  ;;  %v6862_v27 = vpop.permute.xlu0 %6861  ;;  %7877 = vmatprep.subr.bf16.mxu0 %v7156_v23  ;;  %v7262_v20 = vpop.permute.xlu1 %7261 }
 0xa52   :  { %7814 = vmatprep.subr.bf16.mxu1 %v7552_v24  ;;  %7801 = vmatprep.mubr.bf16.mxu1 %v18763_v48 }
 0xa54   :  { %7878 = vmatpush1.bf16.msra.mxu0 %v7155_v3 }
 0xa55   :  { %7815 = vmatpush1.bf16.msra.mxu1 %v7551_v59  ;;  %v6954_v11 = vpop.permute.xlu0 %6953  ;;  %7879 = vmatprep.subr.bf16.mxu0 %v7162_v44  ;;  %v7354_v1 = vpop.permute.xlu1 %7353 }
 0xa58   :  { %7802 = vmatmul.mubr.bf16.gmra.mrb[60].mxu1 %v18790_v42  ;;  %7880 = vmatpush1.bf16.msra.mxu0 %v7161_v19 }
 0xa59   :  { %v7046_v9 = vpop.permute.xlu0 %7045  ;;  %7881 = vmatprep.subr.bf16.mxu0 %v18310_v43  ;;  %v6860_v52 = vpop.permute.xlu1 %6859  ;;  %7844 = vmatprep.mubr.bf16.mxu1 %v22188_v50 }
 0xa5a   :  { %v6882_v6 = vsel %vm206_vm0, %v6860_v52, %v6862_v27  ;;  %v6881_v43 = vsel %vm206_vm0, %v18622_v16, %v6860_v52 }
 0xa5b   :  { %7971 = vmatprep.subr.bf16.mxu1 %v6882_v6 }
 0xa5c   :  { %7882 = vmatpush1.bf16.msra.mxu0 %v18307_v21  ;;  %v7272_v21 = vsel %vm602_vm4, %v18708_v18, %v18733_v62 }
 0xa5d   :  { %v18805_v39 = vpop.permute.xlu0 %7263  ;;  %7883 = vmatprep.subr.bf16.mxu0 %v18329_v29  ;;  %v6952_v45 = vpop.permute.xlu1 %6951  ;;  %v7271_v29 = vsel %vm602_vm4, %v18570_v35, %v18708_v18  ;;  %v7277_v35 = vsel %vm602_vm4, %v18627_v53, %v7262_v20  ;;  %v7364_v18 = vsel %vm695_vm5, %v18738_v37, %v18751_v55  ;;  %v7363_v53 = vsel %vm695_vm5, %v18580_v56, %v18738_v37 }
 0xa5e   :  { %v7278_v16 = vsel %vm602_vm4, %v7262_v20, %v18805_v39  ;;  %v6974_v23 = vsel %vm299_vm1, %v6952_v45, %v6954_v11  ;;  %v7369_v56 = vsel %vm695_vm5, %v18642_v14, %v7354_v1 }
 0xa60   :  { %13651 = vmatmul.mubr.msk.bf16.vlgmr.msra.gmra.mrb[56].mxu1 %vm1088_vm8, %v18803_v32  ;;  %7884 = vmatpush1.bf16.msra.mxu0 %v18327_v47  ;;  %v18827_v47 = vld [vmem:[%s22072_s1 + $0x110] ss:$12 sps:$4 sm:$0xff]  }
 0xa61   :  { %7972 = vmatpush1.bf16.msra.mxu1 %v6881_v43  ;;  %v18816_v31 = vpop.permute.xlu0 %7355  ;;  %7885 = vmatprep.subr.bf16.mxu0 %v7272_v21  ;;  %v7044_v2 = vpop.permute.xlu1 %7043 }
 0xa62   :  { %7854 = vmatprep.mubr.bf16.mxu1 %v22188_v50  ;;  %v7370_v24 = vsel %vm695_vm5, %v7354_v1, %v18816_v31  ;;  %v7066_v44 = vsel %vm392_vm2, %v7044_v2, %v7046_v9 }
 0xa64   :  { %7886 = vmatpush1.bf16.msra.mxu0 %v7271_v29 }
 0xa65   :  { %v6876_v8 = vpop.permute.xlu0 %6875  ;;  %7887 = vmatprep.subr.bf16.mxu0 %v7278_v16  ;;  %v6874_v46 = vpop.permute.xlu1 %6873 }
 0xa66   :  { %v6888_v4 = vsel %vm206_vm0, %v6874_v46, %v6876_v8  ;;  %v6887_v57 = vsel %vm206_vm0, %v18693_v15, %v6874_v46  ;;  %v6973_v15 = vsel %vm299_vm1, %v18640_v38, %v6952_v45 }
 0xa67   :  { %7973 = vmatprep.subr.bf16.mxu1 %v6888_v4 }
 0xa68   :  { %13652 = vmatmul.mubr.msk.bf16.gmra.mrb[60].mxu1 %vm1088_vm8, %v18827_v47  ;;  %7888 = vmatpush1.bf16.msra.mxu0 %v7277_v35 }
 0xa69   :  { %7974 = vmatpush1.bf16.msra.mxu1 %v6887_v57  ;;  %v18839_v12 = vpop.permute.xlu0 %7433  ;;  %7889 = vmatprep.subr.bf16.mxu0 %v7364_v18  ;;  %v7432_v27 = vpop.permute.xlu1 %7431 }
 0xa6a   :  { %7975 = vmatprep.subr.bf16.mxu1 %v6974_v23  ;;  %8003 = vmatprep.mubr.bf16.mxu1 %v18414_v49  ;;  %v7456_v38 = vsel %vm788_vm6, %v7432_v27, %v18839_v12  ;;  %v7455_v19 = vsel %vm788_vm6, %v18594_v58, %v7432_v27 }
 0xa6c   :  { %7890 = vmatpush1.bf16.msra.mxu0 %v7363_v53 }
 0xa6d   :  { %7976 = vmatpush1.bf16.msra.mxu1 %v6973_v15  ;;  %v6968_v20 = vpop.permute.xlu0 %6967  ;;  %7891 = vmatprep.subr.bf16.mxu0 %v7370_v24  ;;  %v6966_v3 = vpop.permute.xlu1 %6965 }
 0xa6e   :  { %v6980_v59 = vsel %vm299_vm1, %v6966_v3, %v6968_v20  ;;  %v6979_v49 = vsel %vm299_vm1, %v18721_v34, %v6966_v3  ;;  %v7065_v34 = vsel %vm392_vm2, %v18650_v33, %v7044_v2 }
 0xa6f   :  { %7977 = vmatprep.subr.bf16.mxu1 %v6980_v59 }
 0xa70   :  { %7892 = vmatpush1.bf16.msra.mxu0 %v7369_v56 }
 0xa71   :  { %7978 = vmatpush1.bf16.msra.mxu1 %v6979_v49  ;;  %v18857_v37 = vpop.permute.xlu0 %7447  ;;  %7893 = vmatprep.subr.bf16.mxu0 %v7456_v38  ;;  %v7058_v11 = vpop.permute.xlu1 %7057 }
 0xa72   :  { %7979 = vmatprep.subr.bf16.mxu1 %v7066_v44  ;;  %v7071_v58 = vsel %vm392_vm2, %v18756_v41, %v7058_v11 }
 0xa74   :  { %7894 = vmatpush1.bf16.msra.mxu0 %v7455_v19 }
 0xa75   :  { %7980 = vmatpush1.bf16.msra.mxu1 %v7065_v34  ;;  %v7060_v14 = vpop.permute.xlu0 %7059  ;;  %v7446_v1 = vpop.permute.xlu1 %7445 }
 0xa76   :  { %v7462_v52 = vsel %vm788_vm6, %v7446_v1, %v18857_v37  ;;  %v7072_v6 = vsel %vm392_vm2, %v7058_v11, %v7060_v14  ;;  %v7461_v9 = vsel %vm788_vm6, %v18652_v51, %v7446_v1 }
 0xa77   :  { %7895 = vmatprep.subr.bf16.mxu0 %v7462_v52  ;;  %7981 = vmatprep.subr.bf16.mxu1 %v7072_v6 }
 0xa78   :  { %7896 = vmatpush1.bf16.msra.mxu0 %v7461_v9 }
 0xa79   :  { %7982 = vmatpush1.bf16.msra.mxu1 %v7071_v58  ;;  %v7138_v45 = vpop.permute.xlu0 %7137  ;;  %v7136_v33 = vpop.permute.xlu1 %7135 }
 0xa7a   :  { %v7158_v43 = vsel %vm485_vm3, %v7136_v33, %v7138_v45  ;;  %v7157_v21 = vsel %vm485_vm3, %v18666_v61, %v7136_v33 }
 0xa7b   :  { %7898 = vmatmul.mubr.bf16.vlgmr.msra.gmra.mrb[64].mxu0 %v18749_v0  ;;  %7983 = vmatprep.subr.bf16.mxu1 %v7158_v43 }
 0xa7c   :  { %7907 = vmatprep.mubr.bf16.mxu0 %v18763_v48 }
 0xa7d   :  { %7984 = vmatpush1.bf16.msra.mxu1 %v7157_v21  ;;  %v7152_v51 = vpop.permute.xlu0 %7151  ;;  %v7150_v2 = vpop.permute.xlu1 %7149 }
 0xa7e   :  { %v7164_v29 = vsel %vm485_vm3, %v7150_v2, %v7152_v51  ;;  %v7163_v41 = vsel %vm485_vm3, %v18716_v54, %v7150_v2 }
 0xa7f   :  { %7985 = vmatprep.subr.bf16.mxu1 %v7164_v29 }
 0xa81   :  { %7986 = vmatpush1.bf16.msra.mxu1 %v7163_v41  ;;  %v7526_v16 = vpop.permute.xlu0 %7525  ;;  %v7524_v8 = vpop.permute.xlu1 %7523 }
 0xa82   :  { %7987 = vmatprep.subr.bf16.mxu1 %v18374_v30  ;;  %v7548_v61 = vsel %vm881_vm7, %v7524_v8, %v7526_v16  ;;  %v7547_v46 = vsel %vm881_vm7, %v18609_v7, %v7524_v8 }
 0xa83   :  { %7908 = vmatmul.mubr.bf16.gmra.mrb[68].mxu0 %v18790_v42  ;;  %7918 = vmatprep.subr.bf16.mxu0 %v7548_v61 }
 0xa84   :  { %7919 = vmatpush1.bf16.msra.mxu0 %v7547_v46  ;;  %7950 = vmatprep.mubr.bf16.mxu0 %v22188_v50 }
 0xa85   :  { %7988 = vmatpush1.bf16.msra.mxu1 %v18371_v36  ;;  %v7540_v54 = vpop.permute.xlu0 %7539  ;;  %v7538_v4 = vpop.permute.xlu1 %7537 }
 0xa86   :  { %7989 = vmatprep.subr.bf16.mxu1 %v18393_v28  ;;  %v7554_v57 = vsel %vm881_vm7, %v7538_v4, %v7540_v54  ;;  %v7553_v30 = vsel %vm881_vm7, %v18685_v13, %v7538_v4 }
 0xa87   :  { %7920 = vmatprep.subr.bf16.mxu0 %v7554_v57 }
 0xa88   :  { %7921 = vmatpush1.bf16.msra.mxu0 %v7553_v30 }
 0xa89   :  { %7990 = vmatpush1.bf16.msra.mxu1 %v18391_v10  ;;  %v7254_v7 = vpop.permute.xlu0 %7253  ;;  %v7252_v35 = vpop.permute.xlu1 %7251 }
 0xa8a   :  { %v7274_v18 = vsel %vm602_vm4, %v7252_v35, %v7254_v7  ;;  %v7273_v36 = vsel %vm602_vm4, %v18733_v62, %v7252_v35 }
 0xa8b   :  { %13653 = vmatmul.mubr.msk.bf16.vlgmr.msra.gmra.mrb[64].mxu0 %vm1088_vm8, %v18803_v32  ;;  %7991 = vmatprep.subr.bf16.mxu1 %v7274_v18 }
 0xa8c   :  { %7960 = vmatprep.mubr.bf16.mxu0 %v22188_v50 }
 0xa8d   :  { %7992 = vmatpush1.bf16.msra.mxu1 %v7273_v36  ;;  %v7268_v28 = vpop.permute.xlu0 %7267  ;;  %v7266_v13 = vpop.permute.xlu1 %7265 }
 0xa8e   :  { %v7280_v23 = vsel %vm602_vm4, %v7266_v13, %v7268_v28  ;;  %v7279_v10 = vsel %vm602_vm4, %v18805_v39, %v7266_v13  ;;  %v22233_v28 = vld [vmem:[#allocation4_spill] sm:$0xff] }
 0xa8f   :  { %7993 = vmatprep.subr.bf16.mxu1 %v7280_v23 }
 0xa91   :  { %7994 = vmatpush1.bf16.msra.mxu1 %v7279_v10  ;;  %v7346_v27 = vpop.permute.xlu0 %7345  ;;  %v7344_v53 = vpop.permute.xlu1 %7343  ;;  %v22235_v10 = vld [vmem:[#allocation5_spill] sm:$0xff] }
 0xa92   :  { %v7366_v62 = vsel %vm695_vm5, %v7344_v53, %v7346_v27  ;;  %v7365_v15 = vsel %vm695_vm5, %v18751_v55, %v7344_v53 }
 0xa93   :  { %13654 = vmatmul.mubr.msk.bf16.gmra.mrb[68].mxu0 %vm1088_vm8, %v18827_v47  ;;  %7995 = vmatprep.subr.bf16.mxu1 %v7366_v62 }
 0xa95   :  { %7996 = vmatpush1.bf16.msra.mxu1 %v7365_v15  ;;  %v7360_v24 = vpop.permute.xlu0 %7359  ;;  %v7358_v20 = vpop.permute.xlu1 %7357 }
 0xa96   :  { %v7372_v3 = vsel %vm695_vm5, %v7358_v20, %v7360_v24  ;;  %v7371_v39 = vsel %vm695_vm5, %v18816_v31, %v7358_v20  ;;  %v22237_v20 = vld [vmem:[#allocation6_spill] sm:$0xff] }
 0xa97   :  { %7997 = vmatprep.subr.bf16.mxu1 %v7372_v3 }
 0xa99   :  { %7998 = vmatpush1.bf16.msra.mxu1 %v7371_v39  ;;  %v7438_v59 = vpop.permute.xlu0 %7437  ;;  %v7436_v49 = vpop.permute.xlu1 %7435  ;;  %v22239_v39 = vld [vmem:[#allocation7_spill] sm:$0xff] }
 0xa9a   :  { %v7458_v56 = vsel %vm788_vm6, %v7436_v49, %v7438_v59  ;;  %v7457_v55 = vsel %vm788_vm6, %v18839_v12, %v7436_v49 }
 0xa9b   :  { %7999 = vmatprep.subr.bf16.mxu1 %v7458_v56 }
 0xa9d   :  { %8000 = vmatpush1.bf16.msra.mxu1 %v7457_v55  ;;  %v7452_v38 = vpop.permute.xlu0 %7451  ;;  %v7450_v44 = vpop.permute.xlu1 %7449 }
 0xa9e   :  { %v7464_v11 = vsel %vm788_vm6, %v7450_v44, %v7452_v38  ;;  %v7463_v19 = vsel %vm788_vm6, %v18857_v37, %v7450_v44 }
 0xa9f   :  { %8001 = vmatprep.subr.bf16.mxu1 %v7464_v11 }
 0xaa1   :  { %8002 = vmatpush1.bf16.msra.mxu1 %v7463_v19  ;;  %v7530_v31 = vpop.permute.xlu0 %7529  ;;  %v7528_v34 = vpop.permute.xlu1 %7527 }
 0xaa2   :  { %v7550_v14 = vsel %vm881_vm7, %v7528_v34, %v7530_v31  ;;  %v7549_v1 = vsel %vm881_vm7, %v7526_v16, %v7528_v34 }
 0xaa3   :  { %8024 = vmatprep.subr.bf16.mxu1 %v7550_v14 }
 0xaa4   :  { %8004 = vmatmul.mubr.bf16.vlgmr.msra.gmra.mrb[64].mxu1 %v18749_v0 }
 0xaa5   :  { %8025 = vmatpush1.bf16.msra.mxu1 %v7549_v1  ;;  %v7544_v12 = vpop.permute.xlu0 %7543  ;;  %v7542_v52 = vpop.permute.xlu1 %7541  ;;  %8013 = vmatprep.mubr.bf16.mxu1 %v18763_v48 }
 0xaa6   :  { %v7556_v6 = vsel %vm881_vm7, %v7542_v52, %v7544_v12  ;;  %v7555_v37 = vsel %vm881_vm7, %v7540_v54, %v7542_v52  ;;  %v22241_v12 = vld [vmem:[#allocation8_spill] sm:$0xff] }
 0xaa7   :  { %8026 = vmatprep.subr.bf16.mxu1 %v7556_v6  ;;  %v22243_v6 = vld [vmem:[#allocation9_spill] sm:$0xff] }
 0xaa9   :  { %8027 = vmatpush1.bf16.msra.mxu1 %v7555_v37 }
 0xaac   :  { %8014 = vmatmul.mubr.bf16.gmra.mrb[68].mxu1 %v18790_v42 }
 0xaad   :  { %8056 = vmatprep.mubr.bf16.mxu1 %v22188_v50 }
 0xab4   :  { %13655 = vmatmul.mubr.msk.bf16.vlgmr.msra.gmra.mrb[64].mxu1 %vm1088_vm8, %v18803_v32 }
 0xab5   :  { %8066 = vmatprep.mubr.bf16.mxu1 %v22188_v50 }
 0xab6   :  { %v18935_v0 = vpop.permute.xlu1 %7705  ;;  %v18938_v9 = vpop.permute.xlu0 %7710 }
 0xaba   :  { %v18951_v4 = vpop.permute.xlu0 %7720  ;;  %v18959_v36 = vpop.permute.xlu1 %7715 }
 0xabc   :  { %13656 = vmatmul.mubr.msk.bf16.gmra.mrb[68].mxu1 %vm1088_vm8, %v18827_v47 }
 0xb33   :  { %v7846_v48 = vpop.f32.mrb[56].mxu1 }
 0xb34   :  { %v13873_v42 = vadd.f32 %v7846_v48, %v18935_v0  ;;  %v7848_v32 = vpop.f32.mrb[57].mxu1 }
 0xb35   :  { %v7850_v58 = vpop.f32.mrb[58].mxu1  ;;  %v13874_v51 = vadd.f32 %v7848_v32, %v18935_v0 }
 0xb36   :  { %v8077_v45 = vmax.f32 %v13873_v42, 0.0  ;;  %v13875_v33 = vadd.f32 %v7850_v58, %v18938_v9  ;;  %v7852_v43 = vpop.f32.mrb[59].mxu1 }
 0xb37   :  { %v13876_v47 = vadd.f32 %v7852_v43, %v18938_v9  ;;  %v8078_v61 = vmax.f32 %v13874_v51, 0.0 }
 0xb38   :  { %v8101_v21 = vmul.f32 %v8077_v45, %v15186_v60  ;;  %v8083_v2 = vmax.f32 %v13875_v33, 0.0 }
 0xb39   :  { %v8084_v41 = vmax.f32 %v13876_v47, 0.0 }
 0xb3a   :  { %v8107_v29 = vmul.f32 %v8083_v2, %v15186_v60  ;;  %v18946_v8 = vadd.f32 %v8101_v21, %v17420_v26  ;;  %v8102_v26 = vmul.f32 %v8078_v61, %v15190_v5 }
 0xb3b   :  { %v7856_v16 = vpop.f32.mrb[60].mxu1  ;;  %v8108_v7 = vmul.f32 %v8084_v41, %v15190_v5 }
 0xb3c   :  { %v18949_v46 = vadd.f32 %v8107_v29, %v17423_v25  ;;  %v7858_v54 = vpop.f32.mrb[61].mxu1  ;;  %v13877_v25 = vadd.f32 %v7856_v16, %v18959_v36  ;;  %v18971_v27 = vadd.f32 %v8102_v26, %v22235_v10  ;;  %v22245_v29 = vld [vmem:[#allocation10_spill] sm:$0xff]  ;;  %v22247_v16 = vld [vmem:[#allocation11_spill] sm:$0xff] }
 0xb3d   :  { %v7860_v57 = vpop.f32.mrb[62].mxu1  ;;  %v18968_v13 = vadd.f32 %v8108_v7, %v22233_v28  ;;  %v13878_v55 = vadd.f32 %v7858_v54, %v18959_v36 }
 0xb3e   :  { %v18955_v30 = vpack.c.bf16 %v18949_v46, %v18946_v8  ;;  %v13879_v35 = vadd.f32 %v7860_v57, %v18951_v4  ;;  %v7862_v18 = vpop.f32.mrb[63].mxu1  ;;  %22236 = vst [vmem:[#allocation5_spill] sm:$0xff] %v18971_v27  ;;  %v8089_v53 = vmax.f32 %v13877_v25, 0.0 }
 0xb3f   :  { %22234 = vst [vmem:[#allocation4_spill] sm:$0xff] %v18968_v13  ;;  %v18979_v62 = vpack.c.bf16 %v18968_v13, %v18971_v27  ;;  %v13880_v56 = vadd.f32 %v7862_v18, %v18951_v4  ;;  %v8090_v44 = vmax.f32 %v13878_v55, 0.0  ;;  %v22249_v55 = vld [vmem:[#allocation12_spill] sm:$0xff] }
 0xb40   :  { %8295 = vrot.lane.b32.xlu0 %v18955_v30, %s14554_s24  ;;  %8203 = vrot.lane.b32.xlu1 %v18955_v30, %s14553_s17  ;;  %v8095_v23 = vmax.f32 %v13879_v35, 0.0  ;;  %v8113_v24 = vmul.f32 %v8089_v53, %v15186_v60 }
 0xb41   :  { %v8096_v38 = vmax.f32 %v13880_v56, 0.0  ;;  %v8114_v34 = vmul.f32 %v8090_v44, %v15190_v5  ;;  %v22251_v44 = vld [vmem:[#allocation13_spill] sm:$0xff] }
 0xb42   :  { %v8119_v15 = vmul.f32 %v8095_v23, %v15186_v60  ;;  %v18991_v59 = vadd.f32 %v8113_v24, %v22239_v39 }
 0xb43   :  { %v8120_v11 = vmul.f32 %v8096_v38, %v15190_v5  ;;  %v19029_v37 = vadd.f32 %v8114_v34, %v22243_v6 }
 0xb44   :  { %8479 = vrot.lane.b32.xlu0 %v18955_v30, %s14556_s26  ;;  %8387 = vrot.lane.b32.xlu1 %v18955_v30, %s14555_s25  ;;  %v18988_v3 = vadd.f32 %v8119_v15, %v22237_v20  ;;  %22240 = vst [vmem:[#allocation7_spill] sm:$0xff] %v18991_v59 }
 0xb45   :  { %v19026_v52 = vadd.f32 %v8120_v11, %v22241_v12  ;;  %22244 = vst [vmem:[#allocation9_spill] sm:$0xff] %v19029_v37 }
 0xb46   :  { %22238 = vst [vmem:[#allocation6_spill] sm:$0xff] %v18988_v3  ;;  %v18999_v49 = vpack.c.bf16 %v18988_v3, %v18991_v59 }
 0xb47   :  { %22242 = vst [vmem:[#allocation8_spill] sm:$0xff] %v19026_v52  ;;  %v19037_v48 = vpack.c.bf16 %v19026_v52, %v19029_v37 }
 0xb48   :  { %8205 = vrot.lane.b32.xlu0 %v18979_v62, %s14553_s17  ;;  %8593 = vrot.lane.b32.xlu1 %v18955_v30, %s14557_s29 }
 0xb4c   :  { %8389 = vrot.lane.b32.xlu0 %v18979_v62, %s14555_s25  ;;  %8685 = vrot.lane.b32.xlu1 %v18955_v30, %s14558_s10 }
 0xb50   :  { %8777 = vrot.lane.b32.xlu1 %v18955_v30, %s14559_s11  ;;  %8217 = vrot.lane.b32.xlu0 %v18999_v49, %s14553_s17 }
 0xb54   :  { %8869 = vrot.lane.b32.xlu1 %v18955_v30, %s14560_s14  ;;  %8401 = vrot.lane.b32.xlu0 %v18999_v49, %s14555_s25 }
 0xb58   :  { %8297 = vrot.lane.b32.xlu1 %v18979_v62, %s14554_s24  ;;  %8607 = vrot.lane.b32.xlu0 %v18999_v49, %s14557_s29 }
 0xb5c   :  { %8481 = vrot.lane.b32.xlu1 %v18979_v62, %s14556_s26  ;;  %8699 = vrot.lane.b32.xlu0 %v18999_v49, %s14558_s10 }
 0xb5e   :  { %v7952_v19 = vpop.f32.mrb[64].mxu0 }
 0xb5f   :  { %v7954_v31 = vpop.f32.mrb[65].mxu0  ;;  %v13881_v43 = vadd.f32 %v7952_v19, %v18935_v0 }
 0xb60   :  { %8595 = vrot.lane.b32.xlu1 %v18979_v62, %s14557_s29  ;;  %8791 = vrot.lane.b32.xlu0 %v18999_v49, %s14559_s11  ;;  %v7956_v14 = vpop.f32.mrb[66].mxu0  ;;  %v13882_v35 = vadd.f32 %v7954_v31, %v18935_v0  ;;  %v22253_v31 = vld [vmem:[#allocation14_spill] sm:$0xff] }
 0xb61   :  { %v7958_v1 = vpop.f32.mrb[67].mxu0  ;;  %v13883_v33 = vadd.f32 %v7956_v14, %v18938_v9  ;;  %v8079_v21 = vmax.f32 %v13881_v43, 0.0  ;;  %v22255_v14 = vld [vmem:[#allocation15_spill] sm:$0xff] }
 0xb62   :  { %v13884_v57 = vadd.f32 %v7958_v1, %v18938_v9  ;;  %v8080_v28 = vmax.f32 %v13882_v35, 0.0 }
 0xb63   :  { %v8085_v47 = vmax.f32 %v13883_v33, 0.0  ;;  %v8103_v2 = vmul.f32 %v8079_v21, %v15232_v17 }
 0xb64   :  { %8687 = vrot.lane.b32.xlu1 %v18979_v62, %s14558_s10  ;;  %8883 = vrot.lane.b32.xlu0 %v18999_v49, %s14560_s14  ;;  %v8086_v26 = vmax.f32 %v13884_v57, 0.0  ;;  %v8104_v24 = vmul.f32 %v8080_v28, %v15236_v22 }
 0xb65   :  { %v8109_v51 = vmul.f32 %v8085_v47, %v15232_v17  ;;  %v19067_v61 = vadd.f32 %v8103_v2, %v22247_v16 }
 0xb66   :  { %v7962_v42 = vpop.f32.mrb[68].mxu0  ;;  %v8110_v10 = vmul.f32 %v8086_v26, %v15236_v22  ;;  %v19104_v34 = vadd.f32 %v8104_v24, %v22253_v31  ;;  %v19174_v24 = vld [vmem:[%s22072_s1 + $0x124] ss:$12 sps:$4 sm:$0xff]  }
 0xb67   :  { %v7964_v32 = vpop.f32.mrb[69].mxu0  ;;  %v19064_v41 = vadd.f32 %v8109_v51, %v22245_v29  ;;  %22248 = vst [vmem:[#allocation11_spill] sm:$0xff] %v19067_v61  ;;  %v13885_v18 = vadd.f32 %v7962_v42, %v18959_v36  ;;  %9143 = vmatprep.mubr.bf16.mxu0 %v19174_v24  ;;  %9249 = vmatprep.mubr.bf16.mxu1 %v19174_v24 }
 0xb68   :  { %8779 = vrot.lane.b32.xlu1 %v18979_v62, %s14559_s11  ;;  %8311 = vrot.lane.b32.xlu0 %v19037_v48, %s14554_s24  ;;  %v7966_v58 = vpop.f32.mrb[70].mxu0  ;;  %v19098_v38 = vadd.f32 %v8110_v10, %v22249_v55  ;;  %22254 = vst [vmem:[#allocation14_spill] sm:$0xff] %v19104_v34  ;;  %v13886_v21 = vadd.f32 %v7964_v32, %v18959_v36  ;;  %v22257_v32 = vld [vmem:[#allocation16_spill] sm:$0xff] }
 0xb69   :  { %v7968_v45 = vpop.f32.mrb[71].mxu0  ;;  %22246 = vst [vmem:[#allocation10_spill] sm:$0xff] %v19064_v41  ;;  %v19075_v54 = vpack.c.bf16 %v19064_v41, %v19067_v61  ;;  %v13887_v7 = vadd.f32 %v7966_v58, %v18951_v4  ;;  %v8091_v23 = vmax.f32 %v13885_v18, 0.0 }
 0xb6a   :  { %22250 = vst [vmem:[#allocation12_spill] sm:$0xff] %v19098_v38  ;;  %v19115_v12 = vpack.c.bf16 %v19098_v38, %v19104_v34  ;;  %v13888_v43 = vadd.f32 %v7968_v45, %v18951_v4  ;;  %v8092_v2 = vmax.f32 %v13886_v21, 0.0 }
 0xb6b   :  { %v8097_v25 = vmax.f32 %v13887_v7, 0.0  ;;  %v8115_v20 = vmul.f32 %v8091_v23, %v15232_v17  ;;  %v22259_v7 = vld [vmem:[#allocation17_spill] sm:$0xff] }
 0xb6c   :  { %8871 = vrot.lane.b32.xlu1 %v18979_v62, %s14560_s14  ;;  %8495 = vrot.lane.b32.xlu0 %v19037_v48, %s14556_s26  ;;  %v8098_v51 = vmax.f32 %v13888_v43, 0.0  ;;  %v8116_v29 = vmul.f32 %v8092_v2, %v15236_v22  ;;  %v22265_v2 = vld [vmem:[#allocation20_spill] sm:$0xff] }
 0xb6d   :  { %v8121_v53 = vmul.f32 %v8097_v25, %v15232_v17  ;;  %v19107_v1 = vadd.f32 %v8115_v20, %v22255_v14 }
 0xb6e   :  { %v8122_v45 = vmul.f32 %v8098_v51, %v15236_v22  ;;  %v19150_v35 = vadd.f32 %v8116_v29, %v22259_v7  ;;  %v22267_v7 = vld [vmem:[#allocation21_spill] sm:$0xff] }
 0xb6f   :  { %v19101_v11 = vadd.f32 %v8121_v53, %v22251_v44  ;;  %22256 = vst [vmem:[#allocation15_spill] sm:$0xff] %v19107_v1  ;;  %v19167_v53 = vpop.permute.xlu0 %14370 }
 0xb70   :  { %8309 = vrot.lane.b32.xlu1 %v18999_v49, %s14554_s24  ;;  %8609 = vrot.lane.b32.xlu0 %v19037_v48, %s14557_s29  ;;  %v19146_v16 = vadd.f32 %v8122_v45, %v22257_v32  ;;  %22260 = vst [vmem:[#allocation17_spill] sm:$0xff] %v19150_v35  ;;  %v14372_v41 = vunpack.i.l.bf16 %v19167_v53  ;;  %v14373_v3 = vunpack.i.h.bf16 %v19167_v53 }
 0xb71   :  { %22252 = vst [vmem:[#allocation13_spill] sm:$0xff] %v19101_v11  ;;  %v19119_v6 = vpack.c.bf16 %v19101_v11, %v19107_v1 }
 0xb72   :  { %22258 = vst [vmem:[#allocation16_spill] sm:$0xff] %v19146_v16  ;;  %v19159_v26 = vpack.c.bf16 %v19146_v16, %v19150_v35 }
 0xb74   :  { %8493 = vrot.lane.b32.xlu1 %v18999_v49, %s14556_s26  ;;  %8701 = vrot.lane.b32.xlu0 %v19037_v48, %s14558_s10 }
 0xb78   :  { %8219 = vrot.lane.b32.xlu1 %v19037_v48, %s14553_s17  ;;  %8793 = vrot.lane.b32.xlu0 %v19037_v48, %s14559_s11 }
 0xb7c   :  { %8403 = vrot.lane.b32.xlu1 %v19037_v48, %s14555_s25  ;;  %8885 = vrot.lane.b32.xlu0 %v19037_v48, %s14560_s14 }
 0xb80   :  { %8207 = vrot.lane.b32.xlu1 %v19075_v54, %s14553_s17  ;;  %8597 = vrot.lane.b32.xlu0 %v19075_v54, %s14557_s29 }
 0xb84   :  { %8299 = vrot.lane.b32.xlu1 %v19075_v54, %s14554_s24  ;;  %8689 = vrot.lane.b32.xlu0 %v19075_v54, %s14558_s10 }
 0xb87   :  { %v8058_v15 = vpop.f32.mrb[64].mxu1 }
 0xb88   :  { %v8060_v39 = vpop.f32.mrb[65].mxu1  ;;  %8391 = vrot.lane.b32.xlu1 %v19075_v54, %s14555_s25  ;;  %8781 = vrot.lane.b32.xlu0 %v19075_v54, %s14559_s11  ;;  %v13889_v18 = vadd.f32 %v8058_v15, %v18935_v0  ;;  %v19169_v15 = vpop.permute.xlu1 %14365 }
 0xb89   :  { %v8062_v56 = vpop.f32.mrb[66].mxu1  ;;  %v14368_v38 = vunpack.i.h.bf16 %v19169_v15 }
 0xb8a   :  { %v8064_v19 = vpop.f32.mrb[67].mxu1  ;;  %v13891_v57 = vadd.f32 %v8062_v56, %v18938_v9  ;;  %v8081_v28 = vmax.f32 %v13889_v18, 0.0  ;;  %v13890_v56 = vadd.f32 %v8060_v39, %v18935_v0  ;;  %v19194_v0 = vpop.permute.xlu0 %14380 }
 0xb8b   :  { %v13892_v10 = vadd.f32 %v8064_v19, %v18938_v9  ;;  %v22261_v9 = vld [vmem:[#allocation18_spill] sm:$0xff]  ;;  %v22263_v19 = vld [vmem:[#allocation19_spill] sm:$0xff] }
 0xb8c   :  { %8483 = vrot.lane.b32.xlu1 %v19075_v54, %s14556_s26  ;;  %8873 = vrot.lane.b32.xlu0 %v19075_v54, %s14560_s14  ;;  %v8087_v25 = vmax.f32 %v13891_v57, 0.0  ;;  %v8105_v20 = vmul.f32 %v8081_v28, %v15296_v40  ;;  %v8082_v14 = vmax.f32 %v13890_v56, 0.0  ;;  %v19196_v39 = vpop.permute.xlu1 %14375 }
 0xb8d   :  { %v8088_v44 = vmax.f32 %v13892_v10, 0.0  ;;  %v14377_v53 = vunpack.i.l.bf16 %v19196_v39 }
 0xb8e   :  { %v8111_v23 = vmul.f32 %v8087_v25, %v15296_v40  ;;  %v19188_v31 = vadd.f32 %v8105_v20, %v22263_v19  ;;  %v8106_v51 = vmul.f32 %v8082_v14, %v15304_v63  ;;  %v14367_v19 = vunpack.i.l.bf16 %v19169_v15 }
 0xb8f   :  { %v8068_v42 = vpop.f32.mrb[68].mxu1  ;;  %v8112_v21 = vmul.f32 %v8088_v44, %v15304_v63 }
 0xb90   :  { %v19121_v58 = vpop.f32.mrb[69].mxu1  ;;  %8611 = vrot.lane.b32.xlu1 %v19119_v6, %s14557_s29  ;;  %8209 = vrot.lane.b32.xlu0 %v19115_v12, %s14553_s17  ;;  %v19185_v55 = vadd.f32 %v8111_v23, %v22261_v9  ;;  %22264 = vst [vmem:[#allocation19_spill] sm:$0xff] %v19188_v31  ;;  %v19215_v18 = vadd.f32 %v8106_v51, %v22267_v7 }
 0xb91   :  { %v8072_v33 = vpop.f32.mrb[70].mxu1  ;;  %v19209_v45 = vadd.f32 %v8112_v21, %v22265_v2  ;;  %v13893_v25 = vadd.f32 %v8068_v42, %v18959_v36  ;;  %v13894_v51 = vadd.f32 %v19121_v58, %v18959_v36 }
 0xb92   :  { %v19128_v47 = vpop.f32.mrb[71].mxu1  ;;  %22262 = vst [vmem:[#allocation18_spill] sm:$0xff] %v19185_v55  ;;  %v19200_v43 = vpack.c.bf16 %v19185_v55, %v19188_v31  ;;  %v13895_v29 = vadd.f32 %v8072_v33, %v18951_v4  ;;  %22268 = vst [vmem:[#allocation21_spill] sm:$0xff] %v19215_v18 }
 0xb93   :  { %22266 = vst [vmem:[#allocation20_spill] sm:$0xff] %v19209_v45  ;;  %v19224_v28 = vpack.c.bf16 %v19209_v45, %v19215_v18  ;;  %v8093_v20 = vmax.f32 %v13893_v25, 0.0  ;;  %v13896_v56 = vadd.f32 %v19128_v47, %v18951_v4  ;;  %v22269_v47 = vld [vmem:[#allocation22_spill] sm:$0xff]  ;;  %v8094_v58 = vmax.f32 %v13894_v51, 0.0 }
 0xb94   :  { %8703 = vrot.lane.b32.xlu1 %v19119_v6, %s14558_s10  ;;  %8301 = vrot.lane.b32.xlu0 %v19115_v12, %s14554_s24  ;;  %v8099_v23 = vmax.f32 %v13895_v29, 0.0 }
 0xb95   :  { %v8117_v21 = vmul.f32 %v8093_v20, %v15296_v40  ;;  %v8100_v29 = vmax.f32 %v13896_v56, 0.0 }
 0xb96   :  { %v8123_v42 = vmul.f32 %v8099_v23, %v15296_v40  ;;  %v22271_v23 = vld [vmem:[#allocation23_spill] sm:$0xff] }
 0xb97   :  { %v19260_v36 = vadd.f32 %v8117_v21, %v22271_v23  ;;  %v8124_v20 = vmul.f32 %v8100_v29, %v15304_v63 }
 0xb98   :  { %8795 = vrot.lane.b32.xlu1 %v19119_v6, %s14559_s11  ;;  %8393 = vrot.lane.b32.xlu0 %v19115_v12, %s14555_s25  ;;  %v19253_v2 = vadd.f32 %v8123_v42, %v22269_v47  ;;  %v22275_v47 = vld [vmem:[#allocation25_spill] sm:$0xff] }
 0xb99   :  { %22272 = vst [vmem:[#allocation23_spill] sm:$0xff] %v19260_v36 }
 0xb9a   :  { %22270 = vst [vmem:[#allocation22_spill] sm:$0xff] %v19253_v2 }
 0xb9c   :  { %8497 = vrot.lane.b32.xlu1 %v19119_v6, %s14556_s26  ;;  %8485 = vrot.lane.b32.xlu0 %v19115_v12, %s14556_s26 }
 0xba0   :  { %8887 = vrot.lane.b32.xlu1 %v19119_v6, %s14560_s14  ;;  %8221 = vrot.lane.b32.xlu0 %v19119_v6, %s14553_s17 }
 0xba4   :  { %8223 = vrot.lane.b32.xlu1 %v19159_v26, %s14553_s17  ;;  %8313 = vrot.lane.b32.xlu0 %v19119_v6, %s14554_s24 }
 0xba8   :  { %8599 = vrot.lane.b32.xlu1 %v19115_v12, %s14557_s29  ;;  %8405 = vrot.lane.b32.xlu0 %v19119_v6, %s14555_s25 }
 0xbac   :  { %8315 = vrot.lane.b32.xlu1 %v19159_v26, %s14554_s24  ;;  %8499 = vrot.lane.b32.xlu0 %v19159_v26, %s14556_s26 }
 0xbb0   :  { %8691 = vrot.lane.b32.xlu1 %v19115_v12, %s14558_s10  ;;  %8601 = vrot.lane.b32.xlu0 %v19200_v43, %s14557_s29 }
 0xbb2   :  { %v19212_v32 = vpop.permute.xlu0 %8295  ;;  %v8204_v57 = vpop.permute.xlu1 %8203 }
 0xbb3   :  { %v8229_v4 = vsel %vm206_vm0, %v14367_v19, %v8204_v57  ;;  %v8118_v19 = vmul.f32 %v8094_v58, %v15304_v63 }
 0xbb4   :  { %8407 = vrot.lane.b32.xlu1 %v19159_v26, %s14555_s25  ;;  %8693 = vrot.lane.b32.xlu0 %v19200_v43, %s14558_s10 }
 0xbb5   :  { %v19286_v29 = vadd.f32 %v8118_v19, %v22275_v47 }
 0xbb6   :  { %v19226_v33 = vpop.permute.xlu0 %8479  ;;  %v19228_v10 = vpop.permute.xlu1 %8387 }
 0xbb7   :  { %22276 = vst [vmem:[#allocation25_spill] sm:$0xff] %v19286_v29 }
 0xbb8   :  { %8613 = vrot.lane.b32.xlu1 %v19159_v26, %s14557_s29  ;;  %8213 = vrot.lane.b32.xlu0 %v19224_v28, %s14553_s17 }
 0xbba   :  { %v19237_v9 = vpop.permute.xlu0 %8205  ;;  %v19239_v44 = vpop.permute.xlu1 %8593 }
 0xbbb   :  { %v8230_v14 = vsel %vm206_vm0, %v8204_v57, %v19237_v9  ;;  %v19268_v57 = vpack.c.bf16 %v19253_v2, %v19260_v36 }
 0xbbc   :  { %8705 = vrot.lane.b32.xlu1 %v19159_v26, %s14558_s10  ;;  %8305 = vrot.lane.b32.xlu0 %v19224_v28, %s14554_s24 }
 0xbbd   :  { %9111 = vmatprep.subr.bf16.mxu0 %v8230_v14  ;;  %v22273_v14 = vld [vmem:[#allocation24_spill] sm:$0xff] }
 0xbbe   :  { %9112 = vmatpush1.bf16.msra.mxu0 %v8229_v4  ;;  %v19255_v7 = vpop.permute.xlu0 %8389  ;;  %v19257_v25 = vpop.permute.xlu1 %8685  ;;  %v19279_v21 = vadd.f32 %v8124_v20, %v22273_v14 }
 0xbc0   :  { %8211 = vrot.lane.b32.xlu1 %v19200_v43, %s14553_s17  ;;  %8397 = vrot.lane.b32.xlu0 %v19224_v28, %s14555_s25  ;;  %22274 = vst [vmem:[#allocation24_spill] sm:$0xff] %v19279_v21  ;;  %v19294_v23 = vpack.c.bf16 %v19279_v21, %v19286_v29 }
 0xbc2   :  { %v8218_v42 = vpop.permute.xlu0 %8217  ;;  %v19271_v56 = vpop.permute.xlu1 %8777 }
 0xbc3   :  { %v8235_v37 = vsel %vm206_vm0, %v14368_v38, %v8218_v42 }
 0xbc4   :  { %8303 = vrot.lane.b32.xlu1 %v19200_v43, %s14554_s24  ;;  %8615 = vrot.lane.b32.xlu0 %v19268_v57, %s14557_s29 }
 0xbc6   :  { %v19281_v51 = vpop.permute.xlu0 %8401  ;;  %v19283_v4 = vpop.permute.xlu1 %8869 }
 0xbc8   :  { %8395 = vrot.lane.b32.xlu1 %v19200_v43, %s14555_s25  ;;  %8707 = vrot.lane.b32.xlu0 %v19268_v57, %s14558_s10 }
 0xbca   :  { %v19296_v58 = vpop.permute.xlu0 %8607  ;;  %v19298_v20 = vpop.permute.xlu1 %8297 }
 0xbcb   :  { %v8322_v15 = vsel %vm299_vm1, %v19212_v32, %v19298_v20 }
 0xbcc   :  { %8225 = vrot.lane.b32.xlu1 %v19268_v57, %s14553_s17  ;;  %8227 = vrot.lane.b32.xlu0 %v19294_v23, %s14553_s17 }
 0xbce   :  { %v19304_v19 = vpop.permute.xlu0 %8699  ;;  %v19306_v14 = vpop.permute.xlu1 %8481 }
 0xbd0   :  { %8783 = vrot.lane.b32.xlu1 %v19115_v12, %s14559_s11  ;;  %8785 = vrot.lane.b32.xlu0 %v19200_v43, %s14559_s11 }
 0xbd2   :  { %v19312_v47 = vpop.permute.xlu0 %8791  ;;  %v19314_v29 = vpop.permute.xlu1 %8595 }
 0xbd4   :  { %8317 = vrot.lane.b32.xlu1 %v19268_v57, %s14554_s24  ;;  %8319 = vrot.lane.b32.xlu0 %v19294_v23, %s14554_s24 }
 0xbd6   :  { %v19320_v21 = vpop.permute.xlu0 %8883  ;;  %v19322_v36 = vpop.permute.xlu1 %8687 }
 0xbd8   :  { %8409 = vrot.lane.b32.xlu1 %v19268_v57, %s14555_s25  ;;  %8799 = vrot.lane.b32.xlu0 %v19268_v57, %s14559_s11 }
 0xbda   :  { %v19328_v2 = vpop.permute.xlu0 %8311  ;;  %v19330_v18 = vpop.permute.xlu1 %8779 }
 0xbdc   :  { %8797 = vrot.lane.b32.xlu1 %v19159_v26, %s14559_s11  ;;  %8411 = vrot.lane.b32.xlu0 %v19294_v23, %s14555_s25 }
 0xbde   :  { %v19336_v45 = vpop.permute.xlu0 %8495  ;;  %v19338_v31 = vpop.permute.xlu1 %8871 }
 0xbe0   :  { %8487 = vrot.lane.b32.xlu1 %v19200_v43, %s14556_s26  ;;  %8489 = vrot.lane.b32.xlu0 %v19224_v28, %s14556_s26 }
 0xbe2   :  { %v19344_v55 = vpop.permute.xlu0 %8609  ;;  %v8310_v35 = vpop.permute.xlu1 %8309 }
 0xbe4   :  { %8501 = vrot.lane.b32.xlu1 %v19268_v57, %s14556_s26  ;;  %8503 = vrot.lane.b32.xlu0 %v19294_v23, %s14556_s26 }
 0xbe6   :  { %v19350_v16 = vpop.permute.xlu0 %8701  ;;  %v19352_v1 = vpop.permute.xlu1 %8493 }
 0xbe8   :  { %8875 = vrot.lane.b32.xlu1 %v19115_v12, %s14560_s14  ;;  %8877 = vrot.lane.b32.xlu0 %v19200_v43, %s14560_s14 }
 0xbea   :  { %v19358_v34 = vpop.permute.xlu0 %8793  ;;  %v19360_v11 = vpop.permute.xlu1 %8219 }
 0xbeb   :  { %v8236_v61 = vsel %vm206_vm0, %v8218_v42, %v19360_v11  ;;  %v8328_v42 = vsel %vm299_vm1, %v8310_v35, %v19328_v2 }
 0xbec   :  { %8889 = vrot.lane.b32.xlu1 %v19159_v26, %s14560_s14  ;;  %8891 = vrot.lane.b32.xlu0 %v19268_v57, %s14560_s14 }
 0xbed   :  { %9113 = vmatprep.subr.bf16.mxu0 %v8236_v61  ;;  %v8321_v61 = vsel %vm299_vm1, %v14372_v41, %v19212_v32 }
 0xbee   :  { %9114 = vmatpush1.bf16.msra.mxu0 %v8235_v37  ;;  %v19371_v52 = vpop.permute.xlu0 %8885  ;;  %v19373_v59 = vpop.permute.xlu1 %8403 }
 0xbef   :  { %9115 = vmatprep.subr.bf16.mxu0 %v8322_v15  ;;  %v8327_v15 = vsel %vm299_vm1, %v14373_v3, %v8310_v35  ;;  %v8413_v3 = vsel %vm392_vm2, %v14377_v53, %v19228_v10 }
 0xbf0   :  { %8603 = vrot.lane.b32.xlu1 %v19224_v28, %s14557_s29  ;;  %8605 = vrot.lane.b32.xlu0 %v22188_v50, %s14557_s29 }
 0xbf2   :  { %9116 = vmatpush1.bf16.msra.mxu0 %v8321_v61  ;;  %v19384_v37 = vpop.permute.xlu0 %8597  ;;  %v8208_v38 = vpop.permute.xlu1 %8207  ;;  %v8414_v61 = vsel %vm392_vm2, %v19228_v10, %v19255_v7  ;;  %v14382_v10 = vunpack.i.l.bf16 %v19194_v0 }
 0xbf3   :  { %9117 = vmatprep.subr.bf16.mxu0 %v8328_v42 }
 0xbf4   :  { %8617 = vrot.lane.b32.xlu1 %v19294_v23, %s14557_s29  ;;  %8619 = vrot.lane.b32.xlu0 %v22188_v50, %s14557_s29 }
 0xbf6   :  { %9118 = vmatpush1.bf16.msra.mxu0 %v8327_v15  ;;  %v19394_v41 = vpop.permute.xlu0 %8689  ;;  %v19396_v32 = vpop.permute.xlu1 %8299  ;;  %v8420_v15 = vsel %vm392_vm2, %v19281_v51, %v19373_v59 }
 0xbf7   :  { %9119 = vmatprep.subr.bf16.mxu0 %v8414_v61  ;;  %v14378_v61 = vunpack.i.h.bf16 %v19196_v39  ;;  %v8506_v39 = vsel %vm485_vm3, %v19226_v33, %v19306_v14 }
 0xbf8   :  { %8695 = vrot.lane.b32.xlu1 %v19224_v28, %s14558_s10  ;;  %8697 = vrot.lane.b32.xlu0 %v22188_v50, %s14558_s10 }
 0xbf9   :  { %v8419_v53 = vsel %vm392_vm2, %v14378_v61, %v19281_v51 }
 0xbfa   :  { %9120 = vmatpush1.bf16.msra.mxu0 %v8413_v3  ;;  %v19408_v35 = vpop.permute.xlu0 %8781  ;;  %v19410_v42 = vpop.permute.xlu1 %8391 }
 0xbfb   :  { %9121 = vmatprep.subr.bf16.mxu0 %v8420_v15  ;;  %v8505_v15 = vsel %vm485_vm3, %v14382_v10, %v19226_v33  ;;  %v8231_v10 = vsel %vm206_vm0, %v19237_v9, %v8208_v38 }
 0xbfc   :  { %8711 = vrot.lane.b32.xlu0 %v22188_v50, %s14558_s10  ;;  %8709 = vrot.lane.b32.xlu1 %v19294_v23, %s14558_s10 }
 0xbfe   :  { %9122 = vmatpush1.bf16.msra.mxu0 %v8419_v53  ;;  %v19423_v3 = vpop.permute.xlu0 %8873  ;;  %v19425_v27 = vpop.permute.xlu1 %8483  ;;  %v8512_v53 = vsel %vm485_vm3, %v19352_v1, %v19336_v45 }
 0xbff   :  { %9123 = vmatprep.subr.bf16.mxu0 %v8506_v39  ;;  %v14383_v39 = vunpack.i.h.bf16 %v19194_v0 }
 0xc00   :  { %8789 = vrot.lane.b32.xlu0 %v22188_v50, %s14559_s11  ;;  %8787 = vrot.lane.b32.xlu1 %v19224_v28, %s14559_s11 }
 0xc01   :  { %v8511_v33 = vsel %vm485_vm3, %v14383_v39, %v19352_v1  ;;  %v13668_v39 = vld [vmem:[%s22073_s2 + $0xd8] sm:$0xff] }
 0xc02   :  { %9124 = vmatpush1.bf16.msra.mxu0 %v8505_v15  ;;  %v19436_v51 = vpop.permute.xlu0 %8209  ;;  %v19438_v61 = vpop.permute.xlu1 %8611 }
 0xc03   :  { %9125 = vmatprep.subr.bf16.mxu0 %v8512_v53  ;;  %v8232_v13 = vsel %vm206_vm0, %v8208_v38, %v19436_v51  ;;  %v8621_v53 = vsel %vm602_vm4, %v19239_v44, %v19314_v29  ;;  %v8627_v44 = vsel %vm602_vm4, %v19296_v58, %v19344_v55 }
 0xc04   :  { %8803 = vrot.lane.b32.xlu0 %v22188_v50, %s14559_s11  ;;  %8801 = vrot.lane.b32.xlu1 %v19294_v23, %s14559_s11 }
 0xc05   :  { %9217 = vmatprep.subr.bf16.mxu1 %v8232_v13 }
 0xc06   :  { %9126 = vmatpush1.bf16.msra.mxu0 %v8511_v33  ;;  %9218 = vmatpush1.bf16.msra.mxu1 %v8231_v10  ;;  %v19454_v0 = vpop.permute.xlu0 %8301  ;;  %v19456_v15 = vpop.permute.xlu1 %8703 }
 0xc07   :  { %9127 = vmatprep.subr.bf16.mxu0 %v18979_v62  ;;  %v13666_v62 = vld [vmem:[%s22073_s2 + $0xc8] sm:$0xff]  ;;  %v8324_v58 = vsel %vm299_vm1, %v19396_v32, %v19454_v0 }
 0xc08   :  { %8881 = vrot.lane.b32.xlu0 %v22188_v50, %s14560_s14  ;;  %8879 = vrot.lane.b32.xlu1 %v19224_v28, %s14560_s14 }
 0xc0a   :  { %9128 = vmatpush1.bf16.msra.mxu0 %v18955_v30  ;;  %v19464_v13 = vpop.permute.xlu0 %8393  ;;  %v19466_v1 = vpop.permute.xlu1 %8795  ;;  %v13665_v30 = vld [vmem:[%s22073_s2 + $0xc0] sm:$0xff] }
 0xc0b   :  { %9129 = vmatprep.subr.bf16.mxu0 %v19037_v48  ;;  %v8622_v48 = vsel %vm602_vm4, %v19314_v29, %v19384_v37 }
 0xc0c   :  { %8895 = vrot.lane.b32.xlu0 %v22188_v50, %s14560_s14  ;;  %8893 = vrot.lane.b32.xlu1 %v19294_v23, %s14560_s14 }
 0xc0e   :  { %9130 = vmatpush1.bf16.msra.mxu0 %v18999_v49  ;;  %v19480_v9 = vpop.permute.xlu0 %8485  ;;  %v19482_v38 = vpop.permute.xlu1 %8497  ;;  %v13667_v49 = vld [vmem:[%s22073_s2 + $0xd0] sm:$0xff] }
 0xc0f   :  { %9131 = vmatprep.subr.bf16.mxu0 %v8622_v48  ;;  %v8714_v48 = vsel %vm695_vm5, %v19322_v36, %v19394_v41 }
 0xc10   :  { %9062 = vperm.xlu0 %14262, %v13666_v62   ;;  %9057 = vperm.xlu1 %14263, %v13665_v30   ;;  %v8628_v62 = vsel %vm602_vm4, %v19344_v55, %v19438_v61  ;;  %v8713_v55 = vsel %vm695_vm5, %v19257_v25, %v19322_v36  ;;  %v8719_v25 = vsel %vm695_vm5, %v19304_v19, %v19350_v16 }
 0xc11   :  { %v8416_v19 = vsel %vm392_vm2, %v19410_v42, %v19464_v13 }
 0xc12   :  { %9132 = vmatpush1.bf16.msra.mxu0 %v8621_v53  ;;  %v8222_v33 = vpop.permute.xlu0 %8221  ;;  %v19496_v10 = vpop.permute.xlu1 %8887 }
 0xc13   :  { %9133 = vmatprep.subr.bf16.mxu0 %v8628_v62 }
 0xc14   :  { %9072 = vperm.xlu0 %14262, %v13668_v39   ;;  %9067 = vperm.xlu1 %14263, %v13667_v49   ;;  %v8237_v39 = vsel %vm206_vm0, %v19360_v11, %v8222_v33  ;;  %v8323_v11 = vsel %vm299_vm1, %v19298_v20, %v19396_v32 }
 0xc16   :  { %9134 = vmatpush1.bf16.msra.mxu0 %v8627_v44  ;;  %v8314_v29 = vpop.permute.xlu0 %8313  ;;  %v19504_v30 = vpop.permute.xlu1 %8223  ;;  %v8720_v44 = vsel %vm695_vm5, %v19350_v16, %v19456_v15  ;;  %v8805_v16 = vsel %vm788_vm6, %v19271_v56, %v19330_v18  ;;  %v19563_v56 = vld [vmem:[%s22072_s1 + $0x120] ss:$12 sps:$4 sm:$0xff]  }
 0xc17   :  { %9135 = vmatprep.subr.bf16.mxu0 %v8714_v48  ;;  %v8238_v53 = vsel %vm206_vm0, %v8222_v33, %v19504_v30  ;;  %v8806_v48 = vsel %vm788_vm6, %v19330_v18, %v19408_v35  ;;  %v8329_v20 = vsel %vm299_vm1, %v19328_v2, %v8314_v29  ;;  %v8415_v18 = vsel %vm392_vm2, %v19255_v7, %v19410_v42 }
 0xc18   :  { %9219 = vmatprep.subr.bf16.mxu1 %v8238_v53  ;;  %v8811_v2 = vsel %vm788_vm6, %v19312_v47, %v19358_v34  ;;  %v8897_v42 = vsel %vm881_vm7, %v19283_v4, %v19338_v31  ;;  %14390 = vrot.lane.b32.xlu0 %v22188_v50, %s14554_s24 }
 0xc19   :  { %9220 = vmatpush1.bf16.msra.mxu1 %v8237_v39  ;;  %14385 = vrot.lane.b32.xlu1 %v22188_v50, %s14553_s17 }
 0xc1a   :  { %9136 = vmatpush1.bf16.msra.mxu0 %v8713_v55  ;;  %v8406_v49 = vpop.permute.xlu0 %8405  ;;  %9221 = vmatprep.subr.bf16.mxu1 %v8324_v58  ;;  %v19519_v62 = vpop.permute.xlu1 %8599  ;;  %v8812_v55 = vsel %vm788_vm6, %v19358_v34, %v19466_v1  ;;  %v19577_v34 = vld [vmem:[%s22072_s1 + $0x13c] ss:$12 sps:$4 sm:$0xff]  }
 0xc1b   :  { %9137 = vmatprep.subr.bf16.mxu0 %v8720_v44  ;;  %v8898_v44 = vsel %vm881_vm7, %v19338_v31, %v19423_v3  ;;  %v8421_v47 = vsel %vm392_vm2, %v19373_v59, %v8406_v49  ;;  %v8507_v59 = vsel %vm485_vm3, %v19306_v14, %v19425_v27  ;;  %v8903_v31 = vsel %vm881_vm7, %v19320_v21, %v19371_v52 }
 0xc1c   :  { %14400 = vrot.lane.b32.xlu0 %v22188_v50, %s14556_s26 }
 0xc1d   :  { %9222 = vmatpush1.bf16.msra.mxu1 %v8323_v11  ;;  %v8508_v11 = vsel %vm485_vm3, %v19425_v27, %v19480_v9  ;;  %v8513_v27 = vsel %vm485_vm3, %v19336_v45, %v19482_v38  ;;  %14395 = vrot.lane.b32.xlu1 %v22188_v50, %s14555_s25 }
 0xc1e   :  { %9138 = vmatpush1.bf16.msra.mxu0 %v8719_v25  ;;  %v19530_v36 = vpop.permute.xlu0 %8499  ;;  %v19532_v33 = vpop.permute.xlu1 %8315 }
 0xc1f   :  { %9139 = vmatprep.subr.bf16.mxu0 %v8806_v48  ;;  %v8330_v53 = vsel %vm299_vm1, %v8314_v29, %v19532_v33  ;;  %v8514_v4 = vsel %vm485_vm3, %v19482_v38, %v19530_v36 }
 0xc20   :  { %9223 = vmatprep.subr.bf16.mxu1 %v8330_v53  ;;  %v8904_v53 = vsel %vm881_vm7, %v19371_v52, %v19496_v10 }
 0xc21   :  { %9224 = vmatpush1.bf16.msra.mxu1 %v8329_v20 }
 0xc22   :  { %9140 = vmatpush1.bf16.msra.mxu0 %v8805_v16  ;;  %v19547_v32 = vpop.permute.xlu0 %8601  ;;  %9225 = vmatprep.subr.bf16.mxu1 %v8416_v19  ;;  %v19549_v39 = vpop.permute.xlu1 %8691  ;;  %v19617_v19 = vld [vmem:[%s22072_s1 + $0x128] ss:$12 sps:$4 sm:$0xff]  }
 0xc23   :  { %9141 = vmatprep.subr.bf16.mxu0 %v8812_v55 }
 0xc25   :  { %9226 = vmatpush1.bf16.msra.mxu1 %v8415_v18 }
 0xc26   :  { %9142 = vmatpush1.bf16.msra.mxu0 %v8811_v2  ;;  %v19565_v29 = vpop.permute.xlu0 %8693  ;;  %v19567_v58 = vpop.permute.xlu1 %8407 }
 0xc27   :  { %9164 = vmatprep.subr.bf16.mxu0 %v8898_v44  ;;  %v8422_v7 = vsel %vm392_vm2, %v8406_v49, %v19567_v58  ;;  %v19604_v49 = vld [vmem:[%s22072_s1 + $0x138] ss:$12 sps:$4 sm:$0xff]  }
 0xc28   :  { %9227 = vmatprep.subr.bf16.mxu1 %v8422_v7 }
 0xc29   :  { %9144 = vmatmul.mubr.bf16.vlgmr.msra.gmra.mrb[72].mxu0 %v19563_v56  ;;  %9228 = vmatpush1.bf16.msra.mxu1 %v8421_v47 }
 0xc2a   :  { %9165 = vmatpush1.bf16.msra.mxu0 %v8897_v42  ;;  %v8214_v25 = vpop.permute.xlu0 %8213  ;;  %9229 = vmatprep.subr.bf16.mxu1 %v8508_v11  ;;  %v8614_v48 = vpop.permute.xlu1 %8613 }
 0xc2b   :  { %9166 = vmatprep.subr.bf16.mxu0 %v8904_v53  ;;  %9153 = vmatprep.mubr.bf16.mxu0 %v19577_v34 }
 0xc2d   :  { %9230 = vmatpush1.bf16.msra.mxu1 %v8507_v59 }
 0xc2e   :  { %9167 = vmatpush1.bf16.msra.mxu0 %v8903_v31  ;;  %v8306_v20 = vpop.permute.xlu0 %8305  ;;  %9231 = vmatprep.subr.bf16.mxu1 %v8514_v4  ;;  %v8706_v16 = vpop.permute.xlu1 %8705 }
 0xc31   :  { %9154 = vmatmul.mubr.bf16.gmra.mrb[76].mxu0 %v19604_v49  ;;  %9232 = vmatpush1.bf16.msra.mxu1 %v8513_v27 }
 0xc32   :  { %v8398_v52 = vpop.permute.xlu0 %8397  ;;  %9233 = vmatprep.subr.bf16.mxu1 %v19115_v12  ;;  %v8212_v21 = vpop.permute.xlu1 %8211  ;;  %9196 = vmatprep.mubr.bf16.mxu0 %v22188_v50 }
 0xc33   :  { %v8234_v14 = vsel %vm206_vm0, %v8212_v21, %v8214_v25  ;;  %v8233_v12 = vsel %vm206_vm0, %v19436_v51, %v8212_v21 }
 0xc34   :  { %9323 = vmatprep.subr.bf16.mxu0 %v8234_v14 }
 0xc35   :  { %9234 = vmatpush1.bf16.msra.mxu1 %v19075_v54  ;;  %v8624_v54 = vsel %vm602_vm4, %v19519_v62, %v19547_v32 }
 0xc36   :  { %v19619_v45 = vpop.permute.xlu0 %8615  ;;  %9235 = vmatprep.subr.bf16.mxu1 %v19159_v26  ;;  %v8304_v38 = vpop.permute.xlu1 %8303  ;;  %v8623_v26 = vsel %vm602_vm4, %v19384_v37, %v19519_v62  ;;  %v8629_v37 = vsel %vm602_vm4, %v19438_v61, %v8614_v48  ;;  %v8716_v62 = vsel %vm695_vm5, %v19549_v39, %v19565_v29  ;;  %v8715_v61 = vsel %vm695_vm5, %v19394_v41, %v19549_v39 }
 0xc37   :  { %v8630_v51 = vsel %vm602_vm4, %v8614_v48, %v19619_v45  ;;  %v8326_v25 = vsel %vm299_vm1, %v8304_v38, %v8306_v20  ;;  %v8721_v41 = vsel %vm695_vm5, %v19456_v15, %v8706_v16 }
 0xc39   :  { %13675 = vmatmul.mubr.msk.bf16.vlgmr.msra.gmra.mrb[72].mxu0 %vm1088_vm8, %v19617_v19  ;;  %9236 = vmatpush1.bf16.msra.mxu1 %v19119_v6  ;;  %v19641_v6 = vld [vmem:[%s22072_s1 + $0x140] ss:$12 sps:$4 sm:$0xff]  }
 0xc3a   :  { %9324 = vmatpush1.bf16.msra.mxu0 %v8233_v12  ;;  %v19630_v55 = vpop.permute.xlu0 %8707  ;;  %9237 = vmatprep.subr.bf16.mxu1 %v8624_v54  ;;  %v8396_v18 = vpop.permute.xlu1 %8395 }
 0xc3b   :  { %9206 = vmatprep.mubr.bf16.mxu0 %v22188_v50  ;;  %v8722_v48 = vsel %vm695_vm5, %v8706_v16, %v19630_v55  ;;  %v8418_v20 = vsel %vm392_vm2, %v8396_v18, %v8398_v52 }
 0xc3d   :  { %9238 = vmatpush1.bf16.msra.mxu1 %v8623_v26 }
 0xc3e   :  { %v8228_v2 = vpop.permute.xlu0 %8227  ;;  %9239 = vmatprep.subr.bf16.mxu1 %v8630_v51  ;;  %v8226_v44 = vpop.permute.xlu1 %8225 }
 0xc3f   :  { %v8240_v7 = vsel %vm206_vm0, %v8226_v44, %v8228_v2  ;;  %v8239_v47 = vsel %vm206_vm0, %v19504_v30, %v8226_v44  ;;  %v8325_v30 = vsel %vm299_vm1, %v19454_v0, %v8304_v38 }
 0xc40   :  { %9325 = vmatprep.subr.bf16.mxu0 %v8240_v7 }
 0xc41   :  { %13676 = vmatmul.mubr.msk.bf16.gmra.mrb[76].mxu0 %vm1088_vm8, %v19641_v6  ;;  %9240 = vmatpush1.bf16.msra.mxu1 %v8629_v37 }
 0xc42   :  { %9326 = vmatpush1.bf16.msra.mxu0 %v8239_v47  ;;  %v19653_v42 = vpop.permute.xlu0 %8785  ;;  %9241 = vmatprep.subr.bf16.mxu1 %v8716_v62  ;;  %v8784_v11 = vpop.permute.xlu1 %8783 }
 0xc43   :  { %9327 = vmatprep.subr.bf16.mxu0 %v8326_v25  ;;  %9355 = vmatprep.mubr.bf16.mxu0 %v19174_v24  ;;  %v8808_v0 = vsel %vm788_vm6, %v8784_v11, %v19653_v42  ;;  %v8807_v27 = vsel %vm788_vm6, %v19408_v35, %v8784_v11 }
 0xc45   :  { %9242 = vmatpush1.bf16.msra.mxu1 %v8715_v61 }
 0xc46   :  { %9328 = vmatpush1.bf16.msra.mxu0 %v8325_v30  ;;  %v8320_v53 = vpop.permute.xlu0 %8319  ;;  %9243 = vmatprep.subr.bf16.mxu1 %v8722_v48  ;;  %v8318_v59 = vpop.permute.xlu1 %8317 }
 0xc47   :  { %v8332_v31 = vsel %vm299_vm1, %v8318_v59, %v8320_v53  ;;  %v8331_v24 = vsel %vm299_vm1, %v19532_v33, %v8318_v59  ;;  %v8417_v33 = vsel %vm392_vm2, %v19464_v13, %v8396_v18 }
 0xc48   :  { %9329 = vmatprep.subr.bf16.mxu0 %v8332_v31 }
 0xc49   :  { %9244 = vmatpush1.bf16.msra.mxu1 %v8721_v41 }
 0xc4a   :  { %9330 = vmatpush1.bf16.msra.mxu0 %v8331_v24  ;;  %v19671_v39 = vpop.permute.xlu0 %8799  ;;  %9245 = vmatprep.subr.bf16.mxu1 %v8808_v0  ;;  %v8410_v4 = vpop.permute.xlu1 %8409 }
 0xc4b   :  { %9331 = vmatprep.subr.bf16.mxu0 %v8418_v20  ;;  %v8423_v35 = vsel %vm392_vm2, %v19567_v58, %v8410_v4 }
 0xc4d   :  { %9246 = vmatpush1.bf16.msra.mxu1 %v8807_v27 }
 0xc4e   :  { %9332 = vmatpush1.bf16.msra.mxu0 %v8417_v33  ;;  %v8412_v15 = vpop.permute.xlu0 %8411  ;;  %v8798_v16 = vpop.permute.xlu1 %8797 }
 0xc4f   :  { %v8814_v21 = vsel %vm788_vm6, %v8798_v16, %v19671_v39  ;;  %v8424_v14 = vsel %vm392_vm2, %v8410_v4, %v8412_v15  ;;  %v8813_v38 = vsel %vm788_vm6, %v19466_v1, %v8798_v16 }
 0xc50   :  { %9247 = vmatprep.subr.bf16.mxu1 %v8814_v21  ;;  %9333 = vmatprep.subr.bf16.mxu0 %v8424_v14 }
 0xc51   :  { %9248 = vmatpush1.bf16.msra.mxu1 %v8813_v38 }
 0xc52   :  { %9334 = vmatpush1.bf16.msra.mxu0 %v8423_v35  ;;  %v8490_v52 = vpop.permute.xlu0 %8489  ;;  %v8488_v13 = vpop.permute.xlu1 %8487 }
 0xc53   :  { %v8510_v12 = vsel %vm485_vm3, %v8488_v13, %v8490_v52  ;;  %v8509_v54 = vsel %vm485_vm3, %v19480_v9, %v8488_v13 }
 0xc54   :  { %9250 = vmatmul.mubr.bf16.vlgmr.msra.gmra.mrb[72].mxu1 %v19563_v56  ;;  %9335 = vmatprep.subr.bf16.mxu0 %v8510_v12 }
 0xc55   :  { %9259 = vmatprep.mubr.bf16.mxu1 %v19577_v34 }
 0xc56   :  { %9336 = vmatpush1.bf16.msra.mxu0 %v8509_v54  ;;  %v8504_v1 = vpop.permute.xlu0 %8503  ;;  %v8502_v18 = vpop.permute.xlu1 %8501 }
 0xc57   :  { %v8516_v26 = vsel %vm485_vm3, %v8502_v18, %v8504_v1  ;;  %v8515_v58 = vsel %vm485_vm3, %v19530_v36, %v8502_v18 }
 0xc58   :  { %9337 = vmatprep.subr.bf16.mxu0 %v8516_v26 }
 0xc5a   :  { %9338 = vmatpush1.bf16.msra.mxu0 %v8515_v58  ;;  %v8878_v51 = vpop.permute.xlu0 %8877  ;;  %v8876_v2 = vpop.permute.xlu1 %8875 }
 0xc5b   :  { %9339 = vmatprep.subr.bf16.mxu0 %v19224_v28  ;;  %v8900_v9 = vsel %vm881_vm7, %v8876_v2, %v8878_v51  ;;  %v8899_v44 = vsel %vm881_vm7, %v19423_v3, %v8876_v2 }
 0xc5c   :  { %9260 = vmatmul.mubr.bf16.gmra.mrb[76].mxu1 %v19604_v49  ;;  %9270 = vmatprep.subr.bf16.mxu1 %v8900_v9 }
 0xc5d   :  { %9271 = vmatpush1.bf16.msra.mxu1 %v8899_v44  ;;  %9302 = vmatprep.mubr.bf16.mxu1 %v22188_v50 }
 0xc5e   :  { %9340 = vmatpush1.bf16.msra.mxu0 %v19200_v43  ;;  %v8892_v36 = vpop.permute.xlu0 %8891  ;;  %v8890_v7 = vpop.permute.xlu1 %8889 }
 0xc5f   :  { %9341 = vmatprep.subr.bf16.mxu0 %v19294_v23  ;;  %v8906_v47 = vsel %vm881_vm7, %v8890_v7, %v8892_v36  ;;  %v8905_v28 = vsel %vm881_vm7, %v19496_v10, %v8890_v7 }
 0xc60   :  { %9272 = vmatprep.subr.bf16.mxu1 %v8906_v47 }
 0xc61   :  { %9273 = vmatpush1.bf16.msra.mxu1 %v8905_v28 }
 0xc62   :  { %9342 = vmatpush1.bf16.msra.mxu0 %v19268_v57  ;;  %v8606_v3 = vpop.permute.xlu0 %8605  ;;  %v8604_v37 = vpop.permute.xlu1 %8603 }
 0xc63   :  { %v8626_v62 = vsel %vm602_vm4, %v8604_v37, %v8606_v3  ;;  %v8625_v43 = vsel %vm602_vm4, %v19547_v32, %v8604_v37 }
 0xc64   :  { %13677 = vmatmul.mubr.msk.bf16.vlgmr.msra.gmra.mrb[72].mxu1 %vm1088_vm8, %v19617_v19  ;;  %9343 = vmatprep.subr.bf16.mxu0 %v8626_v62 }
 0xc65   :  { %9312 = vmatprep.mubr.bf16.mxu1 %v22188_v50 }
 0xc66   :  { %9344 = vmatpush1.bf16.msra.mxu0 %v8625_v43  ;;  %v8620_v23 = vpop.permute.xlu0 %8619  ;;  %v8618_v10 = vpop.permute.xlu1 %8617 }
 0xc67   :  { %v8632_v11 = vsel %vm602_vm4, %v8618_v10, %v8620_v23  ;;  %v8631_v57 = vsel %vm602_vm4, %v19619_v45, %v8618_v10 }
 0xc68   :  { %9345 = vmatprep.subr.bf16.mxu0 %v8632_v11 }
 0xc6a   :  { %9346 = vmatpush1.bf16.msra.mxu0 %v8631_v57  ;;  %v8698_v25 = vpop.permute.xlu0 %8697  ;;  %v8696_v61 = vpop.permute.xlu1 %8695 }
 0xc6b   :  { %v8718_v32 = vsel %vm695_vm5, %v8696_v61, %v8698_v25  ;;  %v8717_v30 = vsel %vm695_vm5, %v19565_v29, %v8696_v61 }
 0xc6c   :  { %13678 = vmatmul.mubr.msk.bf16.gmra.mrb[76].mxu1 %vm1088_vm8, %v19641_v6  ;;  %9347 = vmatprep.subr.bf16.mxu0 %v8718_v32 }
 0xc6e   :  { %9348 = vmatpush1.bf16.msra.mxu0 %v8717_v30  ;;  %v8712_v48 = vpop.permute.xlu0 %8711  ;;  %v8710_v53 = vpop.permute.xlu1 %8709 }
 0xc6f   :  { %v8724_v59 = vsel %vm695_vm5, %v8710_v53, %v8712_v48  ;;  %v8723_v45 = vsel %vm695_vm5, %v19630_v55, %v8710_v53 }
 0xc70   :  { %9349 = vmatprep.subr.bf16.mxu0 %v8724_v59 }
 0xc72   :  { %9350 = vmatpush1.bf16.msra.mxu0 %v8723_v45  ;;  %v8790_v31 = vpop.permute.xlu0 %8789  ;;  %v8788_v24 = vpop.permute.xlu1 %8787 }
 0xc73   :  { %v8810_v41 = vsel %vm788_vm6, %v8788_v24, %v8790_v31  ;;  %v8809_v29 = vsel %vm788_vm6, %v19653_v42, %v8788_v24 }
 0xc74   :  { %9351 = vmatprep.subr.bf16.mxu0 %v8810_v41 }
 0xc76   :  { %9352 = vmatpush1.bf16.msra.mxu0 %v8809_v29  ;;  %v8804_v0 = vpop.permute.xlu0 %8803  ;;  %v8802_v4 = vpop.permute.xlu1 %8801 }
 0xc77   :  { %v8816_v20 = vsel %vm788_vm6, %v8802_v4, %v8804_v0  ;;  %v8815_v27 = vsel %vm788_vm6, %v19671_v39, %v8802_v4 }
 0xc78   :  { %9353 = vmatprep.subr.bf16.mxu0 %v8816_v20 }
 0xc7a   :  { %9354 = vmatpush1.bf16.msra.mxu0 %v8815_v27  ;;  %v8882_v55 = vpop.permute.xlu0 %8881  ;;  %v8880_v33 = vpop.permute.xlu1 %8879 }
 0xc7b   :  { %v8902_v15 = vsel %vm881_vm7, %v8880_v33, %v8882_v55  ;;  %v8901_v16 = vsel %vm881_vm7, %v8878_v51, %v8880_v33 }
 0xc7c   :  { %9376 = vmatprep.subr.bf16.mxu0 %v8902_v15 }
 0xc7d   :  { %9356 = vmatmul.mubr.bf16.vlgmr.msra.gmra.mrb[80].mxu0 %v19563_v56 }
 0xc7e   :  { %9377 = vmatpush1.bf16.msra.mxu0 %v8901_v16  ;;  %v8896_v42 = vpop.permute.xlu0 %8895  ;;  %v8894_v21 = vpop.permute.xlu1 %8893  ;;  %9365 = vmatprep.mubr.bf16.mxu0 %v19577_v34 }
 0xc7f   :  { %v8908_v14 = vsel %vm881_vm7, %v8894_v21, %v8896_v42  ;;  %v8907_v39 = vsel %vm881_vm7, %v8892_v36, %v8894_v21 }
 0xc80   :  { %9378 = vmatprep.subr.bf16.mxu0 %v8908_v14 }
 0xc82   :  { %9379 = vmatpush1.bf16.msra.mxu0 %v8907_v39 }
 0xc85   :  { %9366 = vmatmul.mubr.bf16.gmra.mrb[84].mxu0 %v19604_v49 }
 0xc86   :  { %9408 = vmatprep.mubr.bf16.mxu0 %v22188_v50 }
 0xc8d   :  { %13679 = vmatmul.mubr.msk.bf16.vlgmr.msra.gmra.mrb[80].mxu0 %vm1088_vm8, %v19617_v19 }
 0xc8e   :  { %9418 = vmatprep.mubr.bf16.mxu0 %v22188_v50 }
 0xc8f   :  { %v19749_v56 = vpop.permute.xlu1 %9057  ;;  %v19752_v38 = vpop.permute.xlu0 %9062 }
 0xc93   :  { %v19759_v2 = vpop.permute.xlu1 %9067  ;;  %v19766_v3 = vpop.permute.xlu0 %9072 }
 0xc95   :  { %13680 = vmatmul.mubr.msk.bf16.gmra.mrb[84].mxu0 %vm1088_vm8, %v19641_v6 }
 0xd0c   :  { %v9198_v34 = vpop.f32.mrb[72].mxu0 }
 0xd0d   :  { %v13897_v49 = vadd.f32 %v9198_v34, %v19749_v56  ;;  %v9200_v19 = vpop.f32.mrb[73].mxu0 }
 0xd0e   :  { %v13898_v35 = vadd.f32 %v9200_v19, %v19749_v56  ;;  %v9202_v52 = vpop.f32.mrb[74].mxu0 }
 0xd0f   :  { %v9429_v13 = vmax.f32 %v13897_v49, 0.0  ;;  %v13899_v12 = vadd.f32 %v9202_v52, %v19752_v38  ;;  %v9204_v54 = vpop.f32.mrb[75].mxu0 }
 0xd10   :  { %v9430_v1 = vmax.f32 %v13898_v35, 0.0  ;;  %v13900_v18 = vadd.f32 %v9204_v54, %v19752_v38 }
 0xd11   :  { %v9435_v26 = vmax.f32 %v13899_v12, 0.0  ;;  %v9453_v58 = vmul.f32 %v9429_v13, %v15186_v60 }
 0xd12   :  { %v9436_v6 = vmax.f32 %v13900_v18, 0.0  ;;  %v9454_v9 = vmul.f32 %v9430_v1, %v15190_v5 }
 0xd13   :  { %v9459_v51 = vmul.f32 %v9435_v26, %v15186_v60 }
 0xd14   :  { %v9460_v44 = vmul.f32 %v9436_v6, %v15190_v5  ;;  %v9208_v36 = vpop.f32.mrb[76].mxu0 }
 0xd15   :  { %v19763_v7 = vpack.c.bf16 %v9459_v51, %v9453_v58  ;;  %v13901_v47 = vadd.f32 %v9208_v36, %v19759_v2  ;;  %v9210_v28 = vpop.f32.mrb[77].mxu0 }
 0xd16   :  { %v19768_v37 = vpack.c.bf16 %v9460_v44, %v9454_v9  ;;  %v13902_v62 = vadd.f32 %v9210_v28, %v19759_v2  ;;  %v9212_v43 = vpop.f32.mrb[78].mxu0 }
 0xd17   :  { %v9441_v23 = vmax.f32 %v13901_v47, 0.0  ;;  %v13903_v10 = vadd.f32 %v9212_v43, %v19766_v3  ;;  %v9214_v11 = vpop.f32.mrb[79].mxu0  ;;  %9623 = vrot.lane.b32.xlu0 %v19763_v7, %s14554_s24  ;;  %9531 = vrot.lane.b32.xlu1 %v19763_v7, %s14553_s17 }
 0xd18   :  { %v9442_v57 = vmax.f32 %v13902_v62, 0.0  ;;  %v13904_v25 = vadd.f32 %v9214_v11, %v19766_v3 }
 0xd19   :  { %v9447_v61 = vmax.f32 %v13903_v10, 0.0  ;;  %v9465_v30 = vmul.f32 %v9441_v23, %v15186_v60 }
 0xd1a   :  { %v9448_v32 = vmax.f32 %v13904_v25, 0.0  ;;  %v9466_v53 = vmul.f32 %v9442_v57, %v15190_v5 }
 0xd1b   :  { %v9471_v48 = vmul.f32 %v9447_v61, %v15186_v60  ;;  %9807 = vrot.lane.b32.xlu0 %v19763_v7, %s14556_s26  ;;  %9715 = vrot.lane.b32.xlu1 %v19763_v7, %s14555_s25 }
 0xd1c   :  { %v9472_v59 = vmul.f32 %v9448_v32, %v15190_v5 }
 0xd1d   :  { %v19785_v45 = vpack.c.bf16 %v9471_v48, %v9465_v30 }
 0xd1e   :  { %v19787_v31 = vpack.c.bf16 %v9472_v59, %v9466_v53 }
 0xd1f   :  { %9533 = vrot.lane.b32.xlu0 %v19768_v37, %s14553_s17  ;;  %9921 = vrot.lane.b32.xlu1 %v19763_v7, %s14557_s29 }
 0xd23   :  { %9717 = vrot.lane.b32.xlu0 %v19768_v37, %s14555_s25  ;;  %10013 = vrot.lane.b32.xlu1 %v19763_v7, %s14558_s10 }
 0xd27   :  { %9545 = vrot.lane.b32.xlu0 %v19785_v45, %s14553_s17  ;;  %10105 = vrot.lane.b32.xlu1 %v19763_v7, %s14559_s11 }
 0xd2b   :  { %9729 = vrot.lane.b32.xlu0 %v19785_v45, %s14555_s25  ;;  %10197 = vrot.lane.b32.xlu1 %v19763_v7, %s14560_s14 }
 0xd2f   :  { %9935 = vrot.lane.b32.xlu0 %v19785_v45, %s14557_s29  ;;  %9625 = vrot.lane.b32.xlu1 %v19768_v37, %s14554_s24 }
 0xd33   :  { %10027 = vrot.lane.b32.xlu0 %v19785_v45, %s14558_s10  ;;  %9809 = vrot.lane.b32.xlu1 %v19768_v37, %s14556_s26 }
 0xd37   :  { %10119 = vrot.lane.b32.xlu0 %v19785_v45, %s14559_s11  ;;  %9923 = vrot.lane.b32.xlu1 %v19768_v37, %s14557_s29  ;;  %v9304_v24 = vpop.f32.mrb[72].mxu1 }
 0xd38   :  { %v13905_v41 = vadd.f32 %v9304_v24, %v19749_v56  ;;  %v9306_v29 = vpop.f32.mrb[73].mxu1 }
 0xd39   :  { %v13906_v0 = vadd.f32 %v9306_v29, %v19749_v56  ;;  %v9308_v4 = vpop.f32.mrb[74].mxu1 }
 0xd3a   :  { %v9431_v20 = vmax.f32 %v13905_v41, 0.0  ;;  %v13907_v27 = vadd.f32 %v9308_v4, %v19752_v38  ;;  %v9310_v55 = vpop.f32.mrb[75].mxu1 }
 0xd3b   :  { %v9432_v33 = vmax.f32 %v13906_v0, 0.0  ;;  %v13908_v15 = vadd.f32 %v9310_v55, %v19752_v38  ;;  %10211 = vrot.lane.b32.xlu0 %v19785_v45, %s14560_s14  ;;  %10015 = vrot.lane.b32.xlu1 %v19768_v37, %s14558_s10 }
 0xd3c   :  { %v9437_v16 = vmax.f32 %v13907_v27, 0.0  ;;  %v9455_v21 = vmul.f32 %v9431_v20, %v15232_v17 }
 0xd3d   :  { %v9438_v42 = vmax.f32 %v13908_v15, 0.0  ;;  %v9456_v39 = vmul.f32 %v9432_v33, %v15236_v22 }
 0xd3e   :  { %v9461_v14 = vmul.f32 %v9437_v16, %v15232_v17 }
 0xd3f   :  { %v9462_v34 = vmul.f32 %v9438_v42, %v15236_v22  ;;  %9639 = vrot.lane.b32.xlu0 %v19787_v31, %s14554_s24  ;;  %10107 = vrot.lane.b32.xlu1 %v19768_v37, %s14559_s11  ;;  %v9314_v49 = vpop.f32.mrb[76].mxu1 }
 0xd40   :  { %v19833_v19 = vpack.c.bf16 %v9461_v14, %v9455_v21  ;;  %v13909_v35 = vadd.f32 %v9314_v49, %v19759_v2  ;;  %v9316_v52 = vpop.f32.mrb[77].mxu1 }
 0xd41   :  { %v19836_v13 = vpack.c.bf16 %v9462_v34, %v9456_v39  ;;  %v13910_v12 = vadd.f32 %v9316_v52, %v19759_v2  ;;  %v9318_v54 = vpop.f32.mrb[78].mxu1 }
 0xd42   :  { %v9443_v1 = vmax.f32 %v13909_v35, 0.0  ;;  %v13911_v18 = vadd.f32 %v9318_v54, %v19766_v3  ;;  %v9320_v26 = vpop.f32.mrb[79].mxu1 }
 0xd43   :  { %v9444_v6 = vmax.f32 %v13910_v12, 0.0  ;;  %v13912_v58 = vadd.f32 %v9320_v26, %v19766_v3  ;;  %9823 = vrot.lane.b32.xlu0 %v19787_v31, %s14556_s26  ;;  %10199 = vrot.lane.b32.xlu1 %v19768_v37, %s14560_s14  ;;  %v19940_v26 = vld [vmem:[%s22072_s1 + $0x154] ss:$12 sps:$4 sm:$0xff]  }
 0xd44   :  { %v9449_v51 = vmax.f32 %v13911_v18, 0.0  ;;  %v9467_v44 = vmul.f32 %v9443_v1, %v15232_v17  ;;  %v19935_v18 = vpop.permute.xlu1 %14385  ;;  %10471 = vmatprep.mubr.bf16.mxu1 %v19940_v26  ;;  %10577 = vmatprep.mubr.bf16.mxu0 %v19940_v26 }
 0xd45   :  { %v9450_v9 = vmax.f32 %v13912_v58, 0.0  ;;  %v9468_v47 = vmul.f32 %v9444_v6, %v15236_v22 }
 0xd46   :  { %v9473_v36 = vmul.f32 %v9449_v51, %v15232_v17 }
 0xd47   :  { %v9474_v28 = vmul.f32 %v9450_v9, %v15236_v22  ;;  %9937 = vrot.lane.b32.xlu0 %v19787_v31, %s14557_s29  ;;  %9637 = vrot.lane.b32.xlu1 %v19785_v45, %s14554_s24 }
 0xd48   :  { %v19853_v62 = vpack.c.bf16 %v9473_v36, %v9467_v44  ;;  %v19954_v58 = vpop.permute.xlu1 %14395 }
 0xd49   :  { %v19855_v43 = vpack.c.bf16 %v9474_v28, %v9468_v47 }
 0xd4b   :  { %10029 = vrot.lane.b32.xlu0 %v19787_v31, %s14558_s10  ;;  %9821 = vrot.lane.b32.xlu1 %v19785_v45, %s14556_s26 }
 0xd4f   :  { %10121 = vrot.lane.b32.xlu0 %v19787_v31, %s14559_s11  ;;  %9547 = vrot.lane.b32.xlu1 %v19787_v31, %s14553_s17 }
 0xd53   :  { %10213 = vrot.lane.b32.xlu0 %v19787_v31, %s14560_s14  ;;  %9731 = vrot.lane.b32.xlu1 %v19787_v31, %s14555_s25 }
 0xd57   :  { %9925 = vrot.lane.b32.xlu0 %v19833_v19, %s14557_s29  ;;  %9535 = vrot.lane.b32.xlu1 %v19833_v19, %s14553_s17 }
 0xd5b   :  { %10017 = vrot.lane.b32.xlu0 %v19833_v19, %s14558_s10  ;;  %9627 = vrot.lane.b32.xlu1 %v19833_v19, %s14554_s24 }
 0xd5f   :  { %10109 = vrot.lane.b32.xlu0 %v19833_v19, %s14559_s11  ;;  %9719 = vrot.lane.b32.xlu1 %v19833_v19, %s14555_s25 }
 0xd60   :  { %v9410_v23 = vpop.f32.mrb[80].mxu0 }
 0xd61   :  { %v13913_v10 = vadd.f32 %v9410_v23, %v19749_v56  ;;  %v9412_v11 = vpop.f32.mrb[81].mxu0  ;;  %v14387_v23 = vunpack.i.l.bf16 %v19935_v18 }
 0xd62   :  { %v13914_v57 = vadd.f32 %v9412_v11, %v19749_v56  ;;  %v9414_v25 = vpop.f32.mrb[82].mxu0 }
 0xd63   :  { %v9433_v61 = vmax.f32 %v13913_v10, 0.0  ;;  %v13915_v32 = vadd.f32 %v9414_v25, %v19752_v38  ;;  %v9416_v30 = vpop.f32.mrb[83].mxu0  ;;  %10201 = vrot.lane.b32.xlu0 %v19833_v19, %s14560_s14  ;;  %9811 = vrot.lane.b32.xlu1 %v19833_v19, %s14556_s26 }
 0xd64   :  { %v9434_v48 = vmax.f32 %v13914_v57, 0.0  ;;  %v13916_v53 = vadd.f32 %v9416_v30, %v19752_v38 }
 0xd65   :  { %v9439_v59 = vmax.f32 %v13915_v32, 0.0  ;;  %v9457_v41 = vmul.f32 %v9433_v61, %v15296_v40 }
 0xd66   :  { %v9440_v24 = vmax.f32 %v13916_v53, 0.0  ;;  %v9458_v29 = vmul.f32 %v9434_v48, %v15304_v63 }
 0xd67   :  { %v9463_v56 = vmul.f32 %v9439_v59, %v15296_v40  ;;  %9537 = vrot.lane.b32.xlu0 %v19836_v13, %s14553_s17  ;;  %9939 = vrot.lane.b32.xlu1 %v19853_v62, %s14557_s29 }
 0xd68   :  { %v9464_v0 = vmul.f32 %v9440_v24, %v15304_v63  ;;  %v9420_v4 = vpop.f32.mrb[84].mxu0 }
 0xd69   :  { %v19897_v20 = vpack.c.bf16 %v9463_v56, %v9457_v41  ;;  %v13917_v38 = vadd.f32 %v9420_v4, %v19759_v2  ;;  %v9422_v27 = vpop.f32.mrb[85].mxu0 }
 0xd6a   :  { %v19900_v55 = vpack.c.bf16 %v9464_v0, %v9458_v29  ;;  %v13918_v33 = vadd.f32 %v9422_v27, %v19759_v2  ;;  %v9424_v15 = vpop.f32.mrb[86].mxu0 }
 0xd6b   :  { %v9445_v16 = vmax.f32 %v13917_v38, 0.0  ;;  %v13919_v42 = vadd.f32 %v9424_v15, %v19766_v3  ;;  %v9426_v21 = vpop.f32.mrb[87].mxu0  ;;  %9629 = vrot.lane.b32.xlu0 %v19836_v13, %s14554_s24  ;;  %10031 = vrot.lane.b32.xlu1 %v19853_v62, %s14558_s10 }
 0xd6c   :  { %v9446_v14 = vmax.f32 %v13918_v33, 0.0  ;;  %v13920_v39 = vadd.f32 %v9426_v21, %v19766_v3  ;;  %v19933_v3 = vpop.permute.xlu0 %14390 }
 0xd6d   :  { %v9451_v34 = vmax.f32 %v13919_v42, 0.0  ;;  %v9469_v35 = vmul.f32 %v9445_v16, %v15296_v40 }
 0xd6e   :  { %v9452_v49 = vmax.f32 %v13920_v39, 0.0  ;;  %v9470_v52 = vmul.f32 %v9446_v14, %v15304_v63 }
 0xd6f   :  { %v9475_v2 = vmul.f32 %v9451_v34, %v15296_v40  ;;  %9721 = vrot.lane.b32.xlu0 %v19836_v13, %s14555_s25  ;;  %10123 = vrot.lane.b32.xlu1 %v19853_v62, %s14559_s11 }
 0xd70   :  { %v9476_v12 = vmul.f32 %v9452_v49, %v15304_v63  ;;  %v19952_v6 = vpop.permute.xlu0 %14400  ;;  %v14388_v49 = vunpack.i.h.bf16 %v19935_v18 }
 0xd71   :  { %v19917_v54 = vpack.c.bf16 %v9475_v2, %v9469_v35  ;;  %v14392_v2 = vunpack.i.l.bf16 %v19933_v3 }
 0xd72   :  { %v19919_v1 = vpack.c.bf16 %v9476_v12, %v9470_v52 }
 0xd73   :  { %9813 = vrot.lane.b32.xlu0 %v19836_v13, %s14556_s26  ;;  %9825 = vrot.lane.b32.xlu1 %v19853_v62, %s14556_s26 }
 0xd77   :  { %9549 = vrot.lane.b32.xlu0 %v19853_v62, %s14553_s17  ;;  %10215 = vrot.lane.b32.xlu1 %v19853_v62, %s14560_s14 }
 0xd7b   :  { %9641 = vrot.lane.b32.xlu0 %v19853_v62, %s14554_s24  ;;  %9551 = vrot.lane.b32.xlu1 %v19855_v43, %s14553_s17 }
 0xd7f   :  { %9733 = vrot.lane.b32.xlu0 %v19853_v62, %s14555_s25  ;;  %9927 = vrot.lane.b32.xlu1 %v19836_v13, %s14557_s29 }
 0xd83   :  { %9827 = vrot.lane.b32.xlu0 %v19855_v43, %s14556_s26  ;;  %9643 = vrot.lane.b32.xlu1 %v19855_v43, %s14554_s24 }
 0xd87   :  { %9929 = vrot.lane.b32.xlu0 %v19897_v20, %s14557_s29  ;;  %10019 = vrot.lane.b32.xlu1 %v19836_v13, %s14558_s10 }
 0xd89   :  { %v19960_v51 = vpop.permute.xlu0 %9623  ;;  %v9532_v9 = vpop.permute.xlu1 %9531 }
 0xd8a   :  { %v9557_v11 = vsel %vm206_vm0, %v14387_v23, %v9532_v9  ;;  %v9649_v23 = vsel %vm299_vm1, %v14392_v2, %v19960_v51 }
 0xd8b   :  { %10021 = vrot.lane.b32.xlu0 %v19897_v20, %s14558_s10  ;;  %9735 = vrot.lane.b32.xlu1 %v19855_v43, %s14555_s25 }
 0xd8d   :  { %v19966_v44 = vpop.permute.xlu0 %9807  ;;  %v19968_v36 = vpop.permute.xlu1 %9715 }
 0xd8f   :  { %9541 = vrot.lane.b32.xlu0 %v19900_v55, %s14553_s17  ;;  %9941 = vrot.lane.b32.xlu1 %v19855_v43, %s14557_s29 }
 0xd91   :  { %v19974_v47 = vpop.permute.xlu0 %9533  ;;  %v19976_v28 = vpop.permute.xlu1 %9921 }
 0xd92   :  { %v9558_v10 = vsel %vm206_vm0, %v9532_v9, %v19974_v47 }
 0xd93   :  { %9633 = vrot.lane.b32.xlu0 %v19900_v55, %s14554_s24  ;;  %10033 = vrot.lane.b32.xlu1 %v19855_v43, %s14558_s10 }
 0xd94   :  { %10439 = vmatprep.subr.bf16.mxu1 %v9558_v10 }
 0xd95   :  { %10440 = vmatpush1.bf16.msra.mxu1 %v9557_v11  ;;  %v19986_v57 = vpop.permute.xlu0 %9717  ;;  %v19988_v25 = vpop.permute.xlu1 %10013 }
 0xd96   :  { %v9742_v2 = vsel %vm392_vm2, %v19968_v36, %v19986_v57 }
 0xd97   :  { %9725 = vrot.lane.b32.xlu0 %v19900_v55, %s14555_s25  ;;  %9539 = vrot.lane.b32.xlu1 %v19897_v20, %s14553_s17 }
 0xd99   :  { %v9546_v61 = vpop.permute.xlu0 %9545  ;;  %v19994_v32 = vpop.permute.xlu1 %10105 }
 0xd9a   :  { %v9563_v52 = vsel %vm206_vm0, %v14388_v49, %v9546_v61  ;;  %v14393_v49 = vunpack.i.h.bf16 %v19933_v3  ;;  %v14397_v3 = vunpack.i.l.bf16 %v19954_v58 }
 0xd9b   :  { %9943 = vrot.lane.b32.xlu0 %v19917_v54, %s14557_s29  ;;  %9631 = vrot.lane.b32.xlu1 %v19897_v20, %s14554_s24 }
 0xd9d   :  { %v20000_v30 = vpop.permute.xlu0 %9729  ;;  %v20002_v48 = vpop.permute.xlu1 %10197 }
 0xd9f   :  { %10035 = vrot.lane.b32.xlu0 %v19917_v54, %s14558_s10  ;;  %9723 = vrot.lane.b32.xlu1 %v19897_v20, %s14555_s25 }
 0xda1   :  { %v20008_v53 = vpop.permute.xlu0 %9935  ;;  %v20010_v59 = vpop.permute.xlu1 %9625 }
 0xda2   :  { %v9650_v18 = vsel %vm299_vm1, %v19960_v51, %v20010_v59 }
 0xda3   :  { %9555 = vrot.lane.b32.xlu0 %v19919_v1, %s14553_s17  ;;  %9553 = vrot.lane.b32.xlu1 %v19917_v54, %s14553_s17 }
 0xda5   :  { %v20016_v24 = vpop.permute.xlu0 %10027  ;;  %v20018_v41 = vpop.permute.xlu1 %9809 }
 0xda7   :  { %10113 = vrot.lane.b32.xlu0 %v19897_v20, %s14559_s11  ;;  %10111 = vrot.lane.b32.xlu1 %v19836_v13, %s14559_s11 }
 0xda9   :  { %v20024_v56 = vpop.permute.xlu0 %10119  ;;  %v20026_v29 = vpop.permute.xlu1 %9923 }
 0xdab   :  { %9647 = vrot.lane.b32.xlu0 %v19919_v1, %s14554_s24  ;;  %9645 = vrot.lane.b32.xlu1 %v19917_v54, %s14554_s24 }
 0xdad   :  { %v20032_v0 = vpop.permute.xlu0 %10211  ;;  %v20034_v4 = vpop.permute.xlu1 %10015 }
 0xdaf   :  { %10127 = vrot.lane.b32.xlu0 %v19917_v54, %s14559_s11  ;;  %9737 = vrot.lane.b32.xlu1 %v19917_v54, %s14555_s25 }
 0xdb1   :  { %v20040_v38 = vpop.permute.xlu0 %9639  ;;  %v20042_v27 = vpop.permute.xlu1 %10107 }
 0xdb3   :  { %9739 = vrot.lane.b32.xlu0 %v19919_v1, %s14555_s25  ;;  %10125 = vrot.lane.b32.xlu1 %v19855_v43, %s14559_s11 }
 0xdb5   :  { %v20048_v33 = vpop.permute.xlu0 %9823  ;;  %v20050_v15 = vpop.permute.xlu1 %10199 }
 0xdb7   :  { %9817 = vrot.lane.b32.xlu0 %v19900_v55, %s14556_s26  ;;  %9815 = vrot.lane.b32.xlu1 %v19897_v20, %s14556_s26 }
 0xdb9   :  { %v20056_v16 = vpop.permute.xlu0 %9937  ;;  %v9638_v42 = vpop.permute.xlu1 %9637 }
 0xdba   :  { %v9656_v11 = vsel %vm299_vm1, %v9638_v42, %v20040_v38 }
 0xdbb   :  { %9831 = vrot.lane.b32.xlu0 %v19919_v1, %s14556_s26  ;;  %9829 = vrot.lane.b32.xlu1 %v19917_v54, %s14556_s26 }
 0xdbd   :  { %v20062_v21 = vpop.permute.xlu0 %10029  ;;  %v20064_v14 = vpop.permute.xlu1 %9821 }
 0xdbf   :  { %10205 = vrot.lane.b32.xlu0 %v19897_v20, %s14560_s14  ;;  %10203 = vrot.lane.b32.xlu1 %v19836_v13, %s14560_s14 }
 0xdc1   :  { %v20070_v39 = vpop.permute.xlu0 %10121  ;;  %v20072_v34 = vpop.permute.xlu1 %9547 }
 0xdc2   :  { %v9564_v35 = vsel %vm206_vm0, %v9546_v61, %v20072_v34 }
 0xdc3   :  { %10219 = vrot.lane.b32.xlu0 %v19917_v54, %s14560_s14  ;;  %10217 = vrot.lane.b32.xlu1 %v19855_v43, %s14560_s14 }
 0xdc4   :  { %10441 = vmatprep.subr.bf16.mxu1 %v9564_v35  ;;  %v9655_v35 = vsel %vm299_vm1, %v14393_v49, %v9638_v42  ;;  %v9741_v42 = vsel %vm392_vm2, %v14397_v3, %v19968_v36  ;;  %v14398_v49 = vunpack.i.h.bf16 %v19954_v58  ;;  %v14402_v36 = vunpack.i.l.bf16 %v19952_v6 }
 0xdc5   :  { %10442 = vmatpush1.bf16.msra.mxu1 %v9563_v52  ;;  %v20083_v12 = vpop.permute.xlu0 %10213  ;;  %v20088_v9 = vpop.permute.xlu1 %9731  ;;  %v9834_v3 = vsel %vm485_vm3, %v19966_v44, %v20018_v41 }
 0xdc6   :  { %10443 = vmatprep.subr.bf16.mxu1 %v9650_v18 }
 0xdc7   :  { %9933 = vrot.lane.b32.xlu0 %v22188_v50, %s14557_s29  ;;  %9931 = vrot.lane.b32.xlu1 %v19900_v55, %s14557_s29 }
 0xdc9   :  { %10444 = vmatpush1.bf16.msra.mxu1 %v9649_v23  ;;  %v20096_v10 = vpop.permute.xlu0 %9925  ;;  %v9536_v61 = vpop.permute.xlu1 %9535  ;;  %v9748_v23 = vsel %vm392_vm2, %v20000_v30, %v20088_v9 }
 0xdca   :  { %10445 = vmatprep.subr.bf16.mxu1 %v9656_v11 }
 0xdcb   :  { %9947 = vrot.lane.b32.xlu0 %v22188_v50, %s14557_s29  ;;  %9945 = vrot.lane.b32.xlu1 %v19919_v1, %s14557_s29 }
 0xdcd   :  { %10446 = vmatpush1.bf16.msra.mxu1 %v9655_v35  ;;  %v20106_v51 = vpop.permute.xlu0 %10017  ;;  %v20111_v52 = vpop.permute.xlu1 %9627  ;;  %v9747_v35 = vsel %vm392_vm2, %v14398_v49, %v20000_v30 }
 0xdce   :  { %10447 = vmatprep.subr.bf16.mxu1 %v9742_v2 }
 0xdcf   :  { %10025 = vrot.lane.b32.xlu0 %v22188_v50, %s14558_s10  ;;  %10023 = vrot.lane.b32.xlu1 %v19900_v55, %s14558_s10 }
 0xdd1   :  { %10448 = vmatpush1.bf16.msra.mxu1 %v9741_v42  ;;  %v20120_v18 = vpop.permute.xlu0 %10109  ;;  %v20125_v11 = vpop.permute.xlu1 %9719  ;;  %v9833_v42 = vsel %vm485_vm3, %v14402_v36, %v19966_v44  ;;  %v9559_v36 = vsel %vm206_vm0, %v19974_v47, %v9536_v61 }
 0xdd2   :  { %10449 = vmatprep.subr.bf16.mxu1 %v9748_v23  ;;  %v9840_v23 = vsel %vm485_vm3, %v20064_v14, %v20048_v33 }
 0xdd3   :  { %10039 = vrot.lane.b32.xlu0 %v22188_v50, %s14558_s10  ;;  %10037 = vrot.lane.b32.xlu1 %v19919_v1, %s14558_s10 }
 0xdd5   :  { %10450 = vmatpush1.bf16.msra.mxu1 %v9747_v35  ;;  %v20135_v2 = vpop.permute.xlu0 %10201  ;;  %v20140_v58 = vpop.permute.xlu1 %9811  ;;  %v14403_v35 = vunpack.i.h.bf16 %v19952_v6 }
 0xdd6   :  { %10451 = vmatprep.subr.bf16.mxu1 %v9834_v3 }
 0xdd7   :  { %10117 = vrot.lane.b32.xlu0 %v22188_v50, %s14559_s11  ;;  %10115 = vrot.lane.b32.xlu1 %v19900_v55, %s14559_s11  ;;  %v9839_v44 = vsel %vm485_vm3, %v14403_v35, %v20064_v14  ;;  %v9949_v35 = vsel %vm602_vm4, %v19976_v28, %v20026_v29  ;;  %v9955_v28 = vsel %vm602_vm4, %v20008_v53, %v20056_v16 }
 0xdd8   :  { %v10041_v53 = vsel %vm695_vm5, %v19988_v25, %v20034_v4  ;;  %v10047_v25 = vsel %vm695_vm5, %v20016_v24, %v20062_v21  ;;  %v10133_v24 = vsel %vm788_vm6, %v19994_v32, %v20042_v27  ;;  %v9743_v32 = vsel %vm392_vm2, %v19986_v57, %v20125_v11 }
 0xdd9   :  { %10452 = vmatpush1.bf16.msra.mxu1 %v9833_v42  ;;  %v20148_v30 = vpop.permute.xlu0 %9537  ;;  %v20153_v49 = vpop.permute.xlu1 %9939 }
 0xdda   :  { %10453 = vmatprep.subr.bf16.mxu1 %v9840_v23  ;;  %v9560_v3 = vsel %vm206_vm0, %v9536_v61, %v20148_v30 }
 0xddb   :  { %10131 = vrot.lane.b32.xlu0 %v22188_v50, %s14559_s11  ;;  %10129 = vrot.lane.b32.xlu1 %v19919_v1, %s14559_s11 }
 0xddc   :  { %10545 = vmatprep.subr.bf16.mxu0 %v9560_v3  ;;  %v13692_v3 = vld [vmem:[%s22073_s2 + $0xf8] sm:$0xff] }
 0xddd   :  { %10454 = vmatpush1.bf16.msra.mxu1 %v9839_v44  ;;  %10546 = vmatpush1.bf16.msra.mxu0 %v9559_v36  ;;  %v20166_v6 = vpop.permute.xlu0 %9629  ;;  %v20168_v42 = vpop.permute.xlu1 %10031  ;;  %v9956_v36 = vsel %vm602_vm4, %v20056_v16, %v20153_v49 }
 0xdde   :  { %10455 = vmatprep.subr.bf16.mxu1 %v19768_v37  ;;  %v13690_v37 = vld [vmem:[%s22073_s2 + $0xe8] sm:$0xff]  ;;  %v9652_v16 = vsel %vm299_vm1, %v20111_v52, %v20166_v6 }
 0xddf   :  { %10209 = vrot.lane.b32.xlu0 %v22188_v50, %s14560_s14  ;;  %10207 = vrot.lane.b32.xlu1 %v19900_v55, %s14560_s14 }
 0xde1   :  { %10456 = vmatpush1.bf16.msra.mxu1 %v19763_v7  ;;  %v20176_v14 = vpop.permute.xlu0 %9721  ;;  %v20178_v23 = vpop.permute.xlu1 %10123  ;;  %v13689_v7 = vld [vmem:[%s22073_s2 + $0xe0] sm:$0xff] }
 0xde2   :  { %10457 = vmatprep.subr.bf16.mxu1 %v19787_v31  ;;  %v9950_v31 = vsel %vm602_vm4, %v20026_v29, %v20096_v10 }
 0xde3   :  { %10223 = vrot.lane.b32.xlu0 %v22188_v50, %s14560_s14  ;;  %10221 = vrot.lane.b32.xlu1 %v19919_v1, %s14560_s14 }
 0xde5   :  { %10458 = vmatpush1.bf16.msra.mxu1 %v19785_v45  ;;  %v20192_v47 = vpop.permute.xlu0 %9813  ;;  %v20197_v61 = vpop.permute.xlu1 %9825  ;;  %v13691_v45 = vld [vmem:[%s22073_s2 + $0xf0] sm:$0xff] }
 0xde6   :  { %10459 = vmatprep.subr.bf16.mxu1 %v9950_v31 }
 0xde7   :  { %10390 = vperm.xlu0 %14262, %v13690_v37   ;;  %10385 = vperm.xlu1 %14263, %v13689_v7   ;;  %v10042_v7 = vsel %vm695_vm5, %v20034_v4, %v20106_v51 }
 0xde9   :  { %10460 = vmatpush1.bf16.msra.mxu1 %v9949_v35  ;;  %v9550_v44 = vpop.permute.xlu0 %9549  ;;  %v20211_v37 = vpop.permute.xlu1 %10215 }
 0xdea   :  { %10461 = vmatprep.subr.bf16.mxu1 %v9956_v36  ;;  %v10048_v36 = vsel %vm695_vm5, %v20062_v21, %v20168_v42  ;;  %v9744_v21 = vsel %vm392_vm2, %v20125_v11, %v20176_v14  ;;  %v10225_v11 = vsel %vm881_vm7, %v20002_v48, %v20050_v15  ;;  %v9835_v48 = vsel %vm485_vm3, %v20018_v41, %v20140_v58 }
 0xdeb   :  { %10400 = vperm.xlu0 %14262, %v13692_v3   ;;  %10395 = vperm.xlu1 %14263, %v13691_v45   ;;  %v9565_v3 = vsel %vm206_vm0, %v20072_v34, %v9550_v44  ;;  %v9651_v34 = vsel %vm299_vm1, %v20010_v59, %v20111_v52  ;;  %v9841_v41 = vsel %vm485_vm3, %v20048_v33, %v20197_v61 }
 0xded   :  { %10462 = vmatpush1.bf16.msra.mxu1 %v9955_v28  ;;  %v9642_v29 = vpop.permute.xlu0 %9641  ;;  %v20219_v31 = vpop.permute.xlu1 %9551 }
 0xdee   :  { %10463 = vmatprep.subr.bf16.mxu1 %v10042_v7  ;;  %v9566_v35 = vsel %vm206_vm0, %v9550_v44, %v20219_v31  ;;  %v10134_v44 = vsel %vm788_vm6, %v20042_v27, %v20120_v18  ;;  %v9657_v59 = vsel %vm299_vm1, %v20040_v38, %v9642_v29  ;;  %v10139_v38 = vsel %vm788_vm6, %v20024_v56, %v20070_v39  ;;  %v20275_v27 = vld [vmem:[%s22072_s1 + $0x150] ss:$12 sps:$4 sm:$0xff]   ;;  %v20289_v56 = vld [vmem:[%s22072_s1 + $0x16c] ss:$12 sps:$4 sm:$0xff]  }
 0xdef   :  { %10547 = vmatprep.subr.bf16.mxu0 %v9566_v35  ;;  %14410 = vrot.lane.b32.xlu0 %v22188_v50, %s14554_s24 }
 0xdf0   :  { %10548 = vmatpush1.bf16.msra.mxu0 %v9565_v3  ;;  %v10140_v3 = vsel %vm788_vm6, %v20070_v39, %v20178_v23  ;;  %14405 = vrot.lane.b32.xlu1 %v22188_v50, %s14553_s17 }
 0xdf1   :  { %10464 = vmatpush1.bf16.msra.mxu1 %v10041_v53  ;;  %v9734_v45 = vpop.permute.xlu0 %9733  ;;  %10549 = vmatprep.subr.bf16.mxu0 %v9652_v16  ;;  %v20234_v28 = vpop.permute.xlu1 %9927  ;;  %v10226_v16 = vsel %vm881_vm7, %v20050_v15, %v20135_v2  ;;  %v10231_v15 = vsel %vm881_vm7, %v20032_v0, %v20083_v12 }
 0xdf2   :  { %10465 = vmatprep.subr.bf16.mxu1 %v10048_v36  ;;  %v9749_v39 = vsel %vm392_vm2, %v20088_v9, %v9734_v45 }
 0xdf3   :  { %14420 = vrot.lane.b32.xlu0 %v22188_v50, %s14556_s26 }
 0xdf4   :  { %10550 = vmatpush1.bf16.msra.mxu0 %v9651_v34  ;;  %v9836_v34 = vsel %vm485_vm3, %v20140_v58, %v20192_v47  ;;  %14415 = vrot.lane.b32.xlu1 %v22188_v50, %s14555_s25 }
 0xdf5   :  { %10466 = vmatpush1.bf16.msra.mxu1 %v10047_v25  ;;  %v20242_v4 = vpop.permute.xlu0 %9827  ;;  %v20247_v7 = vpop.permute.xlu1 %9643 }
 0xdf6   :  { %10467 = vmatprep.subr.bf16.mxu1 %v10134_v44  ;;  %v9658_v35 = vsel %vm299_vm1, %v9642_v29, %v20247_v7  ;;  %v10232_v44 = vsel %vm881_vm7, %v20083_v12, %v20211_v37  ;;  %v9842_v9 = vsel %vm485_vm3, %v20197_v61, %v20242_v4 }
 0xdf7   :  { %10551 = vmatprep.subr.bf16.mxu0 %v9658_v35 }
 0xdf8   :  { %10552 = vmatpush1.bf16.msra.mxu0 %v9657_v59 }
 0xdf9   :  { %10468 = vmatpush1.bf16.msra.mxu1 %v10133_v24  ;;  %v20259_v52 = vpop.permute.xlu0 %9929  ;;  %10553 = vmatprep.subr.bf16.mxu0 %v9744_v21  ;;  %v20264_v53 = vpop.permute.xlu1 %10019  ;;  %v20329_v21 = vld [vmem:[%s22072_s1 + $0x158] ss:$12 sps:$4 sm:$0xff]  }
 0xdfa   :  { %10469 = vmatprep.subr.bf16.mxu1 %v10140_v3 }
 0xdfc   :  { %10554 = vmatpush1.bf16.msra.mxu0 %v9743_v32 }
 0xdfd   :  { %10470 = vmatpush1.bf16.msra.mxu1 %v10139_v38  ;;  %v20277_v29 = vpop.permute.xlu0 %10021  ;;  %v20282_v36 = vpop.permute.xlu1 %9735 }
 0xdfe   :  { %10492 = vmatprep.subr.bf16.mxu1 %v10226_v16  ;;  %v9750_v57 = vsel %vm392_vm2, %v9734_v45, %v20282_v36  ;;  %v20316_v45 = vld [vmem:[%s22072_s1 + $0x168] ss:$12 sps:$4 sm:$0xff]  }
 0xdff   :  { %10555 = vmatprep.subr.bf16.mxu0 %v9750_v57 }
 0xe00   :  { %10472 = vmatmul.mubr.bf16.vlgmr.msra.gmra.mrb[80].mxu1 %v20275_v27  ;;  %10556 = vmatpush1.bf16.msra.mxu0 %v9749_v39 }
 0xe01   :  { %10493 = vmatpush1.bf16.msra.mxu1 %v10225_v11  ;;  %v9542_v25 = vpop.permute.xlu0 %9541  ;;  %10557 = vmatprep.subr.bf16.mxu0 %v9836_v34  ;;  %v9942_v35 = vpop.permute.xlu1 %9941 }
 0xe02   :  { %10494 = vmatprep.subr.bf16.mxu1 %v10232_v44  ;;  %10481 = vmatprep.mubr.bf16.mxu1 %v20289_v56 }
 0xe04   :  { %10558 = vmatpush1.bf16.msra.mxu0 %v9835_v48 }
 0xe05   :  { %10495 = vmatpush1.bf16.msra.mxu1 %v10231_v15  ;;  %v9634_v59 = vpop.permute.xlu0 %9633  ;;  %10559 = vmatprep.subr.bf16.mxu0 %v9842_v9  ;;  %v10034_v24 = vpop.permute.xlu1 %10033 }
 0xe08   :  { %10482 = vmatmul.mubr.bf16.gmra.mrb[84].mxu1 %v20316_v45  ;;  %10560 = vmatpush1.bf16.msra.mxu0 %v9841_v41 }
 0xe09   :  { %v9726_v0 = vpop.permute.xlu0 %9725  ;;  %10561 = vmatprep.subr.bf16.mxu0 %v19836_v13  ;;  %v9540_v12 = vpop.permute.xlu1 %9539  ;;  %10524 = vmatprep.mubr.bf16.mxu1 %v22188_v50 }
 0xe0a   :  { %v9562_v58 = vsel %vm206_vm0, %v9540_v12, %v9542_v25  ;;  %v9561_v13 = vsel %vm206_vm0, %v20148_v30, %v9540_v12 }
 0xe0b   :  { %10651 = vmatprep.subr.bf16.mxu1 %v9562_v58 }
 0xe0c   :  { %10562 = vmatpush1.bf16.msra.mxu0 %v19833_v19  ;;  %v9952_v19 = vsel %vm602_vm4, %v20234_v28, %v20259_v52 }
 0xe0d   :  { %v20331_v33 = vpop.permute.xlu0 %9943  ;;  %10563 = vmatprep.subr.bf16.mxu0 %v19855_v43  ;;  %v9632_v61 = vpop.permute.xlu1 %9631  ;;  %v9951_v43 = vsel %vm602_vm4, %v20096_v10, %v20234_v28  ;;  %v9957_v10 = vsel %vm602_vm4, %v20153_v49, %v9942_v35  ;;  %v10044_v28 = vsel %vm695_vm5, %v20264_v53, %v20277_v29  ;;  %v10043_v49 = vsel %vm695_vm5, %v20106_v51, %v20264_v53 }
 0xe0e   :  { %v9958_v30 = vsel %vm602_vm4, %v9942_v35, %v20331_v33  ;;  %v9654_v34 = vsel %vm299_vm1, %v9632_v61, %v9634_v59  ;;  %v10049_v51 = vsel %vm695_vm5, %v20168_v42, %v10034_v24 }
 0xe10   :  { %13699 = vmatmul.mubr.msk.bf16.vlgmr.msra.gmra.mrb[80].mxu1 %vm1088_vm8, %v20329_v21  ;;  %10564 = vmatpush1.bf16.msra.mxu0 %v19853_v62  ;;  %v20353_v62 = vld [vmem:[%s22072_s1 + $0x170] ss:$12 sps:$4 sm:$0xff]  }
 0xe11   :  { %10652 = vmatpush1.bf16.msra.mxu1 %v9561_v13  ;;  %v20342_v3 = vpop.permute.xlu0 %10035  ;;  %10565 = vmatprep.subr.bf16.mxu0 %v9952_v19  ;;  %v9724_v32 = vpop.permute.xlu1 %9723 }
 0xe12   :  { %10534 = vmatprep.mubr.bf16.mxu1 %v22188_v50  ;;  %v10050_v44 = vsel %vm695_vm5, %v10034_v24, %v20342_v3  ;;  %v9746_v9 = vsel %vm392_vm2, %v9724_v32, %v9726_v0 }
 0xe14   :  { %10566 = vmatpush1.bf16.msra.mxu0 %v9951_v43 }
 0xe15   :  { %v9556_v38 = vpop.permute.xlu0 %9555  ;;  %10567 = vmatprep.subr.bf16.mxu0 %v9958_v30  ;;  %v9554_v16 = vpop.permute.xlu1 %9553 }
 0xe16   :  { %v9568_v57 = vsel %vm206_vm0, %v9554_v16, %v9556_v38  ;;  %v9567_v39 = vsel %vm206_vm0, %v20219_v31, %v9554_v16  ;;  %v9653_v31 = vsel %vm299_vm1, %v20166_v6, %v9632_v61 }
 0xe17   :  { %10653 = vmatprep.subr.bf16.mxu1 %v9568_v57 }
 0xe18   :  { %13700 = vmatmul.mubr.msk.bf16.gmra.mrb[84].mxu1 %vm1088_vm8, %v20353_v62  ;;  %10568 = vmatpush1.bf16.msra.mxu0 %v9957_v10 }
 0xe19   :  { %10654 = vmatpush1.bf16.msra.mxu1 %v9567_v39  ;;  %v20365_v11 = vpop.permute.xlu0 %10113  ;;  %10569 = vmatprep.subr.bf16.mxu0 %v10044_v28  ;;  %v10112_v25 = vpop.permute.xlu1 %10111 }
 0xe1a   :  { %10655 = vmatprep.subr.bf16.mxu1 %v9654_v34  ;;  %10683 = vmatprep.mubr.bf16.mxu1 %v19940_v26  ;;  %v10136_v6 = vsel %vm788_vm6, %v10112_v25, %v20365_v11  ;;  %v10135_v41 = vsel %vm788_vm6, %v20120_v18, %v10112_v25 }
 0xe1c   :  { %10570 = vmatpush1.bf16.msra.mxu0 %v10043_v49 }
 0xe1d   :  { %10656 = vmatpush1.bf16.msra.mxu1 %v9653_v31  ;;  %v9648_v35 = vpop.permute.xlu0 %9647  ;;  %10571 = vmatprep.subr.bf16.mxu0 %v10050_v44  ;;  %v9646_v48 = vpop.permute.xlu1 %9645 }
 0xe1e   :  { %v9660_v15 = vsel %vm299_vm1, %v9646_v48, %v9648_v35  ;;  %v9659_v26 = vsel %vm299_vm1, %v20247_v7, %v9646_v48  ;;  %v9745_v7 = vsel %vm392_vm2, %v20176_v14, %v9724_v32 }
 0xe1f   :  { %10657 = vmatprep.subr.bf16.mxu1 %v9660_v15 }
 0xe20   :  { %10572 = vmatpush1.bf16.msra.mxu0 %v10049_v51 }
 0xe21   :  { %10658 = vmatpush1.bf16.msra.mxu1 %v9659_v26  ;;  %v20383_v53 = vpop.permute.xlu0 %10127  ;;  %10573 = vmatprep.subr.bf16.mxu0 %v10136_v6  ;;  %v9738_v59 = vpop.permute.xlu1 %9737 }
 0xe22   :  { %10659 = vmatprep.subr.bf16.mxu1 %v9746_v9  ;;  %v9751_v18 = vsel %vm392_vm2, %v20282_v36, %v9738_v59 }
 0xe24   :  { %10574 = vmatpush1.bf16.msra.mxu0 %v10135_v41 }
 0xe25   :  { %10660 = vmatpush1.bf16.msra.mxu1 %v9745_v7  ;;  %v9740_v42 = vpop.permute.xlu0 %9739  ;;  %v10126_v24 = vpop.permute.xlu1 %10125 }
 0xe26   :  { %v10142_v12 = vsel %vm788_vm6, %v10126_v24, %v20383_v53  ;;  %v9752_v58 = vsel %vm392_vm2, %v9738_v59, %v9740_v42  ;;  %v10141_v0 = vsel %vm788_vm6, %v20178_v23, %v10126_v24 }
 0xe27   :  { %10575 = vmatprep.subr.bf16.mxu0 %v10142_v12  ;;  %10661 = vmatprep.subr.bf16.mxu1 %v9752_v58 }
 0xe28   :  { %10576 = vmatpush1.bf16.msra.mxu0 %v10141_v0 }
 0xe29   :  { %10662 = vmatpush1.bf16.msra.mxu1 %v9751_v18  ;;  %v9818_v61 = vpop.permute.xlu0 %9817  ;;  %v9816_v14 = vpop.permute.xlu1 %9815 }
 0xe2a   :  { %v9838_v13 = vsel %vm485_vm3, %v9816_v14, %v9818_v61  ;;  %v9837_v19 = vsel %vm485_vm3, %v20192_v47, %v9816_v14 }
 0xe2b   :  { %10578 = vmatmul.mubr.bf16.vlgmr.msra.gmra.mrb[88].mxu0 %v20275_v27  ;;  %10663 = vmatprep.subr.bf16.mxu1 %v9838_v13 }
 0xe2c   :  { %10587 = vmatprep.mubr.bf16.mxu0 %v20289_v56 }
 0xe2d   :  { %10664 = vmatpush1.bf16.msra.mxu1 %v9837_v19  ;;  %v9832_v23 = vpop.permute.xlu0 %9831  ;;  %v9830_v32 = vpop.permute.xlu1 %9829 }
 0xe2e   :  { %v9844_v43 = vsel %vm485_vm3, %v9830_v32, %v9832_v23  ;;  %v9843_v36 = vsel %vm485_vm3, %v20242_v4, %v9830_v32 }
 0xe2f   :  { %10665 = vmatprep.subr.bf16.mxu1 %v9844_v43 }
 0xe31   :  { %10666 = vmatpush1.bf16.msra.mxu1 %v9843_v36  ;;  %v10206_v30 = vpop.permute.xlu0 %10205  ;;  %v10204_v38 = vpop.permute.xlu1 %10203 }
 0xe32   :  { %10667 = vmatprep.subr.bf16.mxu1 %v19900_v55  ;;  %v10228_v47 = vsel %vm881_vm7, %v10204_v38, %v10206_v30  ;;  %v10227_v16 = vsel %vm881_vm7, %v20135_v2, %v10204_v38 }
 0xe33   :  { %10588 = vmatmul.mubr.bf16.gmra.mrb[92].mxu0 %v20316_v45  ;;  %10598 = vmatprep.subr.bf16.mxu0 %v10228_v47 }
 0xe34   :  { %10599 = vmatpush1.bf16.msra.mxu0 %v10227_v16  ;;  %10630 = vmatprep.mubr.bf16.mxu0 %v22188_v50 }
 0xe35   :  { %10668 = vmatpush1.bf16.msra.mxu1 %v19897_v20  ;;  %v10220_v4 = vpop.permute.xlu0 %10219  ;;  %v10218_v57 = vpop.permute.xlu1 %10217 }
 0xe36   :  { %10669 = vmatprep.subr.bf16.mxu1 %v19919_v1  ;;  %v10234_v39 = vsel %vm881_vm7, %v10218_v57, %v10220_v4  ;;  %v10233_v55 = vsel %vm881_vm7, %v20211_v37, %v10218_v57 }
 0xe37   :  { %10600 = vmatprep.subr.bf16.mxu0 %v10234_v39 }
 0xe38   :  { %10601 = vmatpush1.bf16.msra.mxu0 %v10233_v55 }
 0xe39   :  { %10670 = vmatpush1.bf16.msra.mxu1 %v19917_v54  ;;  %v9934_v2 = vpop.permute.xlu0 %9933  ;;  %v9932_v10 = vpop.permute.xlu1 %9931 }
 0xe3a   :  { %v9954_v28 = vsel %vm602_vm4, %v9932_v10, %v9934_v2  ;;  %v9953_v20 = vsel %vm602_vm4, %v20259_v52, %v9932_v10 }
 0xe3b   :  { %13701 = vmatmul.mubr.msk.bf16.vlgmr.msra.gmra.mrb[88].mxu0 %vm1088_vm8, %v20329_v21  ;;  %10671 = vmatprep.subr.bf16.mxu1 %v9954_v28 }
 0xe3c   :  { %10640 = vmatprep.mubr.bf16.mxu0 %v22188_v50 }
 0xe3d   :  { %10672 = vmatpush1.bf16.msra.mxu1 %v9953_v20  ;;  %v9948_v1 = vpop.permute.xlu0 %9947  ;;  %v9946_v37 = vpop.permute.xlu1 %9945 }
 0xe3e   :  { %v9960_v34 = vsel %vm602_vm4, %v9946_v37, %v9948_v1  ;;  %v9959_v54 = vsel %vm602_vm4, %v20331_v33, %v9946_v37  ;;  %v22278_v1 = vld [vmem:[#allocation4_spill] sm:$0xff] }
 0xe3f   :  { %10673 = vmatprep.subr.bf16.mxu1 %v9960_v34 }
 0xe41   :  { %10674 = vmatpush1.bf16.msra.mxu1 %v9959_v54  ;;  %v10026_v25 = vpop.permute.xlu0 %10025  ;;  %v10024_v49 = vpop.permute.xlu1 %10023  ;;  %v22280_v54 = vld [vmem:[#allocation5_spill] sm:$0xff] }
 0xe42   :  { %v10046_v52 = vsel %vm695_vm5, %v10024_v49, %v10026_v25  ;;  %v10045_v31 = vsel %vm695_vm5, %v20277_v29, %v10024_v49 }
 0xe43   :  { %13702 = vmatmul.mubr.msk.bf16.gmra.mrb[92].mxu0 %vm1088_vm8, %v20353_v62  ;;  %10675 = vmatprep.subr.bf16.mxu1 %v10046_v52 }
 0xe45   :  { %10676 = vmatpush1.bf16.msra.mxu1 %v10045_v31  ;;  %v10040_v44 = vpop.permute.xlu0 %10039  ;;  %v10038_v35 = vpop.permute.xlu1 %10037 }
 0xe46   :  { %v10052_v48 = vsel %vm695_vm5, %v10038_v35, %v10040_v44  ;;  %v10051_v33 = vsel %vm695_vm5, %v20342_v3, %v10038_v35  ;;  %v22281_v35 = vld [vmem:[#allocation6_spill] sm:$0xff] }
 0xe47   :  { %10677 = vmatprep.subr.bf16.mxu1 %v10052_v48 }
 0xe49   :  { %10678 = vmatpush1.bf16.msra.mxu1 %v10051_v33  ;;  %v10118_v15 = vpop.permute.xlu0 %10117  ;;  %v10116_v26 = vpop.permute.xlu1 %10115  ;;  %v22283_v33 = vld [vmem:[#allocation7_spill] sm:$0xff] }
 0xe4a   :  { %v10138_v51 = vsel %vm788_vm6, %v10116_v26, %v10118_v15  ;;  %v10137_v29 = vsel %vm788_vm6, %v20365_v11, %v10116_v26 }
 0xe4b   :  { %10679 = vmatprep.subr.bf16.mxu1 %v10138_v51 }
 0xe4d   :  { %10680 = vmatpush1.bf16.msra.mxu1 %v10137_v29  ;;  %v10132_v6 = vpop.permute.xlu0 %10131  ;;  %v10130_v9 = vpop.permute.xlu1 %10129 }
 0xe4e   :  { %v10144_v59 = vsel %vm788_vm6, %v10130_v9, %v10132_v6  ;;  %v10143_v41 = vsel %vm788_vm6, %v20383_v53, %v10130_v9 }
 0xe4f   :  { %10681 = vmatprep.subr.bf16.mxu1 %v10144_v59 }
 0xe51   :  { %10682 = vmatpush1.bf16.msra.mxu1 %v10143_v41  ;;  %v10210_v3 = vpop.permute.xlu0 %10209  ;;  %v10208_v7 = vpop.permute.xlu1 %10207 }
 0xe52   :  { %v10230_v42 = vsel %vm881_vm7, %v10208_v7, %v10210_v3  ;;  %v10229_v24 = vsel %vm881_vm7, %v10206_v30, %v10208_v7 }
 0xe53   :  { %10704 = vmatprep.subr.bf16.mxu1 %v10230_v42 }
 0xe54   :  { %10684 = vmatmul.mubr.bf16.vlgmr.msra.gmra.mrb[88].mxu1 %v20275_v27 }
 0xe55   :  { %10705 = vmatpush1.bf16.msra.mxu1 %v10229_v24  ;;  %v10224_v11 = vpop.permute.xlu0 %10223  ;;  %v10222_v12 = vpop.permute.xlu1 %10221  ;;  %10693 = vmatprep.mubr.bf16.mxu1 %v20289_v56 }
 0xe56   :  { %v10236_v58 = vsel %vm881_vm7, %v10222_v12, %v10224_v11  ;;  %v10235_v53 = vsel %vm881_vm7, %v10220_v4, %v10222_v12  ;;  %v22285_v11 = vld [vmem:[#allocation8_spill] sm:$0xff] }
 0xe57   :  { %10706 = vmatprep.subr.bf16.mxu1 %v10236_v58  ;;  %v22287_v58 = vld [vmem:[#allocation9_spill] sm:$0xff] }
 0xe59   :  { %10707 = vmatpush1.bf16.msra.mxu1 %v10235_v53 }
 0xe5c   :  { %10694 = vmatmul.mubr.bf16.gmra.mrb[92].mxu1 %v20316_v45 }
 0xe5d   :  { %10736 = vmatprep.mubr.bf16.mxu1 %v22188_v50 }
 0xe64   :  { %13703 = vmatmul.mubr.msk.bf16.vlgmr.msra.gmra.mrb[88].mxu1 %vm1088_vm8, %v20329_v21 }
 0xe65   :  { %10746 = vmatprep.mubr.bf16.mxu1 %v22188_v50 }
 0xe66   :  { %v20461_v27 = vpop.permute.xlu1 %10385  ;;  %v20464_v0 = vpop.permute.xlu0 %10390 }
 0xe6a   :  { %v20477_v57 = vpop.permute.xlu0 %10400  ;;  %v20485_v20 = vpop.permute.xlu1 %10395 }
 0xe6c   :  { %13704 = vmatmul.mubr.msk.bf16.gmra.mrb[92].mxu1 %vm1088_vm8, %v20353_v62 }
 0xee3   :  { %v10526_v56 = vpop.f32.mrb[80].mxu1 }
 0xee4   :  { %v13921_v45 = vadd.f32 %v10526_v56, %v20461_v27  ;;  %v10528_v21 = vpop.f32.mrb[81].mxu1 }
 0xee5   :  { %v10530_v18 = vpop.f32.mrb[82].mxu1  ;;  %v13922_v23 = vadd.f32 %v10528_v21, %v20461_v27 }
 0xee6   :  { %v10757_v61 = vmax.f32 %v13921_v45, 0.0  ;;  %v13923_v14 = vadd.f32 %v10530_v18, %v20464_v0  ;;  %v10532_v13 = vpop.f32.mrb[83].mxu1 }
 0xee7   :  { %v13924_v62 = vadd.f32 %v10532_v13, %v20464_v0  ;;  %v10758_v47 = vmax.f32 %v13922_v23, 0.0 }
 0xee8   :  { %v10781_v19 = vmul.f32 %v10757_v61, %v15186_v60  ;;  %v10763_v32 = vmax.f32 %v13923_v14, 0.0 }
 0xee9   :  { %v10764_v36 = vmax.f32 %v13924_v62, 0.0 }
 0xeea   :  { %v10787_v43 = vmul.f32 %v10763_v32, %v15186_v60  ;;  %v20472_v38 = vadd.f32 %v10781_v19, %v18946_v8  ;;  %v10782_v8 = vmul.f32 %v10758_v47, %v15190_v5 }
 0xeeb   :  { %v10536_v30 = vpop.f32.mrb[84].mxu1  ;;  %v10788_v2 = vmul.f32 %v10764_v36, %v15190_v5 }
 0xeec   :  { %v20475_v16 = vadd.f32 %v10787_v43, %v18949_v46  ;;  %v10538_v4 = vpop.f32.mrb[85].mxu1  ;;  %v13925_v46 = vadd.f32 %v10536_v30, %v20485_v20  ;;  %v20497_v25 = vadd.f32 %v10782_v8, %v22280_v54  ;;  %v22289_v43 = vld [vmem:[#allocation10_spill] sm:$0xff]  ;;  %v22291_v30 = vld [vmem:[#allocation11_spill] sm:$0xff] }
 0xeed   :  { %v10540_v39 = vpop.f32.mrb[86].mxu1  ;;  %v20494_v37 = vadd.f32 %v10788_v2, %v22278_v1  ;;  %v13926_v29 = vadd.f32 %v10538_v4, %v20485_v20 }
 0xeee   :  { %22277 = vst [vmem:[#allocation26_spill] sm:$0xff] %v20475_v16  ;;  %v20481_v55 = vpack.c.bf16 %v20475_v16, %v20472_v38  ;;  %v13927_v10 = vadd.f32 %v10540_v39, %v20477_v57  ;;  %v10542_v28 = vpop.f32.mrb[87].mxu1  ;;  %v10769_v49 = vmax.f32 %v13925_v46, 0.0 }
 0xeef   :  { %22279 = vst [vmem:[#allocation4_spill] sm:$0xff] %v20494_v37  ;;  %v20505_v52 = vpack.c.bf16 %v20494_v37, %v20497_v25  ;;  %v13928_v51 = vadd.f32 %v10542_v28, %v20477_v57  ;;  %v10770_v9 = vmax.f32 %v13926_v29, 0.0  ;;  %v22293_v29 = vld [vmem:[#allocation12_spill] sm:$0xff] }
 0xef0   :  { %10975 = vrot.lane.b32.xlu0 %v20481_v55, %s14554_s24  ;;  %10883 = vrot.lane.b32.xlu1 %v20481_v55, %s14553_s17  ;;  %v10775_v34 = vmax.f32 %v13927_v10, 0.0  ;;  %v10793_v44 = vmul.f32 %v10769_v49, %v15186_v60 }
 0xef1   :  { %v10776_v6 = vmax.f32 %v13928_v51, 0.0  ;;  %v10794_v7 = vmul.f32 %v10770_v9, %v15190_v5  ;;  %v22295_v9 = vld [vmem:[#allocation13_spill] sm:$0xff] }
 0xef2   :  { %v10799_v31 = vmul.f32 %v10775_v34, %v15186_v60  ;;  %v20517_v15 = vadd.f32 %v10793_v44, %v22283_v33 }
 0xef3   :  { %v10800_v59 = vmul.f32 %v10776_v6, %v15190_v5  ;;  %v20555_v53 = vadd.f32 %v10794_v7, %v22287_v58 }
 0xef4   :  { %11159 = vrot.lane.b32.xlu0 %v20481_v55, %s14556_s26  ;;  %11067 = vrot.lane.b32.xlu1 %v20481_v55, %s14555_s25  ;;  %v20514_v48 = vadd.f32 %v10799_v31, %v22281_v35  ;;  %22284 = vst [vmem:[#allocation6_spill] sm:$0xff] %v20517_v15 }
 0xef5   :  { %v20552_v12 = vadd.f32 %v10800_v59, %v22285_v11  ;;  %22288 = vst [vmem:[#allocation8_spill] sm:$0xff] %v20555_v53 }
 0xef6   :  { %22282 = vst [vmem:[#allocation5_spill] sm:$0xff] %v20514_v48  ;;  %v20525_v26 = vpack.c.bf16 %v20514_v48, %v20517_v15 }
 0xef7   :  { %22286 = vst [vmem:[#allocation7_spill] sm:$0xff] %v20552_v12  ;;  %v20563_v56 = vpack.c.bf16 %v20552_v12, %v20555_v53 }
 0xef8   :  { %10885 = vrot.lane.b32.xlu0 %v20505_v52, %s14553_s17  ;;  %11273 = vrot.lane.b32.xlu1 %v20481_v55, %s14557_s29 }
 0xefc   :  { %11069 = vrot.lane.b32.xlu0 %v20505_v52, %s14555_s25  ;;  %11365 = vrot.lane.b32.xlu1 %v20481_v55, %s14558_s10 }
 0xf00   :  { %11457 = vrot.lane.b32.xlu1 %v20481_v55, %s14559_s11  ;;  %10897 = vrot.lane.b32.xlu0 %v20525_v26, %s14553_s17 }
 0xf04   :  { %11549 = vrot.lane.b32.xlu1 %v20481_v55, %s14560_s14  ;;  %11081 = vrot.lane.b32.xlu0 %v20525_v26, %s14555_s25 }
 0xf08   :  { %10977 = vrot.lane.b32.xlu1 %v20505_v52, %s14554_s24  ;;  %11287 = vrot.lane.b32.xlu0 %v20525_v26, %s14557_s29 }
 0xf0c   :  { %11161 = vrot.lane.b32.xlu1 %v20505_v52, %s14556_s26  ;;  %11379 = vrot.lane.b32.xlu0 %v20525_v26, %s14558_s10 }
 0xf0e   :  { %v10632_v41 = vpop.f32.mrb[88].mxu0 }
 0xf0f   :  { %v10634_v3 = vpop.f32.mrb[89].mxu0  ;;  %v13929_v13 = vadd.f32 %v10632_v41, %v20461_v27 }
 0xf10   :  { %11275 = vrot.lane.b32.xlu1 %v20505_v52, %s14557_s29  ;;  %11471 = vrot.lane.b32.xlu0 %v20525_v26, %s14559_s11  ;;  %v10636_v42 = vpop.f32.mrb[90].mxu0  ;;  %v13930_v10 = vadd.f32 %v10634_v3, %v20461_v27  ;;  %v22297_v3 = vld [vmem:[#allocation14_spill] sm:$0xff] }
 0xf11   :  { %v10638_v24 = vpop.f32.mrb[91].mxu0  ;;  %v13931_v14 = vadd.f32 %v10636_v42, %v20464_v0  ;;  %v10759_v19 = vmax.f32 %v13929_v13, 0.0  ;;  %v22299_v42 = vld [vmem:[#allocation15_spill] sm:$0xff] }
 0xf12   :  { %v13932_v39 = vadd.f32 %v10638_v24, %v20464_v0  ;;  %v10760_v1 = vmax.f32 %v13930_v10, 0.0 }
 0xf13   :  { %v10765_v62 = vmax.f32 %v13931_v14, 0.0  ;;  %v10783_v32 = vmul.f32 %v10759_v19, %v15232_v17 }
 0xf14   :  { %11367 = vrot.lane.b32.xlu1 %v20505_v52, %s14558_s10  ;;  %11563 = vrot.lane.b32.xlu0 %v20525_v26, %s14560_s14  ;;  %v10766_v8 = vmax.f32 %v13932_v39, 0.0  ;;  %v10784_v44 = vmul.f32 %v10760_v1, %v15236_v22 }
 0xf15   :  { %v10789_v23 = vmul.f32 %v10765_v62, %v15232_v17  ;;  %v20593_v47 = vadd.f32 %v10783_v32, %v22291_v30 }
 0xf16   :  { %v10642_v45 = vpop.f32.mrb[92].mxu0  ;;  %v10790_v54 = vmul.f32 %v10766_v8, %v15236_v22  ;;  %v20630_v7 = vadd.f32 %v10784_v44, %v22297_v3  ;;  %v20700_v44 = vld [vmem:[%s22072_s1 + $0x184] ss:$12 sps:$4 sm:$0xff]  }
 0xf17   :  { %v10644_v21 = vpop.f32.mrb[93].mxu0  ;;  %v20590_v36 = vadd.f32 %v10789_v23, %v22289_v43  ;;  %22292 = vst [vmem:[#allocation10_spill] sm:$0xff] %v20593_v47  ;;  %v13933_v28 = vadd.f32 %v10642_v45, %v20485_v20  ;;  %11823 = vmatprep.mubr.bf16.mxu0 %v20700_v44  ;;  %11929 = vmatprep.mubr.bf16.mxu1 %v20700_v44 }
 0xf18   :  { %11459 = vrot.lane.b32.xlu1 %v20505_v52, %s14559_s11  ;;  %10991 = vrot.lane.b32.xlu0 %v20563_v56, %s14554_s24  ;;  %v10646_v18 = vpop.f32.mrb[94].mxu0  ;;  %v20624_v6 = vadd.f32 %v10790_v54, %v22293_v29  ;;  %22298 = vst [vmem:[#allocation13_spill] sm:$0xff] %v20630_v7  ;;  %v13934_v19 = vadd.f32 %v10644_v21, %v20485_v20  ;;  %v22301_v21 = vld [vmem:[#allocation16_spill] sm:$0xff] }
 0xf19   :  { %v10648_v61 = vpop.f32.mrb[95].mxu0  ;;  %22290 = vst [vmem:[#allocation9_spill] sm:$0xff] %v20590_v36  ;;  %v20601_v4 = vpack.c.bf16 %v20590_v36, %v20593_v47  ;;  %v13935_v2 = vadd.f32 %v10646_v18, %v20477_v57  ;;  %v10771_v34 = vmax.f32 %v13933_v28, 0.0 }
 0xf1a   :  { %22294 = vst [vmem:[#allocation11_spill] sm:$0xff] %v20624_v6  ;;  %v20641_v11 = vpack.c.bf16 %v20624_v6, %v20630_v7  ;;  %v13936_v13 = vadd.f32 %v10648_v61, %v20477_v57  ;;  %v10772_v32 = vmax.f32 %v13934_v19, 0.0 }
 0xf1b   :  { %v10777_v46 = vmax.f32 %v13935_v2, 0.0  ;;  %v10795_v35 = vmul.f32 %v10771_v34, %v15232_v17  ;;  %v22303_v2 = vld [vmem:[#allocation17_spill] sm:$0xff] }
 0xf1c   :  { %11551 = vrot.lane.b32.xlu1 %v20505_v52, %s14560_s14  ;;  %11175 = vrot.lane.b32.xlu0 %v20563_v56, %s14556_s26  ;;  %v10778_v23 = vmax.f32 %v13936_v13, 0.0  ;;  %v10796_v43 = vmul.f32 %v10772_v32, %v15236_v22  ;;  %v22309_v32 = vld [vmem:[#allocation20_spill] sm:$0xff] }
 0xf1d   :  { %v10801_v49 = vmul.f32 %v10777_v46, %v15232_v17  ;;  %v20633_v24 = vadd.f32 %v10795_v35, %v22299_v42 }
 0xf1e   :  { %v10802_v61 = vmul.f32 %v10778_v23, %v15236_v22  ;;  %v20676_v10 = vadd.f32 %v10796_v43, %v22303_v2  ;;  %v22311_v2 = vld [vmem:[#allocation21_spill] sm:$0xff] }
 0xf1f   :  { %v20627_v59 = vadd.f32 %v10801_v49, %v22295_v9  ;;  %22300 = vst [vmem:[#allocation14_spill] sm:$0xff] %v20633_v24  ;;  %v20693_v49 = vpop.permute.xlu0 %14410 }
 0xf20   :  { %10989 = vrot.lane.b32.xlu1 %v20525_v26, %s14554_s24  ;;  %11289 = vrot.lane.b32.xlu0 %v20563_v56, %s14557_s29  ;;  %v20672_v30 = vadd.f32 %v10802_v61, %v22301_v21  ;;  %22304 = vst [vmem:[#allocation16_spill] sm:$0xff] %v20676_v10  ;;  %v14412_v47 = vunpack.i.l.bf16 %v20693_v49  ;;  %v14413_v15 = vunpack.i.h.bf16 %v20693_v49 }
 0xf21   :  { %22296 = vst [vmem:[#allocation12_spill] sm:$0xff] %v20627_v59  ;;  %v20645_v58 = vpack.c.bf16 %v20627_v59, %v20633_v24 }
 0xf22   :  { %22302 = vst [vmem:[#allocation15_spill] sm:$0xff] %v20672_v30  ;;  %v20685_v8 = vpack.c.bf16 %v20672_v30, %v20676_v10 }
 0xf24   :  { %11173 = vrot.lane.b32.xlu1 %v20525_v26, %s14556_s26  ;;  %11381 = vrot.lane.b32.xlu0 %v20563_v56, %s14558_s10 }
 0xf28   :  { %10899 = vrot.lane.b32.xlu1 %v20563_v56, %s14553_s17  ;;  %11473 = vrot.lane.b32.xlu0 %v20563_v56, %s14559_s11 }
 0xf2c   :  { %11083 = vrot.lane.b32.xlu1 %v20563_v56, %s14555_s25  ;;  %11565 = vrot.lane.b32.xlu0 %v20563_v56, %s14560_s14 }
 0xf30   :  { %10887 = vrot.lane.b32.xlu1 %v20601_v4, %s14553_s17  ;;  %11277 = vrot.lane.b32.xlu0 %v20601_v4, %s14557_s29 }
 0xf34   :  { %10979 = vrot.lane.b32.xlu1 %v20601_v4, %s14554_s24  ;;  %11369 = vrot.lane.b32.xlu0 %v20601_v4, %s14558_s10 }
 0xf37   :  { %v10738_v31 = vpop.f32.mrb[88].mxu1 }
 0xf38   :  { %v10740_v33 = vpop.f32.mrb[89].mxu1  ;;  %11071 = vrot.lane.b32.xlu1 %v20601_v4, %s14555_s25  ;;  %11461 = vrot.lane.b32.xlu0 %v20601_v4, %s14559_s11  ;;  %v13937_v28 = vadd.f32 %v10738_v31, %v20461_v27  ;;  %v20695_v31 = vpop.permute.xlu1 %14405 }
 0xf39   :  { %v10742_v51 = vpop.f32.mrb[90].mxu1  ;;  %v14408_v36 = vunpack.i.h.bf16 %v20695_v31 }
 0xf3a   :  { %v10744_v41 = vpop.f32.mrb[91].mxu1  ;;  %v13939_v39 = vadd.f32 %v10742_v51, %v20464_v0  ;;  %v10761_v1 = vmax.f32 %v13937_v28, 0.0  ;;  %v13938_v51 = vadd.f32 %v10740_v33, %v20461_v27  ;;  %v20720_v27 = vpop.permute.xlu0 %14420 }
 0xf3b   :  { %v13940_v54 = vadd.f32 %v10744_v41, %v20464_v0  ;;  %v22305_v0 = vld [vmem:[#allocation18_spill] sm:$0xff]  ;;  %v22307_v41 = vld [vmem:[#allocation19_spill] sm:$0xff] }
 0xf3c   :  { %11163 = vrot.lane.b32.xlu1 %v20601_v4, %s14556_s26  ;;  %11553 = vrot.lane.b32.xlu0 %v20601_v4, %s14560_s14  ;;  %v10767_v46 = vmax.f32 %v13939_v39, 0.0  ;;  %v10785_v35 = vmul.f32 %v10761_v1, %v15296_v40  ;;  %v10762_v42 = vmax.f32 %v13938_v51, 0.0  ;;  %v20722_v33 = vpop.permute.xlu1 %14415 }
 0xf3d   :  { %v10768_v9 = vmax.f32 %v13940_v54, 0.0  ;;  %v14417_v49 = vunpack.i.l.bf16 %v20722_v33 }
 0xf3e   :  { %v10791_v34 = vmul.f32 %v10767_v46, %v15296_v40  ;;  %v20714_v3 = vadd.f32 %v10785_v35, %v22307_v41  ;;  %v10786_v23 = vmul.f32 %v10762_v42, %v15304_v63  ;;  %v14407_v41 = vunpack.i.l.bf16 %v20695_v31 }
 0xf3f   :  { %v10748_v45 = vpop.f32.mrb[92].mxu1  ;;  %v10792_v19 = vmul.f32 %v10768_v9, %v15304_v63 }
 0xf40   :  { %v20647_v18 = vpop.f32.mrb[93].mxu1  ;;  %11291 = vrot.lane.b32.xlu1 %v20645_v58, %s14557_s29  ;;  %10889 = vrot.lane.b32.xlu0 %v20641_v11, %s14553_s17  ;;  %v20711_v29 = vadd.f32 %v10791_v34, %v22305_v0  ;;  %22308 = vst [vmem:[#allocation18_spill] sm:$0xff] %v20714_v3  ;;  %v20741_v28 = vadd.f32 %v10786_v23, %v22311_v2 }
 0xf41   :  { %v10752_v14 = vpop.f32.mrb[94].mxu1  ;;  %v20735_v61 = vadd.f32 %v10792_v19, %v22309_v32  ;;  %v13941_v46 = vadd.f32 %v10748_v45, %v20485_v20  ;;  %v13942_v23 = vadd.f32 %v20647_v18, %v20485_v20 }
 0xf42   :  { %v20654_v62 = vpop.f32.mrb[95].mxu1  ;;  %22306 = vst [vmem:[#allocation17_spill] sm:$0xff] %v20711_v29  ;;  %v20726_v13 = vpack.c.bf16 %v20711_v29, %v20714_v3  ;;  %v13943_v43 = vadd.f32 %v10752_v14, %v20477_v57  ;;  %22312 = vst [vmem:[#allocation20_spill] sm:$0xff] %v20741_v28 }
 0xf43   :  { %22310 = vst [vmem:[#allocation19_spill] sm:$0xff] %v20735_v61  ;;  %v20750_v1 = vpack.c.bf16 %v20735_v61, %v20741_v28  ;;  %v10773_v35 = vmax.f32 %v13941_v46, 0.0  ;;  %v13944_v51 = vadd.f32 %v20654_v62, %v20477_v57  ;;  %v22313_v62 = vld [vmem:[#allocation22_spill] sm:$0xff]  ;;  %v10774_v18 = vmax.f32 %v13942_v23, 0.0 }
 0xf44   :  { %11383 = vrot.lane.b32.xlu1 %v20645_v58, %s14558_s10  ;;  %10981 = vrot.lane.b32.xlu0 %v20641_v11, %s14554_s24  ;;  %v10779_v34 = vmax.f32 %v13943_v43, 0.0 }
 0xf45   :  { %v10797_v19 = vmul.f32 %v10773_v35, %v15296_v40  ;;  %v10780_v43 = vmax.f32 %v13944_v51, 0.0 }
 0xf46   :  { %v10803_v45 = vmul.f32 %v10779_v34, %v15296_v40  ;;  %v22315_v34 = vld [vmem:[#allocation23_spill] sm:$0xff] }
 0xf47   :  { %v20786_v20 = vadd.f32 %v10797_v19, %v22315_v34  ;;  %v10804_v35 = vmul.f32 %v10780_v43, %v15304_v63 }
 0xf48   :  { %11475 = vrot.lane.b32.xlu1 %v20645_v58, %s14559_s11  ;;  %11073 = vrot.lane.b32.xlu0 %v20641_v11, %s14555_s25  ;;  %v20779_v32 = vadd.f32 %v10803_v45, %v22313_v62  ;;  %v22319_v62 = vld [vmem:[#allocation25_spill] sm:$0xff] }
 0xf49   :  { %22316 = vst [vmem:[#allocation22_spill] sm:$0xff] %v20786_v20 }
 0xf4a   :  { %22314 = vst [vmem:[#allocation21_spill] sm:$0xff] %v20779_v32 }
 0xf4c   :  { %11177 = vrot.lane.b32.xlu1 %v20645_v58, %s14556_s26  ;;  %11165 = vrot.lane.b32.xlu0 %v20641_v11, %s14556_s26 }
 0xf50   :  { %11567 = vrot.lane.b32.xlu1 %v20645_v58, %s14560_s14  ;;  %10901 = vrot.lane.b32.xlu0 %v20645_v58, %s14553_s17 }
 0xf54   :  { %10903 = vrot.lane.b32.xlu1 %v20685_v8, %s14553_s17  ;;  %10993 = vrot.lane.b32.xlu0 %v20645_v58, %s14554_s24 }
 0xf58   :  { %11279 = vrot.lane.b32.xlu1 %v20641_v11, %s14557_s29  ;;  %11085 = vrot.lane.b32.xlu0 %v20645_v58, %s14555_s25 }
 0xf5c   :  { %10995 = vrot.lane.b32.xlu1 %v20685_v8, %s14554_s24  ;;  %11179 = vrot.lane.b32.xlu0 %v20685_v8, %s14556_s26 }
 0xf60   :  { %11371 = vrot.lane.b32.xlu1 %v20641_v11, %s14558_s10  ;;  %11281 = vrot.lane.b32.xlu0 %v20726_v13, %s14557_s29 }
 0xf62   :  { %v20738_v21 = vpop.permute.xlu0 %10975  ;;  %v10884_v39 = vpop.permute.xlu1 %10883 }
 0xf63   :  { %v10909_v57 = vsel %vm206_vm0, %v14407_v41, %v10884_v39  ;;  %v10798_v41 = vmul.f32 %v10774_v18, %v15304_v63 }
 0xf64   :  { %11087 = vrot.lane.b32.xlu1 %v20685_v8, %s14555_s25  ;;  %11373 = vrot.lane.b32.xlu0 %v20726_v13, %s14558_s10 }
 0xf65   :  { %v20812_v43 = vadd.f32 %v10798_v41, %v22319_v62 }
 0xf66   :  { %v20752_v14 = vpop.permute.xlu0 %11159  ;;  %v20754_v54 = vpop.permute.xlu1 %11067 }
 0xf68   :  { %11293 = vrot.lane.b32.xlu1 %v20685_v8, %s14557_s29  ;;  %10893 = vrot.lane.b32.xlu0 %v20750_v1, %s14553_s17 }
 0xf6a   :  { %v20763_v0 = vpop.permute.xlu0 %10885  ;;  %v20765_v9 = vpop.permute.xlu1 %11273 }
 0xf6b   :  { %v10910_v42 = vsel %vm206_vm0, %v10884_v39, %v20763_v0  ;;  %v20794_v39 = vpack.c.bf16 %v20779_v32, %v20786_v20 }
 0xf6c   :  { %11385 = vrot.lane.b32.xlu1 %v20685_v8, %s14558_s10  ;;  %10985 = vrot.lane.b32.xlu0 %v20750_v1, %s14554_s24 }
 0xf6d   :  { %11791 = vmatprep.subr.bf16.mxu0 %v10910_v42  ;;  %v22317_v42 = vld [vmem:[#allocation24_spill] sm:$0xff] }
 0xf6e   :  { %11792 = vmatpush1.bf16.msra.mxu0 %v10909_v57  ;;  %v20781_v2 = vpop.permute.xlu0 %11069  ;;  %v20783_v46 = vpop.permute.xlu1 %11365  ;;  %v20805_v19 = vadd.f32 %v10804_v35, %v22317_v42  ;;  %22320 = vst [vmem:[#allocation24_spill] sm:$0xff] %v20812_v43 }
 0xf70   :  { %10891 = vrot.lane.b32.xlu1 %v20726_v13, %s14553_s17  ;;  %11077 = vrot.lane.b32.xlu0 %v20750_v1, %s14555_s25  ;;  %22318 = vst [vmem:[#allocation23_spill] sm:$0xff] %v20805_v19  ;;  %v20820_v34 = vpack.c.bf16 %v20805_v19, %v20812_v43 }
 0xf72   :  { %v10898_v45 = vpop.permute.xlu0 %10897  ;;  %v20797_v51 = vpop.permute.xlu1 %11457 }
 0xf73   :  { %v10915_v12 = vsel %vm206_vm0, %v14408_v36, %v10898_v45 }
 0xf74   :  { %10983 = vrot.lane.b32.xlu1 %v20726_v13, %s14554_s24  ;;  %11295 = vrot.lane.b32.xlu0 %v20794_v39, %s14557_s29 }
 0xf76   :  { %v20807_v23 = vpop.permute.xlu0 %11081  ;;  %v20809_v57 = vpop.permute.xlu1 %11549 }
 0xf78   :  { %11075 = vrot.lane.b32.xlu1 %v20726_v13, %s14555_s25  ;;  %11387 = vrot.lane.b32.xlu0 %v20794_v39, %s14558_s10 }
 0xf7a   :  { %v20822_v18 = vpop.permute.xlu0 %11287  ;;  %v20824_v35 = vpop.permute.xlu1 %10977 }
 0xf7b   :  { %v11002_v31 = vsel %vm299_vm1, %v20738_v21, %v20824_v35 }
 0xf7c   :  { %10905 = vrot.lane.b32.xlu1 %v20794_v39, %s14553_s17  ;;  %10907 = vrot.lane.b32.xlu0 %v20820_v34, %s14553_s17 }
 0xf7e   :  { %v20830_v41 = vpop.permute.xlu0 %11379  ;;  %v20832_v42 = vpop.permute.xlu1 %11161 }
 0xf80   :  { %11463 = vrot.lane.b32.xlu1 %v20641_v11, %s14559_s11  ;;  %11465 = vrot.lane.b32.xlu0 %v20726_v13, %s14559_s11 }
 0xf82   :  { %v20838_v62 = vpop.permute.xlu0 %11471  ;;  %v20840_v19 = vpop.permute.xlu1 %11275 }
 0xf84   :  { %10997 = vrot.lane.b32.xlu1 %v20794_v39, %s14554_s24  ;;  %10999 = vrot.lane.b32.xlu0 %v20820_v34, %s14554_s24 }
 0xf86   :  { %v20846_v32 = vpop.permute.xlu0 %11563  ;;  %v20848_v43 = vpop.permute.xlu1 %11367 }
 0xf88   :  { %11089 = vrot.lane.b32.xlu1 %v20794_v39, %s14555_s25  ;;  %11479 = vrot.lane.b32.xlu0 %v20794_v39, %s14559_s11 }
 0xf8a   :  { %v20854_v20 = vpop.permute.xlu0 %10991  ;;  %v20856_v30 = vpop.permute.xlu1 %11459 }
 0xf8c   :  { %11477 = vrot.lane.b32.xlu1 %v20685_v8, %s14559_s11  ;;  %11091 = vrot.lane.b32.xlu0 %v20820_v34, %s14555_s25 }
 0xf8e   :  { %v20862_v59 = vpop.permute.xlu0 %11175  ;;  %v20864_v10 = vpop.permute.xlu1 %11551 }
 0xf90   :  { %11167 = vrot.lane.b32.xlu1 %v20726_v13, %s14556_s26  ;;  %11169 = vrot.lane.b32.xlu0 %v20750_v1, %s14556_s26 }
 0xf92   :  { %v20870_v24 = vpop.permute.xlu0 %11289  ;;  %v10990_v61 = vpop.permute.xlu1 %10989 }
 0xf94   :  { %11181 = vrot.lane.b32.xlu1 %v20794_v39, %s14556_s26  ;;  %11183 = vrot.lane.b32.xlu0 %v20820_v34, %s14556_s26 }
 0xf96   :  { %v20876_v29 = vpop.permute.xlu0 %11381  ;;  %v20878_v28 = vpop.permute.xlu1 %11173 }
 0xf98   :  { %11555 = vrot.lane.b32.xlu1 %v20641_v11, %s14560_s14  ;;  %11557 = vrot.lane.b32.xlu0 %v20726_v13, %s14560_s14 }
 0xf9a   :  { %v20884_v3 = vpop.permute.xlu0 %11473  ;;  %v20886_v6 = vpop.permute.xlu1 %10899 }
 0xf9b   :  { %v10916_v7 = vsel %vm206_vm0, %v10898_v45, %v20886_v6  ;;  %v11008_v45 = vsel %vm299_vm1, %v10990_v61, %v20854_v20 }
 0xf9c   :  { %11569 = vrot.lane.b32.xlu1 %v20685_v8, %s14560_s14  ;;  %11571 = vrot.lane.b32.xlu0 %v20794_v39, %s14560_s14 }
 0xf9d   :  { %11793 = vmatprep.subr.bf16.mxu0 %v10916_v7  ;;  %v11001_v7 = vsel %vm299_vm1, %v14412_v47, %v20738_v21 }
 0xf9e   :  { %11794 = vmatpush1.bf16.msra.mxu0 %v10915_v12  ;;  %v20897_v48 = vpop.permute.xlu0 %11565  ;;  %v20899_v53 = vpop.permute.xlu1 %11083 }
 0xf9f   :  { %11795 = vmatprep.subr.bf16.mxu0 %v11002_v31  ;;  %v11007_v31 = vsel %vm299_vm1, %v14413_v15, %v10990_v61  ;;  %v11093_v15 = vsel %vm392_vm2, %v14417_v49, %v20754_v54 }
 0xfa0   :  { %11283 = vrot.lane.b32.xlu1 %v20750_v1, %s14557_s29  ;;  %11285 = vrot.lane.b32.xlu0 %v22188_v50, %s14557_s29 }
 0xfa2   :  { %11796 = vmatpush1.bf16.msra.mxu0 %v11001_v7  ;;  %v20910_v12 = vpop.permute.xlu0 %11277  ;;  %v10888_v36 = vpop.permute.xlu1 %10887  ;;  %v11094_v7 = vsel %vm392_vm2, %v20754_v54, %v20781_v2  ;;  %v14422_v54 = vunpack.i.l.bf16 %v20720_v27 }
 0xfa3   :  { %11797 = vmatprep.subr.bf16.mxu0 %v11008_v45 }
 0xfa4   :  { %11297 = vrot.lane.b32.xlu1 %v20820_v34, %s14557_s29  ;;  %11299 = vrot.lane.b32.xlu0 %v22188_v50, %s14557_s29 }
 0xfa6   :  { %11798 = vmatpush1.bf16.msra.mxu0 %v11007_v31  ;;  %v20920_v47 = vpop.permute.xlu0 %11369  ;;  %v20922_v21 = vpop.permute.xlu1 %10979  ;;  %v11100_v31 = vsel %vm392_vm2, %v20807_v23, %v20899_v53 }
 0xfa7   :  { %11799 = vmatprep.subr.bf16.mxu0 %v11094_v7  ;;  %v14418_v7 = vunpack.i.h.bf16 %v20722_v33  ;;  %v11186_v33 = vsel %vm485_vm3, %v20752_v14, %v20832_v42 }
 0xfa8   :  { %11375 = vrot.lane.b32.xlu1 %v20750_v1, %s14558_s10  ;;  %11377 = vrot.lane.b32.xlu0 %v22188_v50, %s14558_s10 }
 0xfa9   :  { %v11099_v49 = vsel %vm392_vm2, %v14418_v7, %v20807_v23 }
 0xfaa   :  { %11800 = vmatpush1.bf16.msra.mxu0 %v11093_v15  ;;  %v20934_v61 = vpop.permute.xlu0 %11461  ;;  %v20936_v45 = vpop.permute.xlu1 %11071 }
 0xfab   :  { %11801 = vmatprep.subr.bf16.mxu0 %v11100_v31  ;;  %v11185_v31 = vsel %vm485_vm3, %v14422_v54, %v20752_v14  ;;  %v10911_v54 = vsel %vm206_vm0, %v20763_v0, %v10888_v36 }
 0xfac   :  { %11391 = vrot.lane.b32.xlu0 %v22188_v50, %s14558_s10  ;;  %11389 = vrot.lane.b32.xlu1 %v20820_v34, %s14558_s10 }
 0xfae   :  { %11802 = vmatpush1.bf16.msra.mxu0 %v11099_v49  ;;  %v20949_v15 = vpop.permute.xlu0 %11553  ;;  %v20951_v37 = vpop.permute.xlu1 %11163  ;;  %v11192_v49 = vsel %vm485_vm3, %v20878_v28, %v20862_v59 }
 0xfaf   :  { %11803 = vmatprep.subr.bf16.mxu0 %v11186_v33  ;;  %v14423_v33 = vunpack.i.h.bf16 %v20720_v27 }
 0xfb0   :  { %11469 = vrot.lane.b32.xlu0 %v22188_v50, %s14559_s11  ;;  %11467 = vrot.lane.b32.xlu1 %v20750_v1, %s14559_s11 }
 0xfb1   :  { %v11191_v14 = vsel %vm485_vm3, %v14423_v33, %v20878_v28  ;;  %v13716_v33 = vld [vmem:[%s22073_s2 + $0x118] sm:$0xff] }
 0xfb2   :  { %11804 = vmatpush1.bf16.msra.mxu0 %v11185_v31  ;;  %v20962_v23 = vpop.permute.xlu0 %10889  ;;  %v20964_v7 = vpop.permute.xlu1 %11291 }
 0xfb3   :  { %11805 = vmatprep.subr.bf16.mxu0 %v11192_v49  ;;  %v10912_v16 = vsel %vm206_vm0, %v10888_v36, %v20962_v23  ;;  %v11301_v49 = vsel %vm602_vm4, %v20765_v9, %v20840_v19  ;;  %v11307_v9 = vsel %vm602_vm4, %v20822_v18, %v20870_v24 }
 0xfb4   :  { %11483 = vrot.lane.b32.xlu0 %v22188_v50, %s14559_s11  ;;  %11481 = vrot.lane.b32.xlu1 %v20820_v34, %s14559_s11 }
 0xfb5   :  { %11897 = vmatprep.subr.bf16.mxu1 %v10912_v16 }
 0xfb6   :  { %11806 = vmatpush1.bf16.msra.mxu0 %v11191_v14  ;;  %11898 = vmatpush1.bf16.msra.mxu1 %v10911_v54  ;;  %v20980_v27 = vpop.permute.xlu0 %10981  ;;  %v20982_v31 = vpop.permute.xlu1 %11383 }
 0xfb7   :  { %11807 = vmatprep.subr.bf16.mxu0 %v20505_v52  ;;  %v13714_v52 = vld [vmem:[%s22073_s2 + $0x108] sm:$0xff]  ;;  %v11004_v18 = vsel %vm299_vm1, %v20922_v21, %v20980_v27 }
 0xfb8   :  { %11561 = vrot.lane.b32.xlu0 %v22188_v50, %s14560_s14  ;;  %11559 = vrot.lane.b32.xlu1 %v20750_v1, %s14560_s14 }
 0xfba   :  { %11808 = vmatpush1.bf16.msra.mxu0 %v20481_v55  ;;  %v20990_v16 = vpop.permute.xlu0 %11073  ;;  %v20992_v28 = vpop.permute.xlu1 %11475  ;;  %v13713_v55 = vld [vmem:[%s22073_s2 + $0x100] sm:$0xff] }
 0xfbb   :  { %11809 = vmatprep.subr.bf16.mxu0 %v20563_v56  ;;  %v11302_v56 = vsel %vm602_vm4, %v20840_v19, %v20910_v12 }
 0xfbc   :  { %11575 = vrot.lane.b32.xlu0 %v22188_v50, %s14560_s14  ;;  %11573 = vrot.lane.b32.xlu1 %v20820_v34, %s14560_s14 }
 0xfbe   :  { %11810 = vmatpush1.bf16.msra.mxu0 %v20525_v26  ;;  %v21006_v0 = vpop.permute.xlu0 %11165  ;;  %v21008_v36 = vpop.permute.xlu1 %11177  ;;  %v13715_v26 = vld [vmem:[%s22073_s2 + $0x110] sm:$0xff] }
 0xfbf   :  { %11811 = vmatprep.subr.bf16.mxu0 %v11302_v56  ;;  %v11394_v56 = vsel %vm695_vm5, %v20848_v43, %v20920_v47 }
 0xfc0   :  { %11742 = vperm.xlu0 %14262, %v13714_v52   ;;  %11737 = vperm.xlu1 %14263, %v13713_v55   ;;  %v11308_v52 = vsel %vm602_vm4, %v20870_v24, %v20964_v7  ;;  %v11393_v24 = vsel %vm695_vm5, %v20783_v46, %v20848_v43  ;;  %v11399_v46 = vsel %vm695_vm5, %v20830_v41, %v20876_v29 }
 0xfc1   :  { %v11096_v41 = vsel %vm392_vm2, %v20936_v45, %v20990_v16 }
 0xfc2   :  { %11812 = vmatpush1.bf16.msra.mxu0 %v11301_v49  ;;  %v10902_v14 = vpop.permute.xlu0 %10901  ;;  %v21022_v54 = vpop.permute.xlu1 %11567 }
 0xfc3   :  { %11813 = vmatprep.subr.bf16.mxu0 %v11308_v52 }
 0xfc4   :  { %11752 = vperm.xlu0 %14262, %v13716_v33   ;;  %11747 = vperm.xlu1 %14263, %v13715_v26   ;;  %v10917_v33 = vsel %vm206_vm0, %v20886_v6, %v10902_v14  ;;  %v11003_v6 = vsel %vm299_vm1, %v20824_v35, %v20922_v21 }
 0xfc6   :  { %11814 = vmatpush1.bf16.msra.mxu0 %v11307_v9  ;;  %v10994_v19 = vpop.permute.xlu0 %10993  ;;  %v21030_v55 = vpop.permute.xlu1 %10903  ;;  %v11400_v9 = vsel %vm695_vm5, %v20876_v29, %v20982_v31  ;;  %v11485_v29 = vsel %vm788_vm6, %v20797_v51, %v20856_v30  ;;  %v21089_v51 = vld [vmem:[%s22072_s1 + $0x180] ss:$12 sps:$4 sm:$0xff]  }
 0xfc7   :  { %11815 = vmatprep.subr.bf16.mxu0 %v11394_v56  ;;  %v10918_v49 = vsel %vm206_vm0, %v10902_v14, %v21030_v55  ;;  %v11486_v56 = vsel %vm788_vm6, %v20856_v30, %v20934_v61  ;;  %v11009_v35 = vsel %vm299_vm1, %v20854_v20, %v10994_v19  ;;  %v11095_v30 = vsel %vm392_vm2, %v20781_v2, %v20936_v45 }
 0xfc8   :  { %11899 = vmatprep.subr.bf16.mxu1 %v10918_v49  ;;  %v11491_v20 = vsel %vm788_vm6, %v20838_v62, %v20884_v3  ;;  %v11577_v45 = vsel %vm881_vm7, %v20809_v57, %v20864_v10  ;;  %14430 = vrot.lane.b32.xlu0 %v22188_v50, %s14554_s24 }
 0xfc9   :  { %11900 = vmatpush1.bf16.msra.mxu1 %v10917_v33  ;;  %14425 = vrot.lane.b32.xlu1 %v22188_v50, %s14553_s17 }
 0xfca   :  { %11816 = vmatpush1.bf16.msra.mxu0 %v11393_v24  ;;  %v11086_v26 = vpop.permute.xlu0 %11085  ;;  %11901 = vmatprep.subr.bf16.mxu1 %v11004_v18  ;;  %v21045_v52 = vpop.permute.xlu1 %11279  ;;  %v11492_v24 = vsel %vm788_vm6, %v20884_v3, %v20992_v28  ;;  %v21103_v3 = vld [vmem:[%s22072_s1 + $0x19c] ss:$12 sps:$4 sm:$0xff]  }
 0xfcb   :  { %11817 = vmatprep.subr.bf16.mxu0 %v11400_v9  ;;  %v11578_v9 = vsel %vm881_vm7, %v20864_v10, %v20949_v15  ;;  %v11101_v62 = vsel %vm392_vm2, %v20899_v53, %v11086_v26  ;;  %v11187_v53 = vsel %vm485_vm3, %v20832_v42, %v20951_v37  ;;  %v11583_v10 = vsel %vm881_vm7, %v20846_v32, %v20897_v48 }
 0xfcc   :  { %14440 = vrot.lane.b32.xlu0 %v22188_v50, %s14556_s26 }
 0xfcd   :  { %11902 = vmatpush1.bf16.msra.mxu1 %v11003_v6  ;;  %v11188_v6 = vsel %vm485_vm3, %v20951_v37, %v21006_v0  ;;  %v11193_v37 = vsel %vm485_vm3, %v20862_v59, %v21008_v36  ;;  %14435 = vrot.lane.b32.xlu1 %v22188_v50, %s14555_s25 }
 0xfce   :  { %11818 = vmatpush1.bf16.msra.mxu0 %v11399_v46  ;;  %v21056_v43 = vpop.permute.xlu0 %11179  ;;  %v21058_v14 = vpop.permute.xlu1 %10995 }
 0xfcf   :  { %11819 = vmatprep.subr.bf16.mxu0 %v11486_v56  ;;  %v11010_v49 = vsel %vm299_vm1, %v10994_v19, %v21058_v14  ;;  %v11194_v57 = vsel %vm485_vm3, %v21008_v36, %v21056_v43 }
 0xfd0   :  { %11903 = vmatprep.subr.bf16.mxu1 %v11010_v49  ;;  %v11584_v49 = vsel %vm881_vm7, %v20897_v48, %v21022_v54 }
 0xfd1   :  { %11904 = vmatpush1.bf16.msra.mxu1 %v11009_v35 }
 0xfd2   :  { %11820 = vmatpush1.bf16.msra.mxu0 %v11485_v29  ;;  %v21073_v21 = vpop.permute.xlu0 %11281  ;;  %11905 = vmatprep.subr.bf16.mxu1 %v11096_v41  ;;  %v21075_v33 = vpop.permute.xlu1 %11371  ;;  %v21143_v41 = vld [vmem:[%s22072_s1 + $0x188] ss:$12 sps:$4 sm:$0xff]  }
 0xfd3   :  { %11821 = vmatprep.subr.bf16.mxu0 %v11492_v24 }
 0xfd5   :  { %11906 = vmatpush1.bf16.msra.mxu1 %v11095_v30 }
 0xfd6   :  { %11822 = vmatpush1.bf16.msra.mxu0 %v11491_v20  ;;  %v21091_v19 = vpop.permute.xlu0 %11373  ;;  %v21093_v18 = vpop.permute.xlu1 %11087 }
 0xfd7   :  { %11844 = vmatprep.subr.bf16.mxu0 %v11578_v9  ;;  %v11102_v2 = vsel %vm392_vm2, %v11086_v26, %v21093_v18  ;;  %v21130_v26 = vld [vmem:[%s22072_s1 + $0x198] ss:$12 sps:$4 sm:$0xff]  }
 0xfd8   :  { %11907 = vmatprep.subr.bf16.mxu1 %v11102_v2 }
 0xfd9   :  { %11824 = vmatmul.mubr.bf16.vlgmr.msra.gmra.mrb[96].mxu0 %v21089_v51  ;;  %11908 = vmatpush1.bf16.msra.mxu1 %v11101_v62 }
 0xfda   :  { %11845 = vmatpush1.bf16.msra.mxu0 %v11577_v45  ;;  %v10894_v46 = vpop.permute.xlu0 %10893  ;;  %11909 = vmatprep.subr.bf16.mxu1 %v11188_v6  ;;  %v11294_v56 = vpop.permute.xlu1 %11293 }
 0xfdb   :  { %11846 = vmatprep.subr.bf16.mxu0 %v11584_v49  ;;  %11833 = vmatprep.mubr.bf16.mxu0 %v21103_v3 }
 0xfdd   :  { %11910 = vmatpush1.bf16.msra.mxu1 %v11187_v53 }
 0xfde   :  { %11847 = vmatpush1.bf16.msra.mxu0 %v11583_v10  ;;  %v10986_v35 = vpop.permute.xlu0 %10985  ;;  %11911 = vmatprep.subr.bf16.mxu1 %v11194_v57  ;;  %v11386_v29 = vpop.permute.xlu1 %11385 }
 0xfe1   :  { %11834 = vmatmul.mubr.bf16.gmra.mrb[100].mxu0 %v21130_v26  ;;  %11912 = vmatpush1.bf16.msra.mxu1 %v11193_v37 }
 0xfe2   :  { %v11078_v48 = vpop.permute.xlu0 %11077  ;;  %11913 = vmatprep.subr.bf16.mxu1 %v20641_v11  ;;  %v10892_v32 = vpop.permute.xlu1 %10891  ;;  %11876 = vmatprep.mubr.bf16.mxu0 %v22188_v50 }
 0xfe3   :  { %v10914_v42 = vsel %vm206_vm0, %v10892_v32, %v10894_v46  ;;  %v10913_v11 = vsel %vm206_vm0, %v20962_v23, %v10892_v32 }
 0xfe4   :  { %12003 = vmatprep.subr.bf16.mxu0 %v10914_v42 }
 0xfe5   :  { %11914 = vmatpush1.bf16.msra.mxu1 %v20601_v4  ;;  %v11304_v4 = vsel %vm602_vm4, %v21045_v52, %v21073_v21 }
 0xfe6   :  { %v21145_v59 = vpop.permute.xlu0 %11295  ;;  %11915 = vmatprep.subr.bf16.mxu1 %v20685_v8  ;;  %v10984_v36 = vpop.permute.xlu1 %10983  ;;  %v11303_v8 = vsel %vm602_vm4, %v20910_v12, %v21045_v52  ;;  %v11309_v12 = vsel %vm602_vm4, %v20964_v7, %v11294_v56  ;;  %v11396_v52 = vsel %vm695_vm5, %v21075_v33, %v21091_v19  ;;  %v11395_v7 = vsel %vm695_vm5, %v20920_v47, %v21075_v33 }
 0xfe7   :  { %v11310_v23 = vsel %vm602_vm4, %v11294_v56, %v21145_v59  ;;  %v11006_v46 = vsel %vm299_vm1, %v10984_v36, %v10986_v35  ;;  %v11401_v47 = vsel %vm695_vm5, %v20982_v31, %v11386_v29 }
 0xfe9   :  { %13723 = vmatmul.mubr.msk.bf16.vlgmr.msra.gmra.mrb[96].mxu0 %vm1088_vm8, %v21143_v41  ;;  %11916 = vmatpush1.bf16.msra.mxu1 %v20645_v58  ;;  %v21167_v58 = vld [vmem:[%s22072_s1 + $0x1a0] ss:$12 sps:$4 sm:$0xff]  }
 0xfea   :  { %12004 = vmatpush1.bf16.msra.mxu0 %v10913_v11  ;;  %v21156_v24 = vpop.permute.xlu0 %11387  ;;  %11917 = vmatprep.subr.bf16.mxu1 %v11304_v4  ;;  %v11076_v30 = vpop.permute.xlu1 %11075 }
 0xfeb   :  { %11886 = vmatprep.mubr.bf16.mxu0 %v22188_v50  ;;  %v11402_v56 = vsel %vm695_vm5, %v11386_v29, %v21156_v24  ;;  %v11098_v35 = vsel %vm392_vm2, %v11076_v30, %v11078_v48 }
 0xfed   :  { %11918 = vmatpush1.bf16.msra.mxu1 %v11303_v8 }
 0xfee   :  { %v10908_v20 = vpop.permute.xlu0 %10907  ;;  %11919 = vmatprep.subr.bf16.mxu1 %v11310_v23  ;;  %v10906_v9 = vpop.permute.xlu1 %10905 }
 0xfef   :  { %v10920_v2 = vsel %vm206_vm0, %v10906_v9, %v10908_v20  ;;  %v10919_v62 = vsel %vm206_vm0, %v21030_v55, %v10906_v9  ;;  %v11005_v55 = vsel %vm299_vm1, %v20980_v27, %v10984_v36 }
 0xff0   :  { %12005 = vmatprep.subr.bf16.mxu0 %v10920_v2 }
 0xff1   :  { %13724 = vmatmul.mubr.msk.bf16.gmra.mrb[100].mxu0 %vm1088_vm8, %v21167_v58  ;;  %11920 = vmatpush1.bf16.msra.mxu1 %v11309_v12 }
 0xff2   :  { %12006 = vmatpush1.bf16.msra.mxu0 %v10919_v62  ;;  %v21179_v45 = vpop.permute.xlu0 %11465  ;;  %11921 = vmatprep.subr.bf16.mxu1 %v11396_v52  ;;  %v11464_v6 = vpop.permute.xlu1 %11463 }
 0xff3   :  { %12007 = vmatprep.subr.bf16.mxu0 %v11006_v46  ;;  %12035 = vmatprep.mubr.bf16.mxu0 %v20700_v44  ;;  %v11488_v27 = vsel %vm788_vm6, %v11464_v6, %v21179_v45  ;;  %v11487_v37 = vsel %vm788_vm6, %v20934_v61, %v11464_v6 }
 0xff5   :  { %11922 = vmatpush1.bf16.msra.mxu1 %v11395_v7 }
 0xff6   :  { %12008 = vmatpush1.bf16.msra.mxu0 %v11005_v55  ;;  %v11000_v49 = vpop.permute.xlu0 %10999  ;;  %11923 = vmatprep.subr.bf16.mxu1 %v11402_v56  ;;  %v10998_v53 = vpop.permute.xlu1 %10997 }
 0xff7   :  { %v11012_v10 = vsel %vm299_vm1, %v10998_v53, %v11000_v49  ;;  %v11011_v44 = vsel %vm299_vm1, %v21058_v14, %v10998_v53  ;;  %v11097_v14 = vsel %vm392_vm2, %v20990_v16, %v11076_v30 }
 0xff8   :  { %12009 = vmatprep.subr.bf16.mxu0 %v11012_v10 }
 0xff9   :  { %11924 = vmatpush1.bf16.msra.mxu1 %v11401_v47 }
 0xffa   :  { %12010 = vmatpush1.bf16.msra.mxu0 %v11011_v44  ;;  %v21197_v33 = vpop.permute.xlu0 %11479  ;;  %11925 = vmatprep.subr.bf16.mxu1 %v11488_v27  ;;  %v11090_v57 = vpop.permute.xlu1 %11089 }
 0xffb   :  { %12011 = vmatprep.subr.bf16.mxu0 %v11098_v35  ;;  %v11103_v61 = vsel %vm392_vm2, %v21093_v18, %v11090_v57 }
 0xffd   :  { %11926 = vmatpush1.bf16.msra.mxu1 %v11487_v37 }
 0xffe   :  { %12012 = vmatpush1.bf16.msra.mxu0 %v11097_v14  ;;  %v11092_v31 = vpop.permute.xlu0 %11091  ;;  %v11478_v29 = vpop.permute.xlu1 %11477 }
 0xfff   :  { %v11494_v32 = vsel %vm788_vm6, %v11478_v29, %v21197_v33  ;;  %v11104_v42 = vsel %vm392_vm2, %v11090_v57, %v11092_v31  ;;  %v11493_v36 = vsel %vm788_vm6, %v20992_v28, %v11478_v29 }
0x1000   :  { %11927 = vmatprep.subr.bf16.mxu1 %v11494_v32  ;;  %12013 = vmatprep.subr.bf16.mxu0 %v11104_v42 }
0x1001   :  { %11928 = vmatpush1.bf16.msra.mxu1 %v11493_v36 }
0x1002   :  { %12014 = vmatpush1.bf16.msra.mxu0 %v11103_v61  ;;  %v11170_v48 = vpop.permute.xlu0 %11169  ;;  %v11168_v16 = vpop.permute.xlu1 %11167 }
0x1003   :  { %v11190_v11 = vsel %vm485_vm3, %v11168_v16, %v11170_v48  ;;  %v11189_v4 = vsel %vm485_vm3, %v21006_v0, %v11168_v16 }
0x1004   :  { %11930 = vmatmul.mubr.bf16.vlgmr.msra.gmra.mrb[96].mxu1 %v21089_v51  ;;  %12015 = vmatprep.subr.bf16.mxu0 %v11190_v11 }
0x1005   :  { %11939 = vmatprep.mubr.bf16.mxu1 %v21103_v3 }
0x1006   :  { %12016 = vmatpush1.bf16.msra.mxu0 %v11189_v4  ;;  %v11184_v28 = vpop.permute.xlu0 %11183  ;;  %v11182_v30 = vpop.permute.xlu1 %11181 }
0x1007   :  { %v11196_v8 = vsel %vm485_vm3, %v11182_v30, %v11184_v28  ;;  %v11195_v18 = vsel %vm485_vm3, %v21056_v43, %v11182_v30 }
0x1008   :  { %12017 = vmatprep.subr.bf16.mxu0 %v11196_v8 }
0x100a   :  { %12018 = vmatpush1.bf16.msra.mxu0 %v11195_v18  ;;  %v11558_v23 = vpop.permute.xlu0 %11557  ;;  %v11556_v20 = vpop.permute.xlu1 %11555 }
0x100b   :  { %12019 = vmatprep.subr.bf16.mxu0 %v20750_v1  ;;  %v11580_v0 = vsel %vm881_vm7, %v11556_v20, %v11558_v23  ;;  %v11579_v9 = vsel %vm881_vm7, %v20949_v15, %v11556_v20 }
0x100c   :  { %11940 = vmatmul.mubr.bf16.gmra.mrb[100].mxu1 %v21130_v26  ;;  %11950 = vmatprep.subr.bf16.mxu1 %v11580_v0 }
0x100d   :  { %11951 = vmatpush1.bf16.msra.mxu1 %v11579_v9  ;;  %11982 = vmatprep.mubr.bf16.mxu1 %v22188_v50 }
0x100e   :  { %12020 = vmatpush1.bf16.msra.mxu0 %v20726_v13  ;;  %v11572_v43 = vpop.permute.xlu0 %11571  ;;  %v11570_v2 = vpop.permute.xlu1 %11569 }
0x100f   :  { %12021 = vmatprep.subr.bf16.mxu0 %v20820_v34  ;;  %v11586_v62 = vsel %vm881_vm7, %v11570_v2, %v11572_v43  ;;  %v11585_v1 = vsel %vm881_vm7, %v21022_v54, %v11570_v2 }
0x1010   :  { %11952 = vmatprep.subr.bf16.mxu1 %v11586_v62 }
0x1011   :  { %11953 = vmatpush1.bf16.msra.mxu1 %v11585_v1 }
0x1012   :  { %12022 = vmatpush1.bf16.msra.mxu0 %v20794_v39  ;;  %v11286_v15 = vpop.permute.xlu0 %11285  ;;  %v11284_v12 = vpop.permute.xlu1 %11283 }
0x1013   :  { %v11306_v52 = vsel %vm602_vm4, %v11284_v12, %v11286_v15  ;;  %v11305_v13 = vsel %vm602_vm4, %v21073_v21, %v11284_v12 }
0x1014   :  { %13725 = vmatmul.mubr.msk.bf16.vlgmr.msra.gmra.mrb[96].mxu1 %vm1088_vm8, %v21143_v41  ;;  %12023 = vmatprep.subr.bf16.mxu0 %v11306_v52 }
0x1015   :  { %11992 = vmatprep.mubr.bf16.mxu1 %v22188_v50 }
0x1016   :  { %12024 = vmatpush1.bf16.msra.mxu0 %v11305_v13  ;;  %v11300_v34 = vpop.permute.xlu0 %11299  ;;  %v11298_v54 = vpop.permute.xlu1 %11297 }
0x1017   :  { %v11312_v6 = vsel %vm602_vm4, %v11298_v54, %v11300_v34  ;;  %v11311_v39 = vsel %vm602_vm4, %v21145_v59, %v11298_v54 }
0x1018   :  { %12025 = vmatprep.subr.bf16.mxu0 %v11312_v6 }
0x101a   :  { %12026 = vmatpush1.bf16.msra.mxu0 %v11311_v39  ;;  %v11378_v46 = vpop.permute.xlu0 %11377  ;;  %v11376_v7 = vpop.permute.xlu1 %11375 }
0x101b   :  { %v11398_v21 = vsel %vm695_vm5, %v11376_v7, %v11378_v46  ;;  %v11397_v55 = vsel %vm695_vm5, %v21091_v19, %v11376_v7 }
0x101c   :  { %13726 = vmatmul.mubr.msk.bf16.gmra.mrb[100].mxu1 %vm1088_vm8, %v21167_v58  ;;  %12027 = vmatprep.subr.bf16.mxu0 %v11398_v21 }
0x101e   :  { %12028 = vmatpush1.bf16.msra.mxu0 %v11397_v55  ;;  %v11392_v56 = vpop.permute.xlu0 %11391  ;;  %v11390_v49 = vpop.permute.xlu1 %11389 }
0x101f   :  { %v11404_v53 = vsel %vm695_vm5, %v11390_v49, %v11392_v56  ;;  %v11403_v59 = vsel %vm695_vm5, %v21156_v24, %v11390_v49 }
0x1020   :  { %12029 = vmatprep.subr.bf16.mxu0 %v11404_v53 }
0x1022   :  { %12030 = vmatpush1.bf16.msra.mxu0 %v11403_v59  ;;  %v11470_v10 = vpop.permute.xlu0 %11469  ;;  %v11468_v44 = vpop.permute.xlu1 %11467 }
0x1023   :  { %v11490_v47 = vsel %vm788_vm6, %v11468_v44, %v11470_v10  ;;  %v11489_v19 = vsel %vm788_vm6, %v21179_v45, %v11468_v44 }
0x1024   :  { %12031 = vmatprep.subr.bf16.mxu0 %v11490_v47 }
0x1026   :  { %12032 = vmatpush1.bf16.msra.mxu0 %v11489_v19  ;;  %v11484_v27 = vpop.permute.xlu0 %11483  ;;  %v11482_v57 = vpop.permute.xlu1 %11481 }
0x1027   :  { %v11496_v35 = vsel %vm788_vm6, %v11482_v57, %v11484_v27  ;;  %v11495_v37 = vsel %vm788_vm6, %v21197_v33, %v11482_v57 }
0x1028   :  { %12033 = vmatprep.subr.bf16.mxu0 %v11496_v35 }
0x102a   :  { %12034 = vmatpush1.bf16.msra.mxu0 %v11495_v37  ;;  %v11562_v24 = vpop.permute.xlu0 %11561  ;;  %v11560_v14 = vpop.permute.xlu1 %11559 }
0x102b   :  { %v11582_v31 = vsel %vm881_vm7, %v11560_v14, %v11562_v24  ;;  %v11581_v29 = vsel %vm881_vm7, %v11558_v23, %v11560_v14 }
0x102c   :  { %12056 = vmatprep.subr.bf16.mxu0 %v11582_v31 }
0x102d   :  { %12036 = vmatmul.mubr.bf16.vlgmr.msra.gmra.mrb[104].mxu0 %v21089_v51 }
0x102e   :  { %12057 = vmatpush1.bf16.msra.mxu0 %v11581_v29  ;;  %v11576_v45 = vpop.permute.xlu0 %11575  ;;  %v11574_v32 = vpop.permute.xlu1 %11573  ;;  %12045 = vmatprep.mubr.bf16.mxu0 %v21103_v3 }
0x102f   :  { %v11588_v42 = vsel %vm881_vm7, %v11574_v32, %v11576_v45  ;;  %v11587_v33 = vsel %vm881_vm7, %v11572_v43, %v11574_v32 }
0x1030   :  { %12058 = vmatprep.subr.bf16.mxu0 %v11588_v42 }
0x1032   :  { %12059 = vmatpush1.bf16.msra.mxu0 %v11587_v33 }
0x1035   :  { %12046 = vmatmul.mubr.bf16.gmra.mrb[108].mxu0 %v21130_v26 }
0x1036   :  { %12088 = vmatprep.mubr.bf16.mxu0 %v22188_v50 }
0x103d   :  { %13727 = vmatmul.mubr.msk.bf16.vlgmr.msra.gmra.mrb[104].mxu0 %vm1088_vm8, %v21143_v41 }
0x103e   :  { %12098 = vmatprep.mubr.bf16.mxu0 %v22188_v50 }
0x103f   :  { %v21275_v51 = vpop.permute.xlu1 %11737  ;;  %v21278_v36 = vpop.permute.xlu0 %11742 }
0x1043   :  { %v21285_v20 = vpop.permute.xlu1 %11747  ;;  %v21292_v15 = vpop.permute.xlu0 %11752 }
0x1045   :  { %13728 = vmatmul.mubr.msk.bf16.gmra.mrb[108].mxu0 %vm1088_vm8, %v21167_v58 }
0x10bc   :  { %v11878_v3 = vpop.f32.mrb[96].mxu0 }
0x10bd   :  { %v13945_v26 = vadd.f32 %v11878_v3, %v21275_v51  ;;  %v11880_v41 = vpop.f32.mrb[97].mxu0 }
0x10be   :  { %v13946_v61 = vadd.f32 %v11880_v41, %v21275_v51  ;;  %v11882_v48 = vpop.f32.mrb[98].mxu0 }
0x10bf   :  { %v12109_v16 = vmax.f32 %v13945_v26, 0.0  ;;  %v13947_v11 = vadd.f32 %v11882_v48, %v21278_v36  ;;  %v11884_v4 = vpop.f32.mrb[99].mxu0 }
0x10c0   :  { %v12110_v28 = vmax.f32 %v13946_v61, 0.0  ;;  %v13948_v30 = vadd.f32 %v11884_v4, %v21278_v36 }
0x10c1   :  { %v12115_v8 = vmax.f32 %v13947_v11, 0.0  ;;  %v12133_v18 = vmul.f32 %v12109_v16, %v15186_v60 }
0x10c2   :  { %v12116_v58 = vmax.f32 %v13948_v30, 0.0  ;;  %v12134_v0 = vmul.f32 %v12110_v28, %v15190_v5 }
0x10c3   :  { %v12139_v23 = vmul.f32 %v12115_v8, %v15186_v60 }
0x10c4   :  { %v12140_v9 = vmul.f32 %v12116_v58, %v15190_v5  ;;  %v11888_v43 = vpop.f32.mrb[100].mxu0 }
0x10c5   :  { %v21289_v2 = vpack.c.bf16 %v12139_v23, %v12133_v18  ;;  %v13949_v62 = vadd.f32 %v11888_v43, %v21285_v20  ;;  %v11890_v1 = vpop.f32.mrb[101].mxu0 }
0x10c6   :  { %v21294_v12 = vpack.c.bf16 %v12140_v9, %v12134_v0  ;;  %v13950_v52 = vadd.f32 %v11890_v1, %v21285_v20  ;;  %v11892_v13 = vpop.f32.mrb[102].mxu0 }
0x10c7   :  { %v12121_v34 = vmax.f32 %v13949_v62, 0.0  ;;  %v13951_v54 = vadd.f32 %v11892_v13, %v21292_v15  ;;  %v11894_v6 = vpop.f32.mrb[103].mxu0  ;;  %12303 = vrot.lane.b32.xlu0 %v21289_v2, %s14554_s24  ;;  %12211 = vrot.lane.b32.xlu1 %v21289_v2, %s14553_s17 }
0x10c8   :  { %v12122_v39 = vmax.f32 %v13950_v52, 0.0  ;;  %v13952_v46 = vadd.f32 %v11894_v6, %v21292_v15 }
0x10c9   :  { %v12127_v7 = vmax.f32 %v13951_v54, 0.0  ;;  %v12145_v55 = vmul.f32 %v12121_v34, %v15186_v60 }
0x10ca   :  { %v12128_v21 = vmax.f32 %v13952_v46, 0.0  ;;  %v12146_v49 = vmul.f32 %v12122_v39, %v15190_v5 }
0x10cb   :  { %v12151_v56 = vmul.f32 %v12127_v7, %v15186_v60  ;;  %12487 = vrot.lane.b32.xlu0 %v21289_v2, %s14556_s26  ;;  %12395 = vrot.lane.b32.xlu1 %v21289_v2, %s14555_s25 }
0x10cc   :  { %v12152_v53 = vmul.f32 %v12128_v21, %v15190_v5 }
0x10cd   :  { %v21311_v59 = vpack.c.bf16 %v12151_v56, %v12145_v55 }
0x10ce   :  { %v21313_v10 = vpack.c.bf16 %v12152_v53, %v12146_v49 }
0x10cf   :  { %12213 = vrot.lane.b32.xlu0 %v21294_v12, %s14553_s17  ;;  %12601 = vrot.lane.b32.xlu1 %v21289_v2, %s14557_s29 }
0x10d3   :  { %12397 = vrot.lane.b32.xlu0 %v21294_v12, %s14555_s25  ;;  %12693 = vrot.lane.b32.xlu1 %v21289_v2, %s14558_s10 }
0x10d7   :  { %12225 = vrot.lane.b32.xlu0 %v21311_v59, %s14553_s17  ;;  %12785 = vrot.lane.b32.xlu1 %v21289_v2, %s14559_s11 }
0x10db   :  { %12409 = vrot.lane.b32.xlu0 %v21311_v59, %s14555_s25  ;;  %12305 = vrot.lane.b32.xlu1 %v21294_v12, %s14554_s24 }
0x10df   :  { %12615 = vrot.lane.b32.xlu0 %v21311_v59, %s14557_s29  ;;  %12489 = vrot.lane.b32.xlu1 %v21294_v12, %s14556_s26 }
0x10e3   :  { %12707 = vrot.lane.b32.xlu0 %v21311_v59, %s14558_s10  ;;  %12603 = vrot.lane.b32.xlu1 %v21294_v12, %s14557_s29 }
0x10e7   :  { %12799 = vrot.lane.b32.xlu0 %v21311_v59, %s14559_s11  ;;  %12695 = vrot.lane.b32.xlu1 %v21294_v12, %s14558_s10  ;;  %v11984_v60 = vpop.f32.mrb[96].mxu1 }
0x10e8   :  { %v13953_v5 = vadd.f32 %v11984_v60, %v21275_v51  ;;  %v11986_v44 = vpop.f32.mrb[97].mxu1 }
0x10e9   :  { %v13954_v47 = vadd.f32 %v11986_v44, %v21275_v51  ;;  %v11988_v19 = vpop.f32.mrb[98].mxu1 }
0x10ea   :  { %v12111_v27 = vmax.f32 %v13953_v5, 0.0  ;;  %v13955_v57 = vadd.f32 %v11988_v19, %v21278_v36  ;;  %v11990_v35 = vpop.f32.mrb[99].mxu1 }
0x10eb   :  { %v12112_v37 = vmax.f32 %v13954_v47, 0.0  ;;  %v13956_v24 = vadd.f32 %v11990_v35, %v21278_v36  ;;  %12891 = vrot.lane.b32.xlu0 %v21311_v59, %s14560_s14  ;;  %12787 = vrot.lane.b32.xlu1 %v21294_v12, %s14559_s11 }
0x10ec   :  { %v12117_v14 = vmax.f32 %v13955_v57, 0.0  ;;  %v12135_v29 = vmul.f32 %v12111_v27, %v15232_v17 }
0x10ed   :  { %v12118_v31 = vmax.f32 %v13956_v24, 0.0  ;;  %v12136_v32 = vmul.f32 %v12112_v37, %v15236_v22 }
0x10ee   :  { %v12141_v45 = vmul.f32 %v12117_v14, %v15232_v17 }
0x10ef   :  { %v12142_v42 = vmul.f32 %v12118_v31, %v15236_v22  ;;  %12319 = vrot.lane.b32.xlu0 %v21313_v10, %s14554_s24  ;;  %12317 = vrot.lane.b32.xlu1 %v21311_v59, %s14554_s24  ;;  %v11994_v33 = vpop.f32.mrb[100].mxu1 }
0x10f0   :  { %v21359_v3 = vpack.c.bf16 %v12141_v45, %v12135_v29  ;;  %v13957_v26 = vadd.f32 %v11994_v33, %v21285_v20  ;;  %v11996_v41 = vpop.f32.mrb[101].mxu1 }
0x10f1   :  { %v21362_v61 = vpack.c.bf16 %v12142_v42, %v12136_v32  ;;  %v13958_v48 = vadd.f32 %v11996_v41, %v21285_v20  ;;  %v11998_v16 = vpop.f32.mrb[102].mxu1 }
0x10f2   :  { %v12123_v11 = vmax.f32 %v13957_v26, 0.0  ;;  %v13959_v4 = vadd.f32 %v11998_v16, %v21292_v15  ;;  %v12000_v28 = vpop.f32.mrb[103].mxu1 }
0x10f3   :  { %v12124_v30 = vmax.f32 %v13958_v48, 0.0  ;;  %v13960_v8 = vadd.f32 %v12000_v28, %v21292_v15  ;;  %12503 = vrot.lane.b32.xlu0 %v21313_v10, %s14556_s26  ;;  %12501 = vrot.lane.b32.xlu1 %v21311_v59, %s14556_s26 }
0x10f4   :  { %v12129_v58 = vmax.f32 %v13959_v4, 0.0  ;;  %v12147_v23 = vmul.f32 %v12123_v11, %v15232_v17 }
0x10f5   :  { %v12130_v18 = vmax.f32 %v13960_v8, 0.0  ;;  %v12148_v9 = vmul.f32 %v12124_v30, %v15236_v22 }
0x10f6   :  { %v12153_v0 = vmul.f32 %v12129_v58, %v15232_v17 }
0x10f7   :  { %v12154_v43 = vmul.f32 %v12130_v18, %v15236_v22  ;;  %12617 = vrot.lane.b32.xlu0 %v21313_v10, %s14557_s29  ;;  %12227 = vrot.lane.b32.xlu1 %v21313_v10, %s14553_s17 }
0x10f8   :  { %v21379_v62 = vpack.c.bf16 %v12153_v0, %v12147_v23 }
0x10f9   :  { %v21381_v1 = vpack.c.bf16 %v12154_v43, %v12148_v9 }
0x10fb   :  { %12709 = vrot.lane.b32.xlu0 %v21313_v10, %s14558_s10  ;;  %12879 = vrot.lane.b32.xlu1 %v21294_v12, %s14560_s14 }
0x10ff   :  { %12801 = vrot.lane.b32.xlu0 %v21313_v10, %s14559_s11  ;;  %12877 = vrot.lane.b32.xlu1 %v21289_v2, %s14560_s14 }
0x1103   :  { %12893 = vrot.lane.b32.xlu0 %v21313_v10, %s14560_s14  ;;  %12411 = vrot.lane.b32.xlu1 %v21313_v10, %s14555_s25 }
0x1107   :  { %12605 = vrot.lane.b32.xlu0 %v21359_v3, %s14557_s29  ;;  %12215 = vrot.lane.b32.xlu1 %v21359_v3, %s14553_s17 }
0x110b   :  { %12697 = vrot.lane.b32.xlu0 %v21359_v3, %s14558_s10  ;;  %12307 = vrot.lane.b32.xlu1 %v21359_v3, %s14554_s24 }
0x110f   :  { %12789 = vrot.lane.b32.xlu0 %v21359_v3, %s14559_s11  ;;  %12399 = vrot.lane.b32.xlu1 %v21359_v3, %s14555_s25 }
0x1110   :  { %v12090_v17 = vpop.f32.mrb[104].mxu0 }
0x1111   :  { %v13961_v22 = vadd.f32 %v12090_v17, %v21275_v51  ;;  %v12092_v52 = vpop.f32.mrb[105].mxu0 }
0x1112   :  { %v13962_v13 = vadd.f32 %v12092_v52, %v21275_v51  ;;  %v12094_v34 = vpop.f32.mrb[106].mxu0 }
0x1113   :  { %v12113_v54 = vmax.f32 %v13961_v22, 0.0  ;;  %v13963_v6 = vadd.f32 %v12094_v34, %v21278_v36  ;;  %v12096_v39 = vpop.f32.mrb[107].mxu0  ;;  %12881 = vrot.lane.b32.xlu0 %v21359_v3, %s14560_s14  ;;  %12491 = vrot.lane.b32.xlu1 %v21359_v3, %s14556_s26 }
0x1114   :  { %v12114_v46 = vmax.f32 %v13962_v13, 0.0  ;;  %v13964_v7 = vadd.f32 %v12096_v39, %v21278_v36 }
0x1115   :  { %v12119_v21 = vmax.f32 %v13963_v6, 0.0  ;;  %v12137_v56 = vmul.f32 %v12113_v54, %v15296_v40 }
0x1116   :  { %v12120_v55 = vmax.f32 %v13964_v7, 0.0  ;;  %v12138_v49 = vmul.f32 %v12114_v46, %v15304_v63 }
0x1117   :  { %v12143_v51 = vmul.f32 %v12119_v21, %v15296_v40  ;;  %12217 = vrot.lane.b32.xlu0 %v21362_v61, %s14553_s17  ;;  %12619 = vrot.lane.b32.xlu1 %v21379_v62, %s14557_s29 }
0x1118   :  { %v12144_v53 = vmul.f32 %v12120_v55, %v15304_v63  ;;  %v12100_v60 = vpop.f32.mrb[108].mxu0 }
0x1119   :  { %v21423_v5 = vpack.c.bf16 %v12143_v51, %v12137_v56  ;;  %v13965_v36 = vadd.f32 %v12100_v60, %v21285_v20  ;;  %v12102_v44 = vpop.f32.mrb[109].mxu0 }
0x111a   :  { %v21426_v47 = vpack.c.bf16 %v12144_v53, %v12138_v49  ;;  %v13966_v19 = vadd.f32 %v12102_v44, %v21285_v20  ;;  %v12104_v27 = vpop.f32.mrb[110].mxu0 }
0x111b   :  { %v12125_v57 = vmax.f32 %v13965_v36, 0.0  ;;  %v13967_v35 = vadd.f32 %v12104_v27, %v21292_v15  ;;  %v12106_v37 = vpop.f32.mrb[111].mxu0  ;;  %12309 = vrot.lane.b32.xlu0 %v21362_v61, %s14554_s24  ;;  %12711 = vrot.lane.b32.xlu1 %v21379_v62, %s14558_s10 }
0x111c   :  { %v12126_v24 = vmax.f32 %v13966_v19, 0.0  ;;  %v13968_v14 = vadd.f32 %v12106_v37, %v21292_v15  ;;  %v21468_v15 = vpop.permute.xlu1 %14425 }
0x111d   :  { %v12131_v31 = vmax.f32 %v13967_v35, 0.0  ;;  %v12149_v45 = vmul.f32 %v12125_v57, %v15296_v40  ;;  %v14427_v58 = vunpack.i.l.bf16 %v21468_v15  ;;  %v14428_v44 = vunpack.i.h.bf16 %v21468_v15 }
0x111e   :  { %v12132_v29 = vmax.f32 %v13968_v14, 0.0  ;;  %v12150_v32 = vmul.f32 %v12126_v24, %v15304_v63 }
0x111f   :  { %v12155_v20 = vmul.f32 %v12131_v31, %v15296_v40  ;;  %12401 = vrot.lane.b32.xlu0 %v21362_v61, %s14555_s25  ;;  %12803 = vrot.lane.b32.xlu1 %v21379_v62, %s14559_s11  ;;  %v21454_v40 = vld [vmem:[%s22072_s1 + $0x1b4] ss:$12 sps:$4 sm:$0xff]  }
0x1120   :  { %v12156_v42 = vmul.f32 %v12132_v29, %v15304_v63  ;;  %13151 = vmatprep.mubr.bf16.mxu1 %v21454_v40  ;;  %13257 = vmatprep.mubr.bf16.mxu0 %v21454_v40  ;;  %v21466_v63 = vpop.permute.xlu0 %14430  ;;  %v21480_v48 = vpop.permute.xlu1 %14435 }
0x1121   :  { %v21443_v33 = vpack.c.bf16 %v12155_v20, %v12149_v45  ;;  %v14432_v24 = vunpack.i.l.bf16 %v21466_v63  ;;  %v14433_v20 = vunpack.i.h.bf16 %v21466_v63  ;;  %v14437_v63 = vunpack.i.l.bf16 %v21480_v48 }
0x1122   :  { %v21445_v26 = vpack.c.bf16 %v12156_v42, %v12150_v32 }
0x1123   :  { %12493 = vrot.lane.b32.xlu0 %v21362_v61, %s14556_s26  ;;  %12895 = vrot.lane.b32.xlu1 %v21379_v62, %s14560_s14 }
0x1124   :  { %v21478_v41 = vpop.permute.xlu0 %14440 }
0x1127   :  { %12231 = vrot.lane.b32.xlu0 %v21381_v1, %s14553_s17  ;;  %12229 = vrot.lane.b32.xlu1 %v21379_v62, %s14553_s17 }
0x112b   :  { %12323 = vrot.lane.b32.xlu0 %v21381_v1, %s14554_s24  ;;  %12321 = vrot.lane.b32.xlu1 %v21379_v62, %s14554_s24 }
0x112f   :  { %12415 = vrot.lane.b32.xlu0 %v21381_v1, %s14555_s25  ;;  %12413 = vrot.lane.b32.xlu1 %v21379_v62, %s14555_s25 }
0x1133   :  { %12507 = vrot.lane.b32.xlu0 %v21381_v1, %s14556_s26  ;;  %12505 = vrot.lane.b32.xlu1 %v21379_v62, %s14556_s26 }
0x1137   :  { %12221 = vrot.lane.b32.xlu0 %v21426_v47, %s14553_s17  ;;  %12219 = vrot.lane.b32.xlu1 %v21423_v5, %s14553_s17 }
0x1139   :  { %v21486_v16 = vpop.permute.xlu0 %12303  ;;  %v12212_v11 = vpop.permute.xlu1 %12211 }
0x113a   :  { %v12237_v23 = vsel %vm206_vm0, %v14427_v58, %v12212_v11  ;;  %v12329_v14 = vsel %vm299_vm1, %v14432_v24, %v21486_v16  ;;  %v14443_v24 = vunpack.i.h.bf16 %v21478_v41 }
0x113b   :  { %12313 = vrot.lane.b32.xlu0 %v21426_v47, %s14554_s24  ;;  %12311 = vrot.lane.b32.xlu1 %v21423_v5, %s14554_s24 }
0x113d   :  { %v21492_v4 = vpop.permute.xlu0 %12487  ;;  %v21494_v28 = vpop.permute.xlu1 %12395 }
0x113f   :  { %12405 = vrot.lane.b32.xlu0 %v21426_v47, %s14555_s25  ;;  %12403 = vrot.lane.b32.xlu1 %v21423_v5, %s14555_s25 }
0x1141   :  { %v21500_v30 = vpop.permute.xlu0 %12213  ;;  %v21502_v8 = vpop.permute.xlu1 %12601 }
0x1142   :  { %v12238_v18 = vsel %vm206_vm0, %v12212_v11, %v21500_v30  ;;  %v12421_v11 = vsel %vm392_vm2, %v14437_v63, %v21494_v28 }
0x1143   :  { %12497 = vrot.lane.b32.xlu0 %v21426_v47, %s14556_s26  ;;  %12495 = vrot.lane.b32.xlu1 %v21423_v5, %s14556_s26 }
0x1144   :  { %13119 = vmatprep.subr.bf16.mxu1 %v12238_v18 }
0x1145   :  { %13120 = vmatpush1.bf16.msra.mxu1 %v12237_v23  ;;  %v21512_v0 = vpop.permute.xlu0 %12397  ;;  %v21514_v9 = vpop.permute.xlu1 %12693 }
0x1146   :  { %v12422_v15 = vsel %vm392_vm2, %v21494_v28, %v21512_v0 }
0x1147   :  { %12235 = vrot.lane.b32.xlu0 %v21445_v26, %s14553_s17  ;;  %12233 = vrot.lane.b32.xlu1 %v21443_v33, %s14553_s17 }
0x1149   :  { %v12226_v43 = vpop.permute.xlu0 %12225  ;;  %v12786_v17 = vpop.permute.xlu1 %12785 }
0x114a   :  { %v12243_v27 = vsel %vm206_vm0, %v14428_v44, %v12226_v43 }
0x114b   :  { %12609 = vrot.lane.b32.xlu0 %v21423_v5, %s14557_s29  ;;  %12607 = vrot.lane.b32.xlu1 %v21362_v61, %s14557_s29 }
0x114d   :  { %v21524_v22 = vpop.permute.xlu0 %12409  ;;  %v21526_v52 = vpop.permute.xlu1 %12305 }
0x114e   :  { %v12330_v35 = vsel %vm299_vm1, %v21486_v16, %v21526_v52 }
0x114f   :  { %12327 = vrot.lane.b32.xlu0 %v21445_v26, %s14554_s24  ;;  %12325 = vrot.lane.b32.xlu1 %v21443_v33, %s14554_s24 }
0x1151   :  { %v21532_v13 = vpop.permute.xlu0 %12615  ;;  %v21534_v34 = vpop.permute.xlu1 %12489 }
0x1153   :  { %14445 = vrot.lane.b32.xlu0 %v22188_v50, %s14557_s29  ;;  %12417 = vrot.lane.b32.xlu1 %v21443_v33, %s14555_s25 }
0x1155   :  { %v21540_v54 = vpop.permute.xlu0 %12707  ;;  %v21542_v6 = vpop.permute.xlu1 %12603 }
0x1157   :  { %12419 = vrot.lane.b32.xlu0 %v21445_v26, %s14555_s25  ;;  %12509 = vrot.lane.b32.xlu1 %v21443_v33, %s14556_s26 }
0x1159   :  { %v21548_v39 = vpop.permute.xlu0 %12799  ;;  %v21550_v46 = vpop.permute.xlu1 %12695 }
0x115b   :  { %12623 = vrot.lane.b32.xlu0 %v21443_v33, %s14557_s29  ;;  %12611 = vrot.lane.b32.xlu1 %v21426_v47, %s14557_s29 }
0x115d   :  { %v21556_v7 = vpop.permute.xlu0 %12891  ;;  %v21558_v21 = vpop.permute.xlu1 %12787 }
0x115e   :  { %v21562_v55 = vsel %vm788_vm6, %v12786_v17, %v21558_v21 }
0x115f   :  { %12511 = vrot.lane.b32.xlu0 %v21445_v26, %s14556_s26  ;;  %12621 = vrot.lane.b32.xlu1 %v21381_v1, %s14557_s29 }
0x1161   :  { %v21568_v56 = vpop.permute.xlu0 %12319  ;;  %v12318_v51 = vpop.permute.xlu1 %12317 }
0x1162   :  { %v12336_v29 = vsel %vm299_vm1, %v12318_v51, %v21568_v56  ;;  %v12335_v32 = vsel %vm299_vm1, %v14433_v20, %v12318_v51  ;;  %v12514_v51 = vsel %vm485_vm3, %v21492_v4, %v21534_v34 }
0x1163   :  { %12699 = vrot.lane.b32.xlu0 %v21362_v61, %s14558_s10  ;;  %12701 = vrot.lane.b32.xlu1 %v21423_v5, %s14558_s10 }
0x1165   :  { %v21574_v49 = vpop.permute.xlu0 %12503  ;;  %v21576_v53 = vpop.permute.xlu1 %12501 }
0x1167   :  { %12703 = vrot.lane.b32.xlu0 %v21426_v47, %s14558_s10  ;;  %14450 = vrot.lane.b32.xlu1 %v22188_v50, %s14558_s10 }
0x1169   :  { %v21582_v60 = vpop.permute.xlu0 %12617  ;;  %v21584_v36 = vpop.permute.xlu1 %12227 }
0x116a   :  { %v12244_v19 = vsel %vm206_vm0, %v12226_v43, %v21584_v36  ;;  %v14438_v43 = vunpack.i.h.bf16 %v21480_v48  ;;  %v14442_v48 = vunpack.i.l.bf16 %v21478_v41 }
0x116b   :  { %12713 = vrot.lane.b32.xlu0 %v21381_v1, %s14558_s10  ;;  %12715 = vrot.lane.b32.xlu1 %v21443_v33, %s14558_s10 }
0x116c   :  { %13121 = vmatprep.subr.bf16.mxu1 %v12244_v19  ;;  %v12427_v28 = vsel %vm392_vm2, %v14438_v43, %v21524_v22 }
0x116d   :  { %13122 = vmatpush1.bf16.msra.mxu1 %v12243_v27  ;;  %v21594_v57 = vpop.permute.xlu0 %12709  ;;  %v21599_v37 = vpop.permute.xlu1 %12879  ;;  %v12520_v27 = vsel %vm485_vm3, %v21576_v53, %v21574_v49 }
0x116e   :  { %13123 = vmatprep.subr.bf16.mxu1 %v12330_v35 }
0x116f   :  { %12793 = vrot.lane.b32.xlu0 %v21423_v5, %s14559_s11  ;;  %12625 = vrot.lane.b32.xlu1 %v21445_v26, %s14557_s29 }
0x1171   :  { %13124 = vmatpush1.bf16.msra.mxu1 %v12329_v14  ;;  %v21608_v31 = vpop.permute.xlu0 %12801  ;;  %v21612_v45 = vpop.permute.xlu1 %12877 }
0x1172   :  { %13125 = vmatprep.subr.bf16.mxu1 %v12336_v29 }
0x1173   :  { %12797 = vrot.lane.b32.xlu0 %v22188_v50, %s14559_s11  ;;  %12791 = vrot.lane.b32.xlu1 %v21362_v61, %s14559_s11 }
0x1175   :  { %13126 = vmatpush1.bf16.msra.mxu1 %v12335_v32  ;;  %v21620_v42 = vpop.permute.xlu0 %12893  ;;  %v21625_v16 = vpop.permute.xlu1 %12411 }
0x1176   :  { %13127 = vmatprep.subr.bf16.mxu1 %v12422_v15  ;;  %v12428_v18 = vsel %vm392_vm2, %v21524_v22, %v21625_v16  ;;  %v12513_v22 = vsel %vm485_vm3, %v14442_v48, %v21492_v4  ;;  %v12519_v4 = vsel %vm485_vm3, %v14443_v24, %v21576_v53  ;;  %v13737_v15 = vld [vmem:[%s22073_s2 + $0x120] sm:$0xff] }
0x1177   :  { %12717 = vrot.lane.b32.xlu0 %v21445_v26, %s14558_s10  ;;  %12795 = vrot.lane.b32.xlu1 %v21426_v47, %s14559_s11 }
0x1179   :  { %13128 = vmatpush1.bf16.msra.mxu1 %v12421_v11  ;;  %v21634_v58 = vpop.permute.xlu0 %12605  ;;  %v12216_v23 = vpop.permute.xlu1 %12215 }
0x117a   :  { %13129 = vmatprep.subr.bf16.mxu1 %v12428_v18 }
0x117b   :  { %12807 = vrot.lane.b32.xlu0 %v21443_v33, %s14559_s11  ;;  %12805 = vrot.lane.b32.xlu1 %v21381_v1, %s14559_s11 }
0x117d   :  { %13130 = vmatpush1.bf16.msra.mxu1 %v12427_v28  ;;  %v21646_v17 = vpop.permute.xlu0 %12697  ;;  %v21651_v44 = vpop.permute.xlu1 %12307 }
0x117e   :  { %13131 = vmatprep.subr.bf16.mxu1 %v12514_v51  ;;  %v12722_v28 = vsel %vm695_vm5, %v21550_v46, %v21646_v17 }
0x117f   :  { %12811 = vrot.lane.b32.xlu0 %v22188_v50, %s14559_s11  ;;  %12809 = vrot.lane.b32.xlu1 %v21445_v26, %s14559_s11 }
0x1181   :  { %13132 = vmatpush1.bf16.msra.mxu1 %v12513_v22  ;;  %v21660_v19 = vpop.permute.xlu0 %12789  ;;  %v21665_v35 = vpop.permute.xlu1 %12399 }
0x1182   :  { %13133 = vmatprep.subr.bf16.mxu1 %v12520_v27 }
0x1183   :  { %12885 = vrot.lane.b32.xlu0 %v21423_v5, %s14560_s14  ;;  %12883 = vrot.lane.b32.xlu1 %v21362_v61, %s14560_s14 }
0x1185   :  { %13134 = vmatpush1.bf16.msra.mxu1 %v12519_v4  ;;  %v21674_v14 = vpop.permute.xlu0 %12881  ;;  %v21676_v29 = vpop.permute.xlu1 %12491 }
0x1186   :  { %13135 = vmatprep.subr.bf16.mxu1 %v21294_v12  ;;  %v12239_v12 = vsel %vm206_vm0, %v21500_v30, %v12216_v23  ;;  %v13738_v30 = vld [vmem:[%s22073_s2 + $0x128] sm:$0xff] }
0x1187   :  { %12889 = vrot.lane.b32.xlu0 %v22188_v50, %s14560_s14  ;;  %12887 = vrot.lane.b32.xlu1 %v21426_v47, %s14560_s14 }
0x1189   :  { %13136 = vmatpush1.bf16.msra.mxu1 %v21289_v2  ;;  %v21684_v41 = vpop.permute.xlu0 %12217  ;;  %v21686_v20 = vpop.permute.xlu1 %12619 }
0x118a   :  { %13137 = vmatprep.subr.bf16.mxu1 %v21313_v10  ;;  %v12240_v53 = vsel %vm206_vm0, %v12216_v23, %v21684_v41  ;;  %v12630_v10 = vsel %vm602_vm4, %v21542_v6, %v21634_v58  ;;  %v12636_v11 = vsel %vm602_vm4, %v21582_v60, %v21686_v20  ;;  %v13739_v23 = vld [vmem:[%s22073_s2 + $0x130] sm:$0xff] }
0x118b   :  { %12899 = vrot.lane.b32.xlu0 %v21443_v33, %s14560_s14  ;;  %12897 = vrot.lane.b32.xlu1 %v21381_v1, %s14560_s14 }
0x118c   :  { %13225 = vmatprep.subr.bf16.mxu0 %v12240_v53 }
0x118d   :  { %13138 = vmatpush1.bf16.msra.mxu1 %v21311_v59  ;;  %13226 = vmatpush1.bf16.msra.mxu0 %v12239_v12  ;;  %v21698_v2 = vpop.permute.xlu0 %12309  ;;  %v21703_v32 = vpop.permute.xlu1 %12711  ;;  %v12629_v59 = vsel %vm602_vm4, %v21502_v8, %v21542_v6  ;;  %v12635_v8 = vsel %vm602_vm4, %v21532_v13, %v21582_v60  ;;  %v13740_v6 = vld [vmem:[%s22073_s2 + $0x138] sm:$0xff]  ;;  %v12721_v13 = vsel %vm695_vm5, %v21514_v9, %v21550_v46 }
0x118e   :  { %13139 = vmatprep.subr.bf16.mxu1 %v12630_v10  ;;  %v12728_v48 = vsel %vm695_vm5, %v21594_v57, %v21703_v32  ;;  %v12727_v9 = vsel %vm695_vm5, %v21540_v54, %v21594_v57  ;;  %v12332_v46 = vsel %vm299_vm1, %v21651_v44, %v21698_v2  ;;  %v12331_v12 = vsel %vm299_vm1, %v21526_v52, %v21651_v44  ;;  %v21786_v44 = vld [vmem:[%s22072_s1 + $0x1b0] ss:$12 sps:$4 sm:$0xff]  }
0x118f   :  { %12903 = vrot.lane.b32.xlu0 %v22188_v50, %s14560_s14  ;;  %12901 = vrot.lane.b32.xlu1 %v21445_v26, %s14560_s14  ;;  %v12819_v52 = vsel %vm788_vm6, %v21548_v39, %v21608_v31  ;;  %v21796_v39 = vld [vmem:[%s22072_s1 + $0x1cc] ss:$12 sps:$4 sm:$0xff]  }
0x1191   :  { %13140 = vmatpush1.bf16.msra.mxu1 %v12629_v59  ;;  %v21718_v63 = vpop.permute.xlu0 %12401  ;;  %v21723_v18 = vpop.permute.xlu1 %12803 }
0x1192   :  { %13141 = vmatprep.subr.bf16.mxu1 %v12636_v11  ;;  %v12820_v10 = vsel %vm788_vm6, %v21608_v31, %v21723_v18  ;;  %v12423_v31 = vsel %vm392_vm2, %v21512_v0, %v21665_v35  ;;  %v12905_v11 = vsel %vm881_vm7, %v21612_v45, %v21599_v37 }
0x1193   :  { %13070 = vperm.xlu0 %14262, %v13738_v30   ;;  %13065 = vperm.xlu1 %14263, %v13737_v15  }
0x1195   :  { %13142 = vmatpush1.bf16.msra.mxu1 %v12635_v8  ;;  %v21734_v43 = vpop.permute.xlu0 %12493  ;;  %v21739_v51 = vpop.permute.xlu1 %12895 }
0x1196   :  { %13143 = vmatprep.subr.bf16.mxu1 %v12722_v28  ;;  %v12516_v45 = vsel %vm485_vm3, %v21676_v29, %v21734_v43 }
0x1197   :  { %13080 = vperm.xlu0 %14262, %v13740_v6   ;;  %13075 = vperm.xlu1 %14263, %v13739_v23   ;;  %v12912_v23 = vsel %vm881_vm7, %v21620_v42, %v21739_v51 }
0x1199   :  { %13144 = vmatpush1.bf16.msra.mxu1 %v12721_v13  ;;  %v21744_v60 = vpop.permute.xlu0 %12231  ;;  %v12230_v22 = vpop.permute.xlu1 %12229 }
0x119a   :  { %13145 = vmatprep.subr.bf16.mxu1 %v12728_v48  ;;  %v12245_v27 = vsel %vm206_vm0, %v21584_v36, %v12230_v22  ;;  %v12246_v24 = vsel %vm206_vm0, %v12230_v22, %v21744_v60  ;;  %v12814_v36 = vsel %vm788_vm6, %v21558_v21, %v21660_v19 }
0x119b   :  { %13227 = vmatprep.subr.bf16.mxu0 %v12246_v24 }
0x119c   :  { %13228 = vmatpush1.bf16.msra.mxu0 %v12245_v27 }
0x119d   :  { %13146 = vmatpush1.bf16.msra.mxu1 %v12727_v9  ;;  %v21759_v4 = vpop.permute.xlu0 %12323  ;;  %13229 = vmatprep.subr.bf16.mxu0 %v12332_v46  ;;  %v12322_v53 = vpop.permute.xlu1 %12321  ;;  %v21837_v9 = vld [vmem:[%s22072_s1 + $0x1b8] ss:$12 sps:$4 sm:$0xff]  }
0x119e   :  { %13147 = vmatprep.subr.bf16.mxu1 %v12814_v36  ;;  %v12338_v54 = vsel %vm299_vm1, %v12322_v53, %v21759_v4  ;;  %v12337_v59 = vsel %vm299_vm1, %v21568_v56, %v12322_v53  ;;  %v12906_v56 = vsel %vm881_vm7, %v21599_v37, %v21674_v14  ;;  %v12911_v37 = vsel %vm881_vm7, %v21556_v7, %v21620_v42 }
0x119f   :  { %v12515_v7 = vsel %vm485_vm3, %v21534_v34, %v21676_v29 }
0x11a0   :  { %13230 = vmatpush1.bf16.msra.mxu0 %v12331_v12 }
0x11a1   :  { %13148 = vmatpush1.bf16.msra.mxu1 %v21562_v55  ;;  %v21770_v57 = vpop.permute.xlu0 %12415  ;;  %13231 = vmatprep.subr.bf16.mxu0 %v12338_v54  ;;  %v12414_v21 = vpop.permute.xlu1 %12413  ;;  %v12424_v55 = vsel %vm392_vm2, %v21665_v35, %v21718_v63  ;;  %v21822_v35 = vld [vmem:[%s22072_s1 + $0x1c8] ss:$12 sps:$4 sm:$0xff]  }
0x11a2   :  { %13149 = vmatprep.subr.bf16.mxu1 %v12820_v10  ;;  %v12430_v8 = vsel %vm392_vm2, %v12414_v21, %v21770_v57  ;;  %v12429_v0 = vsel %vm392_vm2, %v21625_v16, %v12414_v21 }
0x11a4   :  { %13232 = vmatpush1.bf16.msra.mxu0 %v12337_v59 }
0x11a5   :  { %13150 = vmatpush1.bf16.msra.mxu1 %v12819_v52  ;;  %v21788_v30 = vpop.permute.xlu0 %12507  ;;  %13233 = vmatprep.subr.bf16.mxu0 %v12424_v55  ;;  %v12506_v15 = vpop.permute.xlu1 %12505 }
0x11a6   :  { %13172 = vmatprep.subr.bf16.mxu1 %v12906_v56  ;;  %v12522_v42 = vsel %vm485_vm3, %v12506_v15, %v21788_v30  ;;  %v12521_v24 = vsel %vm485_vm3, %v21574_v49, %v12506_v15 }
0x11a8   :  { %13152 = vmatmul.mubr.bf16.vlgmr.msra.gmra.mrb[104].mxu1 %v21786_v44  ;;  %13234 = vmatpush1.bf16.msra.mxu0 %v12423_v31 }
0x11a9   :  { %13173 = vmatpush1.bf16.msra.mxu1 %v12905_v11  ;;  %v12222_v6 = vpop.permute.xlu0 %12221  ;;  %13235 = vmatprep.subr.bf16.mxu0 %v12430_v8  ;;  %v12220_v28 = vpop.permute.xlu1 %12219 }
0x11aa   :  { %13174 = vmatprep.subr.bf16.mxu1 %v12912_v23  ;;  %13161 = vmatprep.mubr.bf16.mxu1 %v21796_v39  ;;  %v12242_v48 = vsel %vm206_vm0, %v12220_v28, %v12222_v6  ;;  %v12241_v46 = vsel %vm206_vm0, %v21684_v41, %v12220_v28 }
0x11ac   :  { %13236 = vmatpush1.bf16.msra.mxu0 %v12429_v0 }
0x11ad   :  { %13175 = vmatpush1.bf16.msra.mxu1 %v12911_v37  ;;  %v12314_v13 = vpop.permute.xlu0 %12313  ;;  %13237 = vmatprep.subr.bf16.mxu0 %v12516_v45  ;;  %v12312_v16 = vpop.permute.xlu1 %12311 }
0x11ae   :  { %13331 = vmatprep.subr.bf16.mxu1 %v12242_v48 }
0x11b0   :  { %13162 = vmatmul.mubr.bf16.gmra.mrb[108].mxu1 %v21822_v35  ;;  %13238 = vmatpush1.bf16.msra.mxu0 %v12515_v7 }
0x11b1   :  { %v12406_v22 = vpop.permute.xlu0 %12405  ;;  %13239 = vmatprep.subr.bf16.mxu0 %v12522_v42  ;;  %v12404_v27 = vpop.permute.xlu1 %12403  ;;  %13204 = vmatprep.mubr.bf16.mxu1 %v22188_v50 }
0x11b2   :  { %v12426_v55 = vsel %vm392_vm2, %v12404_v27, %v12406_v22  ;;  %v12425_v56 = vsel %vm392_vm2, %v21718_v63, %v12404_v27 }
0x11b4   :  { %13240 = vmatpush1.bf16.msra.mxu0 %v12521_v24 }
0x11b5   :  { %v12498_v34 = vpop.permute.xlu0 %12497  ;;  %13241 = vmatprep.subr.bf16.mxu0 %v21362_v61  ;;  %v12496_v29 = vpop.permute.xlu1 %12495  ;;  %v21854_v61 = vld [vmem:[%s22072_s1 + $0x1d0] ss:$12 sps:$4 sm:$0xff]  }
0x11b6   :  { %v12518_v8 = vsel %vm485_vm3, %v12496_v29, %v12498_v34  ;;  %v12517_v23 = vsel %vm485_vm3, %v21734_v43, %v12496_v29 }
0x11b8   :  { %13747 = vmatmul.mubr.msk.bf16.vlgmr.msra.gmra.mrb[104].mxu1 %vm1088_vm8, %v21837_v9  ;;  %13242 = vmatpush1.bf16.msra.mxu0 %v21359_v3 }
0x11b9   :  { %13332 = vmatpush1.bf16.msra.mxu1 %v12241_v46  ;;  %v12236_v49 = vpop.permute.xlu0 %12235  ;;  %13243 = vmatprep.subr.bf16.mxu0 %v21381_v1  ;;  %v12234_v36 = vpop.permute.xlu1 %12233  ;;  %v12334_v1 = vsel %vm299_vm1, %v12312_v16, %v12314_v13 }
0x11ba   :  { %v12247_v53 = vsel %vm206_vm0, %v21744_v60, %v12234_v36  ;;  %v12248_v12 = vsel %vm206_vm0, %v12234_v36, %v12236_v49  ;;  %13214 = vmatprep.mubr.bf16.mxu1 %v22188_v50 }
0x11bb   :  { %13333 = vmatprep.subr.bf16.mxu1 %v12248_v12 }
0x11bc   :  { %13244 = vmatpush1.bf16.msra.mxu0 %v21379_v62  ;;  %v12333_v62 = vsel %vm299_vm1, %v21698_v2, %v12312_v16 }
0x11bd   :  { %13334 = vmatpush1.bf16.msra.mxu1 %v12247_v53  ;;  %v21856_v3 = vpop.permute.xlu0 %12609  ;;  %v12608_v41 = vpop.permute.xlu1 %12607 }
0x11be   :  { %13335 = vmatprep.subr.bf16.mxu1 %v12334_v1  ;;  %v12631_v60 = vsel %vm602_vm4, %v21634_v58, %v12608_v41  ;;  %v12632_v54 = vsel %vm602_vm4, %v12608_v41, %v21856_v3 }
0x11bf   :  { %13245 = vmatprep.subr.bf16.mxu0 %v12632_v54 }
0x11c0   :  { %13748 = vmatmul.mubr.msk.bf16.gmra.mrb[108].mxu1 %vm1088_vm8, %v21854_v61  ;;  %13246 = vmatpush1.bf16.msra.mxu0 %v12631_v60 }
0x11c1   :  { %13336 = vmatpush1.bf16.msra.mxu1 %v12333_v62  ;;  %v12328_v10 = vpop.permute.xlu0 %12327  ;;  %v12326_v21 = vpop.permute.xlu1 %12325  ;;  %13363 = vmatprep.mubr.bf16.mxu1 %v21454_v40 }
0x11c2   :  { %v12339_v59 = vsel %vm299_vm1, %v21759_v4, %v12326_v21  ;;  %v12340_v58 = vsel %vm299_vm1, %v12326_v21, %v12328_v10 }
0x11c3   :  { %13337 = vmatprep.subr.bf16.mxu1 %v12340_v58 }
0x11c5   :  { %13338 = vmatpush1.bf16.msra.mxu1 %v12339_v59  ;;  %v14446_v52 = vpop.permute.xlu0 %14445  ;;  %v12418_v2 = vpop.permute.xlu1 %12417 }
0x11c6   :  { %13339 = vmatprep.subr.bf16.mxu1 %v12426_v55  ;;  %v12431_v4 = vsel %vm392_vm2, %v21770_v57, %v12418_v2  ;;  %v14448_v24 = vunpack.i.h.bf16 %v14446_v52 }
0x11c9   :  { %13340 = vmatpush1.bf16.msra.mxu1 %v12425_v56  ;;  %v12420_v15 = vpop.permute.xlu0 %12419  ;;  %v12510_v31 = vpop.permute.xlu1 %12509 }
0x11ca   :  { %v12432_v40 = vsel %vm392_vm2, %v12418_v2, %v12420_v15  ;;  %v12523_v57 = vsel %vm485_vm3, %v21788_v30, %v12510_v31  ;;  %v14447_v30 = vunpack.i.l.bf16 %v14446_v52 }
0x11cb   :  { %13341 = vmatprep.subr.bf16.mxu1 %v12432_v40 }
0x11cd   :  { %13342 = vmatpush1.bf16.msra.mxu1 %v12431_v4  ;;  %v12624_v11 = vpop.permute.xlu0 %12623  ;;  %v12612_v6 = vpop.permute.xlu1 %12611 }
0x11ce   :  { %13343 = vmatprep.subr.bf16.mxu1 %v12518_v8  ;;  %v12634_v22 = vsel %vm602_vm4, %v12612_v6, %v14447_v30 }
0x11d1   :  { %13344 = vmatpush1.bf16.msra.mxu1 %v12517_v23  ;;  %v12512_v63 = vpop.permute.xlu0 %12511  ;;  %v12622_v28 = vpop.permute.xlu1 %12621 }
0x11d2   :  { %v12637_v0 = vsel %vm602_vm4, %v21686_v20, %v12622_v28  ;;  %v12638_v37 = vsel %vm602_vm4, %v12622_v28, %v12624_v11  ;;  %v12524_v45 = vsel %vm485_vm3, %v12510_v31, %v12512_v63 }
0x11d3   :  { %13247 = vmatprep.subr.bf16.mxu0 %v12638_v37  ;;  %13345 = vmatprep.subr.bf16.mxu1 %v12524_v45 }
0x11d4   :  { %13248 = vmatpush1.bf16.msra.mxu0 %v12637_v0 }
0x11d5   :  { %13346 = vmatpush1.bf16.msra.mxu1 %v12523_v57  ;;  %v12700_v13 = vpop.permute.xlu0 %12699  ;;  %v12702_v48 = vpop.permute.xlu1 %12701 }
0x11d6   :  { %v12723_v43 = vsel %vm695_vm5, %v21646_v17, %v12700_v13  ;;  %13347 = vmatprep.subr.bf16.mxu1 %v21426_v47  ;;  %v12724_v20 = vsel %vm695_vm5, %v12700_v13, %v12702_v48 }
0x11d7   :  { %13249 = vmatprep.subr.bf16.mxu0 %v12724_v20 }
0x11d8   :  { %13250 = vmatpush1.bf16.msra.mxu0 %v12723_v43 }
0x11d9   :  { %13348 = vmatpush1.bf16.msra.mxu1 %v21423_v5  ;;  %v12704_v16 = vpop.permute.xlu0 %12703  ;;  %v14451_v7 = vpop.permute.xlu1 %14450  ;;  %v12633_v5 = vsel %vm602_vm4, %v21856_v3, %v12612_v6 }
0x11da   :  { %13349 = vmatprep.subr.bf16.mxu1 %v21445_v26  ;;  %v14452_v26 = vunpack.i.l.bf16 %v14451_v7  ;;  %v12725_v3 = vsel %vm695_vm5, %v12702_v48, %v12704_v16  ;;  %v14453_v1 = vunpack.i.h.bf16 %v14451_v7 }
0x11dc   :  { %v12726_v36 = vsel %vm695_vm5, %v12704_v16, %v14452_v26 }
0x11dd   :  { %13350 = vmatpush1.bf16.msra.mxu1 %v21443_v33  ;;  %v12714_v42 = vpop.permute.xlu0 %12713  ;;  %v12716_v27 = vpop.permute.xlu1 %12715 }
0x11de   :  { %v12729_v47 = vsel %vm695_vm5, %v21703_v32, %v12714_v42  ;;  %13351 = vmatprep.subr.bf16.mxu1 %v12634_v22  ;;  %v12730_v17 = vsel %vm695_vm5, %v12714_v42, %v12716_v27 }
0x11df   :  { %13251 = vmatprep.subr.bf16.mxu0 %v12730_v17 }
0x11e0   :  { %13252 = vmatpush1.bf16.msra.mxu0 %v12729_v47  ;;  %v22321_v47 = vld [vmem:[#allocation26_spill] sm:$0xff] }
0x11e1   :  { %13352 = vmatpush1.bf16.msra.mxu1 %v12633_v5  ;;  %v12794_v34 = vpop.permute.xlu0 %12793  ;;  %v12626_v33 = vpop.permute.xlu1 %12625  ;;  %v22322_v5 = vld [vmem:[#allocation4_spill] sm:$0xff] }
0x11e2   :  { %v12639_v29 = vsel %vm602_vm4, %v12624_v11, %v12626_v33  ;;  %v12640_v46 = vsel %vm602_vm4, %v12626_v33, %v14448_v24 }
0x11e3   :  { %13353 = vmatprep.subr.bf16.mxu1 %v12640_v46 }
0x11e5   :  { %13354 = vmatpush1.bf16.msra.mxu1 %v12639_v29  ;;  %v12798_v32 = vpop.permute.xlu0 %12797  ;;  %v12792_v49 = vpop.permute.xlu1 %12791 }
0x11e6   :  { %v12815_v53 = vsel %vm788_vm6, %v21660_v19, %v12792_v49  ;;  %13355 = vmatprep.subr.bf16.mxu1 %v12726_v36  ;;  %v12816_v12 = vsel %vm788_vm6, %v12792_v49, %v12794_v34 }
0x11e7   :  { %13253 = vmatprep.subr.bf16.mxu0 %v12816_v12 }
0x11e8   :  { %13254 = vmatpush1.bf16.msra.mxu0 %v12815_v53 }
0x11e9   :  { %13356 = vmatpush1.bf16.msra.mxu1 %v12725_v3  ;;  %v12718_v41 = vpop.permute.xlu0 %12717  ;;  %v12796_v60 = vpop.permute.xlu1 %12795  ;;  %v22323_v3 = vld [vmem:[#allocation6_spill] sm:$0xff] }
0x11ea   :  { %v12731_v54 = vsel %vm695_vm5, %v12716_v27, %v12718_v41  ;;  %v12732_v62 = vsel %vm695_vm5, %v12718_v41, %v14453_v1  ;;  %v12818_v19 = vsel %vm788_vm6, %v12796_v60, %v12798_v32  ;;  %v12817_v52 = vsel %vm788_vm6, %v12794_v34, %v12796_v60  ;;  %v22324_v60 = vld [vmem:[#allocation8_spill] sm:$0xff] }
0x11eb   :  { %13357 = vmatprep.subr.bf16.mxu1 %v12732_v62 }
0x11ed   :  { %13358 = vmatpush1.bf16.msra.mxu1 %v12731_v54  ;;  %v12808_v10 = vpop.permute.xlu0 %12807  ;;  %v12806_v21 = vpop.permute.xlu1 %12805 }
0x11ee   :  { %v12821_v59 = vsel %vm788_vm6, %v21723_v18, %v12806_v21  ;;  %13359 = vmatprep.subr.bf16.mxu1 %v12818_v19  ;;  %v12822_v58 = vsel %vm788_vm6, %v12806_v21, %v12808_v10  ;;  %v22326_v19 = vld [vmem:[#allocation7_spill] sm:$0xff] }
0x11ef   :  { %13255 = vmatprep.subr.bf16.mxu0 %v12822_v58 }
0x11f0   :  { %13256 = vmatpush1.bf16.msra.mxu0 %v12821_v59 }
0x11f1   :  { %13360 = vmatpush1.bf16.msra.mxu1 %v12817_v52  ;;  %v12812_v55 = vpop.permute.xlu0 %12811  ;;  %v12810_v2 = vpop.permute.xlu1 %12809 }
0x11f2   :  { %v12823_v56 = vsel %vm788_vm6, %v12808_v10, %v12810_v2  ;;  %v12824_v15 = vsel %vm788_vm6, %v12810_v2, %v12812_v55  ;;  %v22325_v10 = vld [vmem:[#allocation5_spill] sm:$0xff] }
0x11f3   :  { %13258 = vmatmul.mubr.bf16.vlgmr.msra.gmra.mrb[112].mxu0 %v21786_v44  ;;  %13361 = vmatprep.subr.bf16.mxu1 %v12824_v15 }
0x11f4   :  { %13267 = vmatprep.mubr.bf16.mxu0 %v21796_v39 }
0x11f5   :  { %13362 = vmatpush1.bf16.msra.mxu1 %v12823_v56  ;;  %v12886_v18 = vpop.permute.xlu0 %12885  ;;  %v12884_v31 = vpop.permute.xlu1 %12883 }
0x11f6   :  { %v12907_v40 = vsel %vm881_vm7, %v21674_v14, %v12884_v31  ;;  %v12908_v4 = vsel %vm881_vm7, %v12884_v31, %v12886_v18 }
0x11f7   :  { %13278 = vmatprep.subr.bf16.mxu0 %v12908_v4 }
0x11f8   :  { %13364 = vmatmul.mubr.bf16.vlgmr.msra.gmra.mrb[112].mxu1 %v21786_v44  ;;  %13279 = vmatpush1.bf16.msra.mxu0 %v12907_v40 }
0x11f9   :  { %v12890_v11 = vpop.permute.xlu0 %12889  ;;  %v12888_v8 = vpop.permute.xlu1 %12887  ;;  %13373 = vmatprep.mubr.bf16.mxu1 %v21796_v39 }
0x11fa   :  { %v12909_v6 = vsel %vm881_vm7, %v12886_v18, %v12888_v8  ;;  %v12910_v23 = vsel %vm881_vm7, %v12888_v8, %v12890_v11  ;;  %v22327_v11 = vld [vmem:[#allocation10_spill] sm:$0xff] }
0x11fb   :  { %13268 = vmatmul.mubr.bf16.gmra.mrb[116].mxu0 %v21822_v35  ;;  %13384 = vmatprep.subr.bf16.mxu1 %v12910_v23 }
0x11fc   :  { %13385 = vmatpush1.bf16.msra.mxu1 %v12909_v6  ;;  %13310 = vmatprep.mubr.bf16.mxu0 %v22188_v50 }
0x11fd   :  { %v12900_v14 = vpop.permute.xlu0 %12899  ;;  %v12898_v63 = vpop.permute.xlu1 %12897 }
0x11fe   :  { %v12913_v44 = vsel %vm881_vm7, %v21739_v51, %v12898_v63  ;;  %v12914_v28 = vsel %vm881_vm7, %v12898_v63, %v12900_v14 }
0x11ff   :  { %13280 = vmatprep.subr.bf16.mxu0 %v12914_v28 }
0x1200   :  { %13374 = vmatmul.mubr.bf16.gmra.mrb[116].mxu1 %v21822_v35  ;;  %13281 = vmatpush1.bf16.msra.mxu0 %v12913_v44 }
0x1201   :  { %v12904_v39 = vpop.permute.xlu0 %12903  ;;  %v12902_v0 = vpop.permute.xlu1 %12901  ;;  %13416 = vmatprep.mubr.bf16.mxu1 %v22188_v50 }
0x1202   :  { %v12915_v37 = vsel %vm881_vm7, %v12900_v14, %v12902_v0  ;;  %v12916_v45 = vsel %vm881_vm7, %v12902_v0, %v12904_v39  ;;  %v22328_v14 = vld [vmem:[#allocation13_spill] sm:$0xff] }
0x1203   :  { %13749 = vmatmul.mubr.msk.bf16.vlgmr.msra.gmra.mrb[112].mxu0 %vm1088_vm8, %v21837_v9  ;;  %13386 = vmatprep.subr.bf16.mxu1 %v12916_v45  ;;  %v22329_v0 = vld [vmem:[#allocation9_spill] sm:$0xff] }
0x1204   :  { %13387 = vmatpush1.bf16.msra.mxu1 %v12915_v37  ;;  %13320 = vmatprep.mubr.bf16.mxu0 %v22188_v50 }
0x1208   :  { %13751 = vmatmul.mubr.msk.bf16.vlgmr.msra.gmra.mrb[112].mxu1 %vm1088_vm8, %v21837_v9 }
0x1209   :  { %13426 = vmatprep.mubr.bf16.mxu1 %v22188_v50 }
0x120b   :  { %13750 = vmatmul.mubr.msk.bf16.gmra.mrb[116].mxu0 %vm1088_vm8, %v21854_v61 }
0x1210   :  { %13752 = vmatmul.mubr.msk.bf16.gmra.mrb[116].mxu1 %vm1088_vm8, %v21854_v61 }
0x1212   :  { %v21943_v51 = vpop.permute.xlu1 %13065  ;;  %v21946_v48 = vpop.permute.xlu0 %13070 }
0x1216   :  { %v21957_v24 = vpop.permute.xlu1 %13075  ;;  %v21967_v33 = vpop.permute.xlu0 %13080 }
0x128b   :  { %v13206_v35 = vpop.f32.mrb[104].mxu1 }
0x128c   :  { %v13969_v57 = vadd.f32 %v13206_v35, %v21943_v51  ;;  %v13208_v13 = vpop.f32.mrb[105].mxu1 }
0x128d   :  { %v13970_v43 = vadd.f32 %v13208_v13, %v21943_v51  ;;  %v13210_v20 = vpop.f32.mrb[106].mxu1 }
0x128e   :  { %v13437_v9 = vmax.f32 %v13969_v57, 0.0  ;;  %v13971_v50 = vadd.f32 %v13210_v20, %v21946_v48  ;;  %v13212_v16 = vpop.f32.mrb[107].mxu1  ;;  %v22330_v57 = vld [vmem:[#allocation11_spill] sm:$0xff] }
0x128f   :  { %v13438_v7 = vmax.f32 %v13970_v43, 0.0  ;;  %v13972_v30 = vadd.f32 %v13212_v16, %v21946_v48 }
0x1290   :  { %v13461_v61 = vadd.f32 %v13437_v9, %v20472_v38  ;;  %v13443_v42 = vmax.f32 %v13971_v50, 0.0 }
0x1291   :  { %v13462_v22 = vadd.f32 %v13438_v7, %v20497_v25  ;;  %v13444_v27 = vmax.f32 %v13972_v30, 0.0 }
0x1292   :  { %13485 = vst [vmem:[%s22075_s4] sm:$0xff] %v13461_v61  ;;  %v13467_v17 = vadd.f32 %v13443_v42, %v22321_v47  ;;  %v22331_v61 = vld [vmem:[#allocation18_spill] sm:$0xff] }
0x1293   :  { %13486 = vst [vmem:[%s22075_s4 + $0x8] sm:$0xff] %v13462_v22  ;;  %v13468_v26 = vadd.f32 %v13444_v27, %v22322_v5  ;;  %v13216_v34 = vpop.f32.mrb[108].mxu1 }
0x1294   :  { %13491 = vst [vmem:[%s22075_s4 + $0x30] sm:$0xff] %v13467_v17  ;;  %v13973_v38 = vadd.f32 %v13216_v34, %v21957_v24  ;;  %v13218_v25 = vpop.f32.mrb[109].mxu1  ;;  %v22332_v17 = vld [vmem:[#allocation20_spill] sm:$0xff] }
0x1295   :  { %13492 = vst [vmem:[%s22075_s4 + $0x38] sm:$0xff] %v13468_v26  ;;  %v13974_v29 = vadd.f32 %v13218_v25, %v21957_v24  ;;  %v13220_v46 = vpop.f32.mrb[110].mxu1  ;;  %v22333_v25 = vld [vmem:[#allocation17_spill] sm:$0xff] }
0x1296   :  { %v13449_v32 = vmax.f32 %v13973_v38, 0.0  ;;  %v13975_v49 = vadd.f32 %v13220_v46, %v21967_v33  ;;  %v13222_v36 = vpop.f32.mrb[111].mxu1 }
0x1297   :  { %v13450_v53 = vmax.f32 %v13974_v29, 0.0  ;;  %v13976_v12 = vadd.f32 %v13222_v36, %v21967_v33 }
0x1298   :  { %v13473_v1 = vadd.f32 %v13449_v32, %v22323_v3  ;;  %v13455_v41 = vmax.f32 %v13975_v49, 0.0  ;;  %v22334_v49 = vld [vmem:[#allocation19_spill] sm:$0xff] }
0x1299   :  { %v13474_v54 = vadd.f32 %v13450_v53, %v22324_v60  ;;  %v13456_v62 = vmax.f32 %v13976_v12, 0.0  ;;  %v22335_v53 = vld [vmem:[#allocation14_spill] sm:$0xff] }
0x129a   :  { %13497 = vst [vmem:[%s22075_s4 + $0x60] sm:$0xff] %v13473_v1  ;;  %v13479_v21 = vadd.f32 %v13455_v41, %v22325_v10  ;;  %v22336_v41 = vld [vmem:[#allocation16_spill] sm:$0xff] }
0x129b   :  { %13498 = vst [vmem:[%s22075_s4 + $0x68] sm:$0xff] %v13474_v54  ;;  %v13480_v59 = vadd.f32 %v13456_v62, %v22326_v19 }
0x129c   :  { %13503 = vst [vmem:[%s22075_s4 + $0x90] sm:$0xff] %v13479_v21  ;;  %v22337_v21 = vld [vmem:[#allocation12_spill] sm:$0xff] }
0x129d   :  { %13504 = vst [vmem:[%s22075_s4 + $0x98] sm:$0xff] %v13480_v59 }
0x12d6   :  { %v13312_v58 = vpop.f32.mrb[112].mxu0 }
0x12d7   :  { %v13977_v52 = vadd.f32 %v13312_v58, %v21943_v51  ;;  %v13314_v55 = vpop.f32.mrb[113].mxu0 }
0x12d8   :  { %v13978_v2 = vadd.f32 %v13314_v55, %v21943_v51  ;;  %v13316_v56 = vpop.f32.mrb[114].mxu0 }
0x12d9   :  { %v13439_v15 = vmax.f32 %v13977_v52, 0.0  ;;  %v13979_v18 = vadd.f32 %v13316_v56, %v21946_v48  ;;  %v13318_v31 = vpop.f32.mrb[115].mxu0  ;;  %v22338_v52 = vld [vmem:[#allocation15_spill] sm:$0xff] }
0x12da   :  { %v13440_v40 = vmax.f32 %v13978_v2, 0.0  ;;  %v13980_v4 = vadd.f32 %v13318_v31, %v21946_v48 }
0x12db   :  { %v13463_v8 = vadd.f32 %v13439_v15, %v22327_v11  ;;  %v13445_v6 = vmax.f32 %v13979_v18, 0.0  ;;  %v13418_v23 = vpop.f32.mrb[112].mxu1  ;;  %v22340_v11 = vld [vmem:[#allocation24_spill] sm:$0xff] }
0x12dc   :  { %v13464_v63 = vadd.f32 %v13440_v40, %v22328_v14  ;;  %v13446_v44 = vmax.f32 %v13980_v4, 0.0  ;;  %v13985_v28 = vadd.f32 %v13418_v23, %v21943_v51  ;;  %v13420_v39 = vpop.f32.mrb[113].mxu1  ;;  %v22341_v23 = vld [vmem:[#allocation21_spill] sm:$0xff] }
0x12dd   :  { %13487 = vst [vmem:[%s22075_s4 + $0x10] sm:$0xff] %v13463_v8  ;;  %v13469_v37 = vadd.f32 %v13445_v6, %v22329_v0  ;;  %v13986_v45 = vadd.f32 %v13420_v39, %v21943_v51  ;;  %v13422_v35 = vpop.f32.mrb[114].mxu1 }
0x12de   :  { %13488 = vst [vmem:[%s22075_s4 + $0x18] sm:$0xff] %v13464_v63  ;;  %v13470_v13 = vadd.f32 %v13446_v44, %v22330_v57  ;;  %v13441_v43 = vmax.f32 %v13985_v28, 0.0  ;;  %v13987_v20 = vadd.f32 %v13422_v35, %v21946_v48  ;;  %v13424_v9 = vpop.f32.mrb[115].mxu1  ;;  %v13322_v50 = vpop.f32.mrb[116].mxu0 }
0x12df   :  { %13493 = vst [vmem:[%s22075_s4 + $0x40] sm:$0xff] %v13469_v37  ;;  %v13442_v16 = vmax.f32 %v13986_v45, 0.0  ;;  %v13988_v7 = vadd.f32 %v13424_v9, %v21946_v48  ;;  %v13981_v51 = vadd.f32 %v13322_v50, %v21957_v24  ;;  %v13324_v30 = vpop.f32.mrb[117].mxu0 }
0x12e0   :  { %13494 = vst [vmem:[%s22075_s4 + $0x48] sm:$0xff] %v13470_v13  ;;  %v13465_v42 = vadd.f32 %v13441_v43, %v22331_v61  ;;  %v13447_v22 = vmax.f32 %v13987_v20, 0.0  ;;  %v13982_v27 = vadd.f32 %v13324_v30, %v21957_v24  ;;  %v13326_v47 = vpop.f32.mrb[118].mxu0 }
0x12e1   :  { %v13466_v5 = vadd.f32 %v13442_v16, %v22332_v17  ;;  %v13448_v26 = vmax.f32 %v13988_v7, 0.0  ;;  %v13451_v34 = vmax.f32 %v13981_v51, 0.0  ;;  %v13983_v38 = vadd.f32 %v13326_v47, %v21967_v33  ;;  %v13328_v48 = vpop.f32.mrb[119].mxu0 }
0x12e2   :  { %13489 = vst [vmem:[%s22075_s4 + $0x20] sm:$0xff] %v13465_v42  ;;  %v13471_v29 = vadd.f32 %v13447_v22, %v22333_v25  ;;  %v13452_v46 = vmax.f32 %v13982_v27, 0.0  ;;  %v13984_v32 = vadd.f32 %v13328_v48, %v21967_v33 }
0x12e3   :  { %13490 = vst [vmem:[%s22075_s4 + $0x28] sm:$0xff] %v13466_v5  ;;  %v13472_v36 = vadd.f32 %v13448_v26, %v22334_v49  ;;  %v13475_v12 = vadd.f32 %v13451_v34, %v22335_v53  ;;  %v13457_v3 = vmax.f32 %v13983_v38, 0.0  ;;  %v13428_v1 = vpop.f32.mrb[116].mxu1 }
0x12e4   :  { %13495 = vst [vmem:[%s22075_s4 + $0x50] sm:$0xff] %v13471_v29  ;;  %v13476_v60 = vadd.f32 %v13452_v46, %v22336_v41  ;;  %v13458_v54 = vmax.f32 %v13984_v32, 0.0  ;;  %v13989_v62 = vadd.f32 %v13428_v1, %v21957_v24  ;;  %v13430_v10 = vpop.f32.mrb[117].mxu1 }
0x12e5   :  { %13496 = vst [vmem:[%s22075_s4 + $0x58] sm:$0xff] %v13472_v36  ;;  %13499 = vst [vmem:[%s22075_s4 + $0x70] sm:$0xff] %v13475_v12  ;;  %v13481_v19 = vadd.f32 %v13457_v3, %v22337_v21  ;;  %v13990_v59 = vadd.f32 %v13430_v10, %v21957_v24  ;;  %v13432_v58 = vpop.f32.mrb[118].mxu1  ;;  %v22339_v24 = vld [vmem:[#allocation22_spill] sm:$0xff] }
0x12e6   :  { %13500 = vst [vmem:[%s22075_s4 + $0x78] sm:$0xff] %v13476_v60  ;;  %v13482_v55 = vadd.f32 %v13458_v54, %v22338_v52  ;;  %v13453_v2 = vmax.f32 %v13989_v62, 0.0  ;;  %v13991_v56 = vadd.f32 %v13432_v58, %v21967_v33  ;;  %v13434_v15 = vpop.f32.mrb[119].mxu1 }
0x12e7   :  { %13505 = vst [vmem:[%s22075_s4 + $0xa0] sm:$0xff] %v13481_v19  ;;  %v13454_v18 = vmax.f32 %v13990_v59, 0.0  ;;  %v13992_v31 = vadd.f32 %v13434_v15, %v21967_v33  ;;  %v22342_v33 = vld [vmem:[#allocation23_spill] sm:$0xff] }
0x12e8   :  { %13506 = vst [vmem:[%s22075_s4 + $0xa8] sm:$0xff] %v13482_v55  ;;  %v13477_v40 = vadd.f32 %v13453_v2, %v22339_v24  ;;  %v13459_v4 = vmax.f32 %v13991_v56, 0.0 }
0x12e9   :  { %v13478_v8 = vadd.f32 %v13454_v18, %v22340_v11  ;;  %v13460_v6 = vmax.f32 %v13992_v31, 0.0 }
0x12ea   :  { %13501 = vst [vmem:[%s22075_s4 + $0x80] sm:$0xff] %v13477_v40  ;;  %v13483_v14 = vadd.f32 %v13459_v4, %v22341_v23 }
0x12eb   :  { %13502 = vst [vmem:[%s22075_s4 + $0x88] sm:$0xff] %v13478_v8  ;;  %v13484_v63 = vadd.f32 %v13460_v6, %v22342_v33 }
0x12ec   :  { %13507 = vst [vmem:[%s22075_s4 + $0xb0] sm:$0xff] %v13483_v14 }
0x12ed   :  { %13508 = vst [vmem:[%s22075_s4 + $0xb8] sm:$0xff] %v13484_v63 }

</bundles_post_ra>
